<compile_context>
chip_gen: v6e
topology: v6e:2x2x1
jax: 0.10.0
libtpu: 0.0.40
codegen_flags: <defaults>
</compile_context>

<pallas_src>
import functools

import jax
import jax.numpy as jnp
from jax.experimental import pallas as pl
from jax.experimental.pallas import tpu as pltpu


CPAD = 10  # every frame / conv weight is padded to this many channels


# ------------------------------ small helpers ------------------------------

def _round_up(v, m):
    return ((v + m - 1) // m) * m


def _adaptive_windows(in_size, out_size):
    """PyTorch AdaptiveMaxPool2d window (start, length) per output index."""
    wins = []
    for i in range(out_size):
        s = (i * in_size) // out_size
        e = -((-(i + 1) * in_size) // out_size)   # ceil((i+1)*in/out)
        wins.append((s, e - s))
    return tuple(wins)


# ------------------------------ fused kernel -------------------------------

def _fused_cnn_kernel(x_ref, w1_ref, b1_ref, w2_ref, b2_ref, w3_ref, b3_ref,
                      w4_ref, b4_ref, fcw_ref, fcb_ref, o_ref, fa, fb, *,
                      block_n, frame_w1, per_img1, pad1,
                      frame_w2, per_img2, pool1_oh, hwindows, wwindows):
    f32 = jnp.float32
    cpad = fa.shape[1]
    m1 = block_n * per_img1          # rows in the full-resolution frame
    m2 = block_n * per_img2          # rows in the pooled frame
    opw = frame_w2

    def conv_relu6(src, dst, w_ref, b_ref, frame_w, m_rows):
        # im2col: 9 row-shifted slices concatenated along lanes -> 1 MXU matmul
        patch = jnp.concatenate(
            [src[pl.ds(dh * frame_w + dw, m_rows), :]
             for dh in range(3) for dw in range(3)], axis=-1)   # [m, 9*cpad]
        acc = jnp.dot(patch, w_ref[...], preferred_element_type=f32)
        dst[pl.ds(0, m_rows), :] = jnp.clip(acc + b_ref[...], 0.0, 6.0)

    # stage this block's images into frame A; zero the read-ahead tails once
    fa[pl.ds(0, m1), :] = x_ref[0]
    fa[pl.ds(m1, pad1), :] = jnp.zeros((pad1, cpad), f32)
    fb[pl.ds(m1, pad1), :] = jnp.zeros((pad1, cpad), f32)

    conv_relu6(fa, fb, w1_ref, b1_ref, frame_w1, m1)     # conv1 + ReLU6
    conv_relu6(fb, fa, w2_ref, b2_ref, frame_w1, m1)     # conv2 + ReLU6

    # ---- pool1 = MaxPool2d(2,2): one whole-frame 4-way VPU max folds the ----
    # ---- 2x2 window, then stride-2 sublane picks decimate h and w by 2.  ----
    fb[pl.ds(0, m1), :] = jnp.maximum(
        jnp.maximum(fa[pl.ds(0, m1), :], fa[pl.ds(1, m1), :]),
        jnp.maximum(fa[pl.ds(frame_w1, m1), :],
                    fa[pl.ds(frame_w1 + 1, m1), :]))
    for n_l in range(block_n):
        for oy in range(pool1_oh):
            src_row = n_l * per_img1 + 2 * oy * frame_w1   # multiple of 8
            dst_row = n_l * per_img2 + oy * opw
            fa[pl.ds(dst_row, opw), :] = fb[pl.ds(src_row, opw, stride=2), :]

    conv_relu6(fa, fb, w3_ref, b3_ref, frame_w2, m2)     # conv3 + ReLU6
    conv_relu6(fb, fa, w4_ref, b4_ref, frame_w2, m2)     # conv4 + ReLU6

    # ---- pool2 = AdaptiveMaxPool2d(3) fused with Linear(27->5): gather the --
    # ---- 9 windows for all images, concat -> [block_n, 9*cpad], 1 matmul. --
    cells = []
    for hs, hn in hwindows:
        for ws, wn in wwindows:
            cell = None
            for d in range(hn):
                for e in range(wn):
                    row = (hs + d) * frame_w2 + (ws + e)
                    if block_n > 1:
                        v = fa[pl.ds(row, block_n, stride=per_img2), :]
                    else:
                        v = fa[pl.ds(row, 1), :]
                    cell = v if cell is None else jnp.maximum(cell, v)
            cells.append(cell)                            # [block_n, cpad]
    pooled = jnp.concatenate(cells, axis=-1)              # [block_n, 9*cpad]
    logits = jnp.dot(pooled, fcw_ref[...], preferred_element_type=f32)
    o_ref[...] = (logits + fcb_ref[...])[None]


# ------------------------------ public wrapper ------------------------------

def _im2col_weight(w_oihw, cin_pad=CPAD, cout_pad=CPAD):
    # PyTorch (O, C, KH, KW) -> zero-pad channels -> [(kh*KW+kw)*Cpad + c, O]
    o, c, kh, kw = w_oihw.shape
    wp = jnp.pad(w_oihw, ((0, cout_pad - o), (0, cin_pad - c), (0, 0), (0, 0)))
    return jnp.transpose(wp, (2, 3, 1, 0)).reshape(kh * kw * cin_pad, cout_pad)


def _pad_bias(b, cout_pad=CPAD):
    return jnp.pad(b, (0, cout_pad - b.shape[0])).reshape(1, cout_pad)


@functools.partial(jax.jit, static_argnames=("block_n",))
def cnn_forward(params, x_nchw, *, block_n=1):
    n, cin, h, w = x_nchw.shape
    if n % block_n:
        raise ValueError("block_n must divide the batch size")
    nb = n // block_n

    # geometry implied by the module (3x3 VALID convs, 2x2/2 pool, adaptive 3)
    per_img1, frame_w1 = h * w, w
    vh2, vw2 = h - 4, w - 4                               # conv2 valid size
    oph, opw = (vh2 - 2) // 2 + 1, (vw2 - 2) // 2 + 1     # pool1 output size
    per_img2, frame_w2 = oph * opw, opw
    hws = _adaptive_windows(oph - 4, 3)                   # conv4 valid h -> 3
    wws = _adaptive_windows(opw - 4, 3)                   # conv4 valid w -> 3

    m1 = block_n * per_img1
    pad1 = _round_up(2 * frame_w1 + 2, 8)                 # row-shift headroom

    # tiny host-side weight re-layouts (pad channels to CPAD, im2col the taps)
    w1 = _im2col_weight(params["w1"]); b1 = _pad_bias(params["b1"])
    w2 = _im2col_weight(params["w2"]); b2 = _pad_bias(params["b2"])
    w3 = _im2col_weight(params["w3"]); b3 = _pad_bias(params["b3"])
    w4 = _im2col_weight(params["w4"]); b4 = _pad_bias(params["b4"])
    c4 = params["w4"].shape[0]
    # fc weight [5, 27] indexed (c, ph, pw) -> [ph, pw, c_pad, 5] -> [90, 5]
    fcw = params["fcw"].reshape(5, c4, 3, 3).transpose(2, 3, 1, 0)
    fcw = jnp.pad(fcw, ((0, 0), (0, 0), (0, CPAD - c4), (0, 0)))
    fcw = fcw.reshape(9 * CPAD, 5)
    fcb = params["fcb"].reshape(1, 5)

    # NCHW -> per-block flattened NHWC frames, channels zero-padded to CPAD
    x2 = jnp.transpose(x_nchw, (0, 2, 3, 1)).reshape(n, per_img1, cin)
    x2 = jnp.pad(x2, ((0, 0), (0, 0), (0, CPAD - cin))).reshape(nb, m1, CPAD)

    kernel = functools.partial(
        _fused_cnn_kernel, block_n=block_n, frame_w1=frame_w1,
        per_img1=per_img1, pad1=pad1, frame_w2=frame_w2, per_img2=per_img2,
        pool1_oh=oph, hwindows=hws, wwindows=wws)

    def _full(arr):                      # whole-array VMEM block, fixed index
        nd = arr.ndim
        return pl.BlockSpec(arr.shape, lambda b, _nd=nd: (0,) * _nd)

    weights = (w1, b1, w2, b2, w3, b3, w4, b4, fcw, fcb)
    out = pl.pallas_call(
        kernel,
        out_shape=jax.ShapeDtypeStruct((nb, block_n, 5), jnp.float32),
        grid=(nb,),
        in_specs=[pl.BlockSpec((1, m1, CPAD), lambda b: (b, 0, 0))]
                 + [_full(a) for a in weights],
        out_specs=pl.BlockSpec((1, block_n, 5), lambda b: (b, 0, 0)),
        scratch_shapes=[pltpu.VMEM((m1 + pad1, CPAD), jnp.float32)] * 2,
        compiler_params=pltpu.CompilerParams(
            dimension_semantics=("parallel",)),
    )(x2, *weights)
    return out.reshape(n, 5)


# ------------------------- pure-XLA reference check -------------------------

@jax.jit
def cnn_reference(params, x_nchw):
    dnums = ("NCHW", "OIHW", "NCHW")

    def conv_relu6(x, wgt, b):
        y = jax.lax.conv_general_dilated(
            x, wgt, (1, 1), "VALID", dimension_numbers=dnums,
            precision=jax.lax.Precision.HIGHEST)
        return jnp.clip(y + b.reshape(1, -1, 1, 1), 0.0, 6.0)

    x = conv_relu6(x_nchw, params["w1"], params["b1"])
    x = conv_relu6(x, params["w2"], params["b2"])
    x = jax.lax.reduce_window(x, jnp.array(-jnp.inf, x.dtype), jax.lax.max,
                              (1, 1, 2, 2), (1, 1, 2, 2), "VALID")
    x = conv_relu6(x, params["w3"], params["b3"])
    x = conv_relu6(x, params["w4"], params["b4"])
    n, c, h, w = x.shape
    rows = []
    for hs, hn in _adaptive_windows(h, 3):
        cols = []
        for ws, wn in _adaptive_windows(w, 3):
            cols.append(jnp.max(x[:, :, hs:hs + hn, ws:ws + wn], axis=(2, 3)))
        rows.append(jnp.stack(cols, axis=-1))
    pooled = jnp.stack(rows, axis=-2)                  # [n, c, 3, 3]
    flat = pooled.reshape(n, -1)                       # NCHW flatten -> [n, 27]
    return jnp.dot(flat, params["fcw"].T,
                   precision=jax.lax.Precision.HIGHEST) + params["fcb"]


# ------------------------------ params / main -------------------------------

def init_params(key):
    ks = jax.random.split(key, 10)

    def conv(kw_, kb_, o, c, k):
        bound = 1.0 / (c * k * k) ** 0.5
        w = jax.random.uniform(kw_, (o, c, k, k), jnp.float32, -bound, bound)
        b = jax.random.uniform(kb_, (o,), jnp.float32, -bound, bound)
        return w, b

    w1, b1 = conv(ks[0], ks[1], 10, 3, 3)
    w2, b2 = conv(ks[2], ks[3], 10, 10, 3)
    w3, b3 = conv(ks[4], ks[5], 10, 10, 3)
    w4, b4 = conv(ks[6], ks[7], 3, 10, 3)
    fbound = 1.0 / 27.0 ** 0.5
    fw = jax.random.uniform(ks[8], (5, 27), jnp.float32, -fbound, fbound)
    fb = jax.random.uniform(ks[9], (5,), jnp.float32, -fbound, fbound)
    return dict(w1=w1, b1=b1, w2=w2, b2=b2, w3=w3, b3=b3, w4=w4, b4=b4,
                fcw=fw, fcb=fb)


if __name__ == "__main__":
    key = jax.random.PRNGKey(0)
    pkey, xkey = jax.random.split(key)
    params = init_params(pkey)
    # spatial 20: 20 ->conv 18 ->conv 16 ->pool 8 ->conv 6 ->conv 4 ->adaptive 3
    x = jax.random.normal(xkey, (2, 3, 20, 20), jnp.float32)

    out = jax.block_until_ready(cnn_forward(params, x, block_n=1))
    assert out.shape == (2, 5) and out.dtype == jnp.float32

    ref = jax.block_until_ready(cnn_reference(params, x))
    max_err = float(jnp.max(jnp.abs(out - ref)))
    assert max_err < 2e-3, f"kernel/reference mismatch, max abs err={max_err}"

    print("KERNEL_OK")
</pallas_src>

<mosaic_0001>
module attributes {stable_mosaic.version = 11 : i64} {
  func.func @_fused_cnn_kernel(%arg0: i32, %arg1: memref<1x400x10xf32, #tpu.memory_space<vmem>>, %arg2: memref<90x10xf32, #tpu.memory_space<vmem>>, %arg3: memref<1x10xf32, #tpu.memory_space<vmem>>, %arg4: memref<90x10xf32, #tpu.memory_space<vmem>>, %arg5: memref<1x10xf32, #tpu.memory_space<vmem>>, %arg6: memref<90x10xf32, #tpu.memory_space<vmem>>, %arg7: memref<1x10xf32, #tpu.memory_space<vmem>>, %arg8: memref<90x10xf32, #tpu.memory_space<vmem>>, %arg9: memref<1x10xf32, #tpu.memory_space<vmem>>, %arg10: memref<90x5xf32, #tpu.memory_space<vmem>>, %arg11: memref<1x5xf32, #tpu.memory_space<vmem>>, %arg12: memref<1x1x5xf32, #tpu.memory_space<vmem>>, %arg13: memref<448x10xf32, #tpu.memory_space<vmem>>, %arg14: memref<448x10xf32, #tpu.memory_space<vmem>>) attributes {dimension_semantics = [#tpu.dimension_semantics<parallel>], iteration_bounds = array<i64: 2>, scalar_prefetch = 0 : i64, scratch_operands = 2 : i64, tpu.core_type = #tpu.core_type<tc>, window_params = [{transform_indices = @transform_0, window_bounds = array<i64: 1, 400, 10>}, {pipeline_mode = #tpu.pipeline_mode<synchronous>, transform_indices = @transform_1, window_bounds = array<i64: 90, 10>}, {pipeline_mode = #tpu.pipeline_mode<synchronous>, transform_indices = @transform_2, window_bounds = array<i64: 1, 10>}, {pipeline_mode = #tpu.pipeline_mode<synchronous>, transform_indices = @transform_3, window_bounds = array<i64: 90, 10>}, {pipeline_mode = #tpu.pipeline_mode<synchronous>, transform_indices = @transform_4, window_bounds = array<i64: 1, 10>}, {pipeline_mode = #tpu.pipeline_mode<synchronous>, transform_indices = @transform_5, window_bounds = array<i64: 90, 10>}, {pipeline_mode = #tpu.pipeline_mode<synchronous>, transform_indices = @transform_6, window_bounds = array<i64: 1, 10>}, {pipeline_mode = #tpu.pipeline_mode<synchronous>, transform_indices = @transform_7, window_bounds = array<i64: 90, 10>}, {pipeline_mode = #tpu.pipeline_mode<synchronous>, transform_indices = @transform_8, window_bounds = array<i64: 1, 10>}, {pipeline_mode = #tpu.pipeline_mode<synchronous>, transform_indices = @transform_9, window_bounds = array<i64: 90, 5>}, {pipeline_mode = #tpu.pipeline_mode<synchronous>, transform_indices = @transform_10, window_bounds = array<i64: 1, 5>}, {transform_indices = @transform_11, window_bounds = array<i64: 1, 1, 5>}]} {
    %c0 = arith.constant 0 : index
    %c0_0 = arith.constant 0 : index
    %c0_1 = arith.constant 0 : index
    %0 = vector.load %arg1[%c0, %c0_0, %c0_1] : memref<1x400x10xf32, #tpu.memory_space<vmem>>, vector<1x400x10xf32>
    %1 = vector.shape_cast %0 : vector<1x400x10xf32> to vector<400x10xf32>
    %c0_2 = arith.constant 0 : index
    %c0_3 = arith.constant 0 : index
    %2 = vector.load %arg13[%c0_2, %c0_3] : memref<448x10xf32, #tpu.memory_space<vmem>>, vector<400x10xf32>
    tpu.vector_store %arg13[%c0_2, %c0_3], %1 {strides = array<i32>} : memref<448x10xf32, #tpu.memory_space<vmem>>, vector<400x10xf32>,
    %cst = arith.constant 0.000000e+00 : f32
    %3 = vector.broadcast %cst : f32 to vector<48x10xf32>
    %c400 = arith.constant 400 : index
    %c0_4 = arith.constant 0 : index
    %4 = vector.load %arg13[%c400, %c0_4] : memref<448x10xf32, #tpu.memory_space<vmem>>, vector<48x10xf32>
    tpu.vector_store %arg13[%c400, %c0_4], %3 {strides = array<i32>} : memref<448x10xf32, #tpu.memory_space<vmem>>, vector<48x10xf32>,
    %cst_5 = arith.constant 0.000000e+00 : f32
    %5 = vector.broadcast %cst_5 : f32 to vector<48x10xf32>
    %c400_6 = arith.constant 400 : index
    %c0_7 = arith.constant 0 : index
    %6 = vector.load %arg14[%c400_6, %c0_7] : memref<448x10xf32, #tpu.memory_space<vmem>>, vector<48x10xf32>
    tpu.vector_store %arg14[%c400_6, %c0_7], %5 {strides = array<i32>} : memref<448x10xf32, #tpu.memory_space<vmem>>, vector<48x10xf32>,
    %c0_8 = arith.constant 0 : index
    %c0_9 = arith.constant 0 : index
    %7 = vector.load %arg13[%c0_8, %c0_9] : memref<448x10xf32, #tpu.memory_space<vmem>>, vector<400x10xf32>
    %c1 = arith.constant 1 : index
    %c0_10 = arith.constant 0 : index
    %8 = vector.load %arg13[%c1, %c0_10] : memref<448x10xf32, #tpu.memory_space<vmem>>, vector<400x10xf32>
    %c2 = arith.constant 2 : index
    %c0_11 = arith.constant 0 : index
    %9 = vector.load %arg13[%c2, %c0_11] : memref<448x10xf32, #tpu.memory_space<vmem>>, vector<400x10xf32>
    %c20 = arith.constant 20 : index
    %c0_12 = arith.constant 0 : index
    %10 = vector.load %arg13[%c20, %c0_12] : memref<448x10xf32, #tpu.memory_space<vmem>>, vector<400x10xf32>
    %c21 = arith.constant 21 : index
    %c0_13 = arith.constant 0 : index
    %11 = vector.load %arg13[%c21, %c0_13] : memref<448x10xf32, #tpu.memory_space<vmem>>, vector<400x10xf32>
    %c22 = arith.constant 22 : index
    %c0_14 = arith.constant 0 : index
    %12 = vector.load %arg13[%c22, %c0_14] : memref<448x10xf32, #tpu.memory_space<vmem>>, vector<400x10xf32>
    %c40 = arith.constant 40 : index
    %c0_15 = arith.constant 0 : index
    %13 = vector.load %arg13[%c40, %c0_15] : memref<448x10xf32, #tpu.memory_space<vmem>>, vector<400x10xf32>
    %c41 = arith.constant 41 : index
    %c0_16 = arith.constant 0 : index
    %14 = vector.load %arg13[%c41, %c0_16] : memref<448x10xf32, #tpu.memory_space<vmem>>, vector<400x10xf32>
    %c42 = arith.constant 42 : index
    %c0_17 = arith.constant 0 : index
    %15 = vector.load %arg13[%c42, %c0_17] : memref<448x10xf32, #tpu.memory_space<vmem>>, vector<400x10xf32>
    %16 = tpu.concatenate %7, %8, %9, %10, %11, %12, %13, %14, %15 in 1 : vector<400x10xf32>, vector<400x10xf32>, vector<400x10xf32>, vector<400x10xf32>, vector<400x10xf32>, vector<400x10xf32>, vector<400x10xf32>, vector<400x10xf32>, vector<400x10xf32> -> vector<400x90xf32>
    %c0_18 = arith.constant 0 : index
    %c0_19 = arith.constant 0 : index
    %17 = vector.load %arg2[%c0_18, %c0_19] : memref<90x10xf32, #tpu.memory_space<vmem>>, vector<90x10xf32>
    %cst_20 = arith.constant dense<0.000000e+00> : vector<400x10xf32>
    %18 = tpu.matmul %16, %17, %cst_20 {dimension_numbers = #tpu.dot_dimension_numbers<[1], [0], [0], [1], [0, 0, 1, 1], [], []>} : vector<400x90xf32>, vector<90x10xf32>, vector<400x10xf32> -> vector<400x10xf32>
    %c0_21 = arith.constant 0 : index
    %c0_22 = arith.constant 0 : index
    %19 = vector.load %arg3[%c0_21, %c0_22] : memref<1x10xf32, #tpu.memory_space<vmem>>, vector<1x10xf32>
    %20 = vector.broadcast %19 : vector<1x10xf32> to vector<400x10xf32>
    %21 = arith.addf %18, %20 : vector<400x10xf32>
    %cst_23 = arith.constant 0.000000e+00 : f32
    %cst_24 = arith.constant 6.000000e+00 : f32
    %22 = vector.broadcast %cst_23 : f32 to vector<400x10xf32>
    %23 = arith.maximumf %22, %21 : vector<400x10xf32>
    %24 = vector.broadcast %cst_24 : f32 to vector<400x10xf32>
    %25 = arith.minimumf %24, %23 : vector<400x10xf32>
    %c0_25 = arith.constant 0 : index
    %c0_26 = arith.constant 0 : index
    %26 = vector.load %arg14[%c0_25, %c0_26] : memref<448x10xf32, #tpu.memory_space<vmem>>, vector<400x10xf32>
    tpu.vector_store %arg14[%c0_25, %c0_26], %25 {strides = array<i32>} : memref<448x10xf32, #tpu.memory_space<vmem>>, vector<400x10xf32>,
    %c0_27 = arith.constant 0 : index
    %c0_28 = arith.constant 0 : index
    %27 = vector.load %arg14[%c0_27, %c0_28] : memref<448x10xf32, #tpu.memory_space<vmem>>, vector<400x10xf32>
    %c1_29 = arith.constant 1 : index
    %c0_30 = arith.constant 0 : index
    %28 = vector.load %arg14[%c1_29, %c0_30] : memref<448x10xf32, #tpu.memory_space<vmem>>, vector<400x10xf32>
    %c2_31 = arith.constant 2 : index
    %c0_32 = arith.constant 0 : index
    %29 = vector.load %arg14[%c2_31, %c0_32] : memref<448x10xf32, #tpu.memory_space<vmem>>, vector<400x10xf32>
    %c20_33 = arith.constant 20 : index
    %c0_34 = arith.constant 0 : index
    %30 = vector.load %arg14[%c20_33, %c0_34] : memref<448x10xf32, #tpu.memory_space<vmem>>, vector<400x10xf32>
    %c21_35 = arith.constant 21 : index
    %c0_36 = arith.constant 0 : index
    %31 = vector.load %arg14[%c21_35, %c0_36] : memref<448x10xf32, #tpu.memory_space<vmem>>, vector<400x10xf32>
    %c22_37 = arith.constant 22 : index
    %c0_38 = arith.constant 0 : index
    %32 = vector.load %arg14[%c22_37, %c0_38] : memref<448x10xf32, #tpu.memory_space<vmem>>, vector<400x10xf32>
    %c40_39 = arith.constant 40 : index
    %c0_40 = arith.constant 0 : index
    %33 = vector.load %arg14[%c40_39, %c0_40] : memref<448x10xf32, #tpu.memory_space<vmem>>, vector<400x10xf32>
    %c41_41 = arith.constant 41 : index
    %c0_42 = arith.constant 0 : index
    %34 = vector.load %arg14[%c41_41, %c0_42] : memref<448x10xf32, #tpu.memory_space<vmem>>, vector<400x10xf32>
    %c42_43 = arith.constant 42 : index
    %c0_44 = arith.constant 0 : index
    %35 = vector.load %arg14[%c42_43, %c0_44] : memref<448x10xf32, #tpu.memory_space<vmem>>, vector<400x10xf32>
    %36 = tpu.concatenate %27, %28, %29, %30, %31, %32, %33, %34, %35 in 1 : vector<400x10xf32>, vector<400x10xf32>, vector<400x10xf32>, vector<400x10xf32>, vector<400x10xf32>, vector<400x10xf32>, vector<400x10xf32>, vector<400x10xf32>, vector<400x10xf32> -> vector<400x90xf32>
    %c0_45 = arith.constant 0 : index
    %c0_46 = arith.constant 0 : index
    %37 = vector.load %arg4[%c0_45, %c0_46] : memref<90x10xf32, #tpu.memory_space<vmem>>, vector<90x10xf32>
    %cst_47 = arith.constant dense<0.000000e+00> : vector<400x10xf32>
    %38 = tpu.matmul %36, %37, %cst_47 {dimension_numbers = #tpu.dot_dimension_numbers<[1], [0], [0], [1], [0, 0, 1, 1], [], []>} : vector<400x90xf32>, vector<90x10xf32>, vector<400x10xf32> -> vector<400x10xf32>
    %c0_48 = arith.constant 0 : index
    %c0_49 = arith.constant 0 : index
    %39 = vector.load %arg5[%c0_48, %c0_49] : memref<1x10xf32, #tpu.memory_space<vmem>>, vector<1x10xf32>
    %40 = vector.broadcast %39 : vector<1x10xf32> to vector<400x10xf32>
    %41 = arith.addf %38, %40 : vector<400x10xf32>
    %cst_50 = arith.constant 0.000000e+00 : f32
    %cst_51 = arith.constant 6.000000e+00 : f32
    %42 = vector.broadcast %cst_50 : f32 to vector<400x10xf32>
    %43 = arith.maximumf %42, %41 : vector<400x10xf32>
    %44 = vector.broadcast %cst_51 : f32 to vector<400x10xf32>
    %45 = arith.minimumf %44, %43 : vector<400x10xf32>
    %c0_52 = arith.constant 0 : index
    %c0_53 = arith.constant 0 : index
    %46 = vector.load %arg13[%c0_52, %c0_53] : memref<448x10xf32, #tpu.memory_space<vmem>>, vector<400x10xf32>
    tpu.vector_store %arg13[%c0_52, %c0_53], %45 {strides = array<i32>} : memref<448x10xf32, #tpu.memory_space<vmem>>, vector<400x10xf32>,
    %c0_54 = arith.constant 0 : index
    %c0_55 = arith.constant 0 : index
    %47 = vector.load %arg13[%c0_54, %c0_55] : memref<448x10xf32, #tpu.memory_space<vmem>>, vector<400x10xf32>
    %c1_56 = arith.constant 1 : index
    %c0_57 = arith.constant 0 : index
    %48 = vector.load %arg13[%c1_56, %c0_57] : memref<448x10xf32, #tpu.memory_space<vmem>>, vector<400x10xf32>
    %49 = arith.maximumf %47, %48 : vector<400x10xf32>
    %c20_58 = arith.constant 20 : index
    %c0_59 = arith.constant 0 : index
    %50 = vector.load %arg13[%c20_58, %c0_59] : memref<448x10xf32, #tpu.memory_space<vmem>>, vector<400x10xf32>
    %c21_60 = arith.constant 21 : index
    %c0_61 = arith.constant 0 : index
    %51 = vector.load %arg13[%c21_60, %c0_61] : memref<448x10xf32, #tpu.memory_space<vmem>>, vector<400x10xf32>
    %52 = arith.maximumf %50, %51 : vector<400x10xf32>
    %53 = arith.maximumf %49, %52 : vector<400x10xf32>
    %c0_62 = arith.constant 0 : index
    %c0_63 = arith.constant 0 : index
    %54 = vector.load %arg14[%c0_62, %c0_63] : memref<448x10xf32, #tpu.memory_space<vmem>>, vector<400x10xf32>
    tpu.vector_store %arg14[%c0_62, %c0_63], %53 {strides = array<i32>} : memref<448x10xf32, #tpu.memory_space<vmem>>, vector<400x10xf32>,
    %c0_64 = arith.constant 0 : index
    %c0_65 = arith.constant 0 : index
    %55 = tpu.strided_load %arg14[%c0_64, %c0_65] {strides = array<i32: 2, 1>} : memref<448x10xf32, #tpu.memory_space<vmem>>, vector<8x10xf32>
    %c0_66 = arith.constant 0 : index
    %c0_67 = arith.constant 0 : index
    %56 = vector.load %arg13[%c0_66, %c0_67] : memref<448x10xf32, #tpu.memory_space<vmem>>, vector<8x10xf32>
    tpu.vector_store %arg13[%c0_66, %c0_67], %55 {strides = array<i32>} : memref<448x10xf32, #tpu.memory_space<vmem>>, vector<8x10xf32>,
    %c40_68 = arith.constant 40 : index
    %c0_69 = arith.constant 0 : index
    %57 = tpu.strided_load %arg14[%c40_68, %c0_69] {strides = array<i32: 2, 1>} : memref<448x10xf32, #tpu.memory_space<vmem>>, vector<8x10xf32>
    %c8 = arith.constant 8 : index
    %c0_70 = arith.constant 0 : index
    %58 = vector.load %arg13[%c8, %c0_70] : memref<448x10xf32, #tpu.memory_space<vmem>>, vector<8x10xf32>
    tpu.vector_store %arg13[%c8, %c0_70], %57 {strides = array<i32>} : memref<448x10xf32, #tpu.memory_space<vmem>>, vector<8x10xf32>,
    %c80 = arith.constant 80 : index
    %c0_71 = arith.constant 0 : index
    %59 = tpu.strided_load %arg14[%c80, %c0_71] {strides = array<i32: 2, 1>} : memref<448x10xf32, #tpu.memory_space<vmem>>, vector<8x10xf32>
    %c16 = arith.constant 16 : index
    %c0_72 = arith.constant 0 : index
    %60 = vector.load %arg13[%c16, %c0_72] : memref<448x10xf32, #tpu.memory_space<vmem>>, vector<8x10xf32>
    tpu.vector_store %arg13[%c16, %c0_72], %59 {strides = array<i32>} : memref<448x10xf32, #tpu.memory_space<vmem>>, vector<8x10xf32>,
    %c120 = arith.constant 120 : index
    %c0_73 = arith.constant 0 : index
    %61 = tpu.strided_load %arg14[%c120, %c0_73] {strides = array<i32: 2, 1>} : memref<448x10xf32, #tpu.memory_space<vmem>>, vector<8x10xf32>
    %c24 = arith.constant 24 : index
    %c0_74 = arith.constant 0 : index
    %62 = vector.load %arg13[%c24, %c0_74] : memref<448x10xf32, #tpu.memory_space<vmem>>, vector<8x10xf32>
    tpu.vector_store %arg13[%c24, %c0_74], %61 {strides = array<i32>} : memref<448x10xf32, #tpu.memory_space<vmem>>, vector<8x10xf32>,
    %c160 = arith.constant 160 : index
    %c0_75 = arith.constant 0 : index
    %63 = tpu.strided_load %arg14[%c160, %c0_75] {strides = array<i32: 2, 1>} : memref<448x10xf32, #tpu.memory_space<vmem>>, vector<8x10xf32>
    %c32 = arith.constant 32 : index
    %c0_76 = arith.constant 0 : index
    %64 = vector.load %arg13[%c32, %c0_76] : memref<448x10xf32, #tpu.memory_space<vmem>>, vector<8x10xf32>
    tpu.vector_store %arg13[%c32, %c0_76], %63 {strides = array<i32>} : memref<448x10xf32, #tpu.memory_space<vmem>>, vector<8x10xf32>,
    %c200 = arith.constant 200 : index
    %c0_77 = arith.constant 0 : index
    %65 = tpu.strided_load %arg14[%c200, %c0_77] {strides = array<i32: 2, 1>} : memref<448x10xf32, #tpu.memory_space<vmem>>, vector<8x10xf32>
    %c40_78 = arith.constant 40 : index
    %c0_79 = arith.constant 0 : index
    %66 = vector.load %arg13[%c40_78, %c0_79] : memref<448x10xf32, #tpu.memory_space<vmem>>, vector<8x10xf32>
    tpu.vector_store %arg13[%c40_78, %c0_79], %65 {strides = array<i32>} : memref<448x10xf32, #tpu.memory_space<vmem>>, vector<8x10xf32>,
    %c240 = arith.constant 240 : index
    %c0_80 = arith.constant 0 : index
    %67 = tpu.strided_load %arg14[%c240, %c0_80] {strides = array<i32: 2, 1>} : memref<448x10xf32, #tpu.memory_space<vmem>>, vector<8x10xf32>
    %c48 = arith.constant 48 : index
    %c0_81 = arith.constant 0 : index
    %68 = vector.load %arg13[%c48, %c0_81] : memref<448x10xf32, #tpu.memory_space<vmem>>, vector<8x10xf32>
    tpu.vector_store %arg13[%c48, %c0_81], %67 {strides = array<i32>} : memref<448x10xf32, #tpu.memory_space<vmem>>, vector<8x10xf32>,
    %c280 = arith.constant 280 : index
    %c0_82 = arith.constant 0 : index
    %69 = tpu.strided_load %arg14[%c280, %c0_82] {strides = array<i32: 2, 1>} : memref<448x10xf32, #tpu.memory_space<vmem>>, vector<8x10xf32>
    %c56 = arith.constant 56 : index
    %c0_83 = arith.constant 0 : index
    %70 = vector.load %arg13[%c56, %c0_83] : memref<448x10xf32, #tpu.memory_space<vmem>>, vector<8x10xf32>
    tpu.vector_store %arg13[%c56, %c0_83], %69 {strides = array<i32>} : memref<448x10xf32, #tpu.memory_space<vmem>>, vector<8x10xf32>,
    %c0_84 = arith.constant 0 : index
    %c0_85 = arith.constant 0 : index
    %71 = vector.load %arg13[%c0_84, %c0_85] : memref<448x10xf32, #tpu.memory_space<vmem>>, vector<64x10xf32>
    %c1_86 = arith.constant 1 : index
    %c0_87 = arith.constant 0 : index
    %72 = vector.load %arg13[%c1_86, %c0_87] : memref<448x10xf32, #tpu.memory_space<vmem>>, vector<64x10xf32>
    %c2_88 = arith.constant 2 : index
    %c0_89 = arith.constant 0 : index
    %73 = vector.load %arg13[%c2_88, %c0_89] : memref<448x10xf32, #tpu.memory_space<vmem>>, vector<64x10xf32>
    %c8_90 = arith.constant 8 : index
    %c0_91 = arith.constant 0 : index
    %74 = vector.load %arg13[%c8_90, %c0_91] : memref<448x10xf32, #tpu.memory_space<vmem>>, vector<64x10xf32>
    %c9 = arith.constant 9 : index
    %c0_92 = arith.constant 0 : index
    %75 = vector.load %arg13[%c9, %c0_92] : memref<448x10xf32, #tpu.memory_space<vmem>>, vector<64x10xf32>
    %c10 = arith.constant 10 : index
    %c0_93 = arith.constant 0 : index
    %76 = vector.load %arg13[%c10, %c0_93] : memref<448x10xf32, #tpu.memory_space<vmem>>, vector<64x10xf32>
    %c16_94 = arith.constant 16 : index
    %c0_95 = arith.constant 0 : index
    %77 = vector.load %arg13[%c16_94, %c0_95] : memref<448x10xf32, #tpu.memory_space<vmem>>, vector<64x10xf32>
    %c17 = arith.constant 17 : index
    %c0_96 = arith.constant 0 : index
    %78 = vector.load %arg13[%c17, %c0_96] : memref<448x10xf32, #tpu.memory_space<vmem>>, vector<64x10xf32>
    %c18 = arith.constant 18 : index
    %c0_97 = arith.constant 0 : index
    %79 = vector.load %arg13[%c18, %c0_97] : memref<448x10xf32, #tpu.memory_space<vmem>>, vector<64x10xf32>
    %80 = tpu.concatenate %71, %72, %73, %74, %75, %76, %77, %78, %79 in 1 : vector<64x10xf32>, vector<64x10xf32>, vector<64x10xf32>, vector<64x10xf32>, vector<64x10xf32>, vector<64x10xf32>, vector<64x10xf32>, vector<64x10xf32>, vector<64x10xf32> -> vector<64x90xf32>
    %c0_98 = arith.constant 0 : index
    %c0_99 = arith.constant 0 : index
    %81 = vector.load %arg6[%c0_98, %c0_99] : memref<90x10xf32, #tpu.memory_space<vmem>>, vector<90x10xf32>
    %cst_100 = arith.constant dense<0.000000e+00> : vector<64x10xf32>
    %82 = tpu.matmul %80, %81, %cst_100 {dimension_numbers = #tpu.dot_dimension_numbers<[1], [0], [0], [1], [0, 0, 1, 1], [], []>} : vector<64x90xf32>, vector<90x10xf32>, vector<64x10xf32> -> vector<64x10xf32>
    %c0_101 = arith.constant 0 : index
    %c0_102 = arith.constant 0 : index
    %83 = vector.load %arg7[%c0_101, %c0_102] : memref<1x10xf32, #tpu.memory_space<vmem>>, vector<1x10xf32>
    %84 = vector.broadcast %83 : vector<1x10xf32> to vector<64x10xf32>
    %85 = arith.addf %82, %84 : vector<64x10xf32>
    %cst_103 = arith.constant 0.000000e+00 : f32
    %cst_104 = arith.constant 6.000000e+00 : f32
    %86 = vector.broadcast %cst_103 : f32 to vector<64x10xf32>
    %87 = arith.maximumf %86, %85 : vector<64x10xf32>
    %88 = vector.broadcast %cst_104 : f32 to vector<64x10xf32>
    %89 = arith.minimumf %88, %87 : vector<64x10xf32>
    %c0_105 = arith.constant 0 : index
    %c0_106 = arith.constant 0 : index
    %90 = vector.load %arg14[%c0_105, %c0_106] : memref<448x10xf32, #tpu.memory_space<vmem>>, vector<64x10xf32>
    tpu.vector_store %arg14[%c0_105, %c0_106], %89 {strides = array<i32>} : memref<448x10xf32, #tpu.memory_space<vmem>>, vector<64x10xf32>,
    %c0_107 = arith.constant 0 : index
    %c0_108 = arith.constant 0 : index
    %91 = vector.load %arg14[%c0_107, %c0_108] : memref<448x10xf32, #tpu.memory_space<vmem>>, vector<64x10xf32>
    %c1_109 = arith.constant 1 : index
    %c0_110 = arith.constant 0 : index
    %92 = vector.load %arg14[%c1_109, %c0_110] : memref<448x10xf32, #tpu.memory_space<vmem>>, vector<64x10xf32>
    %c2_111 = arith.constant 2 : index
    %c0_112 = arith.constant 0 : index
    %93 = vector.load %arg14[%c2_111, %c0_112] : memref<448x10xf32, #tpu.memory_space<vmem>>, vector<64x10xf32>
    %c8_113 = arith.constant 8 : index
    %c0_114 = arith.constant 0 : index
    %94 = vector.load %arg14[%c8_113, %c0_114] : memref<448x10xf32, #tpu.memory_space<vmem>>, vector<64x10xf32>
    %c9_115 = arith.constant 9 : index
    %c0_116 = arith.constant 0 : index
    %95 = vector.load %arg14[%c9_115, %c0_116] : memref<448x10xf32, #tpu.memory_space<vmem>>, vector<64x10xf32>
    %c10_117 = arith.constant 10 : index
    %c0_118 = arith.constant 0 : index
    %96 = vector.load %arg14[%c10_117, %c0_118] : memref<448x10xf32, #tpu.memory_space<vmem>>, vector<64x10xf32>
    %c16_119 = arith.constant 16 : index
    %c0_120 = arith.constant 0 : index
    %97 = vector.load %arg14[%c16_119, %c0_120] : memref<448x10xf32, #tpu.memory_space<vmem>>, vector<64x10xf32>
    %c17_121 = arith.constant 17 : index
    %c0_122 = arith.constant 0 : index
    %98 = vector.load %arg14[%c17_121, %c0_122] : memref<448x10xf32, #tpu.memory_space<vmem>>, vector<64x10xf32>
    %c18_123 = arith.constant 18 : index
    %c0_124 = arith.constant 0 : index
    %99 = vector.load %arg14[%c18_123, %c0_124] : memref<448x10xf32, #tpu.memory_space<vmem>>, vector<64x10xf32>
    %100 = tpu.concatenate %91, %92, %93, %94, %95, %96, %97, %98, %99 in 1 : vector<64x10xf32>, vector<64x10xf32>, vector<64x10xf32>, vector<64x10xf32>, vector<64x10xf32>, vector<64x10xf32>, vector<64x10xf32>, vector<64x10xf32>, vector<64x10xf32> -> vector<64x90xf32>
    %c0_125 = arith.constant 0 : index
    %c0_126 = arith.constant 0 : index
    %101 = vector.load %arg8[%c0_125, %c0_126] : memref<90x10xf32, #tpu.memory_space<vmem>>, vector<90x10xf32>
    %cst_127 = arith.constant dense<0.000000e+00> : vector<64x10xf32>
    %102 = tpu.matmul %100, %101, %cst_127 {dimension_numbers = #tpu.dot_dimension_numbers<[1], [0], [0], [1], [0, 0, 1, 1], [], []>} : vector<64x90xf32>, vector<90x10xf32>, vector<64x10xf32> -> vector<64x10xf32>
    %c0_128 = arith.constant 0 : index
    %c0_129 = arith.constant 0 : index
    %103 = vector.load %arg9[%c0_128, %c0_129] : memref<1x10xf32, #tpu.memory_space<vmem>>, vector<1x10xf32>
    %104 = vector.broadcast %103 : vector<1x10xf32> to vector<64x10xf32>
    %105 = arith.addf %102, %104 : vector<64x10xf32>
    %cst_130 = arith.constant 0.000000e+00 : f32
    %cst_131 = arith.constant 6.000000e+00 : f32
    %106 = vector.broadcast %cst_130 : f32 to vector<64x10xf32>
    %107 = arith.maximumf %106, %105 : vector<64x10xf32>
    %108 = vector.broadcast %cst_131 : f32 to vector<64x10xf32>
    %109 = arith.minimumf %108, %107 : vector<64x10xf32>
    %c0_132 = arith.constant 0 : index
    %c0_133 = arith.constant 0 : index
    %110 = vector.load %arg13[%c0_132, %c0_133] : memref<448x10xf32, #tpu.memory_space<vmem>>, vector<64x10xf32>
    tpu.vector_store %arg13[%c0_132, %c0_133], %109 {strides = array<i32>} : memref<448x10xf32, #tpu.memory_space<vmem>>, vector<64x10xf32>,
    %c0_134 = arith.constant 0 : index
    %c0_135 = arith.constant 0 : index
    %111 = vector.load %arg13[%c0_134, %c0_135] : memref<448x10xf32, #tpu.memory_space<vmem>>, vector<1x10xf32>
    %c1_136 = arith.constant 1 : index
    %c0_137 = arith.constant 0 : index
    %112 = vector.load %arg13[%c1_136, %c0_137] : memref<448x10xf32, #tpu.memory_space<vmem>>, vector<1x10xf32>
    %113 = arith.maximumf %111, %112 : vector<1x10xf32>
    %c8_138 = arith.constant 8 : index
    %c0_139 = arith.constant 0 : index
    %114 = vector.load %arg13[%c8_138, %c0_139] : memref<448x10xf32, #tpu.memory_space<vmem>>, vector<1x10xf32>
    %115 = arith.maximumf %113, %114 : vector<1x10xf32>
    %c9_140 = arith.constant 9 : index
    %c0_141 = arith.constant 0 : index
    %116 = vector.load %arg13[%c9_140, %c0_141] : memref<448x10xf32, #tpu.memory_space<vmem>>, vector<1x10xf32>
    %117 = arith.maximumf %115, %116 : vector<1x10xf32>
    %c1_142 = arith.constant 1 : index
    %c0_143 = arith.constant 0 : index
    %118 = vector.load %arg13[%c1_142, %c0_143] : memref<448x10xf32, #tpu.memory_space<vmem>>, vector<1x10xf32>
    %c2_144 = arith.constant 2 : index
    %c0_145 = arith.constant 0 : index
    %119 = vector.load %arg13[%c2_144, %c0_145] : memref<448x10xf32, #tpu.memory_space<vmem>>, vector<1x10xf32>
    %120 = arith.maximumf %118, %119 : vector<1x10xf32>
    %c9_146 = arith.constant 9 : index
    %c0_147 = arith.constant 0 : index
    %121 = vector.load %arg13[%c9_146, %c0_147] : memref<448x10xf32, #tpu.memory_space<vmem>>, vector<1x10xf32>
    %122 = arith.maximumf %120, %121 : vector<1x10xf32>
    %c10_148 = arith.constant 10 : index
    %c0_149 = arith.constant 0 : index
    %123 = vector.load %arg13[%c10_148, %c0_149] : memref<448x10xf32, #tpu.memory_space<vmem>>, vector<1x10xf32>
    %124 = arith.maximumf %122, %123 : vector<1x10xf32>
    %c2_150 = arith.constant 2 : index
    %c0_151 = arith.constant 0 : index
    %125 = vector.load %arg13[%c2_150, %c0_151] : memref<448x10xf32, #tpu.memory_space<vmem>>, vector<1x10xf32>
    %c3 = arith.constant 3 : index
    %c0_152 = arith.constant 0 : index
    %126 = vector.load %arg13[%c3, %c0_152] : memref<448x10xf32, #tpu.memory_space<vmem>>, vector<1x10xf32>
    %127 = arith.maximumf %125, %126 : vector<1x10xf32>
    %c10_153 = arith.constant 10 : index
    %c0_154 = arith.constant 0 : index
    %128 = vector.load %arg13[%c10_153, %c0_154] : memref<448x10xf32, #tpu.memory_space<vmem>>, vector<1x10xf32>
    %129 = arith.maximumf %127, %128 : vector<1x10xf32>
    %c11 = arith.constant 11 : index
    %c0_155 = arith.constant 0 : index
    %130 = vector.load %arg13[%c11, %c0_155] : memref<448x10xf32, #tpu.memory_space<vmem>>, vector<1x10xf32>
    %131 = arith.maximumf %129, %130 : vector<1x10xf32>
    %c8_156 = arith.constant 8 : index
    %c0_157 = arith.constant 0 : index
    %132 = vector.load %arg13[%c8_156, %c0_157] : memref<448x10xf32, #tpu.memory_space<vmem>>, vector<1x10xf32>
    %c9_158 = arith.constant 9 : index
    %c0_159 = arith.constant 0 : index
    %133 = vector.load %arg13[%c9_158, %c0_159] : memref<448x10xf32, #tpu.memory_space<vmem>>, vector<1x10xf32>
    %134 = arith.maximumf %132, %133 : vector<1x10xf32>
    %c16_160 = arith.constant 16 : index
    %c0_161 = arith.constant 0 : index
    %135 = vector.load %arg13[%c16_160, %c0_161] : memref<448x10xf32, #tpu.memory_space<vmem>>, vector<1x10xf32>
    %136 = arith.maximumf %134, %135 : vector<1x10xf32>
    %c17_162 = arith.constant 17 : index
    %c0_163 = arith.constant 0 : index
    %137 = vector.load %arg13[%c17_162, %c0_163] : memref<448x10xf32, #tpu.memory_space<vmem>>, vector<1x10xf32>
    %138 = arith.maximumf %136, %137 : vector<1x10xf32>
    %c9_164 = arith.constant 9 : index
    %c0_165 = arith.constant 0 : index
    %139 = vector.load %arg13[%c9_164, %c0_165] : memref<448x10xf32, #tpu.memory_space<vmem>>, vector<1x10xf32>
    %c10_166 = arith.constant 10 : index
    %c0_167 = arith.constant 0 : index
    %140 = vector.load %arg13[%c10_166, %c0_167] : memref<448x10xf32, #tpu.memory_space<vmem>>, vector<1x10xf32>
    %141 = arith.maximumf %139, %140 : vector<1x10xf32>
    %c17_168 = arith.constant 17 : index
    %c0_169 = arith.constant 0 : index
    %142 = vector.load %arg13[%c17_168, %c0_169] : memref<448x10xf32, #tpu.memory_space<vmem>>, vector<1x10xf32>
    %143 = arith.maximumf %141, %142 : vector<1x10xf32>
    %c18_170 = arith.constant 18 : index
    %c0_171 = arith.constant 0 : index
    %144 = vector.load %arg13[%c18_170, %c0_171] : memref<448x10xf32, #tpu.memory_space<vmem>>, vector<1x10xf32>
    %145 = arith.maximumf %143, %144 : vector<1x10xf32>
    %c10_172 = arith.constant 10 : index
    %c0_173 = arith.constant 0 : index
    %146 = vector.load %arg13[%c10_172, %c0_173] : memref<448x10xf32, #tpu.memory_space<vmem>>, vector<1x10xf32>
    %c11_174 = arith.constant 11 : index
    %c0_175 = arith.constant 0 : index
    %147 = vector.load %arg13[%c11_174, %c0_175] : memref<448x10xf32, #tpu.memory_space<vmem>>, vector<1x10xf32>
    %148 = arith.maximumf %146, %147 : vector<1x10xf32>
    %c18_176 = arith.constant 18 : index
    %c0_177 = arith.constant 0 : index
    %149 = vector.load %arg13[%c18_176, %c0_177] : memref<448x10xf32, #tpu.memory_space<vmem>>, vector<1x10xf32>
    %150 = arith.maximumf %148, %149 : vector<1x10xf32>
    %c19 = arith.constant 19 : index
    %c0_178 = arith.constant 0 : index
    %151 = vector.load %arg13[%c19, %c0_178] : memref<448x10xf32, #tpu.memory_space<vmem>>, vector<1x10xf32>
    %152 = arith.maximumf %150, %151 : vector<1x10xf32>
    %c16_179 = arith.constant 16 : index
    %c0_180 = arith.constant 0 : index
    %153 = vector.load %arg13[%c16_179, %c0_180] : memref<448x10xf32, #tpu.memory_space<vmem>>, vector<1x10xf32>
    %c17_181 = arith.constant 17 : index
    %c0_182 = arith.constant 0 : index
    %154 = vector.load %arg13[%c17_181, %c0_182] : memref<448x10xf32, #tpu.memory_space<vmem>>, vector<1x10xf32>
    %155 = arith.maximumf %153, %154 : vector<1x10xf32>
    %c24_183 = arith.constant 24 : index
    %c0_184 = arith.constant 0 : index
    %156 = vector.load %arg13[%c24_183, %c0_184] : memref<448x10xf32, #tpu.memory_space<vmem>>, vector<1x10xf32>
    %157 = arith.maximumf %155, %156 : vector<1x10xf32>
    %c25 = arith.constant 25 : index
    %c0_185 = arith.constant 0 : index
    %158 = vector.load %arg13[%c25, %c0_185] : memref<448x10xf32, #tpu.memory_space<vmem>>, vector<1x10xf32>
    %159 = arith.maximumf %157, %158 : vector<1x10xf32>
    %c17_186 = arith.constant 17 : index
    %c0_187 = arith.constant 0 : index
    %160 = vector.load %arg13[%c17_186, %c0_187] : memref<448x10xf32, #tpu.memory_space<vmem>>, vector<1x10xf32>
    %c18_188 = arith.constant 18 : index
    %c0_189 = arith.constant 0 : index
    %161 = vector.load %arg13[%c18_188, %c0_189] : memref<448x10xf32, #tpu.memory_space<vmem>>, vector<1x10xf32>
    %162 = arith.maximumf %160, %161 : vector<1x10xf32>
    %c25_190 = arith.constant 25 : index
    %c0_191 = arith.constant 0 : index
    %163 = vector.load %arg13[%c25_190, %c0_191] : memref<448x10xf32, #tpu.memory_space<vmem>>, vector<1x10xf32>
    %164 = arith.maximumf %162, %163 : vector<1x10xf32>
    %c26 = arith.constant 26 : index
    %c0_192 = arith.constant 0 : index
    %165 = vector.load %arg13[%c26, %c0_192] : memref<448x10xf32, #tpu.memory_space<vmem>>, vector<1x10xf32>
    %166 = arith.maximumf %164, %165 : vector<1x10xf32>
    %c18_193 = arith.constant 18 : index
    %c0_194 = arith.constant 0 : index
    %167 = vector.load %arg13[%c18_193, %c0_194] : memref<448x10xf32, #tpu.memory_space<vmem>>, vector<1x10xf32>
    %c19_195 = arith.constant 19 : index
    %c0_196 = arith.constant 0 : index
    %168 = vector.load %arg13[%c19_195, %c0_196] : memref<448x10xf32, #tpu.memory_space<vmem>>, vector<1x10xf32>
    %169 = arith.maximumf %167, %168 : vector<1x10xf32>
    %c26_197 = arith.constant 26 : index
    %c0_198 = arith.constant 0 : index
    %170 = vector.load %arg13[%c26_197, %c0_198] : memref<448x10xf32, #tpu.memory_space<vmem>>, vector<1x10xf32>
    %171 = arith.maximumf %169, %170 : vector<1x10xf32>
    %c27 = arith.constant 27 : index
    %c0_199 = arith.constant 0 : index
    %172 = vector.load %arg13[%c27, %c0_199] : memref<448x10xf32, #tpu.memory_space<vmem>>, vector<1x10xf32>
    %173 = arith.maximumf %171, %172 : vector<1x10xf32>
    %174 = tpu.concatenate %117, %124, %131, %138, %145, %152, %159, %166, %173 in 1 : vector<1x10xf32>, vector<1x10xf32>, vector<1x10xf32>, vector<1x10xf32>, vector<1x10xf32>, vector<1x10xf32>, vector<1x10xf32>, vector<1x10xf32>, vector<1x10xf32> -> vector<1x90xf32>
    %c0_200 = arith.constant 0 : index
    %c0_201 = arith.constant 0 : index
    %175 = vector.load %arg10[%c0_200, %c0_201] : memref<90x5xf32, #tpu.memory_space<vmem>>, vector<90x5xf32>
    %cst_202 = arith.constant dense<0.000000e+00> : vector<1x5xf32>
    %176 = tpu.matmul %174, %175, %cst_202 {dimension_numbers = #tpu.dot_dimension_numbers<[1], [0], [0], [1], [0, 0, 1, 1], [], []>} : vector<1x90xf32>, vector<90x5xf32>, vector<1x5xf32> -> vector<1x5xf32>
    %c0_203 = arith.constant 0 : index
    %c0_204 = arith.constant 0 : index
    %177 = vector.load %arg11[%c0_203, %c0_204] : memref<1x5xf32, #tpu.memory_space<vmem>>, vector<1x5xf32>
    %178 = arith.addf %176, %177 : vector<1x5xf32>
    %179 = vector.shape_cast %178 : vector<1x5xf32> to vector<1x1x5xf32>
    %c0_205 = arith.constant 0 : index
    %c0_206 = arith.constant 0 : index
    %c0_207 = arith.constant 0 : index
    %180 = vector.load %arg12[%c0_205, %c0_206, %c0_207] : memref<1x1x5xf32, #tpu.memory_space<vmem>>, vector<1x1x5xf32>
    tpu.vector_store %arg12[%c0_205, %c0_206, %c0_207], %179 {strides = array<i32>} : memref<1x1x5xf32, #tpu.memory_space<vmem>>, vector<1x1x5xf32>,
    return
  }
  func.func @transform_0(%arg0: i32) -> (i32, i32, i32) {
    %c0_i32 = arith.constant 0 : i32
    %c0_i32_0 = arith.constant 0 : i32
    %c0_i32_1 = arith.constant 0 : i32
    return %arg0, %c0_i32, %c0_i32_0 : i32, i32, i32
  }
  func.func @transform_1(%arg0: i32) -> (i32, i32) {
    %c0_i32 = arith.constant 0 : i32
    %c0_i32_0 = arith.constant 0 : i32
    %c0_i32_1 = arith.constant 0 : i32
    return %c0_i32, %c0_i32_0 : i32, i32
  }
  func.func @transform_2(%arg0: i32) -> (i32, i32) {
    %c0_i32 = arith.constant 0 : i32
    %c0_i32_0 = arith.constant 0 : i32
    %c0_i32_1 = arith.constant 0 : i32
    return %c0_i32, %c0_i32_0 : i32, i32
  }
  func.func @transform_3(%arg0: i32) -> (i32, i32) {
    %c0_i32 = arith.constant 0 : i32
    %c0_i32_0 = arith.constant 0 : i32
    %c0_i32_1 = arith.constant 0 : i32
    return %c0_i32, %c0_i32_0 : i32, i32
  }
  func.func @transform_4(%arg0: i32) -> (i32, i32) {
    %c0_i32 = arith.constant 0 : i32
    %c0_i32_0 = arith.constant 0 : i32
    %c0_i32_1 = arith.constant 0 : i32
    return %c0_i32, %c0_i32_0 : i32, i32
  }
  func.func @transform_5(%arg0: i32) -> (i32, i32) {
    %c0_i32 = arith.constant 0 : i32
    %c0_i32_0 = arith.constant 0 : i32
    %c0_i32_1 = arith.constant 0 : i32
    return %c0_i32, %c0_i32_0 : i32, i32
  }
  func.func @transform_6(%arg0: i32) -> (i32, i32) {
    %c0_i32 = arith.constant 0 : i32
    %c0_i32_0 = arith.constant 0 : i32
    %c0_i32_1 = arith.constant 0 : i32
    return %c0_i32, %c0_i32_0 : i32, i32
  }
  func.func @transform_7(%arg0: i32) -> (i32, i32) {
    %c0_i32 = arith.constant 0 : i32
    %c0_i32_0 = arith.constant 0 : i32
    %c0_i32_1 = arith.constant 0 : i32
    return %c0_i32, %c0_i32_0 : i32, i32
  }
  func.func @transform_8(%arg0: i32) -> (i32, i32) {
    %c0_i32 = arith.constant 0 : i32
    %c0_i32_0 = arith.constant 0 : i32
    %c0_i32_1 = arith.constant 0 : i32
    return %c0_i32, %c0_i32_0 : i32, i32
  }
  func.func @transform_9(%arg0: i32) -> (i32, i32) {
    %c0_i32 = arith.constant 0 : i32
    %c0_i32_0 = arith.constant 0 : i32
    %c0_i32_1 = arith.constant 0 : i32
    return %c0_i32, %c0_i32_0 : i32, i32
  }
  func.func @transform_10(%arg0: i32) -> (i32, i32) {
    %c0_i32 = arith.constant 0 : i32
    %c0_i32_0 = arith.constant 0 : i32
    %c0_i32_1 = arith.constant 0 : i32
    return %c0_i32, %c0_i32_0 : i32, i32
  }
  func.func @transform_11(%arg0: i32) -> (i32, i32, i32) {
    %c0_i32 = arith.constant 0 : i32
    %c0_i32_0 = arith.constant 0 : i32
    %c0_i32_1 = arith.constant 0 : i32
    return %arg0, %c0_i32, %c0_i32_0 : i32, i32, i32
  }
}

</mosaic_0001>

<bundles_post_ra>
// kernel: cnn_forward.1
= control target key start
LH: loop header
LB: loop body
LE: loop exit
PB: predicated region body
PF: predicated region fallthrough
CT: control target
= control target key end

     0   :  { %s13293_s0 = inlined_call_operand.vmem [shape: f32[2,400,10], index: 0, kind: input, shape index: {}]   ;;  %s13294_s1 = inlined_call_operand.vmem [shape: f32[90,10], index: 1, kind: input, shape index: {}]   ;;  %s13295_s2 = inlined_call_operand.vmem [shape: f32[1,10], index: 2, kind: input, shape index: {}]   ;;  %s13296_s3 = inlined_call_operand.vmem [shape: f32[90,10], index: 3, kind: input, shape index: {}]   ;;  %s13297_s4 = inlined_call_operand.vmem [shape: f32[1,10], index: 4, kind: input, shape index: {}]   ;;  %s13298_s5 = inlined_call_operand.vmem [shape: f32[90,10], index: 5, kind: input, shape index: {}]   ;;  %s13299_s6 = inlined_call_operand.vmem [shape: f32[1,10], index: 6, kind: input, shape index: {}]   ;;  %s13300_s7 = inlined_call_operand.vmem [shape: f32[90,10], index: 7, kind: input, shape index: {}]   ;;  %s13301_s8 = inlined_call_operand.vmem [shape: f32[1,10], index: 8, kind: input, shape index: {}]   ;;  %s13302_s9 = inlined_call_operand.vmem [shape: f32[90,5], index: 9, kind: input, shape index: {}]   ;;  %s13303_s10 = inlined_call_operand.vmem [shape: f32[1,5], index: 10, kind: input, shape index: {}]   ;;  %s13304_s11 = inlined_call_operand.hbm [shape: f32[2,1,5], index: 11, kind: output, shape index: {}]  }
   0x1   :  { %13333 = sst [smem:[#allocation176_spill]] %s13293_s0 }
   0x2   :  { %13334 = sst [smem:[#allocation177_spill]] %s13294_s1 }
   0x3   :  { %13335 = sst [smem:[#allocation178_spill]] %s13295_s2 }
   0x4   :  { %13336 = sst [smem:[#allocation179_spill]] %s13296_s3 }
   0x5   :  { %16 = vsyncpa [#allocation5], 0 }
   0x6   :  { %18 = vsyncpa [#allocation5 + $0x1], 0  ;;  %s8810_s17 = smov 0   ;;  %s8812_s18 = smov 0  }
   0x7   :  { %s8814_s19 = smov 0   ;;  %s8816_s20 = smov 0  }
   0x8 LB: > { %s8831_s21 = sadd.s32 4294967295, %s8737_s20   ;;  %s7875_s22 = sadd.s32 4294967294, %s8737_s20   ;;  %s8737_s20 = sphi %s8816_s20, %s13693_s20   ;;  %s8733_s19 = sphi %s8814_s19, %s13692_s19   ;;  %s8729_s18 = sphi %s8812_s18, %s13691_s18   ;;  %s8725_s17 = sphi %s8810_s17, %s13690_s17  }
   0x9   : > { %s8835_s23 = sadd.s32 1, %s8737_s20   ;;  %s267_s24 = sadd.s32 1, %s8733_s19 }
   0xa   : > { %s264_s25 = ssub.s32 %s8737_s20, %s8835_s23  ;;  %p277_p0 = scmp.ne.s32.totalorder %s8733_s19, %s8729_s18 }
   0xb   : > { %p265_p1 = scmp.eq.s32.totalorder %s264_s25, 0  ;;  %p278_p2 = scmp.eq.s32.totalorder %s8831_s21, 1 }
   0xc   : > { %p283_p3 = scmp.ne.s32.totalorder %s8729_s18, %s8725_s17  ;;  %p284_p4 = scmp.eq.s32.totalorder %s7875_s22, 1 }
   0xd   : > { %s8846_s26 = scalar_select %p265_p1, %s8733_s19, %s267_s24  }
   0xe   : > { %p8848_p5 = por %p278_p2, %p277_p0  ;;  %p8852_p6 = por %p284_p4, %p283_p3 }
   0xf   : > { %p7878_p7 = scmp.ge.s32.totalorder %s8737_s20, 1  ;;  %p340_p8 = scmp.lt.s32.totalorder %s8737_s20, 3 }
  0x11   : > { %p341_p9 = pnand %p7878_p7, %p340_p8 }
  0x13   : > { %344 = sbr.rel (%p341_p9) target bundleno = 2857 (0xb29), region = 64 }
  0x18   : > { %p379_p10 = scmp.lt.s32.totalorder %s8831_s21, 1  ;;  %vm434_vm0 = vcmask 80896   ;;  %v13305_v0 = vmov 0.0   ;;  %s13339_s0 = sld [smem:[#allocation176_spill]]  ;;  %vm2899_vm1 = vcmask 1041408   ;;  %vm2372_vm2 = vcmask 162816  }
  0x19   : > { %485 = vst.msk [vmem:[#allocation2 + $0x190] sm:$0xff] %vm434_vm0, %v13305_v0  ;;  %486 = vst.msk [vmem:[#allocation2 + $0x198] sm:$0xff] %vm434_vm0, %v13305_v0  ;;  %s13331_s15 = smov 10   ;;  %s13325_s16 = smov 20   ;;  %vm2423_vm3 = vcmask 244736   ;;  %vm2474_vm4 = vcmask 326656  }
  0x1a   : > { %487 = vst.msk [vmem:[#allocation2 + $0x1a0] sm:$0xff] %vm434_vm0, %v13305_v0  ;;  %488 = vst.msk [vmem:[#allocation2 + $0x1a8] sm:$0xff] %vm434_vm0, %v13305_v0  ;;  %s380_s29 = scalar_select %p379_p10, %s8831_s21, 1  ;;  %vm2525_vm5 = vcmask 408576   ;;  %vm2576_vm6 = vcmask 490496   ;;  %vm2627_vm7 = vcmask 572416  }
  0x1b   : > { %489 = vst.msk [vmem:[#allocation2 + $0x1b0] sm:$0xff] %vm434_vm0, %v13305_v0  ;;  %490 = vst.msk [vmem:[#allocation2 + $0x1b8] sm:$0xff] %vm434_vm0, %v13305_v0  ;;  %s13323_s22 = smov 30   ;;  %s13329_s24 = smov 40   ;;  %vm2678_vm8 = vcmask 654336   ;;  %vm2748_vm9 = vcmask 736256  }
  0x1c   : > { %491 = vst.msk [vmem:[#allocation3 + $0x190] sm:$0xff] %vm434_vm0, %v13305_v0  ;;  %492 = vst.msk [vmem:[#allocation3 + $0x198] sm:$0xff] %vm434_vm0, %v13305_v0  ;;  %s8483_s30 = smul.u32 400, %s380_s29  ;;  %s13445_s1 = sld [smem:[#allocation177_spill]]  ;;  %vm8748_vm10 = vmmov 0   ;;  %vm7805_vm11 = vcmask 32768  }
  0x1d   : > { %493 = vst.msk [vmem:[#allocation3 + $0x1a0] sm:$0xff] %vm434_vm0, %v13305_v0  ;;  %494 = vst.msk [vmem:[#allocation3 + $0x1a8] sm:$0xff] %vm434_vm0, %v13305_v0  ;;  %s13327_s13 = smov 50   ;;  %s13319_s12 = smov 70  }
  0x1e   : > { %495 = vst.msk [vmem:[#allocation3 + $0x1b0] sm:$0xff] %vm434_vm0, %v13305_v0  ;;  %496 = vst.msk [vmem:[#allocation3 + $0x1b8] sm:$0xff] %vm434_vm0, %v13305_v0  ;;  %s8889_s14 = scalar_lea.vmem %s13339_s0, %s8483_s30  ;;  %s13321_s30 = smov 60  }
  0x1f   : > { %v386_v1 = vld [vmem:[%s8889_s14 + $0x10] sm:$0xff]  ;;  %v387_v2 = vld [vmem:[%s8889_s14 + $0x18] sm:$0xff]  ;;  %v384_v3 = vld [vmem:[%s8889_s14] sm:$0xff]  ;;  %s13583_s2 = sld [smem:[#allocation178_spill]]  ;;  %s13635_s29 = smov 60  }
  0x20   : > { %437 = vst.msk [vmem:[#allocation2 + $0x10] sm:$0xff] %vm434_vm0, %v386_v1  ;;  %438 = vst.msk [vmem:[#allocation2 + $0x18] sm:$0xff] %vm434_vm0, %v387_v2  ;;  %v385_v4 = vld [vmem:[%s8889_s14 + $0x8] sm:$0xff]  ;;  %v388_v5 = vld [vmem:[%s8889_s14 + $0x20] sm:$0xff]  ;;  %s13614_s3 = sld [smem:[#allocation179_spill]]  ;;  %s13685_s0 = smov 10  }
  0x21   : > { %435 = vst.msk [vmem:[#allocation2] sm:$0xff] %vm434_vm0, %v384_v3  ;;  %v389_v6 = vld [vmem:[%s8889_s14 + $0x28] sm:$0xff]  ;;  %436 = vst.msk [vmem:[#allocation2 + $0x8] sm:$0xff] %vm434_vm0, %v385_v4  ;;  %v390_v7 = vld [vmem:[%s8889_s14 + $0x30] sm:$0xff] }
  0x22   : > { %439 = vst.msk [vmem:[#allocation2 + $0x20] sm:$0xff] %vm434_vm0, %v388_v5  ;;  %440 = vst.msk [vmem:[#allocation2 + $0x28] sm:$0xff] %vm434_vm0, %v389_v6  ;;  %v391_v8 = vld [vmem:[%s8889_s14 + $0x38] sm:$0xff]  ;;  %v392_v9 = vld [vmem:[%s8889_s14 + $0x40] sm:$0xff] }
  0x23   : > { %441 = vst.msk [vmem:[#allocation2 + $0x30] sm:$0xff] %vm434_vm0, %v390_v7  ;;  %442 = vst.msk [vmem:[#allocation2 + $0x38] sm:$0xff] %vm434_vm0, %v391_v8  ;;  %v393_v10 = vld [vmem:[%s8889_s14 + $0x48] sm:$0xff]  ;;  %v394_v11 = vld [vmem:[%s8889_s14 + $0x50] sm:$0xff] }
  0x24   : > { %443 = vst.msk [vmem:[#allocation2 + $0x40] sm:$0xff] %vm434_vm0, %v392_v9  ;;  %v395_v12 = vld [vmem:[%s8889_s14 + $0x58] sm:$0xff]  ;;  %444 = vst.msk [vmem:[#allocation2 + $0x48] sm:$0xff] %vm434_vm0, %v393_v10  ;;  %v396_v13 = vld [vmem:[%s8889_s14 + $0x60] sm:$0xff] }
  0x25   : > { %445 = vst.msk [vmem:[#allocation2 + $0x50] sm:$0xff] %vm434_vm0, %v394_v11  ;;  %446 = vst.msk [vmem:[#allocation2 + $0x58] sm:$0xff] %vm434_vm0, %v395_v12  ;;  %v397_v14 = vld [vmem:[%s8889_s14 + $0x68] sm:$0xff]  ;;  %v398_v15 = vld [vmem:[%s8889_s14 + $0x70] sm:$0xff] }
  0x26   : > { %447 = vst.msk [vmem:[#allocation2 + $0x60] sm:$0xff] %vm434_vm0, %v396_v13  ;;  %448 = vst.msk [vmem:[#allocation2 + $0x68] sm:$0xff] %vm434_vm0, %v397_v14  ;;  %v399_v16 = vld [vmem:[%s8889_s14 + $0x78] sm:$0xff]  ;;  %v400_v17 = vld [vmem:[%s8889_s14 + $0x80] sm:$0xff] }
  0x27   : > { %449 = vst.msk [vmem:[#allocation2 + $0x70] sm:$0xff] %vm434_vm0, %v398_v15  ;;  %v401_v18 = vld [vmem:[%s8889_s14 + $0x88] sm:$0xff]  ;;  %450 = vst.msk [vmem:[#allocation2 + $0x78] sm:$0xff] %vm434_vm0, %v399_v16  ;;  %v402_v19 = vld [vmem:[%s8889_s14 + $0x90] sm:$0xff] }
  0x28   : > { %451 = vst.msk [vmem:[#allocation2 + $0x80] sm:$0xff] %vm434_vm0, %v400_v17  ;;  %452 = vst.msk [vmem:[#allocation2 + $0x88] sm:$0xff] %vm434_vm0, %v401_v18  ;;  %v403_v20 = vld [vmem:[%s8889_s14 + $0x98] sm:$0xff]  ;;  %v404_v21 = vld [vmem:[%s8889_s14 + $0xa0] sm:$0xff] }
  0x29   : > { %453 = vst.msk [vmem:[#allocation2 + $0x90] sm:$0xff] %vm434_vm0, %v402_v19  ;;  %454 = vst.msk [vmem:[#allocation2 + $0x98] sm:$0xff] %vm434_vm0, %v403_v20  ;;  %v405_v22 = vld [vmem:[%s8889_s14 + $0xa8] sm:$0xff]  ;;  %v406_v23 = vld [vmem:[%s8889_s14 + $0xb0] sm:$0xff] }
  0x2a   : > { %455 = vst.msk [vmem:[#allocation2 + $0xa0] sm:$0xff] %vm434_vm0, %v404_v21  ;;  %v407_v24 = vld [vmem:[%s8889_s14 + $0xb8] sm:$0xff]  ;;  %456 = vst.msk [vmem:[#allocation2 + $0xa8] sm:$0xff] %vm434_vm0, %v405_v22  ;;  %v408_v26 = vld [vmem:[%s8889_s14 + $0xc0] sm:$0xff] }
  0x2b   : > { %v549_v25 = vld [vmem:[#allocation2 + $0x11] sm:$0xff]  ;;  %457 = vst.msk [vmem:[#allocation2 + $0xb0] sm:$0xff] %vm434_vm0, %v406_v23  ;;  %458 = vst.msk [vmem:[#allocation2 + $0xb8] sm:$0xff] %vm434_vm0, %v407_v24  ;;  %v409_v27 = vld [vmem:[%s8889_s14 + $0xc8] sm:$0xff] }
  0x2c   : > { %866 = vrot.lane.b32.xlu1 %v549_v25, %s13331_s15  ;;  %v547_v28 = vld [vmem:[#allocation2 + $0x1] sm:$0xff]  ;;  %459 = vst.msk [vmem:[#allocation2 + $0xc0] sm:$0xff] %vm434_vm0, %v408_v26  ;;  %460 = vst.msk [vmem:[#allocation2 + $0xc8] sm:$0xff] %vm434_vm0, %v409_v27  ;;  %v550_v29 = vld [vmem:[#allocation2 + $0x19] sm:$0xff] }
  0x2d   : > { %862 = vrot.lane.b32.xlu0 %v547_v28, %s13331_s15  ;;  %v548_v30 = vld [vmem:[#allocation2 + $0x9] sm:$0xff]  ;;  %v551_v32 = vld [vmem:[#allocation2 + $0x21] sm:$0xff]  ;;  %v554_v33 = vld [vmem:[#allocation2 + $0x39] sm:$0xff] }
  0x2e   : > { %v552_v31 = vld [vmem:[#allocation2 + $0x29] sm:$0xff]  ;;  %v553_v35 = vld [vmem:[#allocation2 + $0x31] sm:$0xff]  ;;  %v412_v37 = vld [vmem:[%s8889_s14 + $0xe0] sm:$0xff] }
  0x2f   : > { %v410_v34 = vld [vmem:[%s8889_s14 + $0xd0] sm:$0xff]  ;;  %v411_v36 = vld [vmem:[%s8889_s14 + $0xd8] sm:$0xff]  ;;  %463 = vst.msk [vmem:[#allocation2 + $0xe0] sm:$0xff] %vm434_vm0, %v412_v37  ;;  %v413_v38 = vld [vmem:[%s8889_s14 + $0xe8] sm:$0xff] }
  0x30   : > { %868 = vrot.lane.b32.xlu1 %v550_v29, %s13331_s15  ;;  %461 = vst.msk [vmem:[#allocation2 + $0xd0] sm:$0xff] %vm434_vm0, %v410_v34  ;;  %462 = vst.msk [vmem:[#allocation2 + $0xd8] sm:$0xff] %vm434_vm0, %v411_v36  ;;  %v414_v39 = vld [vmem:[%s8889_s14 + $0xf0] sm:$0xff]  ;;  %v415_v40 = vld [vmem:[%s8889_s14 + $0xf8] sm:$0xff] }
  0x31   : > { %864 = vrot.lane.b32.xlu0 %v548_v30, %s13331_s15  ;;  %464 = vst.msk [vmem:[#allocation2 + $0xe8] sm:$0xff] %vm434_vm0, %v413_v38  ;;  %465 = vst.msk [vmem:[#allocation2 + $0xf0] sm:$0xff] %vm434_vm0, %v414_v39  ;;  %v416_v41 = vld [vmem:[%s8889_s14 + $0x100] sm:$0xff]  ;;  %v417_v42 = vld [vmem:[%s8889_s14 + $0x108] sm:$0xff] }
  0x32   : > { %466 = vst.msk [vmem:[#allocation2 + $0xf8] sm:$0xff] %vm434_vm0, %v415_v40  ;;  %v418_v43 = vld [vmem:[%s8889_s14 + $0x110] sm:$0xff]  ;;  %467 = vst.msk [vmem:[#allocation2 + $0x100] sm:$0xff] %vm434_vm0, %v416_v41  ;;  %v419_v45 = vld [vmem:[%s8889_s14 + $0x118] sm:$0xff] }
  0x33   : > { %v556_v44 = vld [vmem:[#allocation2 + $0x49] sm:$0xff]  ;;  %468 = vst.msk [vmem:[#allocation2 + $0x108] sm:$0xff] %vm434_vm0, %v417_v42  ;;  %469 = vst.msk [vmem:[#allocation2 + $0x110] sm:$0xff] %vm434_vm0, %v418_v43  ;;  %v420_v46 = vld [vmem:[%s8889_s14 + $0x120] sm:$0xff] }
  0x34   : > { %872 = vrot.lane.b32.xlu1 %v552_v31, %s13331_s15  ;;  %v421_v47 = vld [vmem:[%s8889_s14 + $0x128] sm:$0xff]  ;;  %470 = vst.msk [vmem:[#allocation2 + $0x118] sm:$0xff] %vm434_vm0, %v419_v45  ;;  %471 = vst.msk [vmem:[#allocation2 + $0x120] sm:$0xff] %vm434_vm0, %v420_v46  ;;  %v422_v49 = vld [vmem:[%s8889_s14 + $0x130] sm:$0xff] }
  0x35   : > { %870 = vrot.lane.b32.xlu0 %v551_v32, %s13331_s15  ;;  %v555_v48 = vld [vmem:[#allocation2 + $0x41] sm:$0xff]  ;;  %472 = vst.msk [vmem:[#allocation2 + $0x128] sm:$0xff] %vm434_vm0, %v421_v47  ;;  %v423_v50 = vld [vmem:[%s8889_s14 + $0x138] sm:$0xff]  ;;  %473 = vst.msk [vmem:[#allocation2 + $0x130] sm:$0xff] %vm434_vm0, %v422_v49 }
  0x36   : > { %v424_v51 = vld [vmem:[%s8889_s14 + $0x140] sm:$0xff]  ;;  %474 = vst.msk [vmem:[#allocation2 + $0x138] sm:$0xff] %vm434_vm0, %v423_v50  ;;  %v425_v52 = vld [vmem:[%s8889_s14 + $0x148] sm:$0xff]  ;;  %v426_v53 = vld [vmem:[%s8889_s14 + $0x150] sm:$0xff] }
  0x37   : > { %475 = vst.msk [vmem:[#allocation2 + $0x140] sm:$0xff] %vm434_vm0, %v424_v51  ;;  %v427_v54 = vld [vmem:[%s8889_s14 + $0x158] sm:$0xff]  ;;  %476 = vst.msk [vmem:[#allocation2 + $0x148] sm:$0xff] %vm434_vm0, %v425_v52  ;;  %v428_v55 = vld [vmem:[%s8889_s14 + $0x160] sm:$0xff] }
  0x38   : > { %876 = vrot.lane.b32.xlu1 %v554_v33, %s13331_s15  ;;  %477 = vst.msk [vmem:[#allocation2 + $0x150] sm:$0xff] %vm434_vm0, %v426_v53  ;;  %478 = vst.msk [vmem:[#allocation2 + $0x158] sm:$0xff] %vm434_vm0, %v427_v54  ;;  %v429_v56 = vld [vmem:[%s8889_s14 + $0x168] sm:$0xff]  ;;  %v430_v57 = vld [vmem:[%s8889_s14 + $0x170] sm:$0xff] }
  0x39   : > { %874 = vrot.lane.b32.xlu0 %v553_v35, %s13331_s15  ;;  %479 = vst.msk [vmem:[#allocation2 + $0x160] sm:$0xff] %vm434_vm0, %v428_v55  ;;  %480 = vst.msk [vmem:[#allocation2 + $0x168] sm:$0xff] %vm434_vm0, %v429_v56  ;;  %v431_v58 = vld [vmem:[%s8889_s14 + $0x178] sm:$0xff]  ;;  %v432_v59 = vld [vmem:[%s8889_s14 + $0x180] sm:$0xff] }
  0x3a   : > { %481 = vst.msk [vmem:[#allocation2 + $0x170] sm:$0xff] %vm434_vm0, %v430_v57  ;;  %482 = vst.msk [vmem:[#allocation2 + $0x178] sm:$0xff] %vm434_vm0, %v431_v58  ;;  %v433_v60 = vld [vmem:[%s8889_s14 + $0x188] sm:$0xff]  ;;  %v558_v61 = vld [vmem:[#allocation2 + $0x59] sm:$0xff]  ;;  %s13317_s14 = smov 80  }
  0x3b   : > { %483 = vst.msk [vmem:[#allocation2 + $0x180] sm:$0xff] %vm434_vm0, %v432_v59  ;;  %484 = vst.msk [vmem:[#allocation2 + $0x188] sm:$0xff] %vm434_vm0, %v433_v60  ;;  %v557_v62 = vld [vmem:[#allocation2 + $0x51] sm:$0xff]  ;;  %v560_v63 = vld [vmem:[#allocation2 + $0x69] sm:$0xff] }
  0x3c   : > { %880 = vrot.lane.b32.xlu1 %v556_v44, %s13331_s15  ;;  %v559_v1 = vld [vmem:[#allocation2 + $0x61] sm:$0xff]  ;;  %v562_v2 = vld [vmem:[#allocation2 + $0x79] sm:$0xff]  ;;  %v561_v3 = vld [vmem:[#allocation2 + $0x71] sm:$0xff] }
  0x3d   : > { %878 = vrot.lane.b32.xlu0 %v555_v48, %s13331_s15  ;;  %v564_v4 = vld [vmem:[#allocation2 + $0x89] sm:$0xff]  ;;  %v563_v5 = vld [vmem:[#allocation2 + $0x81] sm:$0xff]  ;;  %v566_v6 = vld [vmem:[#allocation2 + $0x99] sm:$0xff] }
  0x3e   : > { %v565_v7 = vld [vmem:[#allocation2 + $0x91] sm:$0xff]  ;;  %v568_v8 = vld [vmem:[#allocation2 + $0xa9] sm:$0xff]  ;;  %v567_v9 = vld [vmem:[#allocation2 + $0xa1] sm:$0xff] }
  0x3f   : > { %v570_v10 = vld [vmem:[#allocation2 + $0xb9] sm:$0xff]  ;;  %v569_v11 = vld [vmem:[#allocation2 + $0xb1] sm:$0xff]  ;;  %v572_v12 = vld [vmem:[#allocation2 + $0xc9] sm:$0xff] }
  0x40   : > { %884 = vrot.lane.b32.xlu1 %v558_v61, %s13331_s15  ;;  %v571_v13 = vld [vmem:[#allocation2 + $0xc1] sm:$0xff]  ;;  %v574_v14 = vld [vmem:[#allocation2 + $0xd9] sm:$0xff]  ;;  %v573_v15 = vld [vmem:[#allocation2 + $0xd1] sm:$0xff] }
  0x41   : > { %882 = vrot.lane.b32.xlu0 %v557_v62, %s13331_s15  ;;  %v576_v16 = vld [vmem:[#allocation2 + $0xe9] sm:$0xff]  ;;  %v575_v17 = vld [vmem:[#allocation2 + $0xe1] sm:$0xff]  ;;  %v578_v18 = vld [vmem:[#allocation2 + $0xf9] sm:$0xff] }
  0x42   : > { %v577_v19 = vld [vmem:[#allocation2 + $0xf1] sm:$0xff]  ;;  %v580_v20 = vld [vmem:[#allocation2 + $0x109] sm:$0xff]  ;;  %v579_v21 = vld [vmem:[#allocation2 + $0x101] sm:$0xff] }
  0x43   : > { %v582_v22 = vld [vmem:[#allocation2 + $0x119] sm:$0xff]  ;;  %v581_v23 = vld [vmem:[#allocation2 + $0x111] sm:$0xff]  ;;  %v584_v24 = vld [vmem:[#allocation2 + $0x129] sm:$0xff] }
  0x44   : > { %888 = vrot.lane.b32.xlu1 %v560_v63, %s13331_s15  ;;  %v583_v25 = vld [vmem:[#allocation2 + $0x121] sm:$0xff]  ;;  %v586_v26 = vld [vmem:[#allocation2 + $0x139] sm:$0xff]  ;;  %v585_v27 = vld [vmem:[#allocation2 + $0x131] sm:$0xff] }
  0x45   : > { %886 = vrot.lane.b32.xlu0 %v559_v1, %s13331_s15  ;;  %v588_v28 = vld [vmem:[#allocation2 + $0x149] sm:$0xff]  ;;  %v587_v29 = vld [vmem:[#allocation2 + $0x141] sm:$0xff]  ;;  %v590_v30 = vld [vmem:[#allocation2 + $0x159] sm:$0xff] }
  0x46   : > { %v589_v31 = vld [vmem:[#allocation2 + $0x151] sm:$0xff]  ;;  %v592_v32 = vld [vmem:[#allocation2 + $0x169] sm:$0xff]  ;;  %v591_v33 = vld [vmem:[#allocation2 + $0x161] sm:$0xff] }
  0x47   : > { %v594_v34 = vld [vmem:[#allocation2 + $0x179] sm:$0xff]  ;;  %v593_v35 = vld [vmem:[#allocation2 + $0x171] sm:$0xff]  ;;  %v596_v36 = vld [vmem:[#allocation2 + $0x189] sm:$0xff] }
  0x48   : > { %892 = vrot.lane.b32.xlu1 %v562_v2, %s13331_s15  ;;  %v595_v37 = vld [vmem:[#allocation2 + $0x181] sm:$0xff]  ;;  %v598_v38 = vld [vmem:[#allocation2 + $0xa] sm:$0xff]  ;;  %v599_v41 = vld [vmem:[#allocation2 + $0x12] sm:$0xff] }
  0x49   : > { %890 = vrot.lane.b32.xlu0 %v561_v3, %s13331_s15  ;;  %v597_v39 = vld [vmem:[#allocation2 + $0x2] sm:$0xff]  ;;  %v600_v40 = vld [vmem:[#allocation2 + $0x1a] sm:$0xff]  ;;  %v9045_v42 = vld [vmem:[#allocation2 + $0x2a] sm:$0xff] }
  0x4a   : > { %v601_v43 = vld [vmem:[#allocation2 + $0x22] sm:$0xff]  ;;  %v604_v44 = vld [vmem:[#allocation2 + $0x3a] sm:$0xff]  ;;  %v9050_v45 = vld [vmem:[#allocation2 + $0x32] sm:$0xff] }
  0x4b   : > { %v606_v46 = vld [vmem:[#allocation2 + $0x4a] sm:$0xff]  ;;  %v9057_v48 = vld [vmem:[#allocation2 + $0x42] sm:$0xff]  ;;  %v608_v50 = vld [vmem:[#allocation2 + $0x5a] sm:$0xff] }
  0x4c   : > { %896 = vrot.lane.b32.xlu1 %v564_v4, %s13331_s15  ;;  %v607_v52 = vld [vmem:[#allocation2 + $0x52] sm:$0xff]  ;;  %v610_v54 = vld [vmem:[#allocation2 + $0x6a] sm:$0xff]  ;;  %v609_v56 = vld [vmem:[#allocation2 + $0x62] sm:$0xff] }
  0x4d   : > { %894 = vrot.lane.b32.xlu0 %v563_v5, %s13331_s15  ;;  %v612_v58 = vld [vmem:[#allocation2 + $0x7a] sm:$0xff]  ;;  %v611_v60 = vld [vmem:[#allocation2 + $0x72] sm:$0xff]  ;;  %v614_v62 = vld [vmem:[#allocation2 + $0x8a] sm:$0xff] }
  0x4e   : > { %v613_v1 = vld [vmem:[#allocation2 + $0x82] sm:$0xff]  ;;  %v616_v3 = vld [vmem:[#allocation2 + $0x9a] sm:$0xff]  ;;  %v615_v5 = vld [vmem:[#allocation2 + $0x92] sm:$0xff] }
  0x4f   : > { %v659_v0 = vld [vmem:[#allocation2 + $0x74] sm:$0xff] }
  0x50   : > { %900 = vrot.lane.b32.xlu1 %v566_v6, %s13331_s15 }
  0x51   : > { %898 = vrot.lane.b32.xlu0 %v565_v7, %s13331_s15  ;;  %v618_v7 = vld [vmem:[#allocation2 + $0xaa] sm:$0xff] }
  0x54   : > { %904 = vrot.lane.b32.xlu1 %v568_v8, %s13331_s15 }
  0x55   : > { %902 = vrot.lane.b32.xlu0 %v567_v9, %s13331_s15  ;;  %v617_v9 = vld [vmem:[#allocation2 + $0xa2] sm:$0xff] }
  0x58   : > { %908 = vrot.lane.b32.xlu1 %v570_v10, %s13331_s15 }
  0x59   : > { %906 = vrot.lane.b32.xlu0 %v569_v11, %s13331_s15  ;;  %v620_v11 = vld [vmem:[#allocation2 + $0xba] sm:$0xff] }
  0x5c   : > { %912 = vrot.lane.b32.xlu1 %v572_v12, %s13331_s15 }
  0x5d   : > { %910 = vrot.lane.b32.xlu0 %v571_v13, %s13331_s15  ;;  %v619_v13 = vld [vmem:[#allocation2 + $0xb2] sm:$0xff] }
  0x60   : > { %916 = vrot.lane.b32.xlu1 %v574_v14, %s13331_s15 }
  0x61   : > { %914 = vrot.lane.b32.xlu0 %v573_v15, %s13331_s15  ;;  %v622_v15 = vld [vmem:[#allocation2 + $0xca] sm:$0xff] }
  0x64   : > { %920 = vrot.lane.b32.xlu1 %v576_v16, %s13331_s15 }
  0x65   : > { %918 = vrot.lane.b32.xlu0 %v575_v17, %s13331_s15  ;;  %v621_v17 = vld [vmem:[#allocation2 + $0xc2] sm:$0xff] }
  0x68   : > { %924 = vrot.lane.b32.xlu1 %v578_v18, %s13331_s15 }
  0x69   : > { %922 = vrot.lane.b32.xlu0 %v577_v19, %s13331_s15  ;;  %v624_v19 = vld [vmem:[#allocation2 + $0xda] sm:$0xff] }
  0x6c   : > { %928 = vrot.lane.b32.xlu1 %v580_v20, %s13331_s15 }
  0x6d   : > { %926 = vrot.lane.b32.xlu0 %v579_v21, %s13331_s15  ;;  %v623_v21 = vld [vmem:[#allocation2 + $0xd2] sm:$0xff] }
  0x70   : > { %932 = vrot.lane.b32.xlu1 %v582_v22, %s13331_s15 }
  0x71   : > { %930 = vrot.lane.b32.xlu0 %v581_v23, %s13331_s15  ;;  %v626_v23 = vld [vmem:[#allocation2 + $0xea] sm:$0xff] }
  0x74   : > { %936 = vrot.lane.b32.xlu1 %v584_v24, %s13331_s15 }
  0x75   : > { %934 = vrot.lane.b32.xlu0 %v583_v25, %s13331_s15  ;;  %v625_v25 = vld [vmem:[#allocation2 + $0xe2] sm:$0xff] }
  0x78   : > { %940 = vrot.lane.b32.xlu1 %v586_v26, %s13331_s15 }
  0x79   : > { %938 = vrot.lane.b32.xlu0 %v585_v27, %s13331_s15  ;;  %v628_v27 = vld [vmem:[#allocation2 + $0xfa] sm:$0xff] }
  0x7c   : > { %944 = vrot.lane.b32.xlu1 %v588_v28, %s13331_s15 }
  0x7d   : > { %942 = vrot.lane.b32.xlu0 %v587_v29, %s13331_s15  ;;  %v627_v29 = vld [vmem:[#allocation2 + $0xf2] sm:$0xff] }
  0x80   : > { %948 = vrot.lane.b32.xlu1 %v590_v30, %s13331_s15 }
  0x81   : > { %946 = vrot.lane.b32.xlu0 %v589_v31, %s13331_s15  ;;  %v630_v31 = vld [vmem:[#allocation2 + $0x10a] sm:$0xff] }
  0x84   : > { %952 = vrot.lane.b32.xlu1 %v592_v32, %s13331_s15 }
  0x85   : > { %950 = vrot.lane.b32.xlu0 %v591_v33, %s13331_s15  ;;  %v629_v33 = vld [vmem:[#allocation2 + $0x102] sm:$0xff] }
  0x88   : > { %956 = vrot.lane.b32.xlu1 %v594_v34, %s13331_s15 }
  0x89   : > { %954 = vrot.lane.b32.xlu0 %v593_v35, %s13331_s15  ;;  %v632_v35 = vld [vmem:[#allocation2 + $0x11a] sm:$0xff] }
  0x8c   : > { %960 = vrot.lane.b32.xlu1 %v596_v36, %s13331_s15 }
  0x8d   : > { %958 = vrot.lane.b32.xlu0 %v595_v37, %s13331_s15  ;;  %v631_v37 = vld [vmem:[#allocation2 + $0x112] sm:$0xff] }
  0x90   : > { %1064 = vrot.lane.b32.xlu1 %v598_v38, %s13325_s16 }
  0x91   : > { %1062 = vrot.lane.b32.xlu0 %v597_v39, %s13325_s16  ;;  %v634_v39 = vld [vmem:[#allocation2 + $0x12a] sm:$0xff] }
  0x94   : > { %1068 = vrot.lane.b32.xlu1 %v600_v40, %s13325_s16 }
  0x95   : > { %1066 = vrot.lane.b32.xlu0 %v599_v41, %s13325_s16  ;;  %v633_v41 = vld [vmem:[#allocation2 + $0x122] sm:$0xff] }
  0x98   : > { %1072 = vrot.lane.b32.xlu1 %v9045_v42, %s13325_s16 }
  0x99   : > { %1070 = vrot.lane.b32.xlu0 %v601_v43, %s13325_s16 }
  0x9c   : > { %1076 = vrot.lane.b32.xlu1 %v604_v44, %s13325_s16  ;;  %v636_v44 = vld [vmem:[#allocation2 + $0x13a] sm:$0xff] }
  0x9d   : > { %1074 = vrot.lane.b32.xlu0 %v9050_v45, %s13325_s16 }
  0x9e   : > { %v9055_v47 = vpop.permute.xlu1 %866 }
  0x9f   : > { %v9059_v49 = vpop.permute.xlu0 %862 }
  0xa0   : > { %1080 = vrot.lane.b32.xlu1 %v606_v46, %s13325_s16 }
  0xa1   : > { %1078 = vrot.lane.b32.xlu0 %v9057_v48, %s13325_s16 }
  0xa2   : > { %v9064_v51 = vpop.permute.xlu1 %868 }
  0xa3   : > { %v9066_v53 = vpop.permute.xlu0 %864 }
  0xa4   : > { %1084 = vrot.lane.b32.xlu1 %v608_v50, %s13325_s16  ;;  %v635_v50 = vld [vmem:[#allocation2 + $0x132] sm:$0xff] }
  0xa5   : > { %1082 = vrot.lane.b32.xlu0 %v607_v52, %s13325_s16 }
  0xa6   : > { %v9070_v55 = vpop.permute.xlu1 %872 }
  0xa7   : > { %v9072_v57 = vpop.permute.xlu0 %870 }
  0xa8   : > { %1088 = vrot.lane.b32.xlu1 %v610_v54, %s13325_s16  ;;  %v638_v54 = vld [vmem:[#allocation2 + $0x14a] sm:$0xff] }
  0xa9   : > { %1086 = vrot.lane.b32.xlu0 %v609_v56, %s13325_s16 }
  0xaa   : > { %v9076_v59 = vpop.permute.xlu1 %876 }
  0xab   : > { %v9078_v61 = vpop.permute.xlu0 %874 }
  0xac   : > { %1092 = vrot.lane.b32.xlu1 %v612_v58, %s13325_s16  ;;  %v637_v58 = vld [vmem:[#allocation2 + $0x142] sm:$0xff] }
  0xad   : > { %1090 = vrot.lane.b32.xlu0 %v611_v60, %s13325_s16 }
  0xae   : > { %v9082_v63 = vpop.permute.xlu1 %880 }
  0xaf   : > { %v9084_v2 = vpop.permute.xlu0 %878 }
  0xb0   : > { %1096 = vrot.lane.b32.xlu1 %v614_v62, %s13325_s16  ;;  %v640_v62 = vld [vmem:[#allocation2 + $0x15a] sm:$0xff] }
  0xb1   : > { %1094 = vrot.lane.b32.xlu0 %v613_v1, %s13325_s16 }
  0xb2   : > { %v9088_v4 = vpop.permute.xlu1 %884 }
  0xb3   : > { %13340 = vst [vmem:[#allocation7_spill] sm:$0xff] %v9088_v4  ;;  %v9090_v6 = vpop.permute.xlu0 %882 }
  0xb4   : > { %1100 = vrot.lane.b32.xlu1 %v616_v3, %s13325_s16  ;;  %v639_v3 = vld [vmem:[#allocation2 + $0x152] sm:$0xff] }
  0xb5   : > { %1098 = vrot.lane.b32.xlu0 %v615_v5, %s13325_s16 }
  0xb6   : > { %v9094_v8 = vpop.permute.xlu1 %888 }
  0xb7   : > { %13341 = vst [vmem:[#allocation8_spill] sm:$0xff] %v9094_v8  ;;  %v9096_v10 = vpop.permute.xlu0 %886 }
  0xb8   : > { %13342 = vst [vmem:[#allocation9_spill] sm:$0xff] %v9096_v10  ;;  %1104 = vrot.lane.b32.xlu1 %v618_v7, %s13325_s16  ;;  %v642_v7 = vld [vmem:[#allocation2 + $0x16a] sm:$0xff]  ;;  %v756_v10 = vld [vmem:[#allocation2 + $0x5e] sm:$0xff] }
  0xb9   : > { %1102 = vrot.lane.b32.xlu0 %v617_v9, %s13325_s16 }
  0xba   : > { %v9100_v12 = vpop.permute.xlu1 %892 }
  0xbb   : > { %13343 = vst [vmem:[#allocation10_spill] sm:$0xff] %v9100_v12  ;;  %v9102_v14 = vpop.permute.xlu0 %890 }
  0xbc   : > { %13344 = vst [vmem:[#allocation11_spill] sm:$0xff] %v9102_v14  ;;  %1108 = vrot.lane.b32.xlu1 %v620_v11, %s13325_s16  ;;  %v641_v11 = vld [vmem:[#allocation2 + $0x162] sm:$0xff]  ;;  %v8538_v14 = vld [vmem:[#allocation2 + $0x51] sm:$0xff] }
  0xbd   : > { %1106 = vrot.lane.b32.xlu0 %v619_v13, %s13325_s16 }
  0xbe   : > { %v9106_v16 = vpop.permute.xlu1 %896 }
  0xbf   : > { %13345 = vst [vmem:[#allocation12_spill] sm:$0xff] %v9106_v16  ;;  %v9108_v18 = vpop.permute.xlu0 %894 }
  0xc0   : > { %13346 = vst [vmem:[#allocation13_spill] sm:$0xff] %v9108_v18  ;;  %1112 = vrot.lane.b32.xlu1 %v622_v15, %s13325_s16  ;;  %v644_v15 = vld [vmem:[#allocation2 + $0x17a] sm:$0xff] }
  0xc1   : > { %1110 = vrot.lane.b32.xlu0 %v621_v17, %s13325_s16 }
  0xc2   : > { %v9112_v20 = vpop.permute.xlu1 %900 }
  0xc3   : > { %13347 = vst [vmem:[#allocation14_spill] sm:$0xff] %v9112_v20  ;;  %v9114_v22 = vpop.permute.xlu0 %898  ;;  %v721_v20 = vld [vmem:[#allocation2 + $0xd5] sm:$0xff] }
  0xc4   : > { %13348 = vst [vmem:[#allocation15_spill] sm:$0xff] %v9114_v22  ;;  %1116 = vrot.lane.b32.xlu1 %v624_v19, %s13325_s16  ;;  %v643_v19 = vld [vmem:[#allocation2 + $0x172] sm:$0xff]  ;;  %v723_v22 = vld [vmem:[#allocation2 + $0xe5] sm:$0xff] }
  0xc5   : > { %1114 = vrot.lane.b32.xlu0 %v623_v21, %s13325_s16 }
  0xc6   : > { %v9118_v24 = vpop.permute.xlu1 %904 }
  0xc7   : > { %13349 = vst [vmem:[#allocation16_spill] sm:$0xff] %v9118_v24  ;;  %v9120_v26 = vpop.permute.xlu0 %902  ;;  %v717_v24 = vld [vmem:[#allocation2 + $0xb5] sm:$0xff] }
  0xc8   : > { %13350 = vst [vmem:[#allocation17_spill] sm:$0xff] %v9120_v26  ;;  %1120 = vrot.lane.b32.xlu1 %v626_v23, %s13325_s16  ;;  %v646_v23 = vld [vmem:[#allocation2 + $0x18a] sm:$0xff] }
  0xc9   : > { %1118 = vrot.lane.b32.xlu0 %v625_v25, %s13325_s16  ;;  %v719_v26 = vld [vmem:[#allocation2 + $0xc5] sm:$0xff] }
  0xca   : > { %v9124_v28 = vpop.permute.xlu1 %908 }
  0xcb   : > { %13351 = vst [vmem:[#allocation18_spill] sm:$0xff] %v9124_v28  ;;  %v9126_v30 = vpop.permute.xlu0 %906  ;;  %v713_v28 = vld [vmem:[#allocation2 + $0x95] sm:$0xff] }
  0xcc   : > { %13352 = vst [vmem:[#allocation19_spill] sm:$0xff] %v9126_v30  ;;  %1124 = vrot.lane.b32.xlu1 %v628_v27, %s13325_s16  ;;  %v645_v27 = vld [vmem:[#allocation2 + $0x182] sm:$0xff] }
  0xcd   : > { %1122 = vrot.lane.b32.xlu0 %v627_v29, %s13325_s16  ;;  %v715_v30 = vld [vmem:[#allocation2 + $0xa5] sm:$0xff] }
  0xce   : > { %v9130_v32 = vpop.permute.xlu1 %912 }
  0xcf   : > { %13353 = vst [vmem:[#allocation20_spill] sm:$0xff] %v9130_v32  ;;  %v9132_v34 = vpop.permute.xlu0 %910 }
  0xd0   : > { %13354 = vst [vmem:[#allocation21_spill] sm:$0xff] %v9132_v34  ;;  %1128 = vrot.lane.b32.xlu1 %v630_v31, %s13325_s16  ;;  %v648_v31 = vld [vmem:[#allocation2 + $0x1c] sm:$0xff]  ;;  %v711_v34 = vld [vmem:[#allocation2 + $0x85] sm:$0xff] }
  0xd1   : > { %1126 = vrot.lane.b32.xlu0 %v629_v33, %s13325_s16 }
  0xd2   : > { %v9136_v36 = vpop.permute.xlu1 %916 }
  0xd3   : > { %13355 = vst [vmem:[#allocation22_spill] sm:$0xff] %v9136_v36  ;;  %v9138_v38 = vpop.permute.xlu0 %914 }
  0xd4   : > { %13356 = vst [vmem:[#allocation23_spill] sm:$0xff] %v9138_v38  ;;  %1132 = vrot.lane.b32.xlu1 %v632_v35, %s13325_s16  ;;  %v647_v35 = vld [vmem:[#allocation2 + $0x14] sm:$0xff] }
  0xd5   : > { %1130 = vrot.lane.b32.xlu0 %v631_v37, %s13325_s16  ;;  %v683_v38 = vld [vmem:[#allocation2 + $0x134] sm:$0xff] }
  0xd6   : > { %v9142_v40 = vpop.permute.xlu1 %920 }
  0xd7   : > { %13357 = vst [vmem:[#allocation24_spill] sm:$0xff] %v9142_v40  ;;  %v9144_v43 = vpop.permute.xlu0 %918 }
  0xd8   : > { %13358 = vst [vmem:[#allocation25_spill] sm:$0xff] %v9144_v43  ;;  %1136 = vrot.lane.b32.xlu1 %v634_v39, %s13325_s16  ;;  %v650_v39 = vld [vmem:[#allocation2 + $0x2c] sm:$0xff]  ;;  %v681_v43 = vld [vmem:[#allocation2 + $0x124] sm:$0xff] }
  0xd9   : > { %1134 = vrot.lane.b32.xlu0 %v633_v41, %s13325_s16 }
  0xda   : > { %v9148_v46 = vpop.permute.xlu1 %924 }
  0xdb   : > { %13359 = vst [vmem:[#allocation26_spill] sm:$0xff] %v9148_v46  ;;  %v9150_v52 = vpop.permute.xlu0 %922 }
  0xdc   : > { %13360 = vst [vmem:[#allocation27_spill] sm:$0xff] %v9150_v52  ;;  %1140 = vrot.lane.b32.xlu1 %v636_v44, %s13325_s16  ;;  %v649_v44 = vld [vmem:[#allocation2 + $0x24] sm:$0xff]  ;;  %v679_v52 = vld [vmem:[#allocation2 + $0x114] sm:$0xff] }
  0xdd   : > { %1138 = vrot.lane.b32.xlu0 %v635_v50, %s13325_s16 }
  0xde   : > { %v9154_v56 = vpop.permute.xlu1 %928 }
  0xdf   : > { %13361 = vst [vmem:[#allocation28_spill] sm:$0xff] %v9154_v56  ;;  %v9156_v60 = vpop.permute.xlu0 %926 }
  0xe0   : > { %13362 = vst [vmem:[#allocation29_spill] sm:$0xff] %v9156_v60  ;;  %1144 = vrot.lane.b32.xlu1 %v638_v54, %s13325_s16  ;;  %v652_v54 = vld [vmem:[#allocation2 + $0x3c] sm:$0xff]  ;;  %v677_v60 = vld [vmem:[#allocation2 + $0x104] sm:$0xff] }
  0xe1   : > { %1142 = vrot.lane.b32.xlu0 %v637_v58, %s13325_s16 }
  0xe2   : > { %v9160_v1 = vpop.permute.xlu1 %932 }
  0xe3   : > { %13363 = vst [vmem:[#allocation30_spill] sm:$0xff] %v9160_v1  ;;  %v9162_v5 = vpop.permute.xlu0 %930 }
  0xe4   : > { %13364 = vst [vmem:[#allocation31_spill] sm:$0xff] %v9162_v5  ;;  %1148 = vrot.lane.b32.xlu1 %v640_v62, %s13325_s16  ;;  %v651_v62 = vld [vmem:[#allocation2 + $0x34] sm:$0xff] }
  0xe5   : > { %1146 = vrot.lane.b32.xlu0 %v639_v3, %s13325_s16  ;;  %v675_v5 = vld [vmem:[#allocation2 + $0xf4] sm:$0xff] }
  0xe6   : > { %v9166_v9 = vpop.permute.xlu1 %936 }
  0xe7   : > { %13365 = vst [vmem:[#allocation32_spill] sm:$0xff] %v9166_v9  ;;  %v9168_v13 = vpop.permute.xlu0 %934 }
  0xe8   : > { %13366 = vst [vmem:[#allocation33_spill] sm:$0xff] %v9168_v13  ;;  %1152 = vrot.lane.b32.xlu1 %v642_v7, %s13325_s16  ;;  %v654_v7 = vld [vmem:[#allocation2 + $0x4c] sm:$0xff]  ;;  %v673_v13 = vld [vmem:[#allocation2 + $0xe4] sm:$0xff] }
  0xe9   : > { %1150 = vrot.lane.b32.xlu0 %v641_v11, %s13325_s16 }
  0xea   : > { %v9172_v17 = vpop.permute.xlu1 %940 }
  0xeb   : > { %13367 = vst [vmem:[#allocation34_spill] sm:$0xff] %v9172_v17  ;;  %v9174_v21 = vpop.permute.xlu0 %938 }
  0xec   : > { %13368 = vst [vmem:[#allocation35_spill] sm:$0xff] %v9174_v21  ;;  %1156 = vrot.lane.b32.xlu1 %v644_v15, %s13325_s16  ;;  %v653_v15 = vld [vmem:[#allocation2 + $0x44] sm:$0xff]  ;;  %v671_v21 = vld [vmem:[#allocation2 + $0xd4] sm:$0xff] }
  0xed   : > { %1154 = vrot.lane.b32.xlu0 %v643_v19, %s13325_s16 }
  0xee   : > { %v9178_v25 = vpop.permute.xlu1 %944 }
  0xef   : > { %13369 = vst [vmem:[#allocation36_spill] sm:$0xff] %v9178_v25  ;;  %v9180_v29 = vpop.permute.xlu0 %942 }
  0xf0   : > { %13370 = vst [vmem:[#allocation37_spill] sm:$0xff] %v9180_v29  ;;  %1160 = vrot.lane.b32.xlu1 %v646_v23, %s13325_s16  ;;  %v656_v23 = vld [vmem:[#allocation2 + $0x5c] sm:$0xff]  ;;  %v669_v29 = vld [vmem:[#allocation2 + $0xc4] sm:$0xff] }
  0xf1   : > { %1158 = vrot.lane.b32.xlu0 %v645_v27, %s13325_s16 }
  0xf2   : > { %v9184_v33 = vpop.permute.xlu1 %948 }
  0xf3   : > { %13371 = vst [vmem:[#allocation38_spill] sm:$0xff] %v9184_v33  ;;  %v9186_v37 = vpop.permute.xlu0 %946 }
  0xf4   : > { %13372 = vst [vmem:[#allocation39_spill] sm:$0xff] %v9186_v37  ;;  %1264 = vrot.lane.b32.xlu1 %v648_v31, %s13323_s22  ;;  %v655_v31 = vld [vmem:[#allocation2 + $0x54] sm:$0xff] }
  0xf5   : > { %1262 = vrot.lane.b32.xlu0 %v647_v35, %s13323_s22  ;;  %v667_v37 = vld [vmem:[#allocation2 + $0xb4] sm:$0xff] }
  0xf6   : > { %v9190_v41 = vpop.permute.xlu1 %952 }
  0xf7   : > { %13373 = vst [vmem:[#allocation40_spill] sm:$0xff] %v9190_v41  ;;  %v9192_v50 = vpop.permute.xlu0 %950  ;;  %v665_v41 = vld [vmem:[#allocation2 + $0xa4] sm:$0xff] }
  0xf8   : > { %13374 = vst [vmem:[#allocation41_spill] sm:$0xff] %v9192_v50  ;;  %1268 = vrot.lane.b32.xlu1 %v650_v39, %s13323_s22  ;;  %v658_v39 = vld [vmem:[#allocation2 + $0x6c] sm:$0xff] }
  0xf9   : > { %1266 = vrot.lane.b32.xlu0 %v649_v44, %s13323_s22 }
  0xfa   : > { %v9196_v58 = vpop.permute.xlu1 %956 }
  0xfb   : > { %13375 = vst [vmem:[#allocation42_spill] sm:$0xff] %v9196_v58  ;;  %v9198_v3 = vpop.permute.xlu0 %954 }
  0xfc   : > { %13376 = vst [vmem:[#allocation43_spill] sm:$0xff] %v9198_v3  ;;  %1272 = vrot.lane.b32.xlu1 %v652_v54, %s13323_s22  ;;  %v657_v54 = vld [vmem:[#allocation2 + $0x64] sm:$0xff]  ;;  %v663_v3 = vld [vmem:[#allocation2 + $0x94] sm:$0xff] }
  0xfd   : > { %1270 = vrot.lane.b32.xlu0 %v651_v62, %s13323_s22 }
  0xfe   : > { %v9202_v11 = vpop.permute.xlu1 %960 }
  0xff   : > { %13377 = vst [vmem:[#allocation44_spill] sm:$0xff] %v9202_v11  ;;  %v9204_v19 = vpop.permute.xlu0 %958 }
 0x100   : > { %13378 = vst [vmem:[#allocation45_spill] sm:$0xff] %v9204_v19  ;;  %1276 = vrot.lane.b32.xlu1 %v654_v7, %s13323_s22  ;;  %v660_v7 = vld [vmem:[#allocation2 + $0x7c] sm:$0xff]  ;;  %v661_v19 = vld [vmem:[#allocation2 + $0x84] sm:$0xff] }
 0x101   : > { %1274 = vrot.lane.b32.xlu0 %v653_v15, %s13323_s22 }
 0x102   : > { %v9208_v27 = vpop.permute.xlu1 %1064 }
 0x103   : > { %v9210_v35 = vpop.permute.xlu0 %1062 }
 0x104   : > { %1280 = vrot.lane.b32.xlu1 %v656_v23, %s13323_s22  ;;  %v662_v23 = vld [vmem:[#allocation2 + $0x8c] sm:$0xff] }
 0x105   : > { %1278 = vrot.lane.b32.xlu0 %v655_v31, %s13323_s22 }
 0x106   : > { %v9214_v44 = vpop.permute.xlu1 %1068 }
 0x107   : > { %v9216_v62 = vpop.permute.xlu0 %1066 }
 0x108   : > { %1284 = vrot.lane.b32.xlu1 %v658_v39, %s13323_s22  ;;  %v664_v39 = vld [vmem:[#allocation2 + $0x9c] sm:$0xff] }
 0x109   : > { %1282 = vrot.lane.b32.xlu0 %v657_v54, %s13323_s22 }
 0x10a   : > { %v9220_v15 = vpop.permute.xlu1 %1072 }
 0x10b   : > { %v9222_v11 = vpop.permute.xlu0 %1070 }
 0x10c   : > { %1288 = vrot.lane.b32.xlu1 %v660_v7, %s13323_s22 }
 0x10d   : > { %1286 = vrot.lane.b32.xlu0 %v659_v0, %s13323_s22  ;;  %v666_v0 = vld [vmem:[#allocation2 + $0xac] sm:$0xff] }
 0x10e   : > { %v9226_v31 = vpop.permute.xlu1 %1076 }
 0x10f   : > { %v9228_v58 = vpop.permute.xlu0 %1074 }
 0x110   : > { %1292 = vrot.lane.b32.xlu1 %v662_v23, %s13323_s22 }
 0x111   : > { %1290 = vrot.lane.b32.xlu0 %v661_v19, %s13323_s22  ;;  %v668_v19 = vld [vmem:[#allocation2 + $0xbc] sm:$0xff] }
 0x112   : > { %v9232_v54 = vpop.permute.xlu1 %1080 }
 0x113   : > { %v9234_v50 = vpop.permute.xlu0 %1078 }
 0x114   : > { %1296 = vrot.lane.b32.xlu1 %v664_v39, %s13323_s22 }
 0x115   : > { %1294 = vrot.lane.b32.xlu0 %v663_v3, %s13323_s22  ;;  %v670_v3 = vld [vmem:[#allocation2 + $0xcc] sm:$0xff] }
 0x116   : > { %v9238_v7 = vpop.permute.xlu1 %1084 }
 0x117   : > { %13379 = vst [vmem:[#allocation46_spill] sm:$0xff] %v9238_v7  ;;  %v9240_v33 = vpop.permute.xlu0 %1082  ;;  %v8560_v7 = vld [vmem:[#allocation2 + $0x9a] sm:$0xff] }
 0x118   : > { %13380 = vst [vmem:[#allocation47_spill] sm:$0xff] %v9240_v33  ;;  %1300 = vrot.lane.b32.xlu1 %v666_v0, %s13323_s22 }
 0x119   : > { %1298 = vrot.lane.b32.xlu0 %v665_v41, %s13323_s22  ;;  %v672_v41 = vld [vmem:[#allocation2 + $0xdc] sm:$0xff] }
 0x11a   : > { %v9244_v23 = vpop.permute.xlu1 %1088 }
 0x11b   : > { %13381 = vst [vmem:[#allocation48_spill] sm:$0xff] %v9244_v23  ;;  %v9246_v25 = vpop.permute.xlu0 %1086 }
 0x11c   : > { %13382 = vst [vmem:[#allocation49_spill] sm:$0xff] %v9246_v25  ;;  %1304 = vrot.lane.b32.xlu1 %v668_v19, %s13323_s22  ;;  %v754_v25 = vld [vmem:[#allocation2 + $0x4e] sm:$0xff] }
 0x11d   : > { %1302 = vrot.lane.b32.xlu0 %v667_v37, %s13323_s22  ;;  %v674_v37 = vld [vmem:[#allocation2 + $0xec] sm:$0xff] }
 0x11e   : > { %v9250_v39 = vpop.permute.xlu1 %1092 }
 0x11f   : > { %13383 = vst [vmem:[#allocation50_spill] sm:$0xff] %v9250_v39  ;;  %v9252_v17 = vpop.permute.xlu0 %1090  ;;  %v8537_v39 = vld [vmem:[#allocation2 + $0x3a] sm:$0xff] }
 0x120   : > { %13384 = vst [vmem:[#allocation51_spill] sm:$0xff] %v9252_v17  ;;  %1308 = vrot.lane.b32.xlu1 %v670_v3, %s13323_s22 }
 0x121   : > { %1306 = vrot.lane.b32.xlu0 %v669_v29, %s13323_s22  ;;  %v676_v29 = vld [vmem:[#allocation2 + $0xfc] sm:$0xff] }
 0x122   : > { %v9256_v0 = vpop.permute.xlu1 %1096 }
 0x123   : > { %13385 = vst [vmem:[#allocation52_spill] sm:$0xff] %v9256_v0  ;;  %v9258_v9 = vpop.permute.xlu0 %1094 }
 0x124   : > { %13386 = vst [vmem:[#allocation53_spill] sm:$0xff] %v9258_v9  ;;  %1312 = vrot.lane.b32.xlu1 %v672_v41, %s13323_s22  ;;  %v8535_v9 = vld [vmem:[#allocation2 + $0x41] sm:$0xff] }
 0x125   : > { %1310 = vrot.lane.b32.xlu0 %v671_v21, %s13323_s22  ;;  %v678_v21 = vld [vmem:[#allocation2 + $0x10c] sm:$0xff] }
 0x126   : > { %v9262_v19 = vpop.permute.xlu1 %1100 }
 0x127   : > { %13387 = vst [vmem:[#allocation54_spill] sm:$0xff] %v9262_v19  ;;  %v9264_v1 = vpop.permute.xlu0 %1098 }
 0x128   : > { %13388 = vst [vmem:[#allocation55_spill] sm:$0xff] %v9264_v1  ;;  %1316 = vrot.lane.b32.xlu1 %v674_v37, %s13323_s22 }
 0x129   : > { %1314 = vrot.lane.b32.xlu0 %v673_v13, %s13323_s22  ;;  %v680_v13 = vld [vmem:[#allocation2 + $0x11c] sm:$0xff] }
 0x12a   : > { %v9268_v3 = vpop.permute.xlu1 %1104 }
 0x12b   : > { %13389 = vst [vmem:[#allocation56_spill] sm:$0xff] %v9268_v3  ;;  %v9270_v56 = vpop.permute.xlu0 %1102 }
 0x12c   : > { %13390 = vst [vmem:[#allocation57_spill] sm:$0xff] %v9270_v56  ;;  %1320 = vrot.lane.b32.xlu1 %v676_v29, %s13323_s22 }
 0x12d   : > { %1318 = vrot.lane.b32.xlu0 %v675_v5, %s13323_s22  ;;  %v682_v5 = vld [vmem:[#allocation2 + $0x12c] sm:$0xff] }
 0x12e   : > { %v9274_v41 = vpop.permute.xlu1 %1108 }
 0x12f   : > { %13391 = vst [vmem:[#allocation58_spill] sm:$0xff] %v9274_v41  ;;  %v9276_v46 = vpop.permute.xlu0 %1106 }
 0x130   : > { %13392 = vst [vmem:[#allocation59_spill] sm:$0xff] %v9276_v46  ;;  %1324 = vrot.lane.b32.xlu1 %v678_v21, %s13323_s22 }
 0x131   : > { %1322 = vrot.lane.b32.xlu0 %v677_v60, %s13323_s22  ;;  %v684_v60 = vld [vmem:[#allocation2 + $0x13c] sm:$0xff] }
 0x132   : > { %v9280_v37 = vpop.permute.xlu1 %1112 }
 0x133   : > { %13393 = vst [vmem:[#allocation60_spill] sm:$0xff] %v9280_v37  ;;  %v9282_v40 = vpop.permute.xlu0 %1110 }
 0x134   : > { %13394 = vst [vmem:[#allocation61_spill] sm:$0xff] %v9282_v40  ;;  %1328 = vrot.lane.b32.xlu1 %v680_v13, %s13323_s22 }
 0x135   : > { %1326 = vrot.lane.b32.xlu0 %v679_v52, %s13323_s22  ;;  %v686_v52 = vld [vmem:[#allocation2 + $0x14c] sm:$0xff] }
 0x136   : > { %v9286_v29 = vpop.permute.xlu1 %1116 }
 0x137   : > { %13395 = vst [vmem:[#allocation62_spill] sm:$0xff] %v9286_v29  ;;  %v9288_v36 = vpop.permute.xlu0 %1114  ;;  %v685_v29 = vld [vmem:[#allocation2 + $0x144] sm:$0xff] }
 0x138   : > { %13396 = vst [vmem:[#allocation63_spill] sm:$0xff] %v9288_v36  ;;  %1332 = vrot.lane.b32.xlu1 %v682_v5, %s13323_s22 }
 0x139   : > { %1330 = vrot.lane.b32.xlu0 %v681_v43, %s13323_s22  ;;  %v688_v43 = vld [vmem:[#allocation2 + $0x15c] sm:$0xff] }
 0x13a   : > { %v9292_v21 = vpop.permute.xlu1 %1120 }
 0x13b   : > { %13397 = vst [vmem:[#allocation64_spill] sm:$0xff] %v9292_v21  ;;  %v9294_v37 = vpop.permute.xlu0 %1118  ;;  %v687_v21 = vld [vmem:[#allocation2 + $0x154] sm:$0xff] }
 0x13c   : > { %13398 = vst [vmem:[#allocation65_spill] sm:$0xff] %v9294_v37  ;;  %1336 = vrot.lane.b32.xlu1 %v684_v60, %s13323_s22 }
 0x13d   : > { %1334 = vrot.lane.b32.xlu0 %v683_v38, %s13323_s22  ;;  %v690_v38 = vld [vmem:[#allocation2 + $0x16c] sm:$0xff] }
 0x13e   : > { %v9298_v13 = vpop.permute.xlu1 %1124 }
 0x13f   : > { %13399 = vst [vmem:[#allocation66_spill] sm:$0xff] %v9298_v13  ;;  %v9300_v32 = vpop.permute.xlu0 %1122  ;;  %v689_v13 = vld [vmem:[#allocation2 + $0x164] sm:$0xff] }
 0x140   : > { %13400 = vst [vmem:[#allocation67_spill] sm:$0xff] %v9300_v32  ;;  %1340 = vrot.lane.b32.xlu1 %v686_v52, %s13323_s22 }
 0x141   : > { %1338 = vrot.lane.b32.xlu0 %v685_v29, %s13323_s22  ;;  %v692_v29 = vld [vmem:[#allocation2 + $0x17c] sm:$0xff] }
 0x142   : > { %v9304_v5 = vpop.permute.xlu1 %1128 }
 0x143   : > { %13401 = vst [vmem:[#allocation68_spill] sm:$0xff] %v9304_v5  ;;  %v9306_v36 = vpop.permute.xlu0 %1126  ;;  %v691_v5 = vld [vmem:[#allocation2 + $0x174] sm:$0xff] }
 0x144   : > { %13402 = vst [vmem:[#allocation69_spill] sm:$0xff] %v9306_v36  ;;  %1344 = vrot.lane.b32.xlu1 %v688_v43, %s13323_s22 }
 0x145   : > { %1342 = vrot.lane.b32.xlu0 %v687_v21, %s13323_s22  ;;  %v694_v21 = vld [vmem:[#allocation2 + $0x18c] sm:$0xff] }
 0x146   : > { %v9310_v60 = vpop.permute.xlu1 %1132 }
 0x147   : > { %13403 = vst [vmem:[#allocation70_spill] sm:$0xff] %v9310_v60  ;;  %v9312_v37 = vpop.permute.xlu0 %1130  ;;  %v693_v60 = vld [vmem:[#allocation2 + $0x184] sm:$0xff] }
 0x148   : > { %13404 = vst [vmem:[#allocation71_spill] sm:$0xff] %v9312_v37  ;;  %1348 = vrot.lane.b32.xlu1 %v690_v38, %s13323_s22 }
 0x149   : > { %1346 = vrot.lane.b32.xlu0 %v689_v13, %s13323_s22  ;;  %v696_v13 = vld [vmem:[#allocation2 + $0x19c] sm:$0xff] }
 0x14a   : > { %v9316_v52 = vpop.permute.xlu1 %1136 }
 0x14b   : > { %13405 = vst [vmem:[#allocation72_spill] sm:$0xff] %v9316_v52  ;;  %v9318_v32 = vpop.permute.xlu0 %1134  ;;  %v6428_v52 = vld [vmem:[#allocation2 + $0x194] sm:$0xff] }
 0x14c   : > { %13406 = vst [vmem:[#allocation73_spill] sm:$0xff] %v9318_v32  ;;  %1352 = vrot.lane.b32.xlu1 %v692_v29, %s13323_s22 }
 0x14d   : > { %1350 = vrot.lane.b32.xlu0 %v691_v5, %s13323_s22  ;;  %v698_v5 = vld [vmem:[#allocation2 + $0x1d] sm:$0xff] }
 0x14e   : > { %v9322_v43 = vpop.permute.xlu1 %1140 }
 0x14f   : > { %13407 = vst [vmem:[#allocation74_spill] sm:$0xff] %v9322_v43  ;;  %v9324_v36 = vpop.permute.xlu0 %1138  ;;  %v697_v43 = vld [vmem:[#allocation2 + $0x15] sm:$0xff] }
 0x150   : > { %13408 = vst [vmem:[#allocation75_spill] sm:$0xff] %v9324_v36  ;;  %1356 = vrot.lane.b32.xlu1 %v694_v21, %s13323_s22 }
 0x151   : > { %1354 = vrot.lane.b32.xlu0 %v693_v60, %s13323_s22  ;;  %v700_v60 = vld [vmem:[#allocation2 + $0x2d] sm:$0xff] }
 0x152   : > { %v9328_v38 = vpop.permute.xlu1 %1144 }
 0x153   : > { %13409 = vst [vmem:[#allocation76_spill] sm:$0xff] %v9328_v38  ;;  %v9330_v37 = vpop.permute.xlu0 %1142  ;;  %v699_v38 = vld [vmem:[#allocation2 + $0x25] sm:$0xff] }
 0x154   : > { %13410 = vst [vmem:[#allocation77_spill] sm:$0xff] %v9330_v37  ;;  %1360 = vrot.lane.b32.xlu1 %v696_v13, %s13323_s22 }
 0x155   : > { %1358 = vrot.lane.b32.xlu0 %v6428_v52, %s13323_s22  ;;  %v702_v52 = vld [vmem:[#allocation2 + $0x3d] sm:$0xff] }
 0x156   : > { %v9334_v29 = vpop.permute.xlu1 %1148 }
 0x157   : > { %13411 = vst [vmem:[#allocation78_spill] sm:$0xff] %v9334_v29  ;;  %v9336_v32 = vpop.permute.xlu0 %1146  ;;  %v701_v29 = vld [vmem:[#allocation2 + $0x35] sm:$0xff] }
 0x158   : > { %13412 = vst [vmem:[#allocation79_spill] sm:$0xff] %v9336_v32  ;;  %1464 = vrot.lane.b32.xlu1 %v698_v5, %s13329_s24 }
 0x159   : > { %1462 = vrot.lane.b32.xlu0 %v697_v43, %s13329_s24  ;;  %v704_v43 = vld [vmem:[#allocation2 + $0x4d] sm:$0xff] }
 0x15a   : > { %v9340_v21 = vpop.permute.xlu1 %1152 }
 0x15b   : > { %13413 = vst [vmem:[#allocation80_spill] sm:$0xff] %v9340_v21  ;;  %v9342_v37 = vpop.permute.xlu0 %1150  ;;  %v703_v21 = vld [vmem:[#allocation2 + $0x45] sm:$0xff] }
 0x15c   : > { %13414 = vst [vmem:[#allocation81_spill] sm:$0xff] %v9342_v37  ;;  %1468 = vrot.lane.b32.xlu1 %v700_v60, %s13329_s24 }
 0x15d   : > { %1466 = vrot.lane.b32.xlu0 %v699_v38, %s13329_s24  ;;  %v706_v38 = vld [vmem:[#allocation2 + $0x5d] sm:$0xff] }
 0x15e   : > { %v9346_v13 = vpop.permute.xlu1 %1156 }
 0x15f   : > { %13415 = vst [vmem:[#allocation82_spill] sm:$0xff] %v9346_v13  ;;  %v9348_v32 = vpop.permute.xlu0 %1154  ;;  %v705_v13 = vld [vmem:[#allocation2 + $0x55] sm:$0xff] }
 0x160   : > { %13416 = vst [vmem:[#allocation83_spill] sm:$0xff] %v9348_v32  ;;  %1472 = vrot.lane.b32.xlu1 %v702_v52, %s13329_s24 }
 0x161   : > { %1470 = vrot.lane.b32.xlu0 %v701_v29, %s13329_s24  ;;  %v708_v29 = vld [vmem:[#allocation2 + $0x6d] sm:$0xff] }
 0x162   : > { %v9352_v5 = vpop.permute.xlu1 %1160 }
 0x163   : > { %13417 = vst [vmem:[#allocation84_spill] sm:$0xff] %v9352_v5  ;;  %v9354_v36 = vpop.permute.xlu0 %1158  ;;  %v707_v5 = vld [vmem:[#allocation2 + $0x65] sm:$0xff] }
 0x164   : > { %13418 = vst [vmem:[#allocation85_spill] sm:$0xff] %v9354_v36  ;;  %1476 = vrot.lane.b32.xlu1 %v704_v43, %s13329_s24  ;;  %v709_v36 = vld [vmem:[#allocation2 + $0x75] sm:$0xff] }
 0x165   : > { %1474 = vrot.lane.b32.xlu0 %v703_v21, %s13329_s24  ;;  %v710_v21 = vld [vmem:[#allocation2 + $0x7d] sm:$0xff] }
 0x166   : > { %v9358_v60 = vpop.permute.xlu1 %1264 }
 0x167   : > { %v9360_v37 = vpop.permute.xlu0 %1262 }
 0x168   : > { %1480 = vrot.lane.b32.xlu1 %v706_v38, %s13329_s24 }
 0x169   : > { %1478 = vrot.lane.b32.xlu0 %v705_v13, %s13329_s24  ;;  %v712_v13 = vld [vmem:[#allocation2 + $0x8d] sm:$0xff] }
 0x16a   : > { %v9364_v52 = vpop.permute.xlu1 %1268 }
 0x16b   : > { %v9366_v32 = vpop.permute.xlu0 %1266 }
 0x16c   : > { %1484 = vrot.lane.b32.xlu1 %v708_v29, %s13329_s24 }
 0x16d   : > { %1482 = vrot.lane.b32.xlu0 %v707_v5, %s13329_s24  ;;  %v714_v5 = vld [vmem:[#allocation2 + $0x9d] sm:$0xff] }
 0x16e   : > { %v9370_v43 = vpop.permute.xlu1 %1272 }
 0x16f   : > { %v9372_v40 = vpop.permute.xlu0 %1270 }
 0x170   : > { %1488 = vrot.lane.b32.xlu1 %v710_v21, %s13329_s24 }
 0x171   : > { %1486 = vrot.lane.b32.xlu0 %v709_v36, %s13329_s24  ;;  %v716_v36 = vld [vmem:[#allocation2 + $0xad] sm:$0xff] }
 0x172   : > { %v9376_v38 = vpop.permute.xlu1 %1276 }
 0x173   : > { %v9378_v41 = vpop.permute.xlu0 %1274 }
 0x174   : > { %1492 = vrot.lane.b32.xlu1 %v712_v13, %s13329_s24 }
 0x175   : > { %1490 = vrot.lane.b32.xlu0 %v711_v34, %s13329_s24  ;;  %v718_v34 = vld [vmem:[#allocation2 + $0xbd] sm:$0xff] }
 0x176   : > { %v9382_v29 = vpop.permute.xlu1 %1280 }
 0x177   : > { %v9384_v46 = vpop.permute.xlu0 %1278 }
 0x178   : > { %1496 = vrot.lane.b32.xlu1 %v714_v5, %s13329_s24 }
 0x179   : > { %1494 = vrot.lane.b32.xlu0 %v713_v28, %s13329_s24  ;;  %v720_v28 = vld [vmem:[#allocation2 + $0xcd] sm:$0xff] }
 0x17a   : > { %v9388_v21 = vpop.permute.xlu1 %1284 }
 0x17b   : > { %13419 = vst [vmem:[#allocation86_spill] sm:$0xff] %v9388_v21  ;;  %v9390_v3 = vpop.permute.xlu0 %1282 }
 0x17c   : > { %13420 = vst [vmem:[#allocation87_spill] sm:$0xff] %v9390_v3  ;;  %1500 = vrot.lane.b32.xlu1 %v716_v36, %s13329_s24 }
 0x17d   : > { %1498 = vrot.lane.b32.xlu0 %v715_v30, %s13329_s24  ;;  %v722_v30 = vld [vmem:[#allocation2 + $0xdd] sm:$0xff] }
 0x17e   : > { %v9394_v13 = vpop.permute.xlu1 %1288 }
 0x17f   : > { %13421 = vst [vmem:[#allocation88_spill] sm:$0xff] %v9394_v13  ;;  %v9396_v56 = vpop.permute.xlu0 %1286  ;;  %v753_v13 = vld [vmem:[#allocation2 + $0x46] sm:$0xff] }
 0x180   : > { %13422 = vst [vmem:[#allocation89_spill] sm:$0xff] %v9396_v56  ;;  %1504 = vrot.lane.b32.xlu1 %v718_v34, %s13329_s24  ;;  %v8540_v56 = vld [vmem:[#allocation2 + $0x4a] sm:$0xff] }
 0x181   : > { %1502 = vrot.lane.b32.xlu0 %v717_v24, %s13329_s24  ;;  %v724_v24 = vld [vmem:[#allocation2 + $0xed] sm:$0xff] }
 0x182   : > { %v9400_v5 = vpop.permute.xlu1 %1292 }
 0x183   : > { %13423 = vst [vmem:[#allocation90_spill] sm:$0xff] %v9400_v5  ;;  %v9402_v19 = vpop.permute.xlu0 %1290 }
 0x184   : > { %13424 = vst [vmem:[#allocation91_spill] sm:$0xff] %v9402_v19  ;;  %1508 = vrot.lane.b32.xlu1 %v720_v28, %s13329_s24  ;;  %v9593_v19 = vld [vmem:[#allocation2 + $0x50] sm:$0xff] }
 0x185   : > { %1506 = vrot.lane.b32.xlu0 %v719_v26, %s13329_s24  ;;  %v726_v26 = vld [vmem:[#allocation2 + $0xfd] sm:$0xff] }
 0x186   : > { %v9406_v36 = vpop.permute.xlu1 %1296 }
 0x187   : > { %13425 = vst [vmem:[#allocation92_spill] sm:$0xff] %v9406_v36  ;;  %v9408_v1 = vpop.permute.xlu0 %1294  ;;  %v725_v36 = vld [vmem:[#allocation2 + $0xf5] sm:$0xff] }
 0x188   : > { %13426 = vst [vmem:[#allocation93_spill] sm:$0xff] %v9408_v1  ;;  %1512 = vrot.lane.b32.xlu1 %v722_v30, %s13329_s24 }
 0x189   : > { %1510 = vrot.lane.b32.xlu0 %v721_v20, %s13329_s24  ;;  %v728_v20 = vld [vmem:[#allocation2 + $0x10d] sm:$0xff] }
 0x18a   : > { %v9412_v34 = vpop.permute.xlu1 %1300 }
 0x18b   : > { %13427 = vst [vmem:[#allocation94_spill] sm:$0xff] %v9412_v34  ;;  %v9414_v0 = vpop.permute.xlu0 %1298  ;;  %v727_v34 = vld [vmem:[#allocation2 + $0x105] sm:$0xff] }
 0x18c   : > { %13428 = vst [vmem:[#allocation95_spill] sm:$0xff] %v9414_v0  ;;  %1516 = vrot.lane.b32.xlu1 %v724_v24, %s13329_s24 }
 0x18d   : > { %1514 = vrot.lane.b32.xlu0 %v723_v22, %s13329_s24  ;;  %v730_v22 = vld [vmem:[#allocation2 + $0x11d] sm:$0xff] }
 0x18e   : > { %v9418_v28 = vpop.permute.xlu1 %1304 }
 0x18f   : > { %13429 = vst [vmem:[#allocation96_spill] sm:$0xff] %v9418_v28  ;;  %v9420_v16 = vpop.permute.xlu0 %1302  ;;  %v729_v28 = vld [vmem:[#allocation2 + $0x115] sm:$0xff] }
 0x190   : > { %13430 = vst [vmem:[#allocation97_spill] sm:$0xff] %v9420_v16  ;;  %1520 = vrot.lane.b32.xlu1 %v726_v26, %s13329_s24 }
 0x191   : > { %1518 = vrot.lane.b32.xlu0 %v725_v36, %s13329_s24  ;;  %v732_v36 = vld [vmem:[#allocation2 + $0x12d] sm:$0xff] }
 0x192   : > { %v9424_v30 = vpop.permute.xlu1 %1308 }
 0x193   : > { %13431 = vst [vmem:[#allocation98_spill] sm:$0xff] %v9424_v30  ;;  %v9426_v1 = vpop.permute.xlu0 %1306  ;;  %v731_v30 = vld [vmem:[#allocation2 + $0x125] sm:$0xff] }
 0x194   : > { %13432 = vst [vmem:[#allocation99_spill] sm:$0xff] %v9426_v1  ;;  %1524 = vrot.lane.b32.xlu1 %v728_v20, %s13329_s24 }
 0x195   : > { %1522 = vrot.lane.b32.xlu0 %v727_v34, %s13329_s24  ;;  %v734_v34 = vld [vmem:[#allocation2 + $0x13d] sm:$0xff] }
 0x196   : > { %v9430_v24 = vpop.permute.xlu1 %1312 }
 0x197   : > { %13433 = vst [vmem:[#allocation100_spill] sm:$0xff] %v9430_v24  ;;  %v9432_v0 = vpop.permute.xlu0 %1310  ;;  %v733_v24 = vld [vmem:[#allocation2 + $0x135] sm:$0xff] }
 0x198   : > { %13434 = vst [vmem:[#allocation101_spill] sm:$0xff] %v9432_v0  ;;  %1528 = vrot.lane.b32.xlu1 %v730_v22, %s13329_s24 }
 0x199   : > { %1526 = vrot.lane.b32.xlu0 %v729_v28, %s13329_s24  ;;  %v736_v28 = vld [vmem:[#allocation2 + $0x14d] sm:$0xff] }
 0x19a   : > { %v9436_v26 = vpop.permute.xlu1 %1316 }
 0x19b   : > { %13435 = vst [vmem:[#allocation102_spill] sm:$0xff] %v9436_v26  ;;  %v9438_v16 = vpop.permute.xlu0 %1314  ;;  %v735_v26 = vld [vmem:[#allocation2 + $0x145] sm:$0xff] }
 0x19c   : > { %13436 = vst [vmem:[#allocation103_spill] sm:$0xff] %v9438_v16  ;;  %1532 = vrot.lane.b32.xlu1 %v732_v36, %s13329_s24 }
 0x19d   : > { %1530 = vrot.lane.b32.xlu0 %v731_v30, %s13329_s24  ;;  %v738_v30 = vld [vmem:[#allocation2 + $0x15d] sm:$0xff] }
 0x19e   : > { %v9442_v20 = vpop.permute.xlu1 %1320 }
 0x19f   : > { %13437 = vst [vmem:[#allocation104_spill] sm:$0xff] %v9442_v20  ;;  %v9444_v1 = vpop.permute.xlu0 %1318  ;;  %v737_v20 = vld [vmem:[#allocation2 + $0x155] sm:$0xff] }
 0x1a0   : > { %13438 = vst [vmem:[#allocation105_spill] sm:$0xff] %v9444_v1  ;;  %1536 = vrot.lane.b32.xlu1 %v734_v34, %s13329_s24 }
 0x1a1   : > { %1534 = vrot.lane.b32.xlu0 %v733_v24, %s13329_s24  ;;  %v740_v24 = vld [vmem:[#allocation2 + $0x16d] sm:$0xff] }
 0x1a2   : > { %v9448_v22 = vpop.permute.xlu1 %1324 }
 0x1a3   : > { %13439 = vst [vmem:[#allocation106_spill] sm:$0xff] %v9448_v22  ;;  %v9450_v0 = vpop.permute.xlu0 %1322  ;;  %v739_v22 = vld [vmem:[#allocation2 + $0x165] sm:$0xff] }
 0x1a4   : > { %13440 = vst [vmem:[#allocation107_spill] sm:$0xff] %v9450_v0  ;;  %1540 = vrot.lane.b32.xlu1 %v736_v28, %s13329_s24  ;;  %v2740_v28 = vld [vmem:[%s13445_s1 + $0x58] sm:$0x3] }
 0x1a5   : > { %1538 = vrot.lane.b32.xlu0 %v735_v26, %s13329_s24  ;;  %v742_v26 = vld [vmem:[#allocation2 + $0x17d] sm:$0xff]  ;;  %8186 = vmatprep.subr.msk.mxu0 %vm2899_vm1, %v2740_v28 }
 0x1a6   : > { %v9454_v36 = vpop.permute.xlu1 %1328  ;;  %8187 = vmatpush3.msk.msra.mxu0 %vm2899_vm1, %v2740_v28 }
 0x1a7   : > { %13441 = vst [vmem:[#allocation108_spill] sm:$0xff] %v9454_v36  ;;  %v9456_v16 = vpop.permute.xlu0 %1326 }
 0x1a8   : > { %13442 = vst [vmem:[#allocation109_spill] sm:$0xff] %v9456_v16  ;;  %1544 = vrot.lane.b32.xlu1 %v738_v30, %s13329_s24  ;;  %v741_v30 = vld [vmem:[#allocation2 + $0x175] sm:$0xff]  ;;  %v9568_v16 = vld [vmem:[#allocation2 + $0x40] sm:$0xff] }
 0x1a9   : > { %1542 = vrot.lane.b32.xlu0 %v737_v20, %s13329_s24 }
 0x1aa   : > { %v9460_v34 = vpop.permute.xlu1 %1332 }
 0x1ab   : > { %13443 = vst [vmem:[#allocation110_spill] sm:$0xff] %v9460_v34  ;;  %v9462_v1 = vpop.permute.xlu0 %1330 }
 0x1ac   : > { %13444 = vst [vmem:[#allocation111_spill] sm:$0xff] %v9462_v1  ;;  %1548 = vrot.lane.b32.xlu1 %v740_v24, %s13329_s24  ;;  %v2739_v24 = vld [vmem:[%s13445_s1 + $0x50] sm:$0xff] }
 0x1ad   : > { %1546 = vrot.lane.b32.xlu0 %v739_v22, %s13329_s24  ;;  %8188 = vmatprep.subr.mxu0 %v2739_v24  ;;  %v744_v22 = vld [vmem:[#allocation2 + $0x18d] sm:$0xff] }
 0x1ae   : > { %v9469_v36 = vpop.permute.xlu1 %1336  ;;  %8189 = vmatpush3.msra.mxu0 %v2739_v24  ;;  %v2736_v24 = vld [vmem:[%s13445_s1 + $0x38] sm:$0xff] }
 0x1af   : > { %13446 = vst [vmem:[#allocation112_spill] sm:$0xff] %v9469_v36  ;;  %v9472_v20 = vpop.permute.xlu0 %1334  ;;  %v2738_v36 = vld [vmem:[%s13445_s1 + $0x48] sm:$0xff] }
 0x1b0   : > { %13447 = vst [vmem:[#allocation113_spill] sm:$0xff] %v9472_v20  ;;  %1552 = vrot.lane.b32.xlu1 %v742_v26, %s13329_s24  ;;  %v743_v20 = vld [vmem:[#allocation2 + $0x185] sm:$0xff]  ;;  %8190 = vmatprep.subr.mxu0 %v2738_v36 }
 0x1b1   : > { %1550 = vrot.lane.b32.xlu0 %v741_v30, %s13329_s24  ;;  %8191 = vmatpush3.msra.mxu0 %v2738_v36  ;;  %v2737_v26 = vld [vmem:[%s13445_s1 + $0x40] sm:$0xff] }
 0x1b2   : > { %v9483_v34 = vpop.permute.xlu1 %1340  ;;  %8192 = vmatprep.subr.mxu0 %v2737_v26  ;;  %v6479_v30 = vld [vmem:[#allocation2 + $0x19d] sm:$0xff] }
 0x1b3   : > { %13448 = vst [vmem:[#allocation114_spill] sm:$0xff] %v9483_v34  ;;  %v9485_v28 = vpop.permute.xlu0 %1338  ;;  %8193 = vmatpush3.msra.mxu0 %v2737_v26  ;;  %v6478_v34 = vld [vmem:[#allocation2 + $0x195] sm:$0xff]  ;;  %v2734_v26 = vld [vmem:[%s13445_s1 + $0x28] sm:$0xff] }
 0x1b4   : > { %13449 = vst [vmem:[#allocation115_spill] sm:$0xff] %v9485_v28  ;;  %1556 = vrot.lane.b32.xlu1 %v744_v22, %s13329_s24  ;;  %8194 = vmatprep.subr.mxu0 %v2736_v24  ;;  %v2735_v22 = vld [vmem:[%s13445_s1 + $0x30] sm:$0xff] }
 0x1b5   : > { %1554 = vrot.lane.b32.xlu0 %v743_v20, %s13329_s24  ;;  %8195 = vmatpush3.msra.mxu0 %v2736_v24  ;;  %v748_v20 = vld [vmem:[#allocation2 + $0x1e] sm:$0xff]  ;;  %v747_v28 = vld [vmem:[#allocation2 + $0x16] sm:$0xff] }
 0x1b6   : > { %v9495_v1 = vpop.permute.xlu1 %1344  ;;  %8196 = vmatprep.subr.mxu0 %v2735_v22 }
 0x1b7   : > { %13450 = vst [vmem:[#allocation116_spill] sm:$0xff] %v9495_v1  ;;  %v9497_v36 = vpop.permute.xlu0 %1342  ;;  %8197 = vmatpush3.msra.mxu0 %v2735_v22  ;;  %v2732_v22 = vld [vmem:[%s13445_s1 + $0x18] sm:$0xff] }
 0x1b8   : > { %13451 = vst [vmem:[#allocation117_spill] sm:$0xff] %v9497_v36  ;;  %1560 = vrot.lane.b32.xlu1 %v6479_v30, %s13329_s24  ;;  %8198 = vmatprep.subr.mxu0 %v2734_v26  ;;  %v2733_v30 = vld [vmem:[%s13445_s1 + $0x20] sm:$0xff]  ;;  %v751_v36 = vld [vmem:[#allocation2 + $0x36] sm:$0xff] }
 0x1b9   : > { %1558 = vrot.lane.b32.xlu0 %v6478_v34, %s13329_s24  ;;  %8199 = vmatpush3.msra.mxu0 %v2734_v26  ;;  %v750_v34 = vld [vmem:[#allocation2 + $0x2e] sm:$0xff] }
 0x1ba   : > { %v9507_v1 = vpop.permute.xlu1 %1348  ;;  %8200 = vmatprep.subr.mxu0 %v2733_v30 }
 0x1bb   : > { %13452 = vst [vmem:[#allocation118_spill] sm:$0xff] %v9507_v1  ;;  %v9509_v24 = vpop.permute.xlu0 %1346  ;;  %8201 = vmatpush3.msra.mxu0 %v2733_v30  ;;  %v2730_v30 = vld [vmem:[%s13445_s1 + $0x8] sm:$0xff] }
 0x1bc   : > { %13453 = vst [vmem:[#allocation119_spill] sm:$0xff] %v9509_v24  ;;  %1664 = vrot.lane.b32.xlu1 %v748_v20, %s13327_s13  ;;  %v749_v24 = vld [vmem:[#allocation2 + $0x26] sm:$0xff]  ;;  %8202 = vmatprep.subr.mxu0 %v2732_v22  ;;  %v2731_v20 = vld [vmem:[%s13445_s1 + $0x10] sm:$0xff] }
 0x1bd   : > { %1662 = vrot.lane.b32.xlu0 %v747_v28, %s13327_s13  ;;  %8203 = vmatpush3.msra.mxu0 %v2732_v22  ;;  %v752_v28 = vld [vmem:[#allocation2 + $0x3e] sm:$0xff] }
 0x1be   : > { %v9519_v1 = vpop.permute.xlu1 %1352  ;;  %8204 = vmatprep.subr.mxu0 %v2731_v20 }
 0x1bf   : > { %13454 = vst [vmem:[#allocation120_spill] sm:$0xff] %v9519_v1  ;;  %v9521_v26 = vpop.permute.xlu0 %1350  ;;  %8205 = vmatpush3.msra.mxu0 %v2731_v20  ;;  %v9542_v20 = vld [vmem:[#allocation2 + $0x30] sm:$0xff] }
 0x1c0   : > { %13455 = vst [vmem:[#allocation121_spill] sm:$0xff] %v9521_v26  ;;  %1668 = vrot.lane.b32.xlu1 %v750_v34, %s13327_s13  ;;  %8206 = vmatprep.subr.mxu0 %v2730_v30  ;;  %v2729_v34 = vld [vmem:[%s13445_s1] sm:$0xff]  ;;  %v9546_v26 = vld [vmem:[#allocation2 + $0x28] sm:$0xff] }
 0x1c1   : > { %1666 = vrot.lane.b32.xlu0 %v749_v24, %s13327_s13  ;;  %8207 = vmatpush3.msra.mxu0 %v2730_v30 }
 0x1c2   : > { %v9531_v1 = vpop.permute.xlu1 %1356  ;;  %8208 = vmatprep.subr.mxu0 %v2729_v34 }
 0x1c3   : > { %13456 = vst [vmem:[#allocation122_spill] sm:$0xff] %v9531_v1  ;;  %v9533_v22 = vpop.permute.xlu0 %1354  ;;  %8209 = vmatpush3.msra.mxu0 %v2729_v34  ;;  %v8534_v34 = vld [vmem:[#allocation2 + $0x29] sm:$0xff] }
 0x1c4   : > { %13457 = vst [vmem:[#allocation123_spill] sm:$0xff] %v9533_v22  ;;  %1672 = vrot.lane.b32.xlu1 %v752_v28, %s13327_s13 }
 0x1c5   : > { %1670 = vrot.lane.b32.xlu0 %v751_v36, %s13327_s13  ;;  %v8533_v36 = vld [vmem:[#allocation2 + $0x31] sm:$0xff] }
 0x1c6   : > { %v9540_v24 = vpop.permute.xlu1 %1360 }
 0x1c7   : > { %13458 = vst [vmem:[#allocation124_spill] sm:$0xff] %v9540_v24  ;;  %v9544_v1 = vpop.permute.xlu0 %1358 }
 0x1c8   : > { %13459 = vst [vmem:[#allocation125_spill] sm:$0xff] %v9544_v1  ;;  %1864 = vrot.lane.b32.xlu1 %v9542_v20, %s13321_s30 }
 0x1c9   : > { %1862 = vrot.lane.b32.xlu0 %v9546_v26, %s13321_s30 }
 0x1ca   : > { %v9552_v28 = vpop.permute.xlu1 %1464 }
 0x1cb   : > { %v9554_v30 = vpop.permute.xlu0 %1462 }
 0x1cc   : > { %2019 = vrot.lane.b32.xlu1 %v8533_v36, %s13319_s12  ;;  %v9572_v36 = vld [vmem:[#allocation2 + $0x38] sm:$0xff] }
 0x1cd   : > { %2017 = vrot.lane.b32.xlu0 %v8534_v34, %s13319_s12 }
 0x1ce   : > { %v9558_v24 = vpop.permute.xlu1 %1468 }
 0x1cf   : > { %v9560_v1 = vpop.permute.xlu0 %1466 }
 0x1d0   : > { %2174 = vrot.lane.b32.xlu1 %v9050_v45, %s13317_s14 }
 0x1d1   : > { %2172 = vrot.lane.b32.xlu0 %v9045_v42, %s13317_s14  ;;  %v8536_v42 = vld [vmem:[#allocation2 + $0x39] sm:$0xff] }
 0x1d2   : > { %v9566_v22 = vpop.permute.xlu1 %1472 }
 0x1d3   : > { %v9570_v0 = vpop.permute.xlu0 %1470 }
 0x1d4   : > { %1868 = vrot.lane.b32.xlu1 %v9568_v16, %s13321_s30 }
 0x1d5   : > { %1866 = vrot.lane.b32.xlu0 %v9572_v36, %s13321_s30 }
 0x1d6   : > { %v9578_v34 = vpop.permute.xlu1 %1476 }
 0x1d7   : > { %v9580_v45 = vpop.permute.xlu0 %1474 }
 0x1d8   : > { %2023 = vrot.lane.b32.xlu1 %v8535_v9, %s13319_s12  ;;  %v9597_v9 = vld [vmem:[#allocation2 + $0x48] sm:$0xff] }
 0x1d9   : > { %2021 = vrot.lane.b32.xlu0 %v8536_v42, %s13319_s12 }
 0x1da   : > { %v9584_v18 = vpop.permute.xlu1 %1480 }
 0x1db   : > { %v9586_v5 = vpop.permute.xlu0 %1478 }
 0x1dc   : > { %2178 = vrot.lane.b32.xlu1 %v9057_v48, %s13317_s14 }
 0x1dd   : > { %2176 = vrot.lane.b32.xlu0 %v8537_v39, %s13317_s14  ;;  %v8539_v39 = vld [vmem:[#allocation2 + $0x49] sm:$0xff] }
 0x1de   : > { %v9591_v12 = vpop.permute.xlu1 %1484 }
 0x1df   : > { %13460 = vst [vmem:[#allocation126_spill] sm:$0xff] %v9591_v12  ;;  %v9595_v17 = vpop.permute.xlu0 %1482  ;;  %v9741_v12 = vld [vmem:[#allocation2 + $0xa0] sm:$0xff] }
 0x1e0   : > { %13461 = vst [vmem:[#allocation127_spill] sm:$0xff] %v9595_v17  ;;  %1872 = vrot.lane.b32.xlu1 %v9593_v19, %s13321_s30  ;;  %13508 = vst [vmem:[#allocation174_spill] sm:$0xff] %v9741_v12 }
 0x1e1   : > { %1870 = vrot.lane.b32.xlu0 %v9597_v9, %s13321_s30 }
 0x1e2   : > { %v9603_v42 = vpop.permute.xlu1 %1488 }
 0x1e3   : > { %13462 = vst [vmem:[#allocation128_spill] sm:$0xff] %v9603_v42  ;;  %v9605_v48 = vpop.permute.xlu0 %1486 }
 0x1e4   : > { %13463 = vst [vmem:[#allocation129_spill] sm:$0xff] %v9605_v48  ;;  %2027 = vrot.lane.b32.xlu1 %v8538_v14, %s13319_s12  ;;  %v8541_v14 = vld [vmem:[#allocation2 + $0x52] sm:$0xff] }
 0x1e5   : > { %2025 = vrot.lane.b32.xlu0 %v8539_v39, %s13319_s12 }
 0x1e6   : > { %v9609_v23 = vpop.permute.xlu1 %1492 }
 0x1e7   : > { %13464 = vst [vmem:[#allocation130_spill] sm:$0xff] %v9609_v23  ;;  %v9611_v8 = vpop.permute.xlu0 %1490  ;;  %v9623_v23 = vld [vmem:[#allocation2 + $0x60] sm:$0xff] }
 0x1e8   : > { %13465 = vst [vmem:[#allocation131_spill] sm:$0xff] %v9611_v8  ;;  %1674 = vrot.lane.b32.xlu1 %v753_v13, %s13327_s13  ;;  %13469 = vst [vmem:[#allocation135_spill] sm:$0xff] %v9623_v23  ;;  %v9627_v13 = vld [vmem:[#allocation2 + $0x58] sm:$0xff] }
 0x1e9   : > { %2180 = vrot.lane.b32.xlu0 %v8540_v56, %s13317_s14  ;;  %13471 = vst [vmem:[#allocation137_spill] sm:$0xff] %v9627_v13 }
 0x1ea   : > { %v9615_v42 = vpop.permute.xlu1 %1496 }
 0x1eb   : > { %13466 = vst [vmem:[#allocation132_spill] sm:$0xff] %v9615_v42  ;;  %v9617_v48 = vpop.permute.xlu0 %1494  ;;  %v8542_v42 = vld [vmem:[#allocation2 + $0x61] sm:$0xff] }
 0x1ec   : > { %13467 = vst [vmem:[#allocation133_spill] sm:$0xff] %v9617_v48  ;;  %1676 = vrot.lane.b32.xlu1 %v754_v25, %s13327_s13 }
 0x1ed   : > { %2182 = vrot.lane.b32.xlu0 %v8541_v14, %s13317_s14  ;;  %v8543_v14 = vld [vmem:[#allocation2 + $0x59] sm:$0xff] }
 0x1ee   : > { %v9621_v39 = vpop.permute.xlu1 %1500 }
 0x1ef   : > { %13468 = vst [vmem:[#allocation134_spill] sm:$0xff] %v9621_v39  ;;  %v9625_v8 = vpop.permute.xlu0 %1498  ;;  %v755_v39 = vld [vmem:[#allocation2 + $0x56] sm:$0xff] }
 0x1f0   : > { %13470 = vst [vmem:[#allocation136_spill] sm:$0xff] %v9625_v8  ;;  %1876 = vrot.lane.b32.xlu1 %v9623_v23, %s13321_s30  ;;  %v8544_v23 = vld [vmem:[#allocation2 + $0x5a] sm:$0xff] }
 0x1f1   : > { %1874 = vrot.lane.b32.xlu0 %v9627_v13, %s13321_s30  ;;  %v497_v13 = vld [vmem:[#allocation2] sm:$0xff] }
 0x1f2   : > { %v9633_v56 = vpop.permute.xlu1 %1504  ;;  %v2322_v17 = vsel %vm434_vm0, %v497_v13, %v9059_v49 }
 0x1f3   : > { %13472 = vst [vmem:[#allocation138_spill] sm:$0xff] %v9633_v56  ;;  %v9635_v25 = vpop.permute.xlu0 %1502  ;;  %v2373_v3 = vsel %vm2372_vm2, %v2322_v17, %v9210_v35 }
 0x1f4   : > { %13473 = vst [vmem:[#allocation139_spill] sm:$0xff] %v9635_v25  ;;  %2031 = vrot.lane.b32.xlu1 %v8542_v42, %s13319_s12  ;;  %v8545_v42 = vld [vmem:[#allocation2 + $0x62] sm:$0xff]  ;;  %v2424_v49 = vsel %vm2423_vm3, %v2373_v3, %v9360_v37 }
 0x1f5   : > { %2029 = vrot.lane.b32.xlu0 %v8543_v14, %s13319_s12  ;;  %v2475_v17 = vsel %vm2474_vm4, %v2424_v49, %v9554_v30 }
 0x1f6   : > { %v9639_v8 = vpop.permute.xlu1 %1508 }
 0x1f7   : > { %13474 = vst [vmem:[#allocation140_spill] sm:$0xff] %v9639_v8  ;;  %v9641_v48 = vpop.permute.xlu0 %1506  ;;  %v9653_v8 = vld [vmem:[#allocation2 + $0x70] sm:$0xff] }
 0x1f8   : > { %13475 = vst [vmem:[#allocation141_spill] sm:$0xff] %v9641_v48  ;;  %1678 = vrot.lane.b32.xlu1 %v755_v39, %s13327_s13  ;;  %13479 = vst [vmem:[#allocation145_spill] sm:$0xff] %v9653_v8  ;;  %v9657_v39 = vld [vmem:[#allocation2 + $0x68] sm:$0xff] }
 0x1f9   : > { %2184 = vrot.lane.b32.xlu0 %v8544_v23, %s13317_s14  ;;  %13481 = vst [vmem:[#allocation147_spill] sm:$0xff] %v9657_v39 }
 0x1fa   : > { %v9645_v56 = vpop.permute.xlu1 %1512 }
 0x1fb   : > { %13476 = vst [vmem:[#allocation142_spill] sm:$0xff] %v9645_v56  ;;  %v9647_v25 = vpop.permute.xlu0 %1510  ;;  %v8546_v56 = vld [vmem:[#allocation2 + $0x71] sm:$0xff] }
 0x1fc   : > { %13477 = vst [vmem:[#allocation143_spill] sm:$0xff] %v9647_v25  ;;  %1680 = vrot.lane.b32.xlu1 %v756_v10, %s13327_s13 }
 0x1fd   : > { %2186 = vrot.lane.b32.xlu0 %v8545_v42, %s13317_s14  ;;  %v8547_v42 = vld [vmem:[#allocation2 + $0x69] sm:$0xff] }
 0x1fe   : > { %v9651_v14 = vpop.permute.xlu1 %1516 }
 0x1ff   : > { %13478 = vst [vmem:[#allocation144_spill] sm:$0xff] %v9651_v14  ;;  %v9655_v48 = vpop.permute.xlu0 %1514  ;;  %v757_v14 = vld [vmem:[#allocation2 + $0x66] sm:$0xff] }
 0x200   : > { %13480 = vst [vmem:[#allocation146_spill] sm:$0xff] %v9655_v48  ;;  %1880 = vrot.lane.b32.xlu1 %v9653_v8, %s13321_s30  ;;  %v8548_v8 = vld [vmem:[#allocation2 + $0x6a] sm:$0xff] }
 0x201   : > { %1878 = vrot.lane.b32.xlu0 %v9657_v39, %s13321_s30  ;;  %v758_v39 = vld [vmem:[#allocation2 + $0x6e] sm:$0xff] }
 0x202   : > { %v9663_v23 = vpop.permute.xlu1 %1520 }
 0x203   : > { %13482 = vst [vmem:[#allocation148_spill] sm:$0xff] %v9663_v23  ;;  %v9665_v10 = vpop.permute.xlu0 %1518 }
 0x204   : > { %13483 = vst [vmem:[#allocation149_spill] sm:$0xff] %v9665_v10  ;;  %2035 = vrot.lane.b32.xlu1 %v8546_v56, %s13319_s12  ;;  %v8549_v56 = vld [vmem:[#allocation2 + $0x72] sm:$0xff] }
 0x205   : > { %2033 = vrot.lane.b32.xlu0 %v8547_v42, %s13319_s12 }
 0x206   : > { %v9669_v48 = vpop.permute.xlu1 %1524 }
 0x207   : > { %13484 = vst [vmem:[#allocation150_spill] sm:$0xff] %v9669_v48  ;;  %v9671_v25 = vpop.permute.xlu0 %1522  ;;  %v9683_v48 = vld [vmem:[#allocation2 + $0x80] sm:$0xff] }
 0x208   : > { %13485 = vst [vmem:[#allocation151_spill] sm:$0xff] %v9671_v25  ;;  %1682 = vrot.lane.b32.xlu1 %v757_v14, %s13327_s13  ;;  %13489 = vst [vmem:[#allocation155_spill] sm:$0xff] %v9683_v48  ;;  %v9687_v14 = vld [vmem:[#allocation2 + $0x78] sm:$0xff] }
 0x209   : > { %2188 = vrot.lane.b32.xlu0 %v8548_v8, %s13317_s14  ;;  %13491 = vst [vmem:[#allocation157_spill] sm:$0xff] %v9687_v14 }
 0x20a   : > { %v9675_v23 = vpop.permute.xlu1 %1528 }
 0x20b   : > { %13486 = vst [vmem:[#allocation152_spill] sm:$0xff] %v9675_v23  ;;  %v9677_v10 = vpop.permute.xlu0 %1526  ;;  %v8550_v23 = vld [vmem:[#allocation2 + $0x81] sm:$0xff] }
 0x20c   : > { %13487 = vst [vmem:[#allocation153_spill] sm:$0xff] %v9677_v10  ;;  %1684 = vrot.lane.b32.xlu1 %v758_v39, %s13327_s13 }
 0x20d   : > { %2190 = vrot.lane.b32.xlu0 %v8549_v56, %s13317_s14  ;;  %v8551_v56 = vld [vmem:[#allocation2 + $0x79] sm:$0xff] }
 0x20e   : > { %v9681_v42 = vpop.permute.xlu1 %1532 }
 0x20f   : > { %13488 = vst [vmem:[#allocation154_spill] sm:$0xff] %v9681_v42  ;;  %v9685_v25 = vpop.permute.xlu0 %1530  ;;  %v759_v42 = vld [vmem:[#allocation2 + $0x76] sm:$0xff] }
 0x210   : > { %13490 = vst [vmem:[#allocation156_spill] sm:$0xff] %v9685_v25  ;;  %1884 = vrot.lane.b32.xlu1 %v9683_v48, %s13321_s30  ;;  %v8552_v48 = vld [vmem:[#allocation2 + $0x7a] sm:$0xff] }
 0x211   : > { %1882 = vrot.lane.b32.xlu0 %v9687_v14, %s13321_s30  ;;  %v760_v14 = vld [vmem:[#allocation2 + $0x7e] sm:$0xff] }
 0x212   : > { %v9693_v8 = vpop.permute.xlu1 %1536 }
 0x213   : > { %13492 = vst [vmem:[#allocation158_spill] sm:$0xff] %v9693_v8  ;;  %v9695_v39 = vpop.permute.xlu0 %1534 }
 0x214   : > { %13493 = vst [vmem:[#allocation159_spill] sm:$0xff] %v9695_v39  ;;  %2039 = vrot.lane.b32.xlu1 %v8550_v23, %s13319_s12  ;;  %v8553_v23 = vld [vmem:[#allocation2 + $0x82] sm:$0xff] }
 0x215   : > { %2037 = vrot.lane.b32.xlu0 %v8551_v56, %s13319_s12 }
 0x216   : > { %v9699_v25 = vpop.permute.xlu1 %1540 }
 0x217   : > { %13494 = vst [vmem:[#allocation160_spill] sm:$0xff] %v9699_v25  ;;  %v9701_v10 = vpop.permute.xlu0 %1538  ;;  %v9713_v25 = vld [vmem:[#allocation2 + $0x90] sm:$0xff] }
 0x218   : > { %13495 = vst [vmem:[#allocation161_spill] sm:$0xff] %v9701_v10  ;;  %1686 = vrot.lane.b32.xlu1 %v759_v42, %s13327_s13  ;;  %13499 = vst [vmem:[#allocation165_spill] sm:$0xff] %v9713_v25  ;;  %v9717_v42 = vld [vmem:[#allocation2 + $0x88] sm:$0xff] }
 0x219   : > { %2192 = vrot.lane.b32.xlu0 %v8552_v48, %s13317_s14  ;;  %13501 = vst [vmem:[#allocation167_spill] sm:$0xff] %v9717_v42 }
 0x21a   : > { %v9705_v8 = vpop.permute.xlu1 %1544 }
 0x21b   : > { %13496 = vst [vmem:[#allocation162_spill] sm:$0xff] %v9705_v8  ;;  %v9707_v39 = vpop.permute.xlu0 %1542  ;;  %v8554_v8 = vld [vmem:[#allocation2 + $0x91] sm:$0xff] }
 0x21c   : > { %13497 = vst [vmem:[#allocation163_spill] sm:$0xff] %v9707_v39  ;;  %1688 = vrot.lane.b32.xlu1 %v760_v14, %s13327_s13 }
 0x21d   : > { %2194 = vrot.lane.b32.xlu0 %v8553_v23, %s13317_s14  ;;  %v8555_v23 = vld [vmem:[#allocation2 + $0x89] sm:$0xff] }
 0x21e   : > { %v9711_v56 = vpop.permute.xlu1 %1548 }
 0x21f   : > { %13498 = vst [vmem:[#allocation164_spill] sm:$0xff] %v9711_v56  ;;  %v9715_v10 = vpop.permute.xlu0 %1546  ;;  %v761_v56 = vld [vmem:[#allocation2 + $0x86] sm:$0xff] }
 0x220   : > { %13500 = vst [vmem:[#allocation166_spill] sm:$0xff] %v9715_v10  ;;  %1888 = vrot.lane.b32.xlu1 %v9713_v25, %s13321_s30  ;;  %v8556_v25 = vld [vmem:[#allocation2 + $0x8a] sm:$0xff] }
 0x221   : > { %1886 = vrot.lane.b32.xlu0 %v9717_v42, %s13321_s30  ;;  %v762_v42 = vld [vmem:[#allocation2 + $0x8e] sm:$0xff] }
 0x222   : > { %v9723_v48 = vpop.permute.xlu1 %1552 }
 0x223   : > { %13502 = vst [vmem:[#allocation168_spill] sm:$0xff] %v9723_v48  ;;  %v9725_v14 = vpop.permute.xlu0 %1550 }
 0x224   : > { %13503 = vst [vmem:[#allocation169_spill] sm:$0xff] %v9725_v14  ;;  %2043 = vrot.lane.b32.xlu1 %v8554_v8, %s13319_s12  ;;  %v8557_v8 = vld [vmem:[#allocation2 + $0x92] sm:$0xff] }
 0x225   : > { %2041 = vrot.lane.b32.xlu0 %v8555_v23, %s13319_s12 }
 0x226   : > { %v9729_v10 = vpop.permute.xlu1 %1556 }
 0x227   : > { %13504 = vst [vmem:[#allocation170_spill] sm:$0xff] %v9729_v10  ;;  %v9731_v39 = vpop.permute.xlu0 %1554 }
 0x228   : > { %13505 = vst [vmem:[#allocation171_spill] sm:$0xff] %v9731_v39  ;;  %1690 = vrot.lane.b32.xlu1 %v761_v56, %s13327_s13  ;;  %v9743_v39 = vld [vmem:[#allocation2 + $0x98] sm:$0xff] }
 0x229   : > { %2196 = vrot.lane.b32.xlu0 %v8556_v25, %s13317_s14  ;;  %13509 = vst [vmem:[#allocation175_spill] sm:$0xff] %v9743_v39 }
 0x22a   : > { %v9735_v48 = vpop.permute.xlu1 %1560 }
 0x22b   : > { %13506 = vst [vmem:[#allocation172_spill] sm:$0xff] %v9735_v48  ;;  %v9737_v14 = vpop.permute.xlu0 %1558  ;;  %v763_v48 = vld [vmem:[#allocation2 + $0x96] sm:$0xff] }
 0x22c   : > { %13507 = vst [vmem:[#allocation173_spill] sm:$0xff] %v9737_v14  ;;  %1692 = vrot.lane.b32.xlu1 %v762_v42, %s13327_s13  ;;  %v8558_v42 = vld [vmem:[#allocation2 + $0xa1] sm:$0xff] }
 0x22d   : > { %2198 = vrot.lane.b32.xlu0 %v8557_v8, %s13317_s14  ;;  %v8559_v8 = vld [vmem:[#allocation2 + $0x99] sm:$0xff] }
 0x22e   : > { %v1665_v23 = vpop.permute.xlu1 %1664 }
 0x22f   : > { %v1663_v10 = vpop.permute.xlu0 %1662 }
 0x230   : > { %1892 = vrot.lane.b32.xlu1 %v9741_v12, %s13321_s30  ;;  %v498_v12 = vld [vmem:[#allocation2 + $0x8] sm:$0xff] }
 0x231   : > { %1890 = vrot.lane.b32.xlu0 %v9743_v39, %s13321_s30  ;;  %v764_v39 = vld [vmem:[#allocation2 + $0x9e] sm:$0xff] }
 0x232   : > { %v9749_v25 = vpop.permute.xlu1 %1668 }
 0x233   : > { %v9751_v56 = vpop.permute.xlu0 %1666 }
 0x234   : > { %2047 = vrot.lane.b32.xlu1 %v8558_v42, %s13319_s12 }
 0x235   : > { %2045 = vrot.lane.b32.xlu0 %v8559_v8, %s13319_s12  ;;  %v2323_v8 = vsel %vm434_vm0, %v498_v12, %v9066_v53  ;;  %v9773_v12 = vld [vmem:[#allocation2 + $0xb0] sm:$0xff] }
 0x236   : > { %v9755_v14 = vpop.permute.xlu1 %1672 }
 0x237   : > { %v9757_v21 = vpop.permute.xlu0 %1670 }
 0x238   : > { %1694 = vrot.lane.b32.xlu1 %v763_v48, %s13327_s13  ;;  %v2374_v48 = vsel %vm2372_vm2, %v2323_v8, %v9208_v27 }
 0x239   : > { %2200 = vrot.lane.b32.xlu0 %v8560_v7, %s13317_s14  ;;  %v8561_v7 = vld [vmem:[#allocation2 + $0xa2] sm:$0xff]  ;;  %v2425_v33 = vsel %vm2423_vm3, %v2374_v48, %v9358_v60  ;;  %v2526_v60 = vsel %vm2525_vm5, %v2475_v17, %v1663_v10  ;;  %v8562_v48 = vld [vmem:[#allocation2 + $0xb1] sm:$0xff] }
 0x23a   : > { %v1865_v4 = vpop.permute.xlu1 %1864  ;;  %v2476_v27 = vsel %vm2474_vm4, %v2425_v33, %v9552_v28 }
 0x23b   : > { %v1863_v42 = vpop.permute.xlu0 %1862  ;;  %v2527_v35 = vsel %vm2525_vm5, %v2476_v27, %v1665_v23 }
 0x23c   : > { %1696 = vrot.lane.b32.xlu1 %v764_v39, %s13327_s13  ;;  %v9779_v39 = vld [vmem:[#allocation2 + $0xa8] sm:$0xff]  ;;  %v2578_v3 = vsel %vm2576_vm6, %v2527_v35, %v1865_v4  ;;  %v2577_v33 = vsel %vm2576_vm6, %v2526_v60, %v1863_v42  ;;  %v500_v4 = vld [vmem:[#allocation2 + $0x18] sm:$0xff] }
 0x23d   : > { %2202 = vrot.lane.b32.xlu0 %v8561_v7, %s13317_s14  ;;  %v8563_v7 = vld [vmem:[#allocation2 + $0xa9] sm:$0xff] }
 0x23e   : > { %v2020_v53 = vpop.permute.xlu1 %2019  ;;  %v765_v42 = vld [vmem:[#allocation2 + $0xa6] sm:$0xff] }
 0x23f   : > { %v2018_v13 = vpop.permute.xlu0 %2017  ;;  %v2629_v37 = vsel %vm2627_vm7, %v2578_v3, %v2020_v53  ;;  %v499_v53 = vld [vmem:[#allocation2 + $0x10] sm:$0xff] }
 0x240   : > { %1896 = vrot.lane.b32.xlu1 %v9773_v12, %s13321_s30  ;;  %v2628_v30 = vsel %vm2627_vm7, %v2577_v33, %v2018_v13  ;;  %v2325_v13 = vsel %vm434_vm0, %v500_v4, %v9064_v51  ;;  %v2324_v17 = vsel %vm434_vm0, %v499_v53, %v9055_v47  ;;  %v8564_v60 = vld [vmem:[#allocation2 + $0xaa] sm:$0xff] }
 0x241   : > { %1894 = vrot.lane.b32.xlu0 %v9779_v39, %s13321_s30  ;;  %v2376_v35 = vsel %vm2372_vm2, %v2325_v13, %v9214_v44  ;;  %v766_v3 = vld [vmem:[#allocation2 + $0xae] sm:$0xff]  ;;  %v2375_v33 = vsel %vm2372_vm2, %v2324_v17, %v9216_v62  ;;  %v8567_v17 = vld [vmem:[#allocation2 + $0xb9] sm:$0xff] }
 0x242   : > { %v2175_v28 = vpop.permute.xlu1 %2174  ;;  %v2426_v51 = vsel %vm2423_vm3, %v2375_v33, %v9366_v32 }
 0x243   : > { %v2680_v23 = vsel %vm2678_vm8, %v2629_v37, %v2175_v28  ;;  %v2173_v8 = vpop.permute.xlu0 %2172  ;;  %v2427_v37 = vsel %vm2423_vm3, %v2376_v35, %v9364_v52  ;;  %v2477_v44 = vsel %vm2474_vm4, %v2426_v51, %v9560_v1  ;;  %v767_v35 = vld [vmem:[#allocation2 + $0xb6] sm:$0xff] }
 0x244   : > { %2051 = vrot.lane.b32.xlu1 %v8562_v48, %s13319_s12  ;;  %v2679_v10 = vsel %vm2678_vm8, %v2628_v30, %v2173_v8  ;;  %v2478_v47 = vsel %vm2474_vm4, %v2427_v37, %v9558_v24  ;;  %v2528_v62 = vsel %vm2525_vm5, %v2477_v44, %v9751_v56  ;;  %v8565_v8 = vld [vmem:[#allocation2 + $0xb2] sm:$0xff] }
 0x245   : > { %2049 = vrot.lane.b32.xlu0 %v8563_v7, %s13319_s12  ;;  %8210 = vmatprep.mubr.msk.f32.mxu0 %vm2748_vm9, %v2679_v10  ;;  %v9826_v10 = vld [vmem:[#allocation2 + $0xc0] sm:$0xff]  ;;  %v9830_v7 = vld [vmem:[#allocation2 + $0xb8] sm:$0xff] }
 0x246   : > { %8211 = vmatmul.mubr.msk.f32.vlgmr.msra.gmra.mxu0 %vm2748_vm9, %v2680_v23  ;;  %v1869_v49 = vpop.permute.xlu1 %1868  ;;  %v2529_v23 = vsel %vm2525_vm5, %v2478_v47, %v9749_v25  ;;  %v8568_v47 = vld [vmem:[#allocation2 + $0xba] sm:$0xff] }
 0x247   : > { %v1867_v27 = vpop.permute.xlu0 %1866  ;;  %v2580_v52 = vsel %vm2576_vm6, %v2529_v23, %v1869_v49 }
 0x248   : > { %1698 = vrot.lane.b32.xlu1 %v765_v42, %s13327_s13  ;;  %v2579_v32 = vsel %vm2576_vm6, %v2528_v62, %v1867_v27  ;;  %v501_v42 = vld [vmem:[#allocation2 + $0x20] sm:$0xff] }
 0x249   : > { %2204 = vrot.lane.b32.xlu0 %v8564_v60, %s13317_s14  ;;  %v8566_v27 = vld [vmem:[#allocation2 + $0xc1] sm:$0xff]  ;;  %v2326_v13 = vsel %vm434_vm0, %v501_v42, %v9072_v57  ;;  %v2327_v57 = vsel %vm434_vm0, %v9546_v26, %v9070_v55 }
 0x24a   : > { %v2024_v28 = vpop.permute.xlu1 %2023  ;;  %v2377_v60 = vsel %vm2372_vm2, %v2326_v13, %v9222_v11  ;;  %v768_v11 = vld [vmem:[#allocation2 + $0xbe] sm:$0xff]  ;;  %v769_v42 = vld [vmem:[#allocation2 + $0xc6] sm:$0xff] }
 0x24b   : > { %v2022_v30 = vpop.permute.xlu0 %2021  ;;  %v2631_v24 = vsel %vm2627_vm7, %v2580_v52, %v2024_v28  ;;  %v2428_v33 = vsel %vm2423_vm3, %v2377_v60, %v9372_v40  ;;  %v2378_v40 = vsel %vm2372_vm2, %v2327_v57, %v9220_v15  ;;  %v8569_v15 = vld [vmem:[#allocation2 + $0xc2] sm:$0xff]  ;;  %v8573_v57 = vld [vmem:[#allocation2 + $0xd2] sm:$0xff] }
 0x24c   : > { %1700 = vrot.lane.b32.xlu1 %v766_v3, %s13327_s13  ;;  %v2630_v1 = vsel %vm2627_vm7, %v2579_v32, %v2022_v30  ;;  %v2479_v28 = vsel %vm2474_vm4, %v2428_v33, %v9570_v0  ;;  %v2429_v0 = vsel %vm2423_vm3, %v2378_v40, %v9370_v43 }
 0x24d   : > { %2206 = vrot.lane.b32.xlu0 %v8565_v8, %s13317_s14  ;;  %v2530_v51 = vsel %vm2525_vm5, %v2479_v28, %v9757_v21  ;;  %v2480_v55 = vsel %vm2474_vm4, %v2429_v0, %v9566_v22  ;;  %v9871_v8 = vld [vmem:[#allocation2 + $0xd0] sm:$0xff]  ;;  %v8574_v0 = vld [vmem:[#allocation2 + $0xe1] sm:$0xff] }
 0x24e   : > { %v2179_v48 = vpop.permute.xlu1 %2178  ;;  %v2531_v26 = vsel %vm2525_vm5, %v2480_v55, %v9755_v14  ;;  %v771_v55 = vld [vmem:[#allocation2 + $0xd6] sm:$0xff] }
 0x24f   : > { %v2682_v25 = vsel %vm2678_vm8, %v2631_v24, %v2179_v48  ;;  %v2177_v4 = vpop.permute.xlu0 %2176  ;;  %v9874_v24 = vld [vmem:[#allocation2 + $0xc8] sm:$0xff] }
 0x250   : > { %v2681_v56 = vsel %vm2678_vm8, %v2630_v1, %v2177_v4  ;;  %1900 = vrot.lane.b32.xlu1 %v9826_v10, %s13321_s30  ;;  %v2328_v4 = vsel %vm434_vm0, %v9542_v20, %v9078_v61  ;;  %v2329_v61 = vsel %vm434_vm0, %v9572_v36, %v9076_v59 }
 0x251   : > { %1898 = vrot.lane.b32.xlu0 %v9830_v7, %s13321_s30  ;;  %8213 = vmatprep.mubr.msk.f32.mxu0 %vm2748_vm9, %v2681_v56  ;;  %v8571_v56 = vld [vmem:[#allocation2 + $0xc9] sm:$0xff]  ;;  %v2380_v60 = vsel %vm2372_vm2, %v2329_v61, %v9226_v31  ;;  %v2332_v61 = vsel %vm434_vm0, %v9593_v19, %v9090_v6 }
 0x252   : > { %8214 = vmatmul.mubr.msk.f32.gmra.mxu0 %vm2748_vm9, %v2682_v25  ;;  %v1873_v53 = vpop.permute.xlu1 %1872  ;;  %v8570_v25 = vld [vmem:[#allocation2 + $0xd1] sm:$0xff] }
 0x253   : > { %v1871_v49 = vpop.permute.xlu0 %1870  ;;  %v2582_v43 = vsel %vm2576_vm6, %v2531_v26, %v1873_v53  ;;  %v2379_v53 = vsel %vm2372_vm2, %v2328_v4, %v9228_v58  ;;  %v770_v58 = vld [vmem:[#allocation2 + $0xce] sm:$0xff]  ;;  %v8577_v4 = vld [vmem:[#allocation2 + $0xe2] sm:$0xff] }
 0x254   : > { %2055 = vrot.lane.b32.xlu1 %v8566_v27, %s13319_s12  ;;  %v2581_v30 = vsel %vm2576_vm6, %v2530_v51, %v1871_v49  ;;  %v2430_v27 = vsel %vm2423_vm3, %v2379_v53, %v9378_v41  ;;  %v9913_v51 = vld [vmem:[#allocation2 + $0xe0] sm:$0xff] }
 0x255   : > { %2053 = vrot.lane.b32.xlu0 %v8567_v17, %s13319_s12  ;;  %v2481_v17 = vsel %vm2474_vm4, %v2430_v27, %v9580_v45  ;;  %v2431_v45 = vsel %vm2423_vm3, %v2380_v60, %v9376_v38 }
 0x256   : > { %v2028_v3 = vpop.permute.xlu1 %2027  ;;  %v2482_v59 = vsel %vm2474_vm4, %v2431_v45, %v9578_v34  ;;  %v9916_v34 = vld [vmem:[#allocation2 + $0xd8] sm:$0xff] }
 0x257   : > { %v2026_v37 = vpop.permute.xlu0 %2025  ;;  %v2633_v32 = vsel %vm2627_vm7, %v2582_v43, %v2028_v3 }
 0x258   : > { %1702 = vrot.lane.b32.xlu1 %v767_v35, %s13327_s13  ;;  %v2632_v23 = vsel %vm2627_vm7, %v2581_v30, %v2026_v37  ;;  %v8572_v35 = vld [vmem:[#allocation2 + $0xca] sm:$0xff] }
 0x259   : > { %2208 = vrot.lane.b32.xlu0 %v8568_v47, %s13317_s14 }
 0x25a   : > { %v1675_v44 = vpop.permute.xlu1 %1674 }
 0x25b   : > { %v2181_v62 = vpop.permute.xlu0 %2180  ;;  %v2532_v20 = vsel %vm2525_vm5, %v2481_v17, %v1675_v44  ;;  %v8578_v17 = vld [vmem:[#allocation2 + $0xf1] sm:$0xff] }
 0x25c   : > { %v2683_v21 = vsel %vm2678_vm8, %v2632_v23, %v2181_v62  ;;  %1704 = vrot.lane.b32.xlu1 %v768_v11, %s13327_s13  ;;  %v2330_v23 = vsel %vm434_vm0, %v9568_v16, %v9084_v2  ;;  %v8575_v62 = vld [vmem:[#allocation2 + $0xd9] sm:$0xff]  ;;  %v2331_v2 = vsel %vm434_vm0, %v9597_v9, %v9082_v63 }
 0x25d   : > { %2210 = vrot.lane.b32.xlu0 %v8569_v15, %s13317_s14  ;;  %8216 = vmatprep.mubr.msk.f32.mxu0 %vm2748_vm9, %v2683_v21  ;;  %v2381_v21 = vsel %vm2372_vm2, %v2330_v23, %v9234_v50  ;;  %v772_v50 = vld [vmem:[#allocation2 + $0xde] sm:$0xff] }
 0x25e   : > { %v1677_v52 = vpop.permute.xlu1 %1676  ;;  %v2432_v15 = vsel %vm2423_vm3, %v2381_v21, %v9384_v46 }
 0x25f   : > { %v2183_v22 = vpop.permute.xlu0 %2182  ;;  %v2533_v28 = vsel %vm2525_vm5, %v2482_v59, %v1677_v52  ;;  %v2483_v52 = vsel %vm2474_vm4, %v2432_v15, %v9586_v5  ;;  %v8581_v15 = vld [vmem:[#allocation2 + $0xf2] sm:$0xff] }
 0x260   : > { %v2684_v48 = vsel %vm2678_vm8, %v2633_v32, %v2183_v22  ;;  %1904 = vrot.lane.b32.xlu1 %v9871_v8, %s13321_s30  ;;  %v8576_v32 = vld [vmem:[#allocation2 + $0xda] sm:$0xff]  ;;  %v2382_v22 = vsel %vm2372_vm2, %v2331_v2, %v9232_v54 }
 0x261   : > { %1902 = vrot.lane.b32.xlu0 %v9874_v24, %s13321_s30  ;;  %8217 = vmatmul.mubr.msk.f32.gmra.mxu0 %vm2748_vm9, %v2684_v48  ;;  %v2433_v5 = vsel %vm2423_vm3, %v2382_v22, %v9382_v29  ;;  %v9997_v2 = vld [vmem:[#allocation2 + $0x100] sm:$0xff] }
 0x262   : > { %v1877_v14 = vpop.permute.xlu1 %1876  ;;  %v2484_v63 = vsel %vm2474_vm4, %v2433_v5, %v9584_v18  ;;  %v9958_v18 = vld [vmem:[#allocation2 + $0xe8] sm:$0xff] }
 0x263   : > { %v1875_v1 = vpop.permute.xlu0 %1874  ;;  %v2584_v31 = vsel %vm2576_vm6, %v2533_v28, %v1877_v14  ;;  %v13514_v28 = vld [vmem:[#allocation137_spill] sm:$0xff]  ;;  %v8582_v5 = vld [vmem:[#allocation2 + $0x101] sm:$0xff] }
 0x264   : > { %2059 = vrot.lane.b32.xlu1 %v8570_v25, %s13319_s12  ;;  %v2583_v41 = vsel %vm2576_vm6, %v2532_v20, %v1875_v1  ;;  %v8579_v20 = vld [vmem:[#allocation2 + $0xe9] sm:$0xff] }
 0x265   : > { %2057 = vrot.lane.b32.xlu0 %v8571_v56, %s13319_s12  ;;  %v9955_v56 = vld [vmem:[#allocation2 + $0xf0] sm:$0xff] }
 0x266   : > { %v2032_v49 = vpop.permute.xlu1 %2031 }
 0x267   : > { %v2030_v13 = vpop.permute.xlu0 %2029  ;;  %v2635_v47 = vsel %vm2627_vm7, %v2584_v31, %v2032_v49  ;;  %v774_v31 = vld [vmem:[#allocation2 + $0xee] sm:$0xff] }
 0x268   : > { %1706 = vrot.lane.b32.xlu1 %v769_v42, %s13327_s13  ;;  %v2634_v33 = vsel %vm2627_vm7, %v2583_v41, %v2030_v13 }
 0x269   : > { %2212 = vrot.lane.b32.xlu0 %v8572_v35, %s13317_s14  ;;  %v773_v35 = vld [vmem:[#allocation2 + $0xe6] sm:$0xff] }
 0x26a   : > { %v1679_v3 = vpop.permute.xlu1 %1678 }
 0x26b   : > { %v2185_v37 = vpop.permute.xlu0 %2184  ;;  %v2534_v16 = vsel %vm2525_vm5, %v2483_v52, %v1679_v3  ;;  %v13511_v3 = vld [vmem:[#allocation87_spill] sm:$0xff] }
 0x26c   : > { %v2685_v36 = vsel %vm2678_vm8, %v2634_v33, %v2185_v37  ;;  %1708 = vrot.lane.b32.xlu1 %v770_v58, %s13327_s13  ;;  %v13510_v58 = vld [vmem:[#allocation47_spill] sm:$0xff] }
 0x26d   : > { %2214 = vrot.lane.b32.xlu0 %v8573_v57, %s13317_s14  ;;  %8219 = vmatprep.mubr.msk.f32.mxu0 %vm2748_vm9, %v2685_v36  ;;  %v2383_v60 = vsel %vm2372_vm2, %v2332_v61, %v13510_v58  ;;  %v13512_v37 = vld [vmem:[#allocation127_spill] sm:$0xff]  ;;  %v8580_v57 = vld [vmem:[#allocation2 + $0xea] sm:$0xff]  ;;  %v8584_v58 = vld [vmem:[#allocation2 + $0xfa] sm:$0xff] }
 0x26e   : > { %v1681_v38 = vpop.permute.xlu1 %1680  ;;  %v2434_v45 = vsel %vm2423_vm3, %v2383_v60, %v13511_v3  ;;  %v13513_v36 = vld [vmem:[#allocation7_spill] sm:$0xff] }
 0x26f   : > { %v2187_v11 = vpop.permute.xlu0 %2186  ;;  %v2535_v25 = vsel %vm2525_vm5, %v2484_v63, %v1681_v38  ;;  %v2485_v59 = vsel %vm2474_vm4, %v2434_v45, %v13512_v37  ;;  %v2333_v6 = vsel %vm434_vm0, %v13514_v28, %v13513_v36  ;;  %v13515_v38 = vld [vmem:[#allocation46_spill] sm:$0xff]  ;;  %v13524_v61 = vld [vmem:[#allocation147_spill] sm:$0xff]  ;;  %v13526_v37 = vld [vmem:[#allocation88_spill] sm:$0xff] }
 0x270   : > { %v2686_v40 = vsel %vm2678_vm8, %v2635_v47, %v2187_v11  ;;  %1908 = vrot.lane.b32.xlu1 %v9913_v51, %s13321_s30  ;;  %v2384_v47 = vsel %vm2372_vm2, %v2333_v6, %v13515_v38  ;;  %v776_v60 = vld [vmem:[#allocation2 + $0xfe] sm:$0xff]  ;;  %v13527_v6 = vld [vmem:[#allocation128_spill] sm:$0xff] }
 0x271   : > { %1906 = vrot.lane.b32.xlu0 %v9916_v34, %s13321_s30  ;;  %8220 = vmatmul.mubr.msk.f32.gmra.mxu0 %vm2748_vm9, %v2686_v40  ;;  %v8585_v38 = vld [vmem:[#allocation2 + $0x102] sm:$0xff] }
 0x272   : > { %v1881_v30 = vpop.permute.xlu1 %1880 }
 0x273   : > { %v1879_v44 = vpop.permute.xlu0 %1878  ;;  %v2586_v54 = vsel %vm2576_vm6, %v2535_v25, %v1881_v30  ;;  %v13516_v30 = vld [vmem:[#allocation86_spill] sm:$0xff] }
 0x274   : > { %2063 = vrot.lane.b32.xlu1 %v8574_v0, %s13319_s12  ;;  %v2585_v46 = vsel %vm2576_vm6, %v2534_v16, %v1879_v44  ;;  %v2435_v44 = vsel %vm2423_vm3, %v2384_v47, %v13516_v30  ;;  %v775_v25 = vld [vmem:[#allocation2 + $0xf6] sm:$0xff] }
 0x275   : > { %2061 = vrot.lane.b32.xlu0 %v8575_v62, %s13319_s12  ;;  %v13517_v62 = vld [vmem:[#allocation126_spill] sm:$0xff] }
 0x276   : > { %v2036_v26 = vpop.permute.xlu1 %2035 }
 0x277   : > { %v2034_v43 = vpop.permute.xlu0 %2033  ;;  %v2637_v42 = vsel %vm2627_vm7, %v2586_v54, %v2036_v26 }
 0x278   : > { %1710 = vrot.lane.b32.xlu1 %v771_v55, %s13327_s13  ;;  %v2636_v14 = vsel %vm2627_vm7, %v2585_v46, %v2034_v43  ;;  %v2486_v55 = vsel %vm2474_vm4, %v2435_v44, %v13517_v62 }
 0x279   : > { %2216 = vrot.lane.b32.xlu0 %v8576_v32, %s13317_s14 }
 0x27a   : > { %v1683_v48 = vpop.permute.xlu1 %1682 }
 0x27b   : > { %v2189_v1 = vpop.permute.xlu0 %2188  ;;  %v2536_v19 = vsel %vm2525_vm5, %v2485_v59, %v1683_v48 }
 0x27c   : > { %v2687_v9 = vsel %vm2678_vm8, %v2636_v14, %v2189_v1  ;;  %1712 = vrot.lane.b32.xlu1 %v772_v50, %s13327_s13  ;;  %v10000_v50 = vld [vmem:[#allocation2 + $0xf8] sm:$0xff]  ;;  %v13519_v1 = vld [vmem:[#allocation135_spill] sm:$0xff] }
 0x27d   : > { %2218 = vrot.lane.b32.xlu0 %v8577_v4, %s13317_s14  ;;  %8222 = vmatprep.mubr.msk.f32.mxu0 %vm2748_vm9, %v2687_v9  ;;  %v13518_v14 = vld [vmem:[#allocation9_spill] sm:$0xff] }
 0x27e   : > { %v1685_v29 = vpop.permute.xlu1 %1684  ;;  %v2334_v63 = vsel %vm434_vm0, %v13519_v1, %v13518_v14  ;;  %v8583_v9 = vld [vmem:[#allocation2 + $0xf9] sm:$0xff]  ;;  %v13532_v1 = vld [vmem:[#allocation131_spill] sm:$0xff] }
 0x27f   : > { %v2191_v53 = vpop.permute.xlu0 %2190  ;;  %v2537_v26 = vsel %vm2525_vm5, %v2486_v55, %v1685_v29  ;;  %v13520_v4 = vld [vmem:[#allocation49_spill] sm:$0xff] }
 0x280   : > { %v2688_v49 = vsel %vm2678_vm8, %v2637_v42, %v2191_v53  ;;  %1912 = vrot.lane.b32.xlu1 %v9955_v56, %s13321_s30  ;;  %v2385_v54 = vsel %vm2372_vm2, %v2334_v63, %v13520_v4  ;;  %v13521_v42 = vld [vmem:[#allocation89_spill] sm:$0xff] }
 0x281   : > { %1910 = vrot.lane.b32.xlu0 %v9958_v18, %s13321_s30  ;;  %8223 = vmatmul.mubr.msk.f32.gmra.mxu0 %vm2748_vm9, %v2688_v49  ;;  %v2436_v53 = vsel %vm2423_vm3, %v2385_v54, %v13521_v42  ;;  %v778_v42 = vld [vmem:[#allocation2 + $0x10e] sm:$0xff] }
 0x282   : > { %v1885_v27 = vpop.permute.xlu1 %1884 }
 0x283   : > { %v1883_v13 = vpop.permute.xlu0 %1882  ;;  %v2588_v43 = vsel %vm2576_vm6, %v2537_v26, %v1885_v27  ;;  %v13522_v27 = vld [vmem:[#allocation129_spill] sm:$0xff]  ;;  %v13528_v26 = vld [vmem:[#allocation11_spill] sm:$0xff] }
 0x284   : > { %2067 = vrot.lane.b32.xlu1 %v8578_v17, %s13319_s12  ;;  %v2587_v11 = vsel %vm2576_vm6, %v2536_v19, %v1883_v13  ;;  %v2487_v13 = vsel %vm2474_vm4, %v2436_v53, %v13522_v27  ;;  %v13523_v17 = vld [vmem:[#allocation8_spill] sm:$0xff]  ;;  %v13535_v53 = vld [vmem:[#allocation50_spill] sm:$0xff] }
 0x285   : > { %2065 = vrot.lane.b32.xlu0 %v8579_v20, %s13319_s12  ;;  %v2335_v20 = vsel %vm434_vm0, %v13524_v61, %v13523_v17  ;;  %v13536_v17 = vld [vmem:[#allocation90_spill] sm:$0xff] }
 0x286   : > { %v2040_v41 = vpop.permute.xlu1 %2039 }
 0x287   : > { %v2038_v33 = vpop.permute.xlu0 %2037  ;;  %v2639_v16 = vsel %vm2627_vm7, %v2588_v43, %v2040_v41  ;;  %v13525_v41 = vld [vmem:[#allocation48_spill] sm:$0xff] }
 0x288   : > { %1714 = vrot.lane.b32.xlu1 %v773_v35, %s13327_s13  ;;  %v2638_v0 = vsel %vm2627_vm7, %v2587_v11, %v2038_v33  ;;  %v2386_v3 = vsel %vm2372_vm2, %v2335_v20, %v13525_v41 }
 0x289   : > { %2220 = vrot.lane.b32.xlu0 %v8580_v57, %s13317_s14  ;;  %v2437_v59 = vsel %vm2423_vm3, %v2386_v3, %v13526_v37 }
 0x28a   : > { %v1687_v40 = vpop.permute.xlu1 %1686  ;;  %v2488_v19 = vsel %vm2474_vm4, %v2437_v59, %v13527_v6  ;;  %v10081_v59 = vld [vmem:[#allocation2 + $0x120] sm:$0xff]  ;;  %v10084_v6 = vld [vmem:[#allocation2 + $0x118] sm:$0xff] }
 0x28b   : > { %v2193_v23 = vpop.permute.xlu0 %2192  ;;  %v2538_v35 = vsel %vm2525_vm5, %v2487_v13, %v1687_v40  ;;  %v10039_v40 = vld [vmem:[#allocation2 + $0x110] sm:$0xff] }
 0x28c   : > { %v2689_v21 = vsel %vm2678_vm8, %v2638_v0, %v2193_v23  ;;  %1716 = vrot.lane.b32.xlu1 %v774_v31, %s13327_s13  ;;  %v10042_v0 = vld [vmem:[#allocation2 + $0x108] sm:$0xff] }
 0x28d   : > { %2222 = vrot.lane.b32.xlu0 %v8581_v15, %s13317_s14  ;;  %8225 = vmatprep.mubr.msk.f32.mxu0 %vm2748_vm9, %v2689_v21  ;;  %v8586_v21 = vld [vmem:[#allocation2 + $0x111] sm:$0xff] }
 0x28e   : > { %v1689_v52 = vpop.permute.xlu1 %1688  ;;  %v13529_v15 = vld [vmem:[#allocation145_spill] sm:$0xff] }
 0x28f   : > { %v2195_v32 = vpop.permute.xlu0 %2194  ;;  %v2539_v31 = vsel %vm2525_vm5, %v2488_v19, %v1689_v52  ;;  %v2336_v43 = vsel %vm434_vm0, %v13529_v15, %v13528_v26  ;;  %v8587_v52 = vld [vmem:[#allocation2 + $0x109] sm:$0xff]  ;;  %v13541_v26 = vld [vmem:[#allocation93_spill] sm:$0xff] }
 0x290   : > { %v2690_v22 = vsel %vm2678_vm8, %v2639_v16, %v2195_v32  ;;  %1916 = vrot.lane.b32.xlu1 %v9997_v2, %s13321_s30  ;;  %v777_v16 = vld [vmem:[#allocation2 + $0x106] sm:$0xff] }
 0x291   : > { %1914 = vrot.lane.b32.xlu0 %v10000_v50, %s13321_s30  ;;  %8226 = vmatmul.mubr.msk.f32.gmra.mxu0 %vm2748_vm9, %v2690_v22  ;;  %v13530_v32 = vld [vmem:[#allocation51_spill] sm:$0xff] }
 0x292   : > { %v1889_v46 = vpop.permute.xlu1 %1888  ;;  %v2387_v22 = vsel %vm2372_vm2, %v2336_v43, %v13530_v32  ;;  %v13543_v32 = vld [vmem:[#allocation12_spill] sm:$0xff] }
 0x293   : > { %v1887_v48 = vpop.permute.xlu0 %1886  ;;  %v2590_v47 = vsel %vm2576_vm6, %v2539_v31, %v1889_v46 }
 0x294   : > { %2071 = vrot.lane.b32.xlu1 %v8582_v5, %s13319_s12  ;;  %v2589_v45 = vsel %vm2576_vm6, %v2538_v35, %v1887_v48  ;;  %v13531_v48 = vld [vmem:[#allocation91_spill] sm:$0xff] }
 0x295   : > { %2069 = vrot.lane.b32.xlu0 %v8583_v9, %s13319_s12  ;;  %v2438_v5 = vsel %vm2423_vm3, %v2387_v22, %v13531_v48  ;;  %v13533_v9 = vld [vmem:[#allocation10_spill] sm:$0xff]  ;;  %v13544_v22 = vld [vmem:[#allocation167_spill] sm:$0xff] }
 0x296   : > { %v2044_v29 = vpop.permute.xlu1 %2043  ;;  %v2489_v63 = vsel %vm2474_vm4, %v2438_v5, %v13532_v1  ;;  %v8592_v5 = vld [vmem:[#allocation2 + $0x11a] sm:$0xff]  ;;  %v13545_v1 = vld [vmem:[#allocation52_spill] sm:$0xff] }
 0x297   : > { %v2042_v49 = vpop.permute.xlu0 %2041  ;;  %v2641_v30 = vsel %vm2627_vm7, %v2590_v47, %v2044_v29  ;;  %v8588_v29 = vld [vmem:[#allocation2 + $0x10a] sm:$0xff]  ;;  %v13538_v47 = vld [vmem:[#allocation13_spill] sm:$0xff] }
 0x298   : > { %1718 = vrot.lane.b32.xlu1 %v775_v25, %s13327_s13  ;;  %v2640_v36 = vsel %vm2627_vm7, %v2589_v45, %v2042_v49  ;;  %v13534_v25 = vld [vmem:[#allocation157_spill] sm:$0xff] }
 0x299   : > { %2224 = vrot.lane.b32.xlu0 %v8584_v58, %s13317_s14  ;;  %v2337_v4 = vsel %vm434_vm0, %v13534_v25, %v13533_v9  ;;  %v13537_v58 = vld [vmem:[#allocation130_spill] sm:$0xff]  ;;  %v8589_v45 = vld [vmem:[#allocation2 + $0x112] sm:$0xff] }
 0x29a   : > { %v1691_v33 = vpop.permute.xlu1 %1690  ;;  %v2388_v49 = vsel %vm2372_vm2, %v2337_v4, %v13535_v53  ;;  %v13546_v4 = vld [vmem:[#allocation92_spill] sm:$0xff] }
 0x29b   : > { %v2197_v28 = vpop.permute.xlu0 %2196  ;;  %v2540_v54 = vsel %vm2525_vm5, %v2489_v63, %v1691_v33  ;;  %v2439_v61 = vsel %vm2423_vm3, %v2388_v49, %v13536_v17  ;;  %v13547_v53 = vld [vmem:[#allocation132_spill] sm:$0xff]  ;;  %v8593_v17 = vld [vmem:[#allocation2 + $0x122] sm:$0xff] }
 0x29c   : > { %v2691_v57 = vsel %vm2678_vm8, %v2640_v36, %v2197_v28  ;;  %1720 = vrot.lane.b32.xlu1 %v776_v60, %s13327_s13  ;;  %v2490_v60 = vsel %vm2474_vm4, %v2439_v61, %v13537_v58 }
 0x29d   : > { %2226 = vrot.lane.b32.xlu0 %v8585_v38, %s13317_s14  ;;  %8228 = vmatprep.mubr.msk.f32.mxu0 %vm2748_vm9, %v2691_v57  ;;  %v8590_v38 = vld [vmem:[#allocation2 + $0x121] sm:$0xff] }
 0x29e   : > { %v1693_v11 = vpop.permute.xlu1 %1692 }
 0x29f   : > { %v2199_v44 = vpop.permute.xlu0 %2198  ;;  %v2541_v3 = vsel %vm2525_vm5, %v2490_v60, %v1693_v11  ;;  %v13539_v11 = vld [vmem:[#allocation155_spill] sm:$0xff] }
 0x2a0   : > { %v2692_v23 = vsel %vm2678_vm8, %v2641_v30, %v2199_v44  ;;  %1920 = vrot.lane.b32.xlu1 %v10039_v40, %s13321_s30  ;;  %v2338_v30 = vsel %vm434_vm0, %v13539_v11, %v13538_v47  ;;  %v8591_v44 = vld [vmem:[#allocation2 + $0x119] sm:$0xff] }
 0x2a1   : > { %1918 = vrot.lane.b32.xlu0 %v10042_v0, %s13321_s30  ;;  %8229 = vmatmul.mubr.msk.f32.gmra.mxu0 %vm2748_vm9, %v2692_v23  ;;  %v779_v23 = vld [vmem:[#allocation2 + $0x116] sm:$0xff] }
 0x2a2   : > { %v1893_v62 = vpop.permute.xlu1 %1892 }
 0x2a3   : > { %v1891_v55 = vpop.permute.xlu0 %1890  ;;  %v2592_v33 = vsel %vm2576_vm6, %v2541_v3, %v1893_v62  ;;  %v13540_v62 = vld [vmem:[#allocation53_spill] sm:$0xff] }
 0x2a4   : > { %2075 = vrot.lane.b32.xlu1 %v8586_v21, %s13319_s12  ;;  %v2591_v27 = vsel %vm2576_vm6, %v2540_v54, %v1891_v55  ;;  %v2389_v55 = vsel %vm2372_vm2, %v2338_v30, %v13540_v62  ;;  %v13551_v30 = vld [vmem:[#allocation95_spill] sm:$0xff]  ;;  %v13552_v62 = vld [vmem:[#allocation136_spill] sm:$0xff] }
 0x2a5   : > { %2073 = vrot.lane.b32.xlu0 %v8587_v52, %s13319_s12  ;;  %v2440_v15 = vsel %vm2423_vm3, %v2389_v55, %v13541_v26  ;;  %v13542_v52 = vld [vmem:[#allocation133_spill] sm:$0xff]  ;;  %v13554_v26 = vld [vmem:[#allocation175_spill] sm:$0xff] }
 0x2a6   : > { %v2048_v46 = vpop.permute.xlu1 %2047 }
 0x2a7   : > { %v2046_v14 = vpop.permute.xlu0 %2045  ;;  %v2643_v36 = vsel %vm2627_vm7, %v2592_v33, %v2048_v46  ;;  %v2339_v46 = vsel %vm434_vm0, %v13544_v22, %v13543_v32  ;;  %v13555_v32 = vld [vmem:[#allocation54_spill] sm:$0xff] }
 0x2a8   : > { %1722 = vrot.lane.b32.xlu1 %v777_v16, %s13327_s13  ;;  %v2642_v20 = vsel %vm2627_vm7, %v2591_v27, %v2046_v14  ;;  %v2491_v16 = vsel %vm2474_vm4, %v2440_v15, %v13542_v52  ;;  %v780_v14 = vld [vmem:[#allocation2 + $0x11e] sm:$0xff]  ;;  %v2390_v63 = vsel %vm2372_vm2, %v2339_v46, %v13545_v1  ;;  %v8596_v52 = vld [vmem:[#allocation2 + $0x12a] sm:$0xff] }
 0x2a9   : > { %2228 = vrot.lane.b32.xlu0 %v8588_v29, %s13317_s14  ;;  %v2441_v54 = vsel %vm2423_vm3, %v2390_v63, %v13546_v4 }
 0x2aa   : > { %v1695_v13 = vpop.permute.xlu1 %1694  ;;  %v2492_v49 = vsel %vm2474_vm4, %v2441_v54, %v13547_v53 }
 0x2ab   : > { %v2201_v35 = vpop.permute.xlu0 %2200  ;;  %v2542_v48 = vsel %vm2525_vm5, %v2491_v16, %v1695_v13  ;;  %v782_v16 = vld [vmem:[#allocation2 + $0x12e] sm:$0xff] }
 0x2ac   : > { %v2693_v41 = vsel %vm2678_vm8, %v2642_v20, %v2201_v35  ;;  %1724 = vrot.lane.b32.xlu1 %v778_v42, %s13327_s13  ;;  %v10123_v35 = vld [vmem:[#allocation2 + $0x130] sm:$0xff] }
 0x2ad   : > { %2230 = vrot.lane.b32.xlu0 %v8589_v45, %s13317_s14  ;;  %8231 = vmatprep.mubr.msk.f32.mxu0 %vm2748_vm9, %v2693_v41  ;;  %v10126_v41 = vld [vmem:[#allocation2 + $0x128] sm:$0xff] }
 0x2ae   : > { %v1697_v37 = vpop.permute.xlu1 %1696 }
 0x2af   : > { %v2203_v28 = vpop.permute.xlu0 %2202  ;;  %v2543_v13 = vsel %vm2525_vm5, %v2492_v49, %v1697_v37  ;;  %v8594_v37 = vld [vmem:[#allocation2 + $0x131] sm:$0xff]  ;;  %v537_v49 = vld [vmem:[#allocation2 + $0x140] sm:$0xff] }
 0x2b0   : > { %v2694_v19 = vsel %vm2678_vm8, %v2643_v36, %v2203_v28  ;;  %1924 = vrot.lane.b32.xlu1 %v10081_v59, %s13321_s30  ;;  %v13548_v36 = vld [vmem:[#allocation15_spill] sm:$0xff]  ;;  %v13549_v28 = vld [vmem:[#allocation165_spill] sm:$0xff] }
 0x2b1   : > { %1922 = vrot.lane.b32.xlu0 %v10084_v6, %s13321_s30  ;;  %8232 = vmatmul.mubr.msk.f32.gmra.mxu0 %vm2748_vm9, %v2694_v19  ;;  %v2340_v19 = vsel %vm434_vm0, %v13549_v28, %v13548_v36  ;;  %v783_v36 = vld [vmem:[#allocation2 + $0x136] sm:$0xff] }
 0x2b2   : > { %v1897_v57 = vpop.permute.xlu1 %1896  ;;  %v13560_v28 = vld [vmem:[#allocation57_spill] sm:$0xff] }
 0x2b3   : > { %v1895_v31 = vpop.permute.xlu0 %1894  ;;  %v2594_v61 = vsel %vm2576_vm6, %v2543_v13, %v1897_v57  ;;  %v8595_v57 = vld [vmem:[#allocation2 + $0x129] sm:$0xff] }
 0x2b4   : > { %2079 = vrot.lane.b32.xlu1 %v8590_v38, %s13319_s12  ;;  %v2593_v9 = vsel %vm2576_vm6, %v2542_v48, %v1895_v31  ;;  %v781_v31 = vld [vmem:[#allocation2 + $0x126] sm:$0xff] }
 0x2b5   : > { %2077 = vrot.lane.b32.xlu0 %v8591_v44, %s13319_s12  ;;  %v13550_v38 = vld [vmem:[#allocation55_spill] sm:$0xff] }
 0x2b6   : > { %v2052_v21 = vpop.permute.xlu1 %2051  ;;  %v2391_v47 = vsel %vm2372_vm2, %v2340_v19, %v13550_v38 }
 0x2b7   : > { %v2050_v43 = vpop.permute.xlu0 %2049  ;;  %v2645_v58 = vsel %vm2627_vm7, %v2594_v61, %v2052_v21  ;;  %v2442_v44 = vsel %vm2423_vm3, %v2391_v47, %v13551_v30  ;;  %v13553_v21 = vld [vmem:[#allocation14_spill] sm:$0xff] }
 0x2b8   : > { %1726 = vrot.lane.b32.xlu1 %v779_v23, %s13327_s13  ;;  %v2644_v29 = vsel %vm2627_vm7, %v2593_v9, %v2050_v43  ;;  %v2493_v55 = vsel %vm2474_vm4, %v2442_v44, %v13552_v62  ;;  %v2341_v15 = vsel %vm434_vm0, %v13554_v26, %v13553_v21  ;;  %v13557_v9 = vld [vmem:[#allocation134_spill] sm:$0xff]  ;;  %v13563_v44 = vld [vmem:[#allocation16_spill] sm:$0xff] }
 0x2b9   : > { %2232 = vrot.lane.b32.xlu0 %v8592_v5, %s13317_s14  ;;  %v2392_v22 = vsel %vm2372_vm2, %v2341_v15, %v13555_v32  ;;  %v13556_v5 = vld [vmem:[#allocation94_spill] sm:$0xff]  ;;  %v13564_v26 = vld [vmem:[#allocation56_spill] sm:$0xff] }
 0x2ba   : > { %v1699_v25 = vpop.permute.xlu1 %1698  ;;  %v784_v21 = vld [vmem:[#allocation2 + $0x13e] sm:$0xff] }
 0x2bb   : > { %v2205_v42 = vpop.permute.xlu0 %2204  ;;  %v2544_v43 = vsel %vm2525_vm5, %v2493_v55, %v1699_v25  ;;  %v8600_v55 = vld [vmem:[#allocation2 + $0x13a] sm:$0xff] }
 0x2bc   : > { %v2695_v27 = vsel %vm2678_vm8, %v2644_v29, %v2205_v42  ;;  %1728 = vrot.lane.b32.xlu1 %v780_v14, %s13327_s13  ;;  %v2443_v14 = vsel %vm2423_vm3, %v2392_v22, %v13556_v5  ;;  %v8597_v29 = vld [vmem:[#allocation2 + $0x132] sm:$0xff]  ;;  %v13566_v5 = vld [vmem:[#allocation138_spill] sm:$0xff] }
 0x2bd   : > { %2234 = vrot.lane.b32.xlu0 %v8593_v17, %s13317_s14  ;;  %8234 = vmatprep.mubr.msk.f32.mxu0 %vm2748_vm9, %v2695_v27  ;;  %v2494_v4 = vsel %vm2474_vm4, %v2443_v14, %v13557_v9  ;;  %v10166_v17 = vld [vmem:[#allocation2 + $0x138] sm:$0xff] }
 0x2be   : > { %v1701_v20 = vpop.permute.xlu1 %1700 }
 0x2bf   : > { %v2207_v60 = vpop.permute.xlu0 %2206  ;;  %v2545_v54 = vsel %vm2525_vm5, %v2494_v4, %v1701_v20  ;;  %v539_v4 = vld [vmem:[#allocation2 + $0x150] sm:$0xff] }
 0x2c0   : > { %v2696_v3 = vsel %vm2678_vm8, %v2645_v58, %v2207_v60  ;;  %1928 = vrot.lane.b32.xlu1 %v10123_v35, %s13321_s30  ;;  %v8598_v60 = vld [vmem:[#allocation2 + $0x141] sm:$0xff] }
 0x2c1   : > { %1926 = vrot.lane.b32.xlu0 %v10126_v41, %s13321_s30  ;;  %8235 = vmatmul.mubr.msk.f32.gmra.mxu0 %vm2748_vm9, %v2696_v3  ;;  %v13558_v3 = vld [vmem:[#allocation17_spill] sm:$0xff] }
 0x2c2   : > { %v1901_v45 = vpop.permute.xlu1 %1900 }
 0x2c3   : > { %v1899_v33 = vpop.permute.xlu0 %1898  ;;  %v2596_v42 = vsel %vm2576_vm6, %v2545_v54, %v1901_v45  ;;  %v13559_v45 = vld [vmem:[#allocation174_spill] sm:$0xff] }
 0x2c4   : > { %2083 = vrot.lane.b32.xlu1 %v8594_v37, %s13319_s12  ;;  %v2595_v46 = vsel %vm2576_vm6, %v2544_v43, %v1899_v33  ;;  %v2342_v33 = vsel %vm434_vm0, %v13559_v45, %v13558_v3  ;;  %v8599_v37 = vld [vmem:[#allocation2 + $0x139] sm:$0xff] }
 0x2c5   : > { %2081 = vrot.lane.b32.xlu0 %v8595_v57, %s13319_s12  ;;  %v2393_v19 = vsel %vm2372_vm2, %v2342_v33, %v13560_v28  ;;  %v13569_v33 = vld [vmem:[#allocation99_spill] sm:$0xff]  ;;  %v13570_v28 = vld [vmem:[#allocation141_spill] sm:$0xff] }
 0x2c6   : > { %v2056_v11 = vpop.permute.xlu1 %2055 }
 0x2c7   : > { %v2054_v23 = vpop.permute.xlu0 %2053  ;;  %v2647_v27 = vsel %vm2627_vm7, %v2596_v42, %v2056_v11  ;;  %v13562_v11 = vld [vmem:[#allocation139_spill] sm:$0xff] }
 0x2c8   : > { %1730 = vrot.lane.b32.xlu1 %v781_v31, %s13327_s13  ;;  %v2646_v1 = vsel %vm2627_vm7, %v2595_v46, %v2054_v23  ;;  %v13561_v31 = vld [vmem:[#allocation97_spill] sm:$0xff]  ;;  %v2343_v23 = vsel %vm434_vm0, %v9779_v39, %v13563_v44 }
 0x2c9   : > { %2236 = vrot.lane.b32.xlu0 %v8596_v52, %s13317_s14  ;;  %v2444_v38 = vsel %vm2423_vm3, %v2393_v19, %v13561_v31  ;;  %v2394_v15 = vsel %vm2372_vm2, %v2343_v23, %v13564_v26 }
 0x2ca   : > { %v1703_v48 = vpop.permute.xlu1 %1702  ;;  %v2495_v30 = vsel %vm2474_vm4, %v2444_v38, %v13562_v11  ;;  %v8604_v38 = vld [vmem:[#allocation2 + $0x14a] sm:$0xff]  ;;  %v13572_v11 = vld [vmem:[#allocation58_spill] sm:$0xff] }
 0x2cb   : > { %v2209_v63 = vpop.permute.xlu0 %2208  ;;  %v2546_v62 = vsel %vm2525_vm5, %v2495_v30, %v1703_v48 }
 0x2cc   : > { %v2697_v25 = vsel %vm2678_vm8, %v2646_v1, %v2209_v63  ;;  %1732 = vrot.lane.b32.xlu1 %v782_v16, %s13327_s13  ;;  %v13565_v16 = vld [vmem:[#allocation96_spill] sm:$0xff]  ;;  %v8601_v1 = vld [vmem:[#allocation2 + $0x142] sm:$0xff] }
 0x2cd   : > { %2238 = vrot.lane.b32.xlu0 %v8597_v29, %s13317_s14  ;;  %8237 = vmatprep.mubr.msk.f32.mxu0 %vm2748_vm9, %v2697_v25  ;;  %v2445_v32 = vsel %vm2423_vm3, %v2394_v15, %v13565_v16  ;;  %v10205_v29 = vld [vmem:[#allocation2 + $0x148] sm:$0xff]  ;;  %v8605_v16 = vld [vmem:[#allocation2 + $0x152] sm:$0xff] }
 0x2ce   : > { %v1705_v53 = vpop.permute.xlu1 %1704  ;;  %v2496_v39 = vsel %vm2474_vm4, %v2445_v32, %v13566_v5  ;;  %v13574_v15 = vld [vmem:[#allocation140_spill] sm:$0xff] }
 0x2cf   : > { %v2211_v13 = vpop.permute.xlu0 %2210  ;;  %v2547_v14 = vsel %vm2525_vm5, %v2496_v39, %v1705_v53 }
 0x2d0   : > { %v2698_v61 = vsel %vm2678_vm8, %v2647_v27, %v2211_v13  ;;  %1932 = vrot.lane.b32.xlu1 %v537_v49, %s13321_s30  ;;  %v8602_v27 = vld [vmem:[#allocation2 + $0x151] sm:$0xff]  ;;  %v13567_v13 = vld [vmem:[#allocation19_spill] sm:$0xff] }
 0x2d1   : > { %1930 = vrot.lane.b32.xlu0 %v10166_v17, %s13321_s30  ;;  %8238 = vmatmul.mubr.msk.f32.gmra.mxu0 %vm2748_vm9, %v2698_v61  ;;  %v2344_v61 = vsel %vm434_vm0, %v9773_v12, %v13567_v13  ;;  %v13577_v13 = vld [vmem:[#allocation101_spill] sm:$0xff] }
 0x2d2   : > { %v1905_v20 = vpop.permute.xlu1 %1904 }
 0x2d3   : > { %v1903_v58 = vpop.permute.xlu0 %1902  ;;  %v2598_v63 = vsel %vm2576_vm6, %v2547_v14, %v1905_v20  ;;  %v8603_v20 = vld [vmem:[#allocation2 + $0x149] sm:$0xff] }
 0x2d4   : > { %2087 = vrot.lane.b32.xlu1 %v8598_v60, %s13319_s12  ;;  %v2597_v43 = vsel %vm2576_vm6, %v2546_v62, %v1903_v58  ;;  %v785_v58 = vld [vmem:[#allocation2 + $0x146] sm:$0xff]  ;;  %v13573_v62 = vld [vmem:[#allocation98_spill] sm:$0xff] }
 0x2d5   : > { %2085 = vrot.lane.b32.xlu0 %v8599_v37, %s13319_s12  ;;  %v13568_v60 = vld [vmem:[#allocation59_spill] sm:$0xff] }
 0x2d6   : > { %v2060_v57 = vpop.permute.xlu1 %2059  ;;  %v2395_v3 = vsel %vm2372_vm2, %v2344_v61, %v13568_v60 }
 0x2d7   : > { %v2058_v47 = vpop.permute.xlu0 %2057  ;;  %v2649_v25 = vsel %vm2627_vm7, %v2598_v63, %v2060_v57  ;;  %v2446_v37 = vsel %vm2423_vm3, %v2395_v3, %v13569_v33  ;;  %v13571_v57 = vld [vmem:[#allocation18_spill] sm:$0xff]  ;;  %v13579_v3 = vld [vmem:[#allocation20_spill] sm:$0xff] }
 0x2d8   : > { %1734 = vrot.lane.b32.xlu1 %v783_v36, %s13327_s13  ;;  %v2648_v22 = vsel %vm2627_vm7, %v2597_v43, %v2058_v47  ;;  %v2497_v19 = vsel %vm2474_vm4, %v2446_v37, %v13570_v28  ;;  %v2345_v12 = vsel %vm434_vm0, %v9830_v7, %v13571_v57  ;;  %v786_v47 = vld [vmem:[#allocation2 + $0x14e] sm:$0xff]  ;;  %v8608_v33 = vld [vmem:[#allocation2 + $0x15a] sm:$0xff] }
 0x2d9   : > { %2240 = vrot.lane.b32.xlu0 %v8600_v55, %s13317_s14  ;;  %v2396_v30 = vsel %vm2372_vm2, %v2345_v12, %v13572_v11  ;;  %v788_v37 = vld [vmem:[#allocation2 + $0x15e] sm:$0xff]  ;;  %v13581_v12 = vld [vmem:[#allocation100_spill] sm:$0xff] }
 0x2da   : > { %v1707_v52 = vpop.permute.xlu1 %1706  ;;  %v2447_v55 = vsel %vm2423_vm3, %v2396_v30, %v13573_v62  ;;  %v13582_v11 = vld [vmem:[#allocation142_spill] sm:$0xff] }
 0x2db   : > { %v2213_v46 = vpop.permute.xlu0 %2212  ;;  %v2548_v31 = vsel %vm2525_vm5, %v2497_v19, %v1707_v52  ;;  %v2498_v7 = vsel %vm2474_vm4, %v2447_v55, %v13574_v15 }
 0x2dc   : > { %v2699_v48 = vsel %vm2678_vm8, %v2648_v22, %v2213_v46  ;;  %1736 = vrot.lane.b32.xlu1 %v784_v21, %s13327_s13  ;;  %v541_v46 = vld [vmem:[#allocation2 + $0x160] sm:$0xff] }
 0x2dd   : > { %2242 = vrot.lane.b32.xlu0 %v8601_v1, %s13317_s14  ;;  %8240 = vmatprep.mubr.msk.f32.mxu0 %vm2748_vm9, %v2699_v48  ;;  %v10244_v48 = vld [vmem:[#allocation2 + $0x158] sm:$0xff] }
 0x2de   : > { %v1709_v9 = vpop.permute.xlu1 %1708 }
 0x2df   : > { %v2215_v54 = vpop.permute.xlu0 %2214  ;;  %v2549_v52 = vsel %vm2525_vm5, %v2498_v7, %v1709_v9  ;;  %v8606_v9 = vld [vmem:[#allocation2 + $0x161] sm:$0xff] }
 0x2e0   : > { %v2700_v42 = vsel %vm2678_vm8, %v2649_v25, %v2215_v54  ;;  %1936 = vrot.lane.b32.xlu1 %v539_v4, %s13321_s30  ;;  %v13575_v4 = vld [vmem:[#allocation21_spill] sm:$0xff]  ;;  %v10283_v7 = vld [vmem:[#allocation2 + $0x168] sm:$0xff] }
 0x2e1   : > { %1934 = vrot.lane.b32.xlu0 %v10205_v29, %s13321_s30  ;;  %8241 = vmatmul.mubr.msk.f32.gmra.mxu0 %vm2748_vm9, %v2700_v42  ;;  %v2346_v25 = vsel %vm434_vm0, %v9826_v10, %v13575_v4  ;;  %v8607_v54 = vld [vmem:[#allocation2 + $0x159] sm:$0xff]  ;;  %v2347_v10 = vsel %vm434_vm0, %v9874_v24, %v13579_v3  ;;  %v8612_v3 = vld [vmem:[#allocation2 + $0x16a] sm:$0xff] }
 0x2e2   : > { %v1909_v53 = vpop.permute.xlu1 %1908  ;;  %v787_v42 = vld [vmem:[#allocation2 + $0x156] sm:$0xff] }
 0x2e3   : > { %v1907_v49 = vpop.permute.xlu0 %1906  ;;  %v2600_v32 = vsel %vm2576_vm6, %v2549_v52, %v1909_v53  ;;  %v13576_v53 = vld [vmem:[#allocation61_spill] sm:$0xff] }
 0x2e4   : > { %2091 = vrot.lane.b32.xlu1 %v8602_v27, %s13319_s12  ;;  %v2599_v44 = vsel %vm2576_vm6, %v2548_v31, %v1907_v49  ;;  %v2397_v49 = vsel %vm2372_vm2, %v2346_v25, %v13576_v53  ;;  %v13586_v25 = vld [vmem:[#allocation103_spill] sm:$0xff] }
 0x2e5   : > { %2089 = vrot.lane.b32.xlu0 %v8603_v20, %s13319_s12  ;;  %v2448_v61 = vsel %vm2423_vm3, %v2397_v49, %v13577_v13  ;;  %v13587_v49 = vld [vmem:[#allocation146_spill] sm:$0xff] }
 0x2e6   : > { %v2064_v45 = vpop.permute.xlu1 %2063 }
 0x2e7   : > { %v2062_v36 = vpop.permute.xlu0 %2061  ;;  %v2651_v5 = vsel %vm2627_vm7, %v2600_v32, %v2064_v45  ;;  %v8610_v32 = vld [vmem:[#allocation2 + $0x171] sm:$0xff] }
 0x2e8   : > { %1738 = vrot.lane.b32.xlu1 %v785_v58, %s13327_s13  ;;  %v2650_v21 = vsel %vm2627_vm7, %v2599_v44, %v2062_v36  ;;  %v13578_v58 = vld [vmem:[#allocation143_spill] sm:$0xff]  ;;  %v13580_v36 = vld [vmem:[#allocation60_spill] sm:$0xff] }
 0x2e9   : > { %2244 = vrot.lane.b32.xlu0 %v8604_v38, %s13317_s14  ;;  %v2499_v60 = vsel %vm2474_vm4, %v2448_v61, %v13578_v58  ;;  %v2398_v28 = vsel %vm2372_vm2, %v2347_v10, %v13580_v36  ;;  %v790_v10 = vld [vmem:[#allocation2 + $0x16e] sm:$0xff] }
 0x2ea   : > { %v1711_v23 = vpop.permute.xlu1 %1710  ;;  %v2449_v31 = vsel %vm2423_vm3, %v2398_v28, %v13581_v12  ;;  %v13590_v28 = vld [vmem:[#allocation102_spill] sm:$0xff] }
 0x2eb   : > { %v2217_v26 = vpop.permute.xlu0 %2216  ;;  %v2550_v45 = vsel %vm2525_vm5, %v2499_v60, %v1711_v23  ;;  %v2500_v24 = vsel %vm2474_vm4, %v2449_v31, %v13582_v11  ;;  %v8609_v23 = vld [vmem:[#allocation2 + $0x162] sm:$0xff] }
 0x2ec   : > { %v2701_v43 = vsel %vm2678_vm8, %v2650_v21, %v2217_v26  ;;  %1740 = vrot.lane.b32.xlu1 %v786_v47, %s13327_s13  ;;  %v543_v21 = vld [vmem:[#allocation2 + $0x170] sm:$0xff] }
 0x2ed   : > { %2246 = vrot.lane.b32.xlu0 %v8605_v16, %s13317_s14  ;;  %8243 = vmatprep.mubr.msk.f32.mxu0 %vm2748_vm9, %v2701_v43 }
 0x2ee   : > { %v1713_v22 = vpop.permute.xlu1 %1712 }
 0x2ef   : > { %v2219_v39 = vpop.permute.xlu0 %2218  ;;  %v2551_v44 = vsel %vm2525_vm5, %v2500_v24, %v1713_v22  ;;  %v10294_v22 = vld [vmem:[%s13583_s2] ss:$0 sm:$0xff] }
 0x2f0   : > { %v2702_v14 = vsel %vm2678_vm8, %v2651_v5, %v2219_v39  ;;  %1940 = vrot.lane.b32.xlu1 %v541_v46, %s13321_s30  ;;  %v13584_v46 = vld [vmem:[#allocation23_spill] sm:$0xff] }
 0x2f1   : > { %1938 = vrot.lane.b32.xlu0 %v10244_v48, %s13321_s30  ;;  %8244 = vmatmul.mubr.msk.f32.gmra.mxu0 %vm2748_vm9, %v2702_v14  ;;  %v2348_v5 = vsel %vm434_vm0, %v9871_v8, %v13584_v46  ;;  %v8611_v39 = vld [vmem:[#allocation2 + $0x169] sm:$0xff]  ;;  %v13588_v8 = vld [vmem:[#allocation22_spill] sm:$0xff] }
 0x2f2   : > { %v1913_v1 = vpop.permute.xlu1 %1912  ;;  %v789_v14 = vld [vmem:[#allocation2 + $0x166] sm:$0xff]  ;;  %v2349_v61 = vsel %vm434_vm0, %v9916_v34, %v13588_v8 }
 0x2f3   : > { %v1911_v63 = vpop.permute.xlu0 %1910  ;;  %v2602_v62 = vsel %vm2576_vm6, %v2551_v44, %v1913_v1  ;;  %v13585_v1 = vld [vmem:[#allocation63_spill] sm:$0xff]  ;;  %v8613_v44 = vld [vmem:[#allocation2 + $0x172] sm:$0xff] }
 0x2f4   : > { %2095 = vrot.lane.b32.xlu1 %v8606_v9, %s13319_s12  ;;  %v2601_v19 = vsel %vm2576_vm6, %v2550_v45, %v1911_v63  ;;  %v2399_v63 = vsel %vm2372_vm2, %v2348_v5, %v13585_v1  ;;  %v13589_v45 = vld [vmem:[#allocation62_spill] sm:$0xff] }
 0x2f5   : > { %2093 = vrot.lane.b32.xlu0 %v8607_v54, %s13319_s12  ;;  %v2450_v54 = vsel %vm2423_vm3, %v2399_v63, %v13586_v25  ;;  %v791_v25 = vld [vmem:[#allocation2 + $0x176] sm:$0xff] }
 0x2f6   : > { %v2068_v27 = vpop.permute.xlu1 %2067 }
 0x2f7   : > { %v2066_v20 = vpop.permute.xlu0 %2065  ;;  %v2653_v26 = vsel %vm2627_vm7, %v2602_v62, %v2068_v27  ;;  %v2501_v27 = vsel %vm2474_vm4, %v2450_v54, %v13587_v49  ;;  %v13593_v54 = vld [vmem:[#allocation65_spill] sm:$0xff] }
 0x2f8   : > { %1742 = vrot.lane.b32.xlu1 %v787_v42, %s13327_s13  ;;  %v2652_v38 = vsel %vm2627_vm7, %v2601_v19, %v2066_v20  ;;  %v13594_v49 = vld [vmem:[#allocation105_spill] sm:$0xff] }
 0x2f9   : > { %2248 = vrot.lane.b32.xlu0 %v8608_v33, %s13317_s14  ;;  %v2400_v33 = vsel %vm2372_vm2, %v2349_v61, %v13589_v45  ;;  %v8616_v45 = vld [vmem:[#allocation2 + $0x17a] sm:$0xff] }
 0x2fa   : > { %v1715_v57 = vpop.permute.xlu1 %1714  ;;  %v2451_v19 = vsel %vm2423_vm3, %v2400_v33, %v13590_v28  ;;  %v792_v33 = vld [vmem:[#allocation2 + $0x17e] sm:$0xff] }
 0x2fb   : > { %v2221_v47 = vpop.permute.xlu0 %2220  ;;  %v2552_v20 = vsel %vm2525_vm5, %v2501_v27, %v1715_v57 }
 0x2fc   : > { %v2703_v30 = vsel %vm2678_vm8, %v2652_v38, %v2221_v47  ;;  %1744 = vrot.lane.b32.xlu1 %v788_v37, %s13327_s13  ;;  %v13591_v38 = vld [vmem:[#allocation144_spill] sm:$0xff] }
 0x2fd   : > { %2250 = vrot.lane.b32.xlu0 %v8609_v23, %s13317_s14  ;;  %8246 = vmatprep.mubr.msk.f32.mxu0 %vm2748_vm9, %v2703_v30  ;;  %v2502_v47 = vsel %vm2474_vm4, %v2451_v19, %v13591_v38 }
 0x2fe   : > { %v1717_v55 = vpop.permute.xlu1 %1716 }
 0x2ff   : > { %v2223_v15 = vpop.permute.xlu0 %2222  ;;  %v2553_v24 = vsel %vm2525_vm5, %v2502_v47, %v1717_v55 }
 0x300   : > { %v2704_v43 = vsel %vm2678_vm8, %v2653_v26, %v2223_v15  ;;  %1944 = vrot.lane.b32.xlu1 %v543_v21, %s13321_s30  ;;  %v545_v21 = vld [vmem:[#allocation2 + $0x180] sm:$0xff] }
 0x301   : > { %1942 = vrot.lane.b32.xlu0 %v10283_v7, %s13321_s30  ;;  %8247 = vmatmul.mubr.msk.f32.gmra.mxu0 %vm2748_vm9, %v2704_v43  ;;  %v544_v43 = vld [vmem:[#allocation2 + $0x178] sm:$0xff] }
 0x302   : > { %v1917_v52 = vpop.permute.xlu1 %1916 }
 0x303   : > { %v1915_v16 = vpop.permute.xlu0 %1914  ;;  %v2604_v23 = vsel %vm2576_vm6, %v2553_v24, %v1917_v52  ;;  %v8617_v24 = vld [vmem:[#allocation2 + $0x182] sm:$0xff] }
 0x304   : > { %2099 = vrot.lane.b32.xlu1 %v8610_v32, %s13319_s12  ;;  %v2603_v37 = vsel %vm2576_vm6, %v2552_v20, %v1915_v16  ;;  %v13595_v20 = vld [vmem:[#allocation149_spill] sm:$0xff] }
 0x305   : > { %2097 = vrot.lane.b32.xlu0 %v8611_v39, %s13319_s12  ;;  %v8614_v39 = vld [vmem:[#allocation2 + $0x181] sm:$0xff] }
 0x306   : > { %v8212_v9 = vpop.f32.mrf.mxu0  ;;  %v2072_v4 = vpop.permute.xlu1 %2071 }
 0x307   : > { %v2975_v42 = vadd.f32 %v8212_v9, %v10294_v22  ;;  %v2070_v53 = vpop.permute.xlu0 %2069  ;;  %v2655_v26 = vsel %vm2627_vm7, %v2604_v23, %v2072_v4  ;;  %v8615_v4 = vld [vmem:[#allocation2 + $0x179] sm:$0xff] }
 0x308   : > { %v2969_v13 = vpop.f32.mrf.mxu0  ;;  %1746 = vrot.lane.b32.xlu1 %v789_v14, %s13327_s13  ;;  %v2654_v34 = vsel %vm2627_vm7, %v2603_v37, %v2070_v53  ;;  %v13592_v14 = vld [vmem:[#allocation25_spill] sm:$0xff]  ;;  %v13597_v37 = vld [vmem:[#allocation64_spill] sm:$0xff] }
 0x309   : > { %v3219_v58 = vmax.f32 %v2975_v42, 0.0  ;;  %v2970_v60 = vadd.f32 %v10294_v22, %v2969_v13  ;;  %2252 = vrot.lane.b32.xlu0 %v8612_v3, %s13317_s14  ;;  %v2350_v1 = vsel %vm434_vm0, %v9913_v51, %v13592_v14  ;;  %v13600_v14 = vld [vmem:[#allocation27_spill] sm:$0xff] }
 0x30a   : > { %v1719_v36 = vpop.permute.xlu1 %1718  ;;  %v2401_v42 = vsel %vm2372_vm2, %v2350_v1, %v13593_v54  ;;  %v2352_v1 = vsel %vm434_vm0, %v9955_v56, %v13600_v14 }
 0x30b   : > { %v3269_v12 = vmin.f32 %v3219_v58, 6.0  ;;  %v3218_v57 = vmax.f32 %v2970_v60, 0.0  ;;  %v2225_v31 = vpop.permute.xlu0 %2224  ;;  %v2452_v27 = vsel %vm2423_vm3, %v2401_v42, %v13594_v49  ;;  %v13596_v58 = vld [vmem:[#allocation24_spill] sm:$0xff]  ;;  %v13602_v49 = vld [vmem:[#allocation107_spill] sm:$0xff] }
 0x30c   : > { %v2705_v11 = vsel %vm2678_vm8, %v2654_v34, %v2225_v31  ;;  %1748 = vrot.lane.b32.xlu1 %v790_v10, %s13327_s13  ;;  %v2503_v51 = vsel %vm2474_vm4, %v2452_v27, %v13595_v20  ;;  %v2351_v60 = vsel %vm434_vm0, %v9958_v18, %v13596_v58  ;;  %v13598_v34 = vld [vmem:[#allocation104_spill] sm:$0xff]  ;;  %v13604_v20 = vld [vmem:[#allocation26_spill] sm:$0xff] }
 0x30d   : > { %3319 = vst.msk [vmem:[#allocation3 + $0x8] sm:$0xff] %vm434_vm0, %v3269_v12  ;;  %v3268_v30 = vmin.f32 %v3218_v57, 6.0  ;;  %2254 = vrot.lane.b32.xlu0 %v8613_v44, %s13317_s14  ;;  %8249 = vmatprep.mubr.msk.f32.mxu0 %vm2748_vm9, %v2705_v11  ;;  %v2554_v3 = vsel %vm2525_vm5, %v2503_v51, %v1719_v36  ;;  %v2402_v28 = vsel %vm2372_vm2, %v2351_v60, %v13597_v37  ;;  %v13599_v31 = vld [vmem:[#allocation148_spill] sm:$0xff]  ;;  %v13606_v37 = vld [vmem:[#allocation106_spill] sm:$0xff] }
 0x30e   : > { %v1721_v62 = vpop.permute.xlu1 %1720  ;;  %v2453_v57 = vsel %vm2423_vm3, %v2402_v28, %v13598_v34  ;;  %v2353_v51 = vsel %vm434_vm0, %v10000_v50, %v13604_v20  ;;  %v8619_v60 = vld [vmem:[#allocation2 + $0x18a] sm:$0xff] }
 0x30f   : > { %3318 = vst.msk [vmem:[#allocation3] sm:$0xff] %vm434_vm0, %v3268_v30  ;;  %v2227_v15 = vpop.permute.xlu0 %2226  ;;  %v2504_v38 = vsel %vm2474_vm4, %v2453_v57, %v13599_v31  ;;  %v797_v30 = vld [vmem:[#allocation2 + $0x190] sm:$0xff]  ;;  %v13607_v57 = vld [vmem:[#allocation150_spill] sm:$0xff] }
 0x310   : > { %v2706_v55 = vsel %vm2678_vm8, %v2655_v26, %v2227_v15  ;;  %1948 = vrot.lane.b32.xlu1 %v545_v21, %s13321_s30  ;;  %v2555_v11 = vsel %vm2525_vm5, %v2504_v38, %v1721_v62  ;;  %v546_v15 = vld [vmem:[#allocation2 + $0x188] sm:$0xff] }
 0x311   : > { %1946 = vrot.lane.b32.xlu0 %v544_v43, %s13321_s30  ;;  %8250 = vmatmul.mubr.msk.f32.gmra.mxu0 %vm2748_vm9, %v2706_v55  ;;  %v802_v55 = vld [vmem:[#allocation2 + $0x191] sm:$0xff] }
 0x312   : > { %v8215_v16 = vpop.f32.mrf.mxu0  ;;  %v1921_v32 = vpop.permute.xlu1 %1920 }
 0x313   : > { %v2985_v52 = vadd.f32 %v8215_v16, %v10294_v22  ;;  %v1919_v46 = vpop.permute.xlu0 %1918  ;;  %v2606_v44 = vsel %vm2576_vm6, %v2555_v11, %v1921_v32 }
 0x314   : > { %v2979_v5 = vpop.f32.mrf.mxu0  ;;  %2103 = vrot.lane.b32.xlu1 %v8614_v39, %s13319_s12  ;;  %v2605_v19 = vsel %vm2576_vm6, %v2554_v3, %v1919_v46  ;;  %v13605_v3 = vld [vmem:[#allocation66_spill] sm:$0xff] }
 0x315   : > { %v3221_v63 = vmax.f32 %v2985_v52, 0.0  ;;  %v2980_v9 = vadd.f32 %v10294_v22, %v2979_v5  ;;  %2101 = vrot.lane.b32.xlu0 %v8615_v4, %s13319_s12  ;;  %v13601_v4 = vld [vmem:[#allocation67_spill] sm:$0xff] }
 0x316   : > { %v2076_v53 = vpop.permute.xlu1 %2075 }
 0x317   : > { %v3271_v13 = vmin.f32 %v3221_v63, 6.0  ;;  %v3220_v8 = vmax.f32 %v2980_v9, 0.0  ;;  %v2074_v61 = vpop.permute.xlu0 %2073  ;;  %v2657_v21 = vsel %vm2627_vm7, %v2606_v44, %v2076_v53  ;;  %v8618_v63 = vld [vmem:[#allocation2 + $0x189] sm:$0xff]  ;;  %v807_v9 = vld [vmem:[#allocation2 + $0x192] sm:$0xff] }
 0x318   : > { %1750 = vrot.lane.b32.xlu1 %v791_v25, %s13327_s13  ;;  %v2656_v18 = vsel %vm2627_vm7, %v2605_v19, %v2074_v61  ;;  %v2403_v25 = vsel %vm2372_vm2, %v2352_v1, %v13601_v4  ;;  %v13610_v4 = vld [vmem:[#allocation109_spill] sm:$0xff] }
 0x319   : > { %3321 = vst.msk [vmem:[#allocation3 + $0x18] sm:$0xff] %vm434_vm0, %v3271_v13  ;;  %v3270_v10 = vmin.f32 %v3220_v8, 6.0  ;;  %2256 = vrot.lane.b32.xlu0 %v8616_v45, %s13317_s14  ;;  %v2454_v27 = vsel %vm2423_vm3, %v2403_v25, %v13602_v49  ;;  %v13603_v8 = vld [vmem:[#allocation151_spill] sm:$0xff] }
 0x31a   : > { %v1723_v12 = vpop.permute.xlu1 %1722  ;;  %v2505_v61 = vsel %vm2474_vm4, %v2454_v27, %v13603_v8 }
 0x31b   : > { %3320 = vst.msk [vmem:[#allocation3 + $0x10] sm:$0xff] %vm434_vm0, %v3270_v10  ;;  %v2229_v36 = vpop.permute.xlu0 %2228  ;;  %v2556_v58 = vsel %vm2525_vm5, %v2505_v61, %v1723_v12  ;;  %v2404_v10 = vsel %vm2372_vm2, %v2353_v51, %v13605_v3  ;;  %v13615_v3 = vld [vmem:[#allocation108_spill] sm:$0xff] }
 0x31c   : > { %v2707_v47 = vsel %vm2678_vm8, %v2656_v18, %v2229_v36  ;;  %1752 = vrot.lane.b32.xlu1 %v792_v33, %s13327_s13  ;;  %v2455_v28 = vsel %vm2423_vm3, %v2404_v10, %v13606_v37  ;;  %v3418_v36 = vld [vmem:[#allocation3 + $0x1] sm:$0xff]  ;;  %v5603_v37 = vld [vmem:[%s13614_s3 + $0x50] sm:$0xff] }
 0x31d   : > { %2258 = vrot.lane.b32.xlu0 %v8617_v24, %s13317_s14  ;;  %8252 = vmatprep.mubr.msk.f32.mxu0 %vm2748_vm9, %v2707_v47  ;;  %v2506_v12 = vsel %vm2474_vm4, %v2455_v28, %v13607_v57  ;;  %v13616_v28 = vld [vmem:[#allocation152_spill] sm:$0xff] }
 0x31e   : > { %v1725_v23 = vpop.permute.xlu1 %1724 }
 0x31f   : > { %v2231_v26 = vpop.permute.xlu0 %2230  ;;  %v2557_v31 = vsel %vm2525_vm5, %v2506_v12, %v1725_v23  ;;  %v5602_v12 = vld [vmem:[%s13614_s3 + $0x48] sm:$0xff] }
 0x320   : > { %v2708_v43 = vsel %vm2678_vm8, %v2657_v21, %v2231_v26  ;;  %1952 = vrot.lane.b32.xlu1 %v797_v30, %s13321_s30  ;;  %v3468_v21 = vld [vmem:[#allocation3 + $0x2] sm:$0xff] }
 0x321   : > { %1950 = vrot.lane.b32.xlu0 %v546_v15, %s13321_s30  ;;  %v8218_v62 = vpop.f32.mrf.mxu0  ;;  %8253 = vmatmul.mubr.msk.f32.gmra.mxu0 %vm2748_vm9, %v2708_v43 }
 0x322   : > { %v2995_v16 = vadd.f32 %v8218_v62, %v10294_v22  ;;  %v1925_v52 = vpop.permute.xlu1 %1924  ;;  %v3419_v50 = vld [vmem:[#allocation3 + $0x9] sm:$0xff] }
 0x323   : > { %v1923_v46 = vpop.permute.xlu0 %1922  ;;  %v2989_v32 = vpop.f32.mrf.mxu0  ;;  %v2608_v38 = vsel %vm2576_vm6, %v2557_v31, %v1925_v52  ;;  %v3469_v30 = vld [vmem:[#allocation3 + $0xa] sm:$0xff] }
 0x324   : > { %v3223_v5 = vmax.f32 %v2995_v16, 0.0  ;;  %v2990_v39 = vadd.f32 %v10294_v22, %v2989_v32  ;;  %2107 = vrot.lane.b32.xlu1 %v802_v55, %s13319_s12  ;;  %v2607_v45 = vsel %vm2576_vm6, %v2556_v58, %v1923_v46  ;;  %v3518_v46 = vld [vmem:[#allocation3 + $0x14] sm:$0xff] }
 0x325   : > { %2105 = vrot.lane.b32.xlu0 %v8618_v63, %s13319_s12  ;;  %v13608_v32 = vld [vmem:[#allocation29_spill] sm:$0xff]  ;;  %s13625_s12 = smov 70  }
 0x326   : > { %v3273_v54 = vmin.f32 %v3223_v5, 6.0  ;;  %v3222_v42 = vmax.f32 %v2990_v39, 0.0  ;;  %v2080_v53 = vpop.permute.xlu1 %2079  ;;  %v2354_v5 = vsel %vm434_vm0, %v9997_v2, %v13608_v32  ;;  %v13609_v39 = vld [vmem:[#allocation69_spill] sm:$0xff] }
 0x327   : > { %v2078_v13 = vpop.permute.xlu0 %2077  ;;  %v2659_v11 = vsel %vm2627_vm7, %v2608_v38, %v2080_v53  ;;  %v2405_v14 = vsel %vm2372_vm2, %v2354_v5, %v13609_v39  ;;  %v13611_v53 = vld [vmem:[#allocation153_spill] sm:$0xff]  ;;  %v13618_v39 = vld [vmem:[#allocation71_spill] sm:$0xff] }
 0x328   : > { %3323 = vst.msk [vmem:[#allocation3 + $0x28] sm:$0xff] %vm434_vm0, %v3273_v54  ;;  %v3272_v56 = vmin.f32 %v3222_v42, 6.0  ;;  %2262 = vrot.lane.b32.xlu1 %v807_v9, %s13317_s14  ;;  %v2658_v19 = vsel %vm2627_vm7, %v2607_v45, %v2078_v13  ;;  %v2456_v25 = vsel %vm2423_vm3, %v2405_v14, %v13610_v4  ;;  %v3420_v42 = vld [vmem:[#allocation3 + $0x11] sm:$0xff]  ;;  %v13619_v4 = vld [vmem:[#allocation111_spill] sm:$0xff] }
 0x329   : > { %2260 = vrot.lane.b32.xlu0 %v8619_v60, %s13317_s14  ;;  %v2507_v49 = vsel %vm2474_vm4, %v2456_v25, %v13611_v53  ;;  %v3568_v2 = vld [vmem:[#allocation3 + $0x15] sm:$0xff]  ;;  %v13612_v13 = vld [vmem:[#allocation28_spill] sm:$0xff]  ;;  %s13689_s14 = smov 30  }
 0x32a   : > { %3322 = vst.msk [vmem:[#allocation3 + $0x20] sm:$0xff] %vm434_vm0, %v3272_v56  ;;  %v1727_v33 = vpop.permute.xlu1 %1726  ;;  %v2355_v8 = vsel %vm434_vm0, %v10042_v0, %v13612_v13  ;;  %v13613_v56 = vld [vmem:[#allocation68_spill] sm:$0xff]  ;;  %v5604_v60 = vld [vmem:[%s13614_s3 + $0x58] sm:$0x3]  ;;  %v13621_v13 = vld [vmem:[#allocation30_spill] sm:$0xff] }
 0x32b   : > { %v2233_v34 = vpop.permute.xlu0 %2232  ;;  %v2558_v61 = vsel %vm2525_vm5, %v2507_v49, %v1727_v33  ;;  %v2406_v20 = vsel %vm2372_vm2, %v2355_v8, %v13613_v56  ;;  %v3618_v33 = vld [vmem:[#allocation3 + $0x16] sm:$0xff]  ;;  %8285 = vmatprep.subr.msk.mxu1 %vm2899_vm1, %v5604_v60  ;;  %v13620_v53 = vld [vmem:[#allocation156_spill] sm:$0xff]  ;;  %v2357_v8 = vsel %vm434_vm0, %v10084_v6, %v13621_v13  ;;  %v5597_v56 = vld [vmem:[%s13614_s3 + $0x20] sm:$0xff] }
 0x32c   : > { %v2709_v18 = vsel %vm2678_vm8, %v2658_v19, %v2233_v34  ;;  %3735 = vrot.lane.b32.xlu1 %v3419_v50, %s13331_s15  ;;  %v2457_v0 = vsel %vm2423_vm3, %v2406_v20, %v13615_v3  ;;  %8286 = vmatpush3.msk.msra.mxu1 %vm2899_vm1, %v5604_v60  ;;  %v5599_v5 = vld [vmem:[%s13614_s3 + $0x30] sm:$0xff]  ;;  %v13622_v20 = vld [vmem:[#allocation70_spill] sm:$0xff] }
 0x32d   : > { %8255 = vmatprep.mubr.msk.f32.mxu0 %vm2748_vm9, %v2709_v18  ;;  %3733 = vrot.lane.b32.xlu0 %v3418_v36, %s13331_s15  ;;  %v2508_v19 = vsel %vm2474_vm4, %v2457_v0, %v13616_v28  ;;  %v13623_v6 = vld [vmem:[#allocation110_spill] sm:$0xff] }
 0x32e   : > { %v1729_v47 = vpop.permute.xlu1 %1728  ;;  %8287 = vmatprep.subr.mxu1 %v5603_v37 }
 0x32f   : > { %v2235_v24 = vpop.permute.xlu0 %2234  ;;  %v2559_v57 = vsel %vm2525_vm5, %v2508_v19, %v1729_v47  ;;  %8288 = vmatpush3.msra.mxu1 %v5603_v37  ;;  %v13624_v37 = vld [vmem:[#allocation154_spill] sm:$0xff] }
 0x330   : > { %v2710_v44 = vsel %vm2678_vm8, %v2659_v11, %v2235_v24  ;;  %3935 = vrot.lane.b32.xlu1 %v3469_v30, %s13325_s16  ;;  %v3470_v11 = vld [vmem:[#allocation3 + $0x12] sm:$0xff]  ;;  %8289 = vmatprep.subr.mxu1 %v5602_v12  ;;  %v5601_v30 = vld [vmem:[%s13614_s3 + $0x40] sm:$0xff] }
 0x331   : > { %v8221_v26 = vpop.f32.mrf.mxu0  ;;  %8256 = vmatmul.mubr.msk.f32.gmra.mxu0 %vm2748_vm9, %v2710_v44  ;;  %3933 = vrot.lane.b32.xlu0 %v3468_v21, %s13325_s16  ;;  %v3519_v55 = vld [vmem:[#allocation3 + $0x1c] sm:$0xff] }
 0x332   : > { %v3005_v23 = vadd.f32 %v8221_v26, %v10294_v22  ;;  %v1929_v15 = vpop.permute.xlu1 %1928  ;;  %v3569_v50 = vld [vmem:[#allocation3 + $0x1d] sm:$0xff]  ;;  %8290 = vmatpush3.msra.mxu1 %v5602_v12 }
 0x333   : > { %v1927_v43 = vpop.permute.xlu0 %1926  ;;  %v2999_v62 = vpop.f32.mrf.mxu0  ;;  %v2610_v18 = vsel %vm2576_vm6, %v2559_v57, %v1929_v15  ;;  %v3421_v24 = vld [vmem:[#allocation3 + $0x19] sm:$0xff]  ;;  %8291 = vmatprep.subr.mxu1 %v5601_v30  ;;  %v5595_v57 = vld [vmem:[%s13614_s3 + $0x10] sm:$0xff] }
 0x334   : > { %v3225_v16 = vmax.f32 %v3005_v23, 0.0  ;;  %v3000_v52 = vadd.f32 %v10294_v22, %v2999_v62  ;;  %4135 = vrot.lane.b32.xlu1 %v3519_v55, %s13323_s22  ;;  %v2609_v51 = vsel %vm2576_vm6, %v2558_v61, %v1927_v43  ;;  %v3373_v43 = vld [vmem:[#allocation3 + $0x28] sm:$0xff]  ;;  %8292 = vmatpush3.msra.mxu1 %v5601_v30 }
 0x335   : > { %4133 = vrot.lane.b32.xlu0 %v3518_v46, %s13323_s22  ;;  %v13617_v46 = vld [vmem:[#allocation31_spill] sm:$0xff] }
 0x336   : > { %v3275_v1 = vmin.f32 %v3225_v16, 6.0  ;;  %v3224_v63 = vmax.f32 %v3000_v52, 0.0  ;;  %v2084_v9 = vpop.permute.xlu1 %2083  ;;  %v3619_v16 = vld [vmem:[#allocation3 + $0x1e] sm:$0xff]  ;;  %v2356_v32 = vsel %vm434_vm0, %v10039_v40, %v13617_v46  ;;  %v5598_v40 = vld [vmem:[%s13614_s3 + $0x28] sm:$0xff] }
 0x337   : > { %v2082_v54 = vpop.permute.xlu0 %2081  ;;  %v2661_v31 = vsel %vm2627_vm7, %v2610_v18, %v2084_v9  ;;  %v5600_v52 = vld [vmem:[%s13614_s3 + $0x38] sm:$0xff]  ;;  %v2407_v14 = vsel %vm2372_vm2, %v2356_v32, %v13618_v39 }
 0x338   : > { %3325 = vst.msk [vmem:[#allocation3 + $0x38] sm:$0xff] %vm434_vm0, %v3275_v1  ;;  %v3274_v27 = vmin.f32 %v3224_v63, 6.0  ;;  %3737 = vrot.lane.b32.xlu1 %v3420_v42, %s13331_s15  ;;  %v2660_v10 = vsel %vm2627_vm7, %v2609_v51, %v2082_v54  ;;  %8293 = vmatprep.subr.mxu1 %v5600_v52  ;;  %v2458_v25 = vsel %vm2423_vm3, %v2407_v14, %v13619_v4  ;;  %v3520_v42 = vld [vmem:[#allocation3 + $0x24] sm:$0xff]  ;;  %v13628_v32 = vld [vmem:[#allocation73_spill] sm:$0xff] }
 0x339   : > { %4333 = vrot.lane.b32.xlu0 %v3568_v2, %s13329_s24  ;;  %8294 = vmatpush3.msra.mxu1 %v5600_v52  ;;  %v2509_v49 = vsel %vm2474_vm4, %v2458_v25, %v13620_v53  ;;  %v3471_v2 = vld [vmem:[#allocation3 + $0x1a] sm:$0xff]  ;;  %v2408_v51 = vsel %vm2372_vm2, %v2357_v8, %v13622_v20  ;;  %v13627_v52 = vld [vmem:[#allocation33_spill] sm:$0xff]  ;;  %v13631_v53 = vld [vmem:[#allocation32_spill] sm:$0xff] }
 0x33a   : > { %3324 = vst.msk [vmem:[#allocation3 + $0x30] sm:$0xff] %vm434_vm0, %v3274_v27  ;;  %v10439_v58 = vpop.permute.xlu1 %1730  ;;  %8295 = vmatprep.subr.mxu1 %v5599_v5  ;;  %v2358_v46 = vsel %vm434_vm0, %v10081_v59, %v13627_v52 }
 0x33b   : > { %v2237_v45 = vpop.permute.xlu0 %2236  ;;  %8296 = vmatpush3.msra.mxu1 %v5599_v5  ;;  %v2560_v61 = vsel %vm2525_vm5, %v2509_v49, %v10439_v58  ;;  %v2459_v58 = vsel %vm2423_vm3, %v2408_v51, %v13623_v6  ;;  %v2409_v5 = vsel %vm2372_vm2, %v2358_v46, %v13628_v32  ;;  %v2359_v49 = vsel %vm434_vm0, %v10126_v41, %v13631_v53  ;;  %v13634_v6 = vld [vmem:[#allocation158_spill] sm:$0xff]  ;;  %v13639_v32 = vld [vmem:[#allocation161_spill] sm:$0xff]  ;;  %v13643_v53 = vld [vmem:[#allocation160_spill] sm:$0xff] }
 0x33c   : > { %v2711_v34 = vsel %vm2678_vm8, %v2660_v10, %v2237_v45  ;;  %4533 = vrot.lane.b32.xlu1 %v3618_v33, %s13327_s13  ;;  %8297 = vmatprep.subr.mxu1 %v5598_v40  ;;  %v5596_v33 = vld [vmem:[%s13614_s3 + $0x18] sm:$0xff]  ;;  %v2510_v28 = vsel %vm2474_vm4, %v2459_v58, %v13624_v37 }
 0x33d   : > { %8258 = vmatprep.mubr.msk.f32.mxu0 %vm2748_vm9, %v2711_v34  ;;  %4335 = vrot.lane.b32.xlu0 %v3569_v50, %s13329_s24 }
 0x33e   : > { %v10463_v36 = vpop.permute.xlu1 %1732  ;;  %8298 = vmatpush3.msra.mxu1 %v5598_v40  ;;  %v3422_v40 = vld [vmem:[#allocation3 + $0x21] sm:$0xff] }
 0x33f   : > { %v2239_v38 = vpop.permute.xlu0 %2238  ;;  %8299 = vmatprep.subr.mxu1 %v5597_v56  ;;  %v2561_v50 = vsel %vm2525_vm5, %v2510_v28, %v10463_v36 }
 0x340   : > { %v2712_v47 = vsel %vm2678_vm8, %v2661_v31, %v2239_v38  ;;  %3937 = vrot.lane.b32.xlu1 %v3470_v11, %s13325_s16  ;;  %8300 = vmatpush3.msra.mxu1 %v5597_v56  ;;  %v3570_v11 = vld [vmem:[#allocation3 + $0x25] sm:$0xff] }
 0x341   : > { %v8224_v44 = vpop.f32.mrf.mxu0  ;;  %8259 = vmatmul.mubr.msk.f32.gmra.mxu0 %vm2748_vm9, %v2712_v47  ;;  %3739 = vrot.lane.b32.xlu0 %v3421_v24, %s13331_s15  ;;  %v10515_v45 = vld [vmem:[#allocation3 + $0x29] sm:$0xff]  ;;  %v10578_v41 = vld [vmem:[#allocation3 + $0x32] sm:$0xff] }
 0x342   : > { %v3015_v21 = vadd.f32 %v8224_v44, %v10294_v22  ;;  %v1933_v26 = vpop.permute.xlu1 %1932  ;;  %v3374_v34 = vld [vmem:[#allocation3 + $0x30] sm:$0xff]  ;;  %8301 = vmatprep.subr.mxu1 %v5596_v33  ;;  %v5594_v24 = vld [vmem:[%s13614_s3 + $0x8] sm:$0xff] }
 0x343   : > { %v1931_v23 = vpop.permute.xlu0 %1930  ;;  %v3009_v15 = vpop.f32.mrf.mxu0  ;;  %v2612_v12 = vsel %vm2576_vm6, %v2561_v50, %v1933_v26  ;;  %8302 = vmatpush3.msra.mxu1 %v5596_v33  ;;  %v3521_v36 = vld [vmem:[#allocation3 + $0x2c] sm:$0xff]  ;;  %v5593_v26 = vld [vmem:[%s13614_s3] sm:$0xff]  ;;  %v3522_v46 = vld [vmem:[#allocation3 + $0x34] sm:$0xff] }
 0x344   : > { %v3227_v62 = vmax.f32 %v3015_v21, 0.0  ;;  %v3010_v55 = vadd.f32 %v10294_v22, %v3009_v15  ;;  %4733 = vrot.lane.b32.xlu1 %v3373_v43, %s13321_s30  ;;  %v2611_v60 = vsel %vm2576_vm6, %v2560_v61, %v1931_v23  ;;  %8303 = vmatprep.subr.mxu1 %v5595_v57  ;;  %v10545_v43 = vld [vmem:[#allocation3 + $0x2a] sm:$0xff] }
 0x345   : > { %4535 = vrot.lane.b32.xlu0 %v3619_v16, %s13327_s13  ;;  %8304 = vmatpush3.msra.mxu1 %v5595_v57  ;;  %v10550_v16 = vld [vmem:[#allocation3 + $0x31] sm:$0xff] }
 0x346   : > { %v3277_v1 = vmin.f32 %v3227_v62, 6.0  ;;  %v3226_v63 = vmax.f32 %v3010_v55, 0.0  ;;  %v2088_v9 = vpop.permute.xlu1 %2087  ;;  %8305 = vmatprep.subr.mxu1 %v5594_v24  ;;  %v3571_v25 = vld [vmem:[#allocation3 + $0x2d] sm:$0xff] }
 0x347   : > { %v2086_v54 = vpop.permute.xlu0 %2085  ;;  %v2663_v31 = vsel %vm2627_vm7, %v2612_v12, %v2088_v9  ;;  %8306 = vmatpush3.msra.mxu1 %v5594_v24  ;;  %v13633_v56 = vld [vmem:[#allocation112_spill] sm:$0xff] }
 0x348   : > { %3327 = vst.msk [vmem:[#allocation3 + $0x48] sm:$0xff] %vm434_vm0, %v3277_v1  ;;  %v3276_v27 = vmin.f32 %v3226_v63, 6.0  ;;  %4137 = vrot.lane.b32.xlu1 %v3520_v42, %s13323_s22  ;;  %v2662_v0 = vsel %vm2627_vm7, %v2611_v60, %v2086_v54  ;;  %8307 = vmatprep.subr.mxu1 %v5593_v26  ;;  %v13629_v63 = vld [vmem:[#allocation113_spill] sm:$0xff]  ;;  %v13630_v54 = vld [vmem:[#allocation159_spill] sm:$0xff] }
 0x349   : > { %3939 = vrot.lane.b32.xlu0 %v3471_v2, %s13325_s16  ;;  %8308 = vmatpush3.msra.mxu1 %v5593_v26  ;;  %v2460_v9 = vsel %vm2423_vm3, %v2409_v5, %v13629_v63  ;;  %v13632_v2 = vld [vmem:[#allocation72_spill] sm:$0xff]  ;;  %v13641_v63 = vld [vmem:[#allocation74_spill] sm:$0xff] }
 0x34a   : > { %3326 = vst.msk [vmem:[#allocation3 + $0x40] sm:$0xff] %vm434_vm0, %v3276_v27  ;;  %v10510_v3 = vpop.permute.xlu1 %1734  ;;  %v2511_v42 = vsel %vm2474_vm4, %v2460_v9, %v13630_v54  ;;  %v2410_v13 = vsel %vm2372_vm2, %v2359_v49, %v13632_v2  ;;  %v3621_v24 = vld [vmem:[#allocation3 + $0x2e] sm:$0xff]  ;;  %v13642_v54 = vld [vmem:[#allocation114_spill] sm:$0xff] }
 0x34b   : > { %v2241_v10 = vpop.permute.xlu0 %2240  ;;  %v2562_v27 = vsel %vm2525_vm5, %v2511_v42, %v10510_v3  ;;  %v2461_v20 = vsel %vm2423_vm3, %v2410_v13, %v13633_v56 }
 0x34c   : > { %v2713_v19 = vsel %vm2678_vm8, %v2662_v0, %v2241_v10  ;;  %4888 = vrot.lane.b32.xlu1 %v10515_v45, %s13625_s12  ;;  %v2512_v3 = vsel %vm2474_vm4, %v2461_v20, %v13634_v6  ;;  %v3620_v0 = vld [vmem:[#allocation3 + $0x26] sm:$0xff]  ;;  %v3572_v20 = vld [vmem:[#allocation3 + $0x35] sm:$0xff] }
 0x34d   : > { %8261 = vmatprep.mubr.msk.f32.mxu0 %vm2748_vm9, %v2713_v19  ;;  %4735 = vrot.lane.b32.xlu0 %v3374_v34, %s13321_s30  ;;  %s13626_s30 = smov 80   ;;  %v3472_v34 = vld [vmem:[#allocation3 + $0x22] sm:$0xff] }
 0x34e   : > { %v1737_v18 = vpop.permute.xlu1 %1736 }
 0x34f   : > { %v2243_v38 = vpop.permute.xlu0 %2242  ;;  %v2563_v10 = vsel %vm2525_vm5, %v2512_v3, %v1737_v18 }
 0x350   : > { %v2714_v47 = vsel %vm2678_vm8, %v2663_v31, %v2243_v38  ;;  %4337 = vrot.lane.b32.xlu1 %v3570_v11, %s13329_s24  ;;  %v3375_v11 = vld [vmem:[#allocation3 + $0x38] sm:$0xff] }
 0x351   : > { %v8227_v30 = vpop.f32.mrf.mxu0  ;;  %8262 = vmatmul.mubr.msk.f32.gmra.mxu0 %vm2748_vm9, %v2714_v47  ;;  %4139 = vrot.lane.b32.xlu0 %v3521_v36, %s13323_s22 }
 0x352   : > { %v3025_v44 = vadd.f32 %v8227_v30, %v10294_v22  ;;  %v1937_v21 = vpop.permute.xlu1 %1936  ;;  %v13636_v30 = vld [vmem:[#allocation35_spill] sm:$0xff] }
 0x353   : > { %v1935_v23 = vpop.permute.xlu0 %1934  ;;  %v3019_v15 = vpop.f32.mrf.mxu0  ;;  %v2614_v33 = vsel %vm2576_vm6, %v2563_v10, %v1937_v21  ;;  %v13637_v21 = vld [vmem:[#allocation75_spill] sm:$0xff] }
 0x354   : > { %v3229_v62 = vmax.f32 %v3025_v44, 0.0  ;;  %v3020_v55 = vadd.f32 %v10294_v22, %v3019_v15  ;;  %5043 = vrot.lane.b32.xlu1 %v10545_v43, %s13626_s30  ;;  %v2613_v8 = vsel %vm2576_vm6, %v2562_v27, %v1935_v23  ;;  %v2360_v44 = vsel %vm434_vm0, %v10123_v35, %v13636_v30  ;;  %v13640_v35 = vld [vmem:[#allocation34_spill] sm:$0xff] }
 0x355   : > { %4890 = vrot.lane.b32.xlu0 %v10550_v16, %s13625_s12  ;;  %v3376_v27 = vld [vmem:[#allocation3 + $0x40] sm:$0xff] }
 0x356   : > { %v3279_v39 = vmin.f32 %v3229_v62, 6.0  ;;  %v3228_v14 = vmax.f32 %v3020_v55, 0.0  ;;  %v2092_v1 = vpop.permute.xlu1 %2091  ;;  %v13638_v62 = vld [vmem:[#allocation115_spill] sm:$0xff] }
 0x357   : > { %v2090_v4 = vpop.permute.xlu0 %2089  ;;  %v2665_v28 = vsel %vm2627_vm7, %v2614_v33, %v2092_v1  ;;  %v10640_v33 = vld [vmem:[#allocation3 + $0x3a] sm:$0xff] }
 0x358   : > { %3329 = vst.msk [vmem:[#allocation3 + $0x58] sm:$0xff] %vm434_vm0, %v3279_v39  ;;  %v3278_v59 = vmin.f32 %v3228_v14, 6.0  ;;  %4339 = vrot.lane.b32.xlu1 %v3571_v25, %s13329_s24  ;;  %v2664_v51 = vsel %vm2627_vm7, %v2613_v8, %v2090_v4  ;;  %v2361_v14 = vsel %vm434_vm0, %v10166_v17, %v13640_v35  ;;  %v10623_v17 = vld [vmem:[#allocation3 + $0x39] sm:$0xff] }
 0x359   : > { %3741 = vrot.lane.b32.xlu0 %v3422_v40, %s13331_s15  ;;  %v2412_v9 = vsel %vm2372_vm2, %v2361_v14, %v13641_v63  ;;  %v3573_v30 = vld [vmem:[#allocation3 + $0x3d] sm:$0xff] }
 0x35a   : > { %3328 = vst.msk [vmem:[#allocation3 + $0x50] sm:$0xff] %vm434_vm0, %v3278_v59  ;;  %v1739_v61 = vpop.permute.xlu1 %1738  ;;  %v2463_v42 = vsel %vm2423_vm3, %v2412_v9, %v13642_v54  ;;  %v13651_v14 = vld [vmem:[#allocation162_spill] sm:$0xff] }
 0x35b   : > { %v2245_v60 = vpop.permute.xlu0 %2244  ;;  %v2514_v49 = vsel %vm2474_vm4, %v2463_v42, %v13643_v53  ;;  %v3622_v63 = vld [vmem:[#allocation3 + $0x36] sm:$0xff] }
 0x35c   : > { %v2715_v58 = vsel %vm2678_vm8, %v2664_v51, %v2245_v60  ;;  %5045 = vrot.lane.b32.xlu1 %v10578_v41, %s13626_s30  ;;  %v3523_v60 = vld [vmem:[#allocation3 + $0x3c] sm:$0xff] }
 0x35d   : > { %8264 = vmatprep.mubr.msk.f32.mxu0 %vm2748_vm9, %v2715_v58  ;;  %4537 = vrot.lane.b32.xlu0 %v3620_v0, %s13327_s13 }
 0x35e   : > { %v1741_v37 = vpop.permute.xlu1 %1740 }
 0x35f   : > { %v2247_v19 = vpop.permute.xlu0 %2246  ;;  %v2565_v2 = vsel %vm2525_vm5, %v2514_v49, %v1741_v37 }
 0x360   : > { %v2716_v50 = vsel %vm2678_vm8, %v2665_v28, %v2247_v19  ;;  %3941 = vrot.lane.b32.xlu1 %v3472_v34, %s13325_s16  ;;  %v10645_v19 = vld [vmem:[#allocation3 + $0x41] sm:$0xff] }
 0x361   : > { %v8230_v57 = vpop.f32.mrf.mxu0  ;;  %8265 = vmatmul.mubr.msk.f32.gmra.mxu0 %vm2748_vm9, %v2716_v50  ;;  %3743 = vrot.lane.b32.xlu0 %v10515_v45, %s13331_s15  ;;  %v2411_v45 = vsel %vm2372_vm2, %v2360_v44, %v13637_v21  ;;  %v8620_v34 = vld [vmem:[#allocation2 + $0x140] sm:$0xff]  ;;  %v13644_v50 = vld [vmem:[#allocation37_spill] sm:$0xff] }
 0x362   : > { %v3035_v12 = vadd.f32 %v8230_v57, %v10294_v22  ;;  %v1941_v18 = vpop.permute.xlu1 %1940  ;;  %v2462_v55 = vsel %vm2423_vm3, %v2411_v45, %v13638_v62  ;;  %v2362_v57 = vsel %vm434_vm0, %v8620_v34, %v13644_v50  ;;  %v13647_v44 = vld [vmem:[#allocation163_spill] sm:$0xff]  ;;  %v13649_v62 = vld [vmem:[#allocation76_spill] sm:$0xff] }
 0x363   : > { %v1939_v31 = vpop.permute.xlu0 %1938  ;;  %v3029_v38 = vpop.f32.mrf.mxu0  ;;  %v2513_v5 = vsel %vm2474_vm4, %v2462_v55, %v13639_v32  ;;  %v2616_v13 = vsel %vm2576_vm6, %v2565_v2, %v1941_v18  ;;  %v13650_v32 = vld [vmem:[#allocation116_spill] sm:$0xff] }
 0x364   : > { %v3231_v47 = vmax.f32 %v3035_v12, 0.0  ;;  %v3030_v36 = vadd.f32 %v10294_v22, %v3029_v38  ;;  %4737 = vrot.lane.b32.xlu1 %v3375_v11, %s13635_s29  ;;  %v2564_v1 = vsel %vm2525_vm5, %v2513_v5, %v1739_v61  ;;  %v13645_v12 = vld [vmem:[#allocation77_spill] sm:$0xff]  ;;  %v3377_v2 = vld [vmem:[#allocation3 + $0x48] sm:$0xff] }
 0x365   : > { %4539 = vrot.lane.b32.xlu0 %v3621_v24, %s13327_s13  ;;  %v2615_v4 = vsel %vm2576_vm6, %v2564_v1, %v1939_v31  ;;  %v2413_v18 = vsel %vm2372_vm2, %v2362_v57, %v13645_v12  ;;  %v13656_v57 = vld [vmem:[#allocation38_spill] sm:$0xff] }
 0x366   : > { %v3281_v26 = vmin.f32 %v3231_v47, 6.0  ;;  %v3230_v23 = vmax.f32 %v3030_v36, 0.0  ;;  %v2096_v15 = vpop.permute.xlu1 %2095  ;;  %v13646_v47 = vld [vmem:[#allocation117_spill] sm:$0xff]  ;;  %v2365_v12 = vsel %vm434_vm0, %v10244_v48, %v13656_v57  ;;  %v10717_v48 = vld [vmem:[#allocation3 + $0x49] sm:$0xff] }
 0x367   : > { %v2094_v52 = vpop.permute.xlu0 %2093  ;;  %v2667_v61 = vsel %vm2627_vm7, %v2616_v13, %v2096_v15  ;;  %v2464_v36 = vsel %vm2423_vm3, %v2413_v18, %v13646_v47 }
 0x368   : > { %3331 = vst.msk [vmem:[#allocation3 + $0x68] sm:$0xff] %vm434_vm0, %v3281_v26  ;;  %v3280_v39 = vmin.f32 %v3230_v23, 6.0  ;;  %4141 = vrot.lane.b32.xlu1 %v3522_v46, %s13323_s22  ;;  %v2666_v59 = vsel %vm2627_vm7, %v2615_v4, %v2094_v52  ;;  %v2515_v21 = vsel %vm2474_vm4, %v2464_v36, %v13647_v44  ;;  %v13648_v26 = vld [vmem:[#allocation36_spill] sm:$0xff]  ;;  %v13658_v36 = vld [vmem:[#allocation118_spill] sm:$0xff] }
 0x369   : > { %3943 = vrot.lane.b32.xlu0 %v10545_v43, %s13325_s16  ;;  %v2363_v23 = vsel %vm434_vm0, %v10205_v29, %v13648_v26  ;;  %v10672_v29 = vld [vmem:[#allocation3 + $0x42] sm:$0xff]  ;;  %v3378_v26 = vld [vmem:[#allocation3 + $0x50] sm:$0xff] }
 0x36a   : > { %3330 = vst.msk [vmem:[#allocation3 + $0x60] sm:$0xff] %vm434_vm0, %v3280_v39  ;;  %v1743_v25 = vpop.permute.xlu1 %1742  ;;  %v2414_v55 = vsel %vm2372_vm2, %v2363_v23, %v13649_v62 }
 0x36b   : > { %v2249_v40 = vpop.permute.xlu0 %2248  ;;  %v2566_v15 = vsel %vm2525_vm5, %v2515_v21, %v1743_v25  ;;  %v2465_v5 = vsel %vm2423_vm3, %v2414_v55, %v13650_v32  ;;  %v13659_v21 = vld [vmem:[#allocation164_spill] sm:$0xff] }
 0x36c   : > { %v2717_v43 = vsel %vm2678_vm8, %v2666_v59, %v2249_v40  ;;  %4892 = vrot.lane.b32.xlu1 %v10623_v17, %s13625_s12  ;;  %v2516_v1 = vsel %vm2474_vm4, %v2465_v5, %v13651_v14  ;;  %v3525_v5 = vld [vmem:[#allocation3 + $0x4c] sm:$0xff] }
 0x36d   : > { %8267 = vmatprep.mubr.msk.f32.mxu0 %vm2748_vm9, %v2717_v43  ;;  %4739 = vrot.lane.b32.xlu0 %v3376_v27, %s13635_s29 }
 0x36e   : > { %v1745_v8 = vpop.permute.xlu1 %1744 }
 0x36f   : > { %v2251_v56 = vpop.permute.xlu0 %2250  ;;  %v2567_v9 = vsel %vm2525_vm5, %v2516_v1, %v1745_v8 }
 0x370   : > { %v2718_v51 = vsel %vm2678_vm8, %v2667_v61, %v2251_v56  ;;  %4341 = vrot.lane.b32.xlu1 %v3572_v20, %s13329_s24  ;;  %v3623_v61 = vld [vmem:[#allocation3 + $0x3e] sm:$0xff]  ;;  %v8621_v56 = vld [vmem:[#allocation2 + $0x150] sm:$0xff] }
 0x371   : > { %v8233_v6 = vpop.f32.mrf.mxu0  ;;  %8268 = vmatmul.mubr.msk.f32.gmra.mxu0 %vm2748_vm9, %v2718_v51  ;;  %4143 = vrot.lane.b32.xlu0 %v3523_v60, %s13323_s22  ;;  %v13653_v51 = vld [vmem:[#allocation79_spill] sm:$0xff] }
 0x372   : > { %v3045_v3 = vadd.f32 %v8233_v6, %v10294_v22  ;;  %v1945_v58 = vpop.permute.xlu1 %1944 }
 0x373   : > { %v1943_v0 = vpop.permute.xlu0 %1942  ;;  %v3039_v10 = vpop.f32.mrf.mxu0  ;;  %v2618_v4 = vsel %vm2576_vm6, %v2567_v9, %v1945_v58  ;;  %v13654_v58 = vld [vmem:[#allocation119_spill] sm:$0xff]  ;;  %v13660_v9 = vld [vmem:[#allocation40_spill] sm:$0xff] }
 0x374   : > { %v3233_v37 = vmax.f32 %v3045_v3, 0.0  ;;  %v3040_v28 = vadd.f32 %v10294_v22, %v3039_v10  ;;  %5047 = vrot.lane.b32.xlu1 %v10640_v33, %s13626_s30  ;;  %v2617_v52 = vsel %vm2576_vm6, %v2566_v15, %v1943_v0 }
 0x375   : > { %4894 = vrot.lane.b32.xlu0 %v10645_v19, %s13625_s12 }
 0x376   : > { %v3283_v31 = vmin.f32 %v3233_v37, 6.0  ;;  %v3232_v38 = vmax.f32 %v3040_v28, 0.0  ;;  %v2100_v11 = vpop.permute.xlu1 %2099  ;;  %v3524_v37 = vld [vmem:[#allocation3 + $0x44] sm:$0xff]  ;;  %v13655_v28 = vld [vmem:[#allocation166_spill] sm:$0xff] }
 0x377   : > { %v2098_v24 = vpop.permute.xlu0 %2097  ;;  %v2669_v54 = vsel %vm2627_vm7, %v2618_v4, %v2100_v11  ;;  %v2367_v4 = vsel %vm434_vm0, %v10283_v7, %v13660_v9  ;;  %v3527_v9 = vld [vmem:[#allocation3 + $0x5c] sm:$0xff] }
 0x378   : > { %3333 = vst.msk [vmem:[#allocation3 + $0x78] sm:$0xff] %vm434_vm0, %v3283_v31  ;;  %v3282_v45 = vmin.f32 %v3232_v38, 6.0  ;;  %4343 = vrot.lane.b32.xlu1 %v3573_v30, %s13329_s24  ;;  %v2668_v39 = vsel %vm2627_vm7, %v2617_v52, %v2098_v24  ;;  %v13657_v31 = vld [vmem:[#allocation78_spill] sm:$0xff] }
 0x379   : > { %3745 = vrot.lane.b32.xlu0 %v10550_v16, %s13331_s15  ;;  %v2416_v38 = vsel %vm2372_vm2, %v2365_v12, %v13657_v31  ;;  %v10772_v31 = vld [vmem:[#allocation3 + $0x52] sm:$0xff] }
 0x37a   : > { %3332 = vst.msk [vmem:[#allocation3 + $0x70] sm:$0xff] %vm434_vm0, %v3282_v45  ;;  %v1747_v46 = vpop.permute.xlu1 %1746  ;;  %v2467_v24 = vsel %vm2423_vm3, %v2416_v38, %v13658_v36 }
 0x37b   : > { %v2253_v35 = vpop.permute.xlu0 %2252  ;;  %v2518_v45 = vsel %vm2474_vm4, %v2467_v24, %v13659_v21  ;;  %v10791_v24 = vld [vmem:[%s13583_s2] ss:$0 sm:$0xff] }
 0x37c   : > { %v2719_v16 = vsel %vm2678_vm8, %v2668_v39, %v2253_v35  ;;  %5049 = vrot.lane.b32.xlu1 %v10672_v29, %s13626_s30 }
 0x37d   : > { %8270 = vmatprep.mubr.msk.f32.mxu0 %vm2748_vm9, %v2719_v16  ;;  %4541 = vrot.lane.b32.xlu0 %v3622_v63, %s13327_s13  ;;  %v10734_v63 = vld [vmem:[#allocation3 + $0x4a] sm:$0xff] }
 0x37e   : > { %v1749_v25 = vpop.permute.xlu1 %1748 }
 0x37f   : > { %v2255_v42 = vpop.permute.xlu0 %2254  ;;  %v2569_v23 = vsel %vm2525_vm5, %v2518_v45, %v1749_v25 }
 0x380   : > { %v2720_v59 = vsel %vm2678_vm8, %v2669_v54, %v2255_v42  ;;  %3945 = vrot.lane.b32.xlu1 %v10578_v41, %s13325_s16  ;;  %v13652_v41 = vld [vmem:[#allocation39_spill] sm:$0xff]  ;;  %v10742_v42 = vld [vmem:[#allocation3 + $0x51] sm:$0xff] }
 0x381   : > { %v8236_v40 = vpop.f32.mrf.mxu0  ;;  %8271 = vmatmul.mubr.msk.f32.gmra.mxu0 %vm2748_vm9, %v2720_v59  ;;  %3747 = vrot.lane.b32.xlu0 %v10623_v17, %s13331_s15  ;;  %v2364_v20 = vsel %vm434_vm0, %v8621_v56, %v13652_v41  ;;  %v8622_v59 = vld [vmem:[#allocation2 + $0x160] sm:$0xff]  ;;  %v13665_v56 = vld [vmem:[#allocation121_spill] sm:$0xff] }
 0x382   : > { %v3055_v53 = vadd.f32 %v8236_v40, %v10294_v22  ;;  %v1949_v49 = vpop.permute.xlu1 %1948  ;;  %v2415_v17 = vsel %vm2372_vm2, %v2364_v20, %v13653_v51  ;;  %v13661_v40 = vld [vmem:[#allocation41_spill] sm:$0xff]  ;;  %v13666_v20 = vld [vmem:[#allocation168_spill] sm:$0xff] }
 0x383   : > { %v1947_v43 = vpop.permute.xlu0 %1946  ;;  %v3049_v27 = vpop.f32.mrf.mxu0  ;;  %v2466_v0 = vsel %vm2423_vm3, %v2415_v17, %v13654_v58  ;;  %v2620_v15 = vsel %vm2576_vm6, %v2569_v23, %v1949_v49  ;;  %v13662_v49 = vld [vmem:[#allocation80_spill] sm:$0xff] }
 0x384   : > { %v3235_v13 = vmax.f32 %v3055_v53, 0.0  ;;  %v3050_v8 = vadd.f32 %v10294_v22, %v3049_v27  ;;  %4741 = vrot.lane.b32.xlu1 %v3377_v2, %s13635_s29  ;;  %v2517_v34 = vsel %vm2474_vm4, %v2466_v0, %v13655_v28  ;;  %v2366_v53 = vsel %vm434_vm0, %v8622_v59, %v13661_v40  ;;  %v13663_v27 = vld [vmem:[#allocation81_spill] sm:$0xff]  ;;  %v13664_v2 = vld [vmem:[#allocation120_spill] sm:$0xff]  ;;  %v3479_v40 = vld [vmem:[#allocation3 + $0x5a] sm:$0xff] }
 0x385   : > { %4543 = vrot.lane.b32.xlu0 %v3623_v61, %s13327_s13  ;;  %v2568_v18 = vsel %vm2525_vm5, %v2517_v34, %v1747_v46  ;;  %v3574_v46 = vld [vmem:[#allocation3 + $0x45] sm:$0xff]  ;;  %v2417_v7 = vsel %vm2372_vm2, %v2366_v53, %v13663_v27 }
 0x386   : > { %v3285_v60 = vmin.f32 %v3235_v13, 6.0  ;;  %v3234_v6 = vmax.f32 %v3050_v8, 0.0  ;;  %v2104_v3 = vpop.permute.xlu1 %2103  ;;  %v2619_v11 = vsel %vm2576_vm6, %v2568_v18, %v1947_v43  ;;  %v2418_v43 = vsel %vm2372_vm2, %v2367_v4, %v13662_v49 }
 0x387   : > { %v2102_v10 = vpop.permute.xlu0 %2101  ;;  %v2671_v55 = vsel %vm2627_vm7, %v2620_v15, %v2104_v3  ;;  %v2468_v41 = vsel %vm2423_vm3, %v2417_v7, %v13665_v56 }
 0x388   : > { %3335 = vst.msk [vmem:[#allocation3 + $0x88] sm:$0xff] %vm434_vm0, %v3285_v60  ;;  %v3284_v50 = vmin.f32 %v3234_v6, 6.0  ;;  %4145 = vrot.lane.b32.xlu1 %v3524_v37, %s13323_s22  ;;  %v2670_v30 = vsel %vm2627_vm7, %v2619_v11, %v2102_v10  ;;  %v3575_v60 = vld [vmem:[#allocation3 + $0x4d] sm:$0xff] }
 0x389   : > { %3947 = vrot.lane.b32.xlu0 %v10640_v33, %s13325_s16  ;;  %v13667_v6 = vld [vmem:[#allocation169_spill] sm:$0xff] }
 0x38a   : > { %3334 = vst.msk [vmem:[#allocation3 + $0x80] sm:$0xff] %vm434_vm0, %v3284_v50  ;;  %v1751_v47 = vpop.permute.xlu1 %1750  ;;  %v2519_v3 = vsel %vm2474_vm4, %v2468_v41, %v13667_v6  ;;  %v10837_v41 = vld [vmem:[#allocation3 + $0x62] sm:$0xff] }
 0x38b   : > { %v2257_v44 = vpop.permute.xlu0 %2256  ;;  %v2570_v10 = vsel %vm2525_vm5, %v2519_v3, %v1751_v47 }
 0x38c   : > { %v2721_v33 = vsel %vm2678_vm8, %v2670_v30, %v2257_v44  ;;  %4896 = vrot.lane.b32.xlu1 %v10717_v48, %s13625_s12 }
 0x38d   : > { %8273 = vmatprep.mubr.msk.f32.mxu0 %vm2748_vm9, %v2721_v33  ;;  %4743 = vrot.lane.b32.xlu0 %v3378_v26, %s13635_s29  ;;  %v10796_v33 = vld [vmem:[#allocation3 + $0x58] sm:$0xff] }
 0x38e   : > { %v1753_v62 = vpop.permute.xlu1 %1752 }
 0x38f   : > { %v2259_v52 = vpop.permute.xlu0 %2258 }
 0x390   : > { %v2722_v32 = vsel %vm2678_vm8, %v2671_v55, %v2259_v52  ;;  %4345 = vrot.lane.b32.xlu1 %v3574_v46, %s13329_s24  ;;  %v3526_v52 = vld [vmem:[#allocation3 + $0x54] sm:$0xff] }
 0x391   : > { %v8239_v39 = vpop.f32.mrf.mxu0  ;;  %8274 = vmatmul.mubr.msk.f32.gmra.mxu0 %vm2748_vm9, %v2722_v32  ;;  %4147 = vrot.lane.b32.xlu0 %v3525_v5, %s13323_s22 }
 0x392   : > { %v3065_v35 = vadd.f32 %v8239_v39, %v10294_v22  ;;  %v1953_v14 = vpop.permute.xlu1 %1952  ;;  %v3429_v39 = vld [vmem:[#allocation3 + $0x59] sm:$0xff] }
 0x393   : > { %v1951_v1 = vpop.permute.xlu0 %1950  ;;  %v3059_v16 = vpop.f32.mrf.mxu0 }
 0x394   : > { %v3237_v25 = vmax.f32 %v3065_v35, 0.0  ;;  %v3060_v54 = vadd.f32 %v10294_v22, %v3059_v16  ;;  %5051 = vrot.lane.b32.xlu1 %v10734_v63, %s13626_s30  ;;  %v2469_v22 = vsel %vm2423_vm3, %v2418_v43, %v13664_v2  ;;  %v2621_v28 = vsel %vm2576_vm6, %v2570_v10, %v1951_v1  ;;  %v3380_v35 = vld [vmem:[#allocation3 + $0x60] sm:$0xff]  ;;  %v3576_v16 = vld [vmem:[#allocation3 + $0x55] sm:$0xff] }
 0x395   : > { %4898 = vrot.lane.b32.xlu0 %v10742_v42, %s13625_s12  ;;  %v2520_v51 = vsel %vm2474_vm4, %v2469_v22, %v13666_v20  ;;  %v10824_v43 = vld [vmem:[#allocation3 + $0x61] sm:$0xff]  ;;  %v3626_v20 = vld [vmem:[#allocation3 + $0x56] sm:$0xff] }
 0x396   : > { %v3287_v13 = vmin.f32 %v3237_v25, 6.0  ;;  %v3236_v8 = vmax.f32 %v3060_v54, 0.0  ;;  %v2108_v61 = vpop.permute.xlu1 %2107  ;;  %v2571_v58 = vsel %vm2525_vm5, %v2520_v51, %v1753_v62 }
 0x397   : > { %v2106_v17 = vpop.permute.xlu0 %2105  ;;  %v2622_v37 = vsel %vm2576_vm6, %v2571_v58, %v1953_v14 }
 0x398   : > { %3337 = vst.msk [vmem:[#allocation3 + $0x98] sm:$0xff] %vm434_vm0, %v3287_v13  ;;  %v3286_v0 = vmin.f32 %v3236_v8, 6.0  ;;  %4347 = vrot.lane.b32.xlu1 %v3575_v60, %s13329_s24  ;;  %v2673_v34 = vsel %vm2627_vm7, %v2622_v37, %v2108_v61  ;;  %v2672_v57 = vsel %vm2627_vm7, %v2621_v28, %v2106_v17  ;;  %v3577_v13 = vld [vmem:[#allocation3 + $0x5d] sm:$0xff] }
 0x399   : > { %3749 = vrot.lane.b32.xlu0 %v10645_v19, %s13331_s15  ;;  %v3624_v19 = vld [vmem:[#allocation3 + $0x46] sm:$0xff] }
 0x39a   : > { %3336 = vst.msk [vmem:[#allocation3 + $0x90] sm:$0xff] %vm434_vm0, %v3286_v0  ;;  %v2263_v50 = vpop.permute.xlu1 %2262  ;;  %v3368_v17 = vld [vmem:[#allocation3] sm:$0xff] }
 0x39b   : > { %v2724_v12 = vsel %vm2678_vm8, %v2673_v34, %v2263_v50  ;;  %v2261_v18 = vpop.permute.xlu0 %2260  ;;  %v10855_v50 = vld [vmem:[#allocation3 + $0x68] sm:$0xff] }
 0x39c   : > { %v2723_v38 = vsel %vm2678_vm8, %v2672_v57, %v2261_v18  ;;  %5053 = vrot.lane.b32.xlu1 %v10772_v31, %s13626_s30 }
 0x39d   : > { %8276 = vmatprep.mubr.msk.f32.mxu0 %vm2748_vm9, %v2723_v38  ;;  %4545 = vrot.lane.b32.xlu0 %v3624_v19, %s13327_s13 }
 0x39e   : > { %8277 = vmatmul.mubr.msk.f32.gmra.mxu0 %vm2748_vm9, %v2724_v12  ;;  %v10780_v11 = vpop.permute.xlu1 %3735 }
 0x39f   : > { %v10782_v47 = vpop.permute.xlu0 %3733 }
 0x3a0   : > { %3949 = vrot.lane.b32.xlu1 %v10672_v29, %s13325_s16 }
 0x3a1   : > { %v8242_v36 = vpop.f32.mrf.mxu0  ;;  %3751 = vrot.lane.b32.xlu0 %v10717_v48, %s13331_s15  ;;  %v3625_v48 = vld [vmem:[#allocation3 + $0x4e] sm:$0xff] }
 0x3a2   : > { %v3075_v30 = vadd.f32 %v10791_v24, %v8242_v36  ;;  %v10794_v44 = vpop.permute.xlu1 %3935 }
 0x3a3   : > { %v3069_v21 = vpop.f32.mrf.mxu0  ;;  %v3934_v45 = vpop.permute.xlu0 %3933 }
 0x3a4   : > { %v3239_v26 = vmax.f32 %v3075_v30, 0.0  ;;  %v3070_v29 = vadd.f32 %v10791_v24, %v3069_v21  ;;  %4745 = vrot.lane.b32.xlu1 %v10796_v33, %s13635_s29  ;;  %v3369_v21 = vld [vmem:[#allocation3 + $0x8] sm:$0xff] }
 0x3a5   : > { %4547 = vrot.lane.b32.xlu0 %v3625_v48, %s13327_s13  ;;  %v5194_v48 = vsel %vm434_vm0, %v3369_v21, %v10780_v11 }
 0x3a6   : > { %v3289_v23 = vmin.f32 %v3239_v26, 6.0  ;;  %v3238_v15 = vmax.f32 %v3070_v29, 0.0  ;;  %v10802_v62 = vpop.permute.xlu1 %4135  ;;  %v3528_v26 = vld [vmem:[#allocation3 + $0x64] sm:$0xff] }
 0x3a7   : > { %v4134_v55 = vpop.permute.xlu0 %4133 }
 0x3a8   : > { %3339 = vst.msk [vmem:[#allocation3 + $0xa8] sm:$0xff] %vm434_vm0, %v3289_v23  ;;  %v3288_v46 = vmin.f32 %v3238_v15, 6.0  ;;  %4149 = vrot.lane.b32.xlu1 %v3526_v52, %s13323_s22  ;;  %v5244_v15 = vsel %vm2372_vm2, %v5194_v48, %v10794_v44  ;;  %v3382_v44 = vld [vmem:[#allocation3 + $0x70] sm:$0xff]  ;;  %v3371_v48 = vld [vmem:[#allocation3 + $0x18] sm:$0xff] }
 0x3a9   : > { %3951 = vrot.lane.b32.xlu0 %v10734_v63, %s13325_s16 }
 0x3aa   : > { %3338 = vst.msk [vmem:[#allocation3 + $0xa0] sm:$0xff] %vm434_vm0, %v3288_v46  ;;  %v10809_v32 = vpop.permute.xlu1 %3737 }
 0x3ab   : > { %v4334_v5 = vpop.permute.xlu0 %4333 }
 0x3ac   : > { %4900 = vrot.lane.b32.xlu1 %v3429_v39, %s13625_s12 }
 0x3ad   : > { %4747 = vrot.lane.b32.xlu0 %v3380_v35, %s13635_s29 }
 0x3ae   : > { %v4534_v14 = vpop.permute.xlu1 %4533 }
 0x3af   : > { %v10813_v1 = vpop.permute.xlu0 %4335 }
 0x3b0   : > { %4349 = vrot.lane.b32.xlu1 %v3576_v16, %s13329_s24 }
 0x3b1   : > { %v8245_v4 = vpop.f32.mrf.mxu0  ;;  %4151 = vrot.lane.b32.xlu0 %v3527_v9, %s13323_s22 }
 0x3b2   : > { %v3085_v63 = vadd.f32 %v10791_v24, %v8245_v4  ;;  %v10818_v25 = vpop.permute.xlu1 %3937  ;;  %v3578_v4 = vld [vmem:[#allocation3 + $0x65] sm:$0xff] }
 0x3b3   : > { %v3079_v54 = vpop.f32.mrf.mxu0  ;;  %v10820_v59 = vpop.permute.xlu0 %3739 }
 0x3b4   : > { %v3241_v53 = vmax.f32 %v3085_v63, 0.0  ;;  %v3080_v49 = vadd.f32 %v10791_v24, %v3079_v54  ;;  %5055 = vrot.lane.b32.xlu1 %v3479_v40, %s13626_s30 }
 0x3b5   : > { %4902 = vrot.lane.b32.xlu0 %v10824_v43, %s13625_s12 }
 0x3b6   : > { %v3291_v27 = vmin.f32 %v3241_v53, 6.0  ;;  %v3240_v7 = vmax.f32 %v3080_v49, 0.0  ;;  %v4734_v2 = vpop.permute.xlu1 %4733 }
 0x3b7   : > { %v4536_v22 = vpop.permute.xlu0 %4535 }
 0x3b8   : > { %3341 = vst.msk [vmem:[#allocation3 + $0xb8] sm:$0xff] %vm434_vm0, %v3291_v27  ;;  %v3290_v8 = vmin.f32 %v3240_v7, 6.0  ;;  %4351 = vrot.lane.b32.xlu1 %v3577_v13, %s13329_s24  ;;  %v3481_v27 = vld [vmem:[#allocation3 + $0x6a] sm:$0xff] }
 0x3b9   : > { %3753 = vrot.lane.b32.xlu0 %v10742_v42, %s13331_s15  ;;  %v5193_v42 = vsel %vm434_vm0, %v3368_v17, %v10782_v47  ;;  %v3579_v17 = vld [vmem:[#allocation3 + $0x6d] sm:$0xff] }
 0x3ba   : > { %3340 = vst.msk [vmem:[#allocation3 + $0xb0] sm:$0xff] %vm434_vm0, %v3290_v8  ;;  %v10833_v61 = vpop.permute.xlu1 %4137  ;;  %v5243_v6 = vsel %vm2372_vm2, %v5193_v42, %v3934_v45 }
 0x3bb   : > { %v10835_v56 = vpop.permute.xlu0 %3939  ;;  %v5293_v58 = vsel %vm2423_vm3, %v5243_v6, %v4134_v55  ;;  %v5294_v55 = vsel %vm2423_vm3, %v5244_v15, %v10802_v62 }
 0x3bc   : > { %5057 = vrot.lane.b32.xlu1 %v10837_v41, %s13626_s30  ;;  %v5343_v37 = vsel %vm2474_vm4, %v5293_v58, %v4334_v5  ;;  %v5344_v11 = vsel %vm2474_vm4, %v5294_v55, %v10813_v1  ;;  %v3431_v5 = vld [vmem:[#allocation3 + $0x69] sm:$0xff]  ;;  %v3530_v55 = vld [vmem:[#allocation3 + $0x74] sm:$0xff] }
 0x3bd   : > { %4549 = vrot.lane.b32.xlu0 %v3626_v20, %s13327_s13  ;;  %v5393_v57 = vsel %vm2525_vm5, %v5343_v37, %v4534_v14  ;;  %v3529_v1 = vld [vmem:[#allocation3 + $0x6c] sm:$0xff] }
 0x3be   : > { %v4889_v51 = vpop.permute.xlu1 %4888  ;;  %v5443_v38 = vsel %vm2576_vm6, %v5393_v57, %v4734_v2  ;;  %v3628_v58 = vld [vmem:[#allocation3 + $0x66] sm:$0xff]  ;;  %v3370_v37 = vld [vmem:[#allocation3 + $0x10] sm:$0xff] }
 0x3bf   : > { %v4736_v60 = vpop.permute.xlu0 %4735  ;;  %v5493_v19 = vsel %vm2627_vm7, %v5443_v38, %v4889_v51 }
 0x3c0   : > { %3953 = vrot.lane.b32.xlu1 %v10772_v31, %s13325_s16  ;;  %v3627_v31 = vld [vmem:[#allocation3 + $0x5e] sm:$0xff] }
 0x3c1   : > { %v8248_v3 = vpop.f32.mrf.mxu0  ;;  %3755 = vrot.lane.b32.xlu0 %v3429_v39, %s13331_s15  ;;  %v5394_v39 = vsel %vm2525_vm5, %v5344_v11, %v4536_v22  ;;  %v10898_v22 = vld [vmem:[#allocation3 + $0x71] sm:$0xff]  ;;  %v5196_v11 = vsel %vm434_vm0, %v3371_v48, %v10820_v59 }
 0x3c2   : > { %v3095_v0 = vadd.f32 %v10791_v24, %v8248_v3  ;;  %v10850_v10 = vpop.permute.xlu1 %4337  ;;  %v5444_v35 = vsel %vm2576_vm6, %v5394_v39, %v4736_v60  ;;  %v10911_v3 = vld [vmem:[#allocation3 + $0x72] sm:$0xff]  ;;  %v5246_v39 = vsel %vm2372_vm2, %v5196_v11, %v10835_v56  ;;  %v10961_v56 = vld [vmem:[#allocation3 + $0x80] sm:$0xff] }
 0x3c3   : > { %v3089_v28 = vpop.f32.mrf.mxu0  ;;  %v10853_v34 = vpop.permute.xlu0 %4139 }
 0x3c4   : > { %v3243_v12 = vmax.f32 %v3095_v0, 0.0  ;;  %v3090_v18 = vadd.f32 %v10791_v24, %v3089_v28  ;;  %4749 = vrot.lane.b32.xlu1 %v10855_v50, %s13635_s29 }
 0x3c5   : > { %4551 = vrot.lane.b32.xlu0 %v3627_v31, %s13327_s13 }
 0x3c6   : > { %v3293_v47 = vmin.f32 %v3243_v12, 6.0  ;;  %v3242_v36 = vmax.f32 %v3090_v18, 0.0  ;;  %v5044_v30 = vpop.permute.xlu1 %5043 }
 0x3c7   : > { %v4891_v45 = vpop.permute.xlu0 %4890  ;;  %v5543_v29 = vsel %vm2678_vm8, %v5493_v19, %v5044_v30 }
 0x3c8   : > { %3343 = vst.msk [vmem:[#allocation3 + $0xc8] sm:$0xff] %vm434_vm0, %v3293_v47  ;;  %v3292_v23 = vmin.f32 %v3242_v36, 6.0  ;;  %4153 = vrot.lane.b32.xlu1 %v3528_v26, %s13323_s22  ;;  %8309 = vmatprep.mubr.msk.f32.mxu1 %vm2748_vm9, %v5543_v29  ;;  %v5494_v62 = vsel %vm2627_vm7, %v5444_v35, %v4891_v45 }
 0x3c9   : > { %3955 = vrot.lane.b32.xlu0 %v3479_v40, %s13325_s16 }
 0x3ca   : > { %3342 = vst.msk [vmem:[#allocation3 + $0xc0] sm:$0xff] %vm434_vm0, %v3292_v23  ;;  %v10876_v52 = vpop.permute.xlu1 %4339 }
 0x3cb   : > { %v10880_v46 = vpop.permute.xlu0 %3741 }
 0x3cc   : > { %4904 = vrot.lane.b32.xlu1 %v3431_v5, %s13625_s12 }
 0x3cd   : > { %4751 = vrot.lane.b32.xlu0 %v3382_v44, %s13635_s29  ;;  %v5296_v44 = vsel %vm2423_vm3, %v5246_v39, %v10853_v34 }
 0x3ce   : > { %v5046_v14 = vpop.permute.xlu1 %5045  ;;  %v5346_v59 = vsel %vm2474_vm4, %v5296_v44, %v10876_v52  ;;  %v3532_v44 = vld [vmem:[#allocation3 + $0x84] sm:$0xff] }
 0x3cf   : > { %v5544_v16 = vsel %vm2678_vm8, %v5494_v62, %v5046_v14  ;;  %v4538_v9 = vpop.permute.xlu0 %4537  ;;  %v3433_v14 = vld [vmem:[#allocation3 + $0x79] sm:$0xff] }
 0x3d0   : > { %4353 = vrot.lane.b32.xlu1 %v3578_v4, %s13329_s24  ;;  %8310 = vmatmul.mubr.msk.f32.vlgmr.msra.gmra.mxu1 %vm2748_vm9, %v5544_v16 }
 0x3d1   : > { %v8251_v63 = vpop.f32.mrf.mxu0  ;;  %4155 = vrot.lane.b32.xlu0 %v3529_v1, %s13323_s22 }
 0x3d2   : > { %v3105_v54 = vadd.f32 %v10791_v24, %v8251_v63  ;;  %v10892_v40 = vpop.permute.xlu1 %3941  ;;  %v3580_v63 = vld [vmem:[#allocation3 + $0x75] sm:$0xff] }
 0x3d3   : > { %v3099_v53 = vpop.f32.mrf.mxu0  ;;  %v10894_v49 = vpop.permute.xlu0 %3743 }
 0x3d4   : > { %v3245_v7 = vmax.f32 %v3105_v54, 0.0  ;;  %v3100_v2 = vadd.f32 %v10791_v24, %v3099_v53  ;;  %5059 = vrot.lane.b32.xlu1 %v3481_v27, %s13626_s30  ;;  %v3531_v54 = vld [vmem:[#allocation3 + $0x7c] sm:$0xff] }
 0x3d5   : > { %4906 = vrot.lane.b32.xlu0 %v10898_v22, %s13625_s12 }
 0x3d6   : > { %v3295_v13 = vmin.f32 %v3245_v7, 6.0  ;;  %v3244_v8 = vmax.f32 %v3100_v2, 0.0  ;;  %v4738_v20 = vpop.permute.xlu1 %4737 }
 0x3d7   : > { %v4540_v51 = vpop.permute.xlu0 %4539 }
 0x3d8   : > { %3345 = vst.msk [vmem:[#allocation3 + $0xd8] sm:$0xff] %vm434_vm0, %v3295_v13  ;;  %v3294_v60 = vmin.f32 %v3244_v8, 6.0  ;;  %4355 = vrot.lane.b32.xlu1 %v3579_v17, %s13329_s24  ;;  %v5396_v16 = vsel %vm2525_vm5, %v5346_v59, %v4540_v51  ;;  %v3483_v8 = vld [vmem:[#allocation3 + $0x7a] sm:$0xff]  ;;  %v8624_v59 = vld [vmem:[#allocation3 + $0x28] sm:$0xff] }
 0x3d9   : > { %3757 = vrot.lane.b32.xlu0 %v10824_v43, %s13331_s15  ;;  %v5195_v43 = vsel %vm434_vm0, %v3370_v37, %v10809_v32  ;;  %v10978_v17 = vld [vmem:[#allocation3 + $0x81] sm:$0xff] }
 0x3da   : > { %3344 = vst.msk [vmem:[#allocation3 + $0xd0] sm:$0xff] %vm434_vm0, %v3294_v60  ;;  %v10907_v42 = vpop.permute.xlu1 %4141  ;;  %v5245_v57 = vsel %vm2372_vm2, %v5195_v43, %v10818_v25 }
 0x3db   : > { %v10909_v6 = vpop.permute.xlu0 %3943  ;;  %v5295_v18 = vsel %vm2423_vm3, %v5245_v57, %v10833_v61  ;;  %v3629_v61 = vld [vmem:[#allocation3 + $0x6e] sm:$0xff] }
 0x3dc   : > { %5061 = vrot.lane.b32.xlu1 %v10911_v3, %s13626_s30  ;;  %v5345_v19 = vsel %vm2474_vm4, %v5295_v18, %v10850_v10  ;;  %v10991_v18 = vld [vmem:[#allocation3 + $0x82] sm:$0xff] }
 0x3dd   : > { %4553 = vrot.lane.b32.xlu0 %v3628_v58, %s13327_s13  ;;  %v5395_v25 = vsel %vm2525_vm5, %v5345_v19, %v4538_v9 }
 0x3de   : > { %v4893_v0 = vpop.permute.xlu1 %4892  ;;  %v5445_v21 = vsel %vm2576_vm6, %v5395_v25, %v4738_v20 }
 0x3df   : > { %v4740_v28 = vpop.permute.xlu0 %4739  ;;  %v5495_v10 = vsel %vm2627_vm7, %v5445_v21, %v4893_v0 }
 0x3e0   : > { %3957 = vrot.lane.b32.xlu1 %v10837_v41, %s13325_s16  ;;  %v10932_v41 = vld [vmem:[#allocation3 + $0x78] sm:$0xff]  ;;  %v5446_v9 = vsel %vm2576_vm6, %v5396_v16, %v4740_v28 }
 0x3e1   : > { %v8254_v12 = vpop.f32.mrf.mxu0  ;;  %3759 = vrot.lane.b32.xlu0 %v3431_v5, %s13331_s15  ;;  %v3581_v28 = vld [vmem:[#allocation3 + $0x7d] sm:$0xff] }
 0x3e2   : > { %v3115_v31 = vadd.f32 %v10791_v24, %v8254_v12  ;;  %v10926_v38 = vpop.permute.xlu1 %4341 }
 0x3e3   : > { %v3109_v32 = vpop.f32.mrf.mxu0  ;;  %v10930_v47 = vpop.permute.xlu0 %4143 }
 0x3e4   : > { %v3247_v36 = vmax.f32 %v3115_v31, 0.0  ;;  %v3110_v30 = vadd.f32 %v10791_v24, %v3109_v32  ;;  %4753 = vrot.lane.b32.xlu1 %v10932_v41, %s13635_s29  ;;  %v3630_v31 = vld [vmem:[#allocation3 + $0x76] sm:$0xff]  ;;  %v3372_v32 = vld [vmem:[#allocation3 + $0x20] sm:$0xff] }
 0x3e5   : > { %4555 = vrot.lane.b32.xlu0 %v3629_v61, %s13327_s13 }
 0x3e6   : > { %v3297_v45 = vmin.f32 %v3247_v36, 6.0  ;;  %v3246_v26 = vmax.f32 %v3110_v30, 0.0  ;;  %v5048_v29 = vpop.permute.xlu1 %5047 }
 0x3e7   : > { %v5545_v23 = vsel %vm2678_vm8, %v5495_v10, %v5048_v29  ;;  %v4895_v15 = vpop.permute.xlu0 %4894 }
 0x3e8   : > { %3347 = vst.msk [vmem:[#allocation3 + $0xe8] sm:$0xff] %vm434_vm0, %v3297_v45  ;;  %v3296_v5 = vmin.f32 %v3246_v26, 6.0  ;;  %4157 = vrot.lane.b32.xlu1 %v3530_v55, %s13323_s22  ;;  %8312 = vmatprep.mubr.msk.f32.mxu1 %vm2748_vm9, %v5545_v23  ;;  %v5496_v34 = vsel %vm2627_vm7, %v5446_v9, %v4895_v15 }
 0x3e9   : > { %3959 = vrot.lane.b32.xlu0 %v3481_v27, %s13325_s16 }
 0x3ea   : > { %3346 = vst.msk [vmem:[#allocation3 + $0xe0] sm:$0xff] %vm434_vm0, %v3296_v5  ;;  %v10953_v35 = vpop.permute.xlu1 %4343 }
 0x3eb   : > { %v10957_v62 = vpop.permute.xlu0 %3745 }
 0x3ec   : > { %4908 = vrot.lane.b32.xlu1 %v3433_v14, %s13625_s12 }
 0x3ed   : > { %4755 = vrot.lane.b32.xlu0 %v10961_v56, %s13635_s29 }
 0x3ee   : > { %v5050_v4 = vpop.permute.xlu1 %5049 }
 0x3ef   : > { %v5546_v1 = vsel %vm2678_vm8, %v5496_v34, %v5050_v4  ;;  %v4542_v52 = vpop.permute.xlu0 %4541 }
 0x3f0   : > { %4357 = vrot.lane.b32.xlu1 %v3580_v63, %s13329_s24  ;;  %8313 = vmatmul.mubr.msk.f32.gmra.mxu1 %vm2748_vm9, %v5546_v1 }
 0x3f1   : > { %v8257_v53 = vpop.f32.mrf.mxu0  ;;  %4159 = vrot.lane.b32.xlu0 %v3531_v54, %s13323_s22 }
 0x3f2   : > { %v3125_v27 = vadd.f32 %v10791_v24, %v8257_v53  ;;  %v10972_v7 = vpop.permute.xlu1 %3945 }
 0x3f3   : > { %v3119_v2 = vpop.f32.mrf.mxu0  ;;  %v10974_v13 = vpop.permute.xlu0 %3747 }
 0x3f4   : > { %v3249_v20 = vmax.f32 %v3125_v27, 0.0  ;;  %v3120_v51 = vadd.f32 %v10791_v24, %v3119_v2  ;;  %5063 = vrot.lane.b32.xlu1 %v3483_v8, %s13626_s30  ;;  %v3582_v2 = vld [vmem:[#allocation3 + $0x85] sm:$0xff] }
 0x3f5   : > { %4910 = vrot.lane.b32.xlu0 %v10978_v17, %s13625_s12 }
 0x3f6   : > { %v3299_v60 = vmin.f32 %v3249_v20, 6.0  ;;  %v3248_v58 = vmax.f32 %v3120_v51, 0.0  ;;  %v4742_v0 = vpop.permute.xlu1 %4741 }
 0x3f7   : > { %v4544_v37 = vpop.permute.xlu0 %4543 }
 0x3f8   : > { %3349 = vst.msk [vmem:[#allocation3 + $0xf8] sm:$0xff] %vm434_vm0, %v3299_v60  ;;  %v3298_v43 = vmin.f32 %v3248_v58, 6.0  ;;  %4359 = vrot.lane.b32.xlu1 %v3581_v28, %s13329_s24 }
 0x3f9   : > { %3761 = vrot.lane.b32.xlu0 %v10898_v22, %s13331_s15  ;;  %v5197_v22 = vsel %vm434_vm0, %v3372_v32, %v10880_v46 }
 0x3fa   : > { %3348 = vst.msk [vmem:[#allocation3 + $0xf0] sm:$0xff] %vm434_vm0, %v3298_v43  ;;  %v10987_v57 = vpop.permute.xlu1 %4145  ;;  %v5247_v36 = vsel %vm2372_vm2, %v5197_v22, %v10892_v40 }
 0x3fb   : > { %v10989_v12 = vpop.permute.xlu0 %3947  ;;  %v5297_v61 = vsel %vm2423_vm3, %v5247_v36, %v10907_v42  ;;  %v3631_v42 = vld [vmem:[#allocation3 + $0x7e] sm:$0xff]  ;;  %v3583_v36 = vld [vmem:[#allocation3 + $0x8d] sm:$0xff] }
 0x3fc   : > { %5065 = vrot.lane.b32.xlu1 %v10991_v18, %s13626_s30  ;;  %v5347_v45 = vsel %vm2474_vm4, %v5297_v61, %v10926_v38 }
 0x3fd   : > { %4557 = vrot.lane.b32.xlu0 %v3630_v31, %s13327_s13  ;;  %v5397_v40 = vsel %vm2525_vm5, %v5347_v45, %v4542_v52  ;;  %v3435_v52 = vld [vmem:[#allocation3 + $0x89] sm:$0xff]  ;;  %v11058_v31 = vld [vmem:[#allocation3 + $0x91] sm:$0xff] }
 0x3fe   : > { %v4897_v19 = vpop.permute.xlu1 %4896  ;;  %v5447_v23 = vsel %vm2576_vm6, %v5397_v40, %v4742_v0  ;;  %v11071_v45 = vld [vmem:[#allocation3 + $0x92] sm:$0xff] }
 0x3ff   : > { %v4744_v25 = vpop.permute.xlu0 %4743  ;;  %v5497_v38 = vsel %vm2627_vm7, %v5447_v23, %v4897_v19 }
 0x400   : > { %3961 = vrot.lane.b32.xlu1 %v10911_v3, %s13325_s16  ;;  %v11012_v3 = vld [vmem:[#allocation3 + $0x88] sm:$0xff] }
 0x401   : > { %v8260_v30 = vpop.f32.mrf.mxu0  ;;  %3763 = vrot.lane.b32.xlu0 %v3433_v14, %s13331_s15  ;;  %v5198_v14 = vsel %vm434_vm0, %v8624_v59, %v10894_v49 }
 0x402   : > { %v3135_v21 = vadd.f32 %v10791_v24, %v8260_v30  ;;  %v11006_v10 = vpop.permute.xlu1 %4345  ;;  %v5248_v9 = vsel %vm2372_vm2, %v5198_v14, %v10909_v6  ;;  %v11041_v6 = vld [vmem:[#allocation3 + $0x90] sm:$0xff] }
 0x403   : > { %v3129_v46 = vpop.f32.mrf.mxu0  ;;  %v11010_v26 = vpop.permute.xlu0 %4147  ;;  %v5298_v34 = vsel %vm2423_vm3, %v5248_v9, %v10930_v47 }
 0x404   : > { %v3251_v29 = vmax.f32 %v3135_v21, 0.0  ;;  %v3130_v48 = vadd.f32 %v10791_v24, %v3129_v46  ;;  %4757 = vrot.lane.b32.xlu1 %v11012_v3, %s13635_s29  ;;  %v5348_v49 = vsel %vm2474_vm4, %v5298_v34, %v10953_v35  ;;  %v3632_v46 = vld [vmem:[#allocation3 + $0x86] sm:$0xff] }
 0x405   : > { %4559 = vrot.lane.b32.xlu0 %v3631_v42, %s13327_s13  ;;  %v5398_v63 = vsel %vm2525_vm5, %v5348_v49, %v4544_v37  ;;  %v3485_v37 = vld [vmem:[#allocation3 + $0x8a] sm:$0xff] }
 0x406   : > { %v3301_v15 = vmin.f32 %v3251_v29, 6.0  ;;  %v3250_v55 = vmax.f32 %v3130_v48, 0.0  ;;  %v5052_v11 = vpop.permute.xlu1 %5051  ;;  %v5448_v54 = vsel %vm2576_vm6, %v5398_v63, %v4744_v25  ;;  %v8625_v48 = vld [vmem:[#allocation3 + $0x30] sm:$0xff]  ;;  %v8626_v63 = vld [vmem:[#allocation3 + $0x38] sm:$0xff] }
 0x407   : > { %v5547_v5 = vsel %vm2678_vm8, %v5497_v38, %v5052_v11  ;;  %v4899_v39 = vpop.permute.xlu0 %4898 }
 0x408   : > { %3351 = vst.msk [vmem:[#allocation3 + $0x108] sm:$0xff] %vm434_vm0, %v3301_v15  ;;  %v3300_v16 = vmin.f32 %v3250_v55, 6.0  ;;  %4161 = vrot.lane.b32.xlu1 %v3532_v44, %s13323_s22  ;;  %8315 = vmatprep.mubr.msk.f32.mxu1 %vm2748_vm9, %v5547_v5  ;;  %v5498_v47 = vsel %vm2627_vm7, %v5448_v54, %v4899_v39  ;;  %v5200_v54 = vsel %vm434_vm0, %v8626_v63, %v10974_v13 }
 0x409   : > { %3963 = vrot.lane.b32.xlu0 %v3483_v8, %s13325_s16  ;;  %v3533_v8 = vld [vmem:[#allocation3 + $0x8c] sm:$0xff] }
 0x40a   : > { %3350 = vst.msk [vmem:[#allocation3 + $0x100] sm:$0xff] %vm434_vm0, %v3300_v16  ;;  %v11033_v4 = vpop.permute.xlu1 %4347 }
 0x40b   : > { %v11037_v1 = vpop.permute.xlu0 %3749 }
 0x40c   : > { %4912 = vrot.lane.b32.xlu1 %v3435_v52, %s13625_s12 }
 0x40d   : > { %4759 = vrot.lane.b32.xlu0 %v11041_v6, %s13635_s29 }
 0x40e   : > { %v5054_v53 = vpop.permute.xlu1 %5053 }
 0x40f   : > { %v5548_v27 = vsel %vm2678_vm8, %v5498_v47, %v5054_v53  ;;  %v4546_v35 = vpop.permute.xlu0 %4545  ;;  %v5250_v53 = vsel %vm2372_vm2, %v5200_v54, %v10989_v12  ;;  %v11121_v12 = vld [vmem:[#allocation3 + $0xa0] sm:$0xff] }
 0x410   : > { %4361 = vrot.lane.b32.xlu1 %v3582_v2, %s13329_s24  ;;  %8316 = vmatmul.mubr.msk.f32.gmra.mxu1 %vm2748_vm9, %v5548_v27  ;;  %v5300_v27 = vsel %vm2423_vm3, %v5250_v53, %v11010_v26 }
 0x411   : > { %v8263_v20 = vpop.f32.mrf.mxu0  ;;  %4163 = vrot.lane.b32.xlu0 %v3533_v8, %s13323_s22  ;;  %v5350_v13 = vsel %vm2474_vm4, %v5300_v27, %v11033_v4  ;;  %v3437_v8 = vld [vmem:[#allocation3 + $0x99] sm:$0xff] }
 0x412   : > { %v3145_v51 = vadd.f32 %v10791_v24, %v8263_v20  ;;  %v11052_v60 = vpop.permute.xlu1 %3949 }
 0x413   : > { %v3139_v58 = vpop.f32.mrf.mxu0  ;;  %v11054_v0 = vpop.permute.xlu0 %3751 }
 0x414   : > { %v3253_v28 = vmax.f32 %v3145_v51, 0.0  ;;  %v3140_v43 = vadd.f32 %v10791_v24, %v3139_v58  ;;  %5067 = vrot.lane.b32.xlu1 %v3485_v37, %s13626_s30 }
 0x415   : > { %4914 = vrot.lane.b32.xlu0 %v11058_v31, %s13625_s12 }
 0x416   : > { %v3303_v19 = vmin.f32 %v3253_v28, 6.0  ;;  %v3252_v32 = vmax.f32 %v3140_v43, 0.0  ;;  %v4746_v25 = vpop.permute.xlu1 %4745  ;;  %v3584_v28 = vld [vmem:[#allocation3 + $0x95] sm:$0xff] }
 0x417   : > { %v4548_v22 = vpop.permute.xlu0 %4547  ;;  %v3535_v43 = vld [vmem:[#allocation3 + $0x9c] sm:$0xff] }
 0x418   : > { %3353 = vst.msk [vmem:[#allocation3 + $0x118] sm:$0xff] %vm434_vm0, %v3303_v19  ;;  %v3302_v30 = vmin.f32 %v3252_v32, 6.0  ;;  %4363 = vrot.lane.b32.xlu1 %v3583_v36, %s13329_s24  ;;  %v5400_v20 = vsel %vm2525_vm5, %v5350_v13, %v4548_v22 }
 0x419   : > { %3765 = vrot.lane.b32.xlu0 %v10978_v17, %s13331_s15  ;;  %v5199_v17 = vsel %vm434_vm0, %v8625_v48, %v10957_v62 }
 0x41a   : > { %3352 = vst.msk [vmem:[#allocation3 + $0x110] sm:$0xff] %vm434_vm0, %v3302_v30  ;;  %v11067_v61 = vpop.permute.xlu1 %4149  ;;  %v5249_v42 = vsel %vm2372_vm2, %v5199_v17, %v10972_v7  ;;  %v3487_v30 = vld [vmem:[#allocation3 + $0x9a] sm:$0xff] }
 0x41b   : > { %v11069_v21 = vpop.permute.xlu0 %3951  ;;  %v5299_v38 = vsel %vm2423_vm3, %v5249_v42, %v10987_v57  ;;  %v3633_v57 = vld [vmem:[#allocation3 + $0x8e] sm:$0xff] }
 0x41c   : > { %5069 = vrot.lane.b32.xlu1 %v11071_v45, %s13626_s30  ;;  %v5349_v11 = vsel %vm2474_vm4, %v5299_v38, %v11006_v10  ;;  %v3585_v38 = vld [vmem:[#allocation3 + $0x9d] sm:$0xff] }
 0x41d   : > { %4561 = vrot.lane.b32.xlu0 %v3632_v46, %s13327_s13  ;;  %v5399_v7 = vsel %vm2525_vm5, %v5349_v11, %v4546_v35 }
 0x41e   : > { %v4901_v40 = vpop.permute.xlu1 %4900  ;;  %v5449_v59 = vsel %vm2576_vm6, %v5399_v7, %v4746_v25  ;;  %v11151_v7 = vld [vmem:[#allocation3 + $0xa2] sm:$0xff] }
 0x41f   : > { %v4748_v29 = vpop.permute.xlu0 %4747  ;;  %v5499_v10 = vsel %vm2627_vm7, %v5449_v59, %v4901_v40  ;;  %v8627_v59 = vld [vmem:[#allocation3 + $0x40] sm:$0xff] }
 0x420   : > { %3965 = vrot.lane.b32.xlu1 %v10991_v18, %s13325_s16  ;;  %v11092_v18 = vld [vmem:[#allocation3 + $0x98] sm:$0xff]  ;;  %v5450_v51 = vsel %vm2576_vm6, %v5400_v20, %v4748_v29  ;;  %v11138_v29 = vld [vmem:[#allocation3 + $0xa1] sm:$0xff] }
 0x421   : > { %v8266_v23 = vpop.f32.mrf.mxu0  ;;  %3767 = vrot.lane.b32.xlu0 %v3435_v52, %s13331_s15  ;;  %v3534_v52 = vld [vmem:[#allocation3 + $0x94] sm:$0xff] }
 0x422   : > { %v3155_v15 = vadd.f32 %v10791_v24, %v8266_v23  ;;  %v11086_v55 = vpop.permute.xlu1 %4349 }
 0x423   : > { %v3149_v62 = vpop.f32.mrf.mxu0  ;;  %v11090_v5 = vpop.permute.xlu0 %4151 }
 0x424   : > { %v3255_v39 = vmax.f32 %v3155_v15, 0.0  ;;  %v3150_v44 = vadd.f32 %v10791_v24, %v3149_v62  ;;  %4761 = vrot.lane.b32.xlu1 %v11092_v18, %s13635_s29 }
 0x425   : > { %4563 = vrot.lane.b32.xlu0 %v3633_v57, %s13327_s13 }
 0x426   : > { %v3305_v14 = vmin.f32 %v3255_v39, 6.0  ;;  %v3254_v16 = vmax.f32 %v3150_v44, 0.0  ;;  %v5056_v9 = vpop.permute.xlu1 %5055  ;;  %v3634_v39 = vld [vmem:[#allocation3 + $0x96] sm:$0xff] }
 0x427   : > { %v5549_v34 = vsel %vm2678_vm8, %v5499_v10, %v5056_v9  ;;  %v4903_v49 = vpop.permute.xlu0 %4902 }
 0x428   : > { %3355 = vst.msk [vmem:[#allocation3 + $0x128] sm:$0xff] %vm434_vm0, %v3305_v14  ;;  %v3304_v47 = vmin.f32 %v3254_v16, 6.0  ;;  %4165 = vrot.lane.b32.xlu1 %v3534_v52, %s13323_s22  ;;  %8318 = vmatprep.mubr.msk.f32.mxu1 %vm2748_vm9, %v5549_v34  ;;  %v5500_v26 = vsel %vm2627_vm7, %v5450_v51, %v4903_v49  ;;  %v3536_v51 = vld [vmem:[#allocation3 + $0xa4] sm:$0xff] }
 0x429   : > { %3967 = vrot.lane.b32.xlu0 %v3485_v37, %s13325_s16 }
 0x42a   : > { %3354 = vst.msk [vmem:[#allocation3 + $0x120] sm:$0xff] %vm434_vm0, %v3304_v47  ;;  %v11113_v35 = vpop.permute.xlu1 %4351 }
 0x42b   : > { %v11117_v2 = vpop.permute.xlu0 %3753 }
 0x42c   : > { %4916 = vrot.lane.b32.xlu1 %v3437_v8, %s13625_s12 }
 0x42d   : > { %4763 = vrot.lane.b32.xlu0 %v11121_v12, %s13635_s29 }
 0x42e   : > { %v5058_v58 = vpop.permute.xlu1 %5057 }
 0x42f   : > { %v5550_v37 = vsel %vm2678_vm8, %v5500_v26, %v5058_v58  ;;  %v4550_v4 = vpop.permute.xlu0 %4549  ;;  %v8628_v26 = vld [vmem:[#allocation3 + $0x48] sm:$0xff] }
 0x430   : > { %4365 = vrot.lane.b32.xlu1 %v3584_v28, %s13329_s24  ;;  %8319 = vmatmul.mubr.msk.f32.gmra.mxu1 %vm2748_vm9, %v5550_v37  ;;  %v5202_v58 = vsel %vm434_vm0, %v8628_v26, %v11054_v0 }
 0x431   : > { %v8269_v19 = vpop.f32.mrf.mxu0  ;;  %4167 = vrot.lane.b32.xlu0 %v3535_v43, %s13323_s22 }
 0x432   : > { %v3165_v32 = vadd.f32 %v10791_v24, %v8269_v19  ;;  %v11132_v25 = vpop.permute.xlu1 %3953 }
 0x433   : > { %v3159_v22 = vpop.f32.mrf.mxu0  ;;  %v11134_v36 = vpop.permute.xlu0 %3755 }
 0x434   : > { %v3257_v46 = vmax.f32 %v3165_v32, 0.0  ;;  %v3160_v40 = vadd.f32 %v10791_v24, %v3159_v22  ;;  %5071 = vrot.lane.b32.xlu1 %v3487_v30, %s13626_s30  ;;  %v3439_v32 = vld [vmem:[#allocation3 + $0xa9] sm:$0xff] }
 0x435   : > { %4918 = vrot.lane.b32.xlu0 %v11138_v29, %s13625_s12 }
 0x436   : > { %v3307_v48 = vmin.f32 %v3257_v46, 6.0  ;;  %v3256_v17 = vmax.f32 %v3160_v40, 0.0  ;;  %v4750_v42 = vpop.permute.xlu1 %4749 }
 0x437   : > { %v4552_v23 = vpop.permute.xlu0 %4551 }
 0x438   : > { %3357 = vst.msk [vmem:[#allocation3 + $0x138] sm:$0xff] %vm434_vm0, %v3307_v48  ;;  %v3306_v15 = vmin.f32 %v3256_v17, 6.0  ;;  %4367 = vrot.lane.b32.xlu1 %v3585_v38, %s13329_s24  ;;  %v3586_v17 = vld [vmem:[#allocation3 + $0xa5] sm:$0xff] }
 0x439   : > { %3769 = vrot.lane.b32.xlu0 %v11058_v31, %s13331_s15  ;;  %v5201_v31 = vsel %vm434_vm0, %v8627_v59, %v11037_v1 }
 0x43a   : > { %3356 = vst.msk [vmem:[#allocation3 + $0x130] sm:$0xff] %vm434_vm0, %v3306_v15  ;;  %v11147_v11 = vpop.permute.xlu1 %4153  ;;  %v5251_v10 = vsel %vm2372_vm2, %v5201_v31, %v11052_v60  ;;  %v11215_v31 = vld [vmem:[#allocation3 + $0xb1] sm:$0xff] }
 0x43b   : > { %v11149_v62 = vpop.permute.xlu0 %3955  ;;  %v5301_v16 = vsel %vm2423_vm3, %v5251_v10, %v11067_v61  ;;  %v3635_v61 = vld [vmem:[#allocation3 + $0x9e] sm:$0xff] }
 0x43c   : > { %5073 = vrot.lane.b32.xlu1 %v11151_v7, %s13626_s30  ;;  %v5351_v49 = vsel %vm2474_vm4, %v5301_v16, %v11086_v55 }
 0x43d   : > { %4565 = vrot.lane.b32.xlu0 %v3634_v39, %s13327_s13  ;;  %v5401_v60 = vsel %vm2525_vm5, %v5351_v49, %v4550_v4  ;;  %v5252_v4 = vsel %vm2372_vm2, %v5202_v58, %v11069_v21  ;;  %v3390_v21 = vld [vmem:[#allocation3 + $0xb0] sm:$0xff] }
 0x43e   : > { %v4905_v44 = vpop.permute.xlu1 %4904  ;;  %v5451_v47 = vsel %vm2576_vm6, %v5401_v60, %v4750_v42  ;;  %v5302_v28 = vsel %vm2423_vm3, %v5252_v4, %v11090_v5  ;;  %v3587_v49 = vld [vmem:[#allocation3 + $0xad] sm:$0xff] }
 0x43f   : > { %v4752_v57 = vpop.permute.xlu0 %4751  ;;  %v5501_v55 = vsel %vm2627_vm7, %v5451_v47, %v4905_v44  ;;  %v5352_v0 = vsel %vm2474_vm4, %v5302_v28, %v11113_v35  ;;  %v3537_v35 = vld [vmem:[#allocation3 + $0xac] sm:$0xff] }
 0x440   : > { %3969 = vrot.lane.b32.xlu1 %v11071_v45, %s13325_s16  ;;  %v11172_v45 = vld [vmem:[#allocation3 + $0xa8] sm:$0xff]  ;;  %v5402_v22 = vsel %vm2525_vm5, %v5352_v0, %v4552_v23 }
 0x441   : > { %v8272_v14 = vpop.f32.mrf.mxu0  ;;  %3771 = vrot.lane.b32.xlu0 %v3437_v8, %s13331_s15  ;;  %v3489_v44 = vld [vmem:[#allocation3 + $0xaa] sm:$0xff] }
 0x442   : > { %v3175_v9 = vadd.f32 %v10791_v24, %v8272_v14  ;;  %v11166_v34 = vpop.permute.xlu1 %4353 }
 0x443   : > { %v3169_v1 = vpop.f32.mrf.mxu0  ;;  %v11170_v52 = vpop.permute.xlu0 %4155 }
 0x444   : > { %v3259_v63 = vmax.f32 %v3175_v9, 0.0  ;;  %v3170_v54 = vadd.f32 %v10791_v24, %v3169_v1  ;;  %4765 = vrot.lane.b32.xlu1 %v11172_v45, %s13635_s29 }
 0x445   : > { %4567 = vrot.lane.b32.xlu0 %v3635_v61, %s13327_s13  ;;  %v3636_v61 = vld [vmem:[#allocation3 + $0xa6] sm:$0xff] }
 0x446   : > { %v3309_v53 = vmin.f32 %v3259_v63, 6.0  ;;  %v3258_v27 = vmax.f32 %v3170_v54, 0.0  ;;  %v5060_v13 = vpop.permute.xlu1 %5059  ;;  %v11228_v54 = vld [vmem:[#allocation3 + $0xb2] sm:$0xff] }
 0x447   : > { %v5551_v8 = vsel %vm2678_vm8, %v5501_v55, %v5060_v13  ;;  %v4907_v20 = vpop.permute.xlu0 %4906 }
 0x448   : > { %3359 = vst.msk [vmem:[#allocation3 + $0x148] sm:$0xff] %vm434_vm0, %v3309_v53  ;;  %v3308_v37 = vmin.f32 %v3258_v27, 6.0  ;;  %4169 = vrot.lane.b32.xlu1 %v3536_v51, %s13323_s22  ;;  %8321 = vmatprep.mubr.msk.f32.mxu1 %vm2748_vm9, %v5551_v8 }
 0x449   : > { %3971 = vrot.lane.b32.xlu0 %v3487_v30, %s13325_s16  ;;  %v5452_v30 = vsel %vm2576_vm6, %v5402_v22, %v4752_v57 }
 0x44a   : > { %3358 = vst.msk [vmem:[#allocation3 + $0x140] sm:$0xff] %vm434_vm0, %v3308_v37  ;;  %v11193_v43 = vpop.permute.xlu1 %4355  ;;  %v5502_v5 = vsel %vm2627_vm7, %v5452_v30, %v4907_v20 }
 0x44b   : > { %v11197_v19 = vpop.permute.xlu0 %3757 }
 0x44c   : > { %4920 = vrot.lane.b32.xlu1 %v3439_v32, %s13625_s12 }
 0x44d   : > { %4767 = vrot.lane.b32.xlu0 %v3390_v21, %s13635_s29 }
 0x44e   : > { %v5062_v46 = vpop.permute.xlu1 %5061 }
 0x44f   : > { %v5552_v40 = vsel %vm2678_vm8, %v5502_v5, %v5062_v46  ;;  %v4554_v48 = vpop.permute.xlu0 %4553  ;;  %v3538_v5 = vld [vmem:[#allocation3 + $0xb4] sm:$0xff]  ;;  %v5204_v46 = vsel %vm434_vm0, %v10796_v33, %v11134_v36 }
 0x450   : > { %4369 = vrot.lane.b32.xlu1 %v3586_v17, %s13329_s24  ;;  %8322 = vmatmul.mubr.msk.f32.gmra.mxu1 %vm2748_vm9, %v5552_v40  ;;  %v5254_v40 = vsel %vm2372_vm2, %v5204_v46, %v11149_v62  ;;  %v3441_v33 = vld [vmem:[#allocation3 + $0xb9] sm:$0xff] }
 0x451   : > { %v8275_v42 = vpop.f32.mrf.mxu0  ;;  %4171 = vrot.lane.b32.xlu0 %v3537_v35, %s13323_s22 }
 0x452   : > { %v3185_v23 = vadd.f32 %v10791_v24, %v8275_v42  ;;  %v11209_v38 = vpop.permute.xlu1 %3957 }
 0x453   : > { %v3179_v15 = vpop.f32.mrf.mxu0  ;;  %v11211_v39 = vpop.permute.xlu0 %3759 }
 0x454   : > { %v3261_v57 = vmax.f32 %v3185_v23, 0.0  ;;  %v3180_v59 = vadd.f32 %v10791_v24, %v3179_v15  ;;  %5075 = vrot.lane.b32.xlu1 %v3489_v44, %s13626_s30  ;;  %v3392_v23 = vld [vmem:[#allocation3 + $0xc0] sm:$0xff] }
 0x455   : > { %4922 = vrot.lane.b32.xlu0 %v11215_v31, %s13625_s12 }
 0x456   : > { %v3311_v10 = vmin.f32 %v3261_v57, 6.0  ;;  %v3260_v14 = vmax.f32 %v3180_v59, 0.0  ;;  %v4754_v16 = vpop.permute.xlu1 %4753  ;;  %v3588_v59 = vld [vmem:[#allocation3 + $0xb5] sm:$0xff] }
 0x457   : > { %v4556_v9 = vpop.permute.xlu0 %4555 }
 0x458   : > { %3361 = vst.msk [vmem:[#allocation3 + $0x158] sm:$0xff] %vm434_vm0, %v3311_v10  ;;  %v3310_v1 = vmin.f32 %v3260_v14, 6.0  ;;  %4371 = vrot.lane.b32.xlu1 %v3587_v49, %s13329_s24 }
 0x459   : > { %3773 = vrot.lane.b32.xlu0 %v11138_v29, %s13331_s15  ;;  %v8629_v29 = vld [vmem:[#allocation3 + $0x50] sm:$0xff] }
 0x45a   : > { %3360 = vst.msk [vmem:[#allocation3 + $0x150] sm:$0xff] %vm434_vm0, %v3310_v1  ;;  %v11224_v60 = vpop.permute.xlu1 %4157  ;;  %v5203_v13 = vsel %vm434_vm0, %v8629_v29, %v11117_v2 }
 0x45b   : > { %v11226_v63 = vpop.permute.xlu0 %3959  ;;  %v5253_v20 = vsel %vm2372_vm2, %v5203_v13, %v11132_v25 }
 0x45c   : > { %5077 = vrot.lane.b32.xlu1 %v11228_v54, %s13626_s30  ;;  %v5303_v58 = vsel %vm2423_vm3, %v5253_v20, %v11147_v11 }
 0x45d   : > { %4569 = vrot.lane.b32.xlu0 %v3636_v61, %s13327_s13  ;;  %v5353_v2 = vsel %vm2474_vm4, %v5303_v58, %v11166_v34  ;;  %v3589_v61 = vld [vmem:[#allocation3 + $0xbd] sm:$0xff] }
 0x45e   : > { %v8278_v47 = vpop.f32.mrf.mxu0  ;;  %v4909_v55 = vpop.permute.xlu1 %4908  ;;  %v5403_v25 = vsel %vm2525_vm5, %v5353_v2, %v4554_v48  ;;  %v5304_v48 = vsel %vm2423_vm3, %v5254_v40, %v11170_v52  ;;  %v11352_v40 = vld [vmem:[%s13297_s4] ss:$0 sm:$0xff] }
 0x45f   : > { %v3195_v53 = vadd.f32 %v10791_v24, %v8278_v47  ;;  %v4756_v27 = vpop.permute.xlu0 %4755  ;;  %v5354_v35 = vsel %vm2474_vm4, %v5304_v48, %v11193_v43  ;;  %v3539_v43 = vld [vmem:[#allocation3 + $0xbc] sm:$0xff] }
 0x460   : > { %v3189_v8 = vpop.f32.mrf.mxu0  ;;  %3973 = vrot.lane.b32.xlu1 %v11151_v7, %s13325_s16  ;;  %v11250_v7 = vld [vmem:[#allocation3 + $0xb8] sm:$0xff]  ;;  %v5404_v36 = vsel %vm2525_vm5, %v5354_v35, %v4556_v9  ;;  %v11291_v9 = vld [vmem:[#allocation3 + $0xc1] sm:$0xff] }
 0x461   : > { %v3263_v51 = vmax.f32 %v3195_v53, 0.0  ;;  %v3190_v26 = vadd.f32 %v10791_v24, %v3189_v8  ;;  %3775 = vrot.lane.b32.xlu0 %v3439_v32, %s13331_s15  ;;  %v3637_v24 = vld [vmem:[#allocation3 + $0xae] sm:$0xff]  ;;  %v5453_v32 = vsel %vm2576_vm6, %v5403_v25, %v4754_v16  ;;  %v5454_v62 = vsel %vm2576_vm6, %v5404_v36, %v4756_v27  ;;  %v3491_v16 = vld [vmem:[#allocation3 + $0xba] sm:$0xff]  ;;  %v11302_v53 = vld [vmem:[#allocation3 + $0xc2] sm:$0xff] }
 0x462   : > { %v11244_v37 = vpop.permute.xlu1 %4357  ;;  %v5503_v34 = vsel %vm2627_vm7, %v5453_v32, %v4909_v55  ;;  %v3638_v27 = vld [vmem:[#allocation3 + $0xb6] sm:$0xff]  ;;  %v8630_v8 = vld [vmem:[#allocation3 + $0x60] sm:$0xff] }
 0x463   : > { %v3313_v4 = vmin.f32 %v3263_v51, 6.0  ;;  %v3262_v28 = vmax.f32 %v3190_v26, 0.0  ;;  %v11248_v0 = vpop.permute.xlu0 %4159  ;;  %v5205_v20 = vsel %vm434_vm0, %v8630_v8, %v11197_v19  ;;  %v3540_v32 = vld [vmem:[#allocation3 + $0xc4] sm:$0xff] }
 0x464   : > { %4769 = vrot.lane.b32.xlu1 %v11250_v7, %s13635_s29  ;;  %v3590_v35 = vld [vmem:[#allocation3 + $0xc5] sm:$0xff] }
 0x465   : > { %3363 = vst.msk [vmem:[#allocation3 + $0x168] sm:$0xff] %vm434_vm0, %v3313_v4  ;;  %v3312_v11 = vmin.f32 %v3262_v28, 6.0  ;;  %4571 = vrot.lane.b32.xlu0 %v3637_v24, %s13327_s13  ;;  %v3393_v4 = vld [vmem:[#allocation3 + $0xc8] sm:$0xff] }
 0x466   : > { %v5064_v22 = vpop.permute.xlu1 %5063 }
 0x467   : > { %3362 = vst.msk [vmem:[#allocation3 + $0x160] sm:$0xff] %vm434_vm0, %v3312_v11  ;;  %v5553_v21 = vsel %vm2678_vm8, %v5503_v34, %v5064_v22  ;;  %v4911_v30 = vpop.permute.xlu0 %4910 }
 0x468   : > { %4173 = vrot.lane.b32.xlu1 %v3538_v5, %s13323_s22  ;;  %8324 = vmatprep.mubr.msk.f32.mxu1 %vm2748_vm9, %v5553_v21  ;;  %v5504_v15 = vsel %vm2627_vm7, %v5454_v62, %v4911_v30  ;;  %v3394_v5 = vld [vmem:[#allocation3 + $0xd0] sm:$0xff] }
 0x469   : > { %3975 = vrot.lane.b32.xlu0 %v3489_v44, %s13325_s16 }
 0x46a   : > { %v11271_v17 = vpop.permute.xlu1 %4359 }
 0x46b   : > { %v11275_v42 = vpop.permute.xlu0 %3761 }
 0x46c   : > { %4924 = vrot.lane.b32.xlu1 %v3441_v33, %s13625_s12 }
 0x46d   : > { %4771 = vrot.lane.b32.xlu0 %v3392_v23, %s13635_s29 }
 0x46e   : > { %v5066_v52 = vpop.permute.xlu1 %5065 }
 0x46f   : > { %v5554_v44 = vsel %vm2678_vm8, %v5504_v15, %v5066_v52  ;;  %v4558_v57 = vpop.permute.xlu0 %4557 }
 0x470   : > { %4373 = vrot.lane.b32.xlu1 %v3588_v59, %s13329_s24  ;;  %8325 = vmatmul.mubr.msk.f32.gmra.mxu1 %vm2748_vm9, %v5554_v44  ;;  %v3493_v59 = vld [vmem:[#allocation3 + $0xca] sm:$0xff] }
 0x471   : > { %4175 = vrot.lane.b32.xlu0 %v3539_v43, %s13323_s22  ;;  %v11365_v43 = vld [vmem:[#allocation3 + $0xd1] sm:$0xff] }
 0x472   : > { %v11286_v10 = vpop.permute.xlu1 %3961 }
 0x473   : > { %v11288_v14 = vpop.permute.xlu0 %3763 }
 0x474   : > { %5079 = vrot.lane.b32.xlu1 %v3491_v16, %s13626_s30 }
 0x475   : > { %4926 = vrot.lane.b32.xlu0 %v11291_v9, %s13625_s12 }
 0x476   : > { %v4758_v49 = vpop.permute.xlu1 %4757 }
 0x477   : > { %v4560_v1 = vpop.permute.xlu0 %4559 }
 0x478   : > { %4375 = vrot.lane.b32.xlu1 %v3589_v61, %s13329_s24 }
 0x479   : > { %3777 = vrot.lane.b32.xlu0 %v11215_v31, %s13331_s15  ;;  %v5255_v31 = vsel %vm2372_vm2, %v5205_v20, %v11209_v38  ;;  %v11378_v20 = vld [vmem:[#allocation3 + $0xd2] sm:$0xff] }
 0x47a   : > { %v11298_v47 = vpop.permute.xlu1 %4161  ;;  %v5305_v51 = vsel %vm2423_vm3, %v5255_v31, %v11224_v60  ;;  %v3640_v31 = vld [vmem:[#allocation3 + $0xc6] sm:$0xff] }
 0x47b   : > { %v11300_v55 = vpop.permute.xlu0 %3963  ;;  %v5355_v58 = vsel %vm2474_vm4, %v5305_v51, %v11244_v37  ;;  %v5206_v37 = vsel %vm434_vm0, %v10855_v50, %v11211_v39  ;;  %v3443_v50 = vld [vmem:[#allocation3 + $0xc9] sm:$0xff] }
 0x47c   : > { %5081 = vrot.lane.b32.xlu1 %v11302_v53, %s13626_s30  ;;  %v5405_v19 = vsel %vm2525_vm5, %v5355_v58, %v4558_v57  ;;  %v5256_v11 = vsel %vm2372_vm2, %v5206_v37, %v11226_v63 }
 0x47d   : > { %4573 = vrot.lane.b32.xlu0 %v3638_v27, %s13327_s13  ;;  %v5455_v38 = vsel %vm2576_vm6, %v5405_v19, %v4758_v49  ;;  %v5306_v34 = vsel %vm2423_vm3, %v5256_v11, %v11248_v0  ;;  %v3542_v11 = vld [vmem:[#allocation3 + $0xd4] sm:$0xff] }
 0x47e   : > { %v4913_v29 = vpop.permute.xlu1 %4912  ;;  %v5356_v21 = vsel %vm2474_vm4, %v5306_v34, %v11271_v17 }
 0x47f   : > { %v4760_v13 = vpop.permute.xlu0 %4759  ;;  %v5505_v28 = vsel %vm2627_vm7, %v5455_v38, %v4913_v29  ;;  %v5406_v39 = vsel %vm2525_vm5, %v5356_v21, %v4560_v1  ;;  %v3591_v29 = vld [vmem:[#allocation3 + $0xcd] sm:$0xff] }
 0x480   : > { %3977 = vrot.lane.b32.xlu1 %v11228_v54, %s13325_s16  ;;  %v3639_v54 = vld [vmem:[#allocation3 + $0xbe] sm:$0xff]  ;;  %v5456_v63 = vsel %vm2576_vm6, %v5406_v39, %v4760_v13 }
 0x481   : > { %3779 = vrot.lane.b32.xlu0 %v3441_v33, %s13331_s15  ;;  %v3541_v33 = vld [vmem:[#allocation3 + $0xcc] sm:$0xff] }
 0x482   : > { %v11316_v26 = vpop.permute.xlu1 %4361 }
 0x483   : > { %v11320_v2 = vpop.permute.xlu0 %4163 }
 0x484   : > { %4773 = vrot.lane.b32.xlu1 %v3393_v4, %s13635_s29  ;;  %v8631_v4 = vld [vmem:[#allocation3 + $0x70] sm:$0xff] }
 0x485   : > { %4575 = vrot.lane.b32.xlu0 %v3639_v54, %s13327_s13  ;;  %v5207_v19 = vsel %vm434_vm0, %v8631_v4, %v11275_v42  ;;  %v11449_v4 = vld [vmem:[#allocation3 + $0xe2] sm:$0xff] }
 0x486   : > { %v5068_v60 = vpop.permute.xlu1 %5067 }
 0x487   : > { %v5555_v25 = vsel %vm2678_vm8, %v5505_v28, %v5068_v60  ;;  %v4915_v24 = vpop.permute.xlu0 %4914 }
 0x488   : > { %4177 = vrot.lane.b32.xlu1 %v3540_v32, %s13323_s22  ;;  %8327 = vmatprep.mubr.msk.f32.mxu1 %vm2748_vm9, %v5555_v25  ;;  %v5506_v46 = vsel %vm2627_vm7, %v5456_v63, %v4915_v24  ;;  %v3395_v25 = vld [vmem:[#allocation3 + $0xd8] sm:$0xff]  ;;  %v3396_v63 = vld [vmem:[#allocation3 + $0xe0] sm:$0xff] }
 0x489   : > { %3979 = vrot.lane.b32.xlu0 %v3491_v16, %s13325_s16 }
 0x48a   : > { %v11338_v22 = vpop.permute.xlu1 %4363 }
 0x48b   : > { %v11342_v30 = vpop.permute.xlu0 %3765 }
 0x48c   : > { %4928 = vrot.lane.b32.xlu1 %v3443_v50, %s13625_s12 }
 0x48d   : > { %4775 = vrot.lane.b32.xlu0 %v3394_v5, %s13635_s29 }
 0x48e   : > { %v5070_v0 = vpop.permute.xlu1 %5069 }
 0x48f   : > { %v5556_v48 = vsel %vm2678_vm8, %v5506_v46, %v5070_v0  ;;  %v4562_v17 = vpop.permute.xlu0 %4561 }
 0x490   : > { %4377 = vrot.lane.b32.xlu1 %v3590_v35, %s13329_s24  ;;  %v8311_v36 = vpop.f32.mrf.mxu1  ;;  %8328 = vmatmul.mubr.msk.f32.gmra.mxu1 %vm2748_vm9, %v5556_v48 }
 0x491   : > { %4179 = vrot.lane.b32.xlu0 %v3541_v33, %s13323_s22  ;;  %v5837_v23 = vadd.f32 %v8311_v36, %v11352_v40 }
 0x492   : > { %v11359_v62 = vpop.permute.xlu1 %3965  ;;  %v5831_v15 = vpop.f32.mrf.mxu1 }
 0x493   : > { %v6081_v52 = vmax.f32 %v5837_v23, 0.0  ;;  %v11361_v44 = vpop.permute.xlu0 %3767  ;;  %v5832_v57 = vadd.f32 %v11352_v40, %v5831_v15 }
 0x494   : > { %5083 = vrot.lane.b32.xlu1 %v3493_v59, %s13626_s30 }
 0x495   : > { %v6131_v16 = vmin.f32 %v6081_v52, 6.0  ;;  %v6080_v49 = vmax.f32 %v5832_v57, 0.0  ;;  %4930 = vrot.lane.b32.xlu0 %v11365_v43, %s13625_s12 }
 0x496   : > { %v4762_v1 = vpop.permute.xlu1 %4761 }
 0x497   : > { %6181 = vst.msk [vmem:[#allocation2 + $0x8] sm:$0xff] %vm434_vm0, %v6131_v16  ;;  %v6130_v61 = vmin.f32 %v6080_v49, 6.0  ;;  %v4564_v27 = vpop.permute.xlu0 %4563  ;;  %v11436_v16 = vld [vmem:[#allocation3 + $0xe1] sm:$0xff] }
 0x498   : > { %4379 = vrot.lane.b32.xlu1 %v3591_v29, %s13329_s24 }
 0x499   : > { %6180 = vst.msk [vmem:[#allocation2] sm:$0xff] %vm434_vm0, %v6130_v61  ;;  %3781 = vrot.lane.b32.xlu0 %v11291_v9, %s13331_s15  ;;  %v5257_v9 = vsel %vm2372_vm2, %v5207_v19, %v11286_v10  ;;  %v3642_v19 = vld [vmem:[#allocation3 + $0xd6] sm:$0xff] }
 0x49a   : > { %v11374_v13 = vpop.permute.xlu1 %4165  ;;  %v5307_v54 = vsel %vm2423_vm3, %v5257_v9, %v11298_v47 }
 0x49b   : > { %v11376_v8 = vpop.permute.xlu0 %3967  ;;  %v5357_v28 = vsel %vm2474_vm4, %v5307_v54, %v11316_v26  ;;  %v5208_v26 = vsel %vm434_vm0, %v10932_v41, %v11288_v14  ;;  %v3445_v41 = vld [vmem:[#allocation3 + $0xd9] sm:$0xff] }
 0x49c   : > { %5085 = vrot.lane.b32.xlu1 %v11378_v20, %s13626_s30  ;;  %v5407_v42 = vsel %vm2525_vm5, %v5357_v28, %v4562_v17  ;;  %v5258_v34 = vsel %vm2372_vm2, %v5208_v26, %v11300_v55  ;;  %v3592_v17 = vld [vmem:[#allocation3 + $0xd5] sm:$0xff] }
 0x49d   : > { %4577 = vrot.lane.b32.xlu0 %v3640_v31, %s13327_s13  ;;  %v5457_v10 = vsel %vm2576_vm6, %v5407_v42, %v4762_v1  ;;  %v5308_v21 = vsel %vm2423_vm3, %v5258_v34, %v11320_v2  ;;  %v3593_v31 = vld [vmem:[#allocation3 + $0xdd] sm:$0xff] }
 0x49e   : > { %v4917_v51 = vpop.permute.xlu1 %4916  ;;  %v5358_v39 = vsel %vm2474_vm4, %v5308_v21, %v11338_v22  ;;  %v3543_v22 = vld [vmem:[#allocation3 + $0xdc] sm:$0xff] }
 0x49f   : > { %v4764_v58 = vpop.permute.xlu0 %4763  ;;  %v5507_v24 = vsel %vm2627_vm7, %v5457_v10, %v4917_v51  ;;  %v5408_v14 = vsel %vm2525_vm5, %v5358_v39, %v4564_v27 }
 0x4a0   : > { %3981 = vrot.lane.b32.xlu1 %v11302_v53, %s13325_s16  ;;  %v3641_v53 = vld [vmem:[#allocation3 + $0xce] sm:$0xff]  ;;  %v5458_v55 = vsel %vm2576_vm6, %v5408_v14, %v4764_v58  ;;  %v6230_v54 = vld [vmem:[#allocation2] sm:$0xff]  ;;  %v5210_v14 = vsel %vm434_vm0, %v11012_v3, %v11361_v44 }
 0x4a1   : > { %3783 = vrot.lane.b32.xlu0 %v3443_v50, %s13331_s15  ;;  %v6280_v28 = vld [vmem:[#allocation2 + $0x1] sm:$0xff]  ;;  %v3447_v3 = vld [vmem:[#allocation3 + $0xe9] sm:$0xff] }
 0x4a2   : > { %v11392_v38 = vpop.permute.xlu1 %4365 }
 0x4a3   : > { %v11396_v60 = vpop.permute.xlu0 %4167 }
 0x4a4   : > { %4777 = vrot.lane.b32.xlu1 %v3395_v25, %s13635_s29 }
 0x4a5   : > { %4579 = vrot.lane.b32.xlu0 %v3641_v53, %s13327_s13 }
 0x4a6   : > { %v5072_v47 = vpop.permute.xlu1 %5071 }
 0x4a7   : > { %v5557_v32 = vsel %vm2678_vm8, %v5507_v24, %v5072_v47  ;;  %v4919_v37 = vpop.permute.xlu0 %4918  ;;  %v6330_v24 = vmax.f32 %v6230_v54, %v6280_v28 }
 0x4a8   : > { %4181 = vrot.lane.b32.xlu1 %v3542_v11, %s13323_s22  ;;  %8330 = vmatprep.mubr.msk.f32.mxu1 %vm2748_vm9, %v5557_v32  ;;  %v5508_v46 = vsel %vm2627_vm7, %v5458_v55, %v4919_v37 }
 0x4a9   : > { %3983 = vrot.lane.b32.xlu0 %v3493_v59, %s13325_s16  ;;  %v3495_v59 = vld [vmem:[#allocation3 + $0xda] sm:$0xff] }
 0x4aa   : > { %v11414_v50 = vpop.permute.xlu1 %4367 }
 0x4ab   : > { %v11418_v5 = vpop.permute.xlu0 %3769 }
 0x4ac   : > { %4932 = vrot.lane.b32.xlu1 %v3445_v41, %s13625_s12 }
 0x4ad   : > { %4779 = vrot.lane.b32.xlu0 %v3396_v63, %s13635_s29  ;;  %v5260_v63 = vsel %vm2372_vm2, %v5210_v14, %v11376_v8  ;;  %v3399_v14 = vld [vmem:[#allocation3 + $0xf8] sm:$0xff] }
 0x4ae   : > { %v5074_v2 = vpop.permute.xlu1 %5073  ;;  %v5310_v55 = vsel %vm2423_vm3, %v5260_v63, %v11396_v60 }
 0x4af   : > { %v5558_v0 = vsel %vm2678_vm8, %v5508_v46, %v5074_v2  ;;  %v4566_v48 = vpop.permute.xlu0 %4565  ;;  %v5360_v2 = vsel %vm2474_vm4, %v5310_v55, %v11414_v50  ;;  %v3545_v50 = vld [vmem:[#allocation3 + $0xec] sm:$0xff] }
 0x4b0   : > { %4381 = vrot.lane.b32.xlu1 %v3592_v17, %s13329_s24  ;;  %v8314_v35 = vpop.f32.mrf.mxu1  ;;  %8331 = vmatmul.mubr.msk.f32.gmra.mxu1 %vm2748_vm9, %v5558_v0 }
 0x4b1   : > { %4183 = vrot.lane.b32.xlu0 %v3543_v22, %s13323_s22  ;;  %v5847_v33 = vadd.f32 %v8314_v35, %v11352_v40 }
 0x4b2   : > { %v11430_v36 = vpop.permute.xlu1 %3969  ;;  %v5841_v23 = vpop.f32.mrf.mxu1 }
 0x4b3   : > { %v6083_v15 = vmax.f32 %v5847_v33, 0.0  ;;  %v11432_v52 = vpop.permute.xlu0 %3771  ;;  %v5842_v57 = vadd.f32 %v11352_v40, %v5841_v23  ;;  %v3594_v33 = vld [vmem:[#allocation3 + $0xe5] sm:$0xff] }
 0x4b4   : > { %5087 = vrot.lane.b32.xlu1 %v3495_v59, %s13626_s30 }
 0x4b5   : > { %v6133_v49 = vmin.f32 %v6083_v15, 6.0  ;;  %v6082_v1 = vmax.f32 %v5842_v57, 0.0  ;;  %4934 = vrot.lane.b32.xlu0 %v11436_v16, %s13625_s12 }
 0x4b6   : > { %v4766_v61 = vpop.permute.xlu1 %4765 }
 0x4b7   : > { %6183 = vst.msk [vmem:[#allocation2 + $0x18] sm:$0xff] %vm434_vm0, %v6133_v49  ;;  %v6132_v27 = vmin.f32 %v6082_v1, 6.0  ;;  %v4568_v29 = vpop.permute.xlu0 %4567 }
 0x4b8   : > { %4383 = vrot.lane.b32.xlu1 %v3593_v31, %s13329_s24  ;;  %v5410_v44 = vsel %vm2525_vm5, %v5360_v2, %v4568_v29  ;;  %v11509_v29 = vld [vmem:[#allocation3 + $0xf1] sm:$0xff] }
 0x4b9   : > { %6182 = vst.msk [vmem:[#allocation2 + $0x10] sm:$0xff] %vm434_vm0, %v6132_v27  ;;  %3785 = vrot.lane.b32.xlu0 %v11365_v43, %s13331_s15  ;;  %v5209_v43 = vsel %vm434_vm0, %v10961_v56, %v11342_v30  ;;  %v3497_v27 = vld [vmem:[#allocation3 + $0xea] sm:$0xff] }
 0x4ba   : > { %v11445_v51 = vpop.permute.xlu1 %4169  ;;  %v5259_v10 = vsel %vm2372_vm2, %v5209_v43, %v11359_v62  ;;  %v3643_v62 = vld [vmem:[#allocation3 + $0xde] sm:$0xff]  ;;  %v3645_v2 = vld [vmem:[#allocation3 + $0xee] sm:$0xff] }
 0x4bb   : > { %v11447_v58 = vpop.permute.xlu0 %3971  ;;  %v5309_v32 = vsel %vm2423_vm3, %v5259_v10, %v11374_v13  ;;  %v3644_v10 = vld [vmem:[#allocation3 + $0xe6] sm:$0xff] }
 0x4bc   : > { %5089 = vrot.lane.b32.xlu1 %v11449_v4, %s13626_s30  ;;  %v5359_v56 = vsel %vm2474_vm4, %v5309_v32, %v11392_v38 }
 0x4bd   : > { %4581 = vrot.lane.b32.xlu0 %v3642_v19, %s13327_s13  ;;  %v5409_v26 = vsel %vm2525_vm5, %v5359_v56, %v4566_v48  ;;  %v3398_v48 = vld [vmem:[#allocation3 + $0xf0] sm:$0xff]  ;;  %v5211_v56 = vsel %vm434_vm0, %v11041_v6, %v11418_v5 }
 0x4be   : > { %v4921_v9 = vpop.permute.xlu1 %4920  ;;  %v5459_v34 = vsel %vm2576_vm6, %v5409_v26, %v4766_v61  ;;  %v5261_v26 = vsel %vm2372_vm2, %v5211_v56, %v11430_v36  ;;  %v11584_v56 = vld [vmem:[#allocation3 + $0x101] sm:$0xff] }
 0x4bf   : > { %v4768_v25 = vpop.permute.xlu0 %4767  ;;  %v5509_v13 = vsel %vm2627_vm7, %v5459_v34, %v4921_v9 }
 0x4c0   : > { %3985 = vrot.lane.b32.xlu1 %v11378_v20, %s13325_s16  ;;  %v6380_v42 = vld [vmem:[#allocation2 + $0x14] sm:$0xff]  ;;  %v3397_v20 = vld [vmem:[#allocation3 + $0xe8] sm:$0xff]  ;;  %v5460_v8 = vsel %vm2576_vm6, %v5410_v44, %v4768_v25 }
 0x4c1   : > { %v6430_v53 = vld [vmem:[#allocation2 + $0x15] sm:$0xff]  ;;  %3787 = vrot.lane.b32.xlu0 %v3445_v41, %s13331_s15  ;;  %v3544_v41 = vld [vmem:[#allocation3 + $0xe4] sm:$0xff]  ;;  %v3595_v25 = vld [vmem:[#allocation3 + $0xed] sm:$0xff] }
 0x4c2   : > { %v6480_v47 = vmax.f32 %v6380_v42, %v6430_v53  ;;  %v11464_v37 = vpop.permute.xlu1 %4369  ;;  %v11522_v53 = vld [vmem:[#allocation3 + $0xf2] sm:$0xff]  ;;  %v6281_v32 = vld [vmem:[#allocation2 + $0x9] sm:$0xff] }
 0x4c3   : > { %v11468_v30 = vpop.permute.xlu0 %4171 }
 0x4c4   : > { %v6530_v11 = vmax.f32 %v6330_v24, %v6480_v47  ;;  %4781 = vrot.lane.b32.xlu1 %v3397_v20, %s13635_s29  ;;  %v6232_v20 = vld [vmem:[#allocation2 + $0x10] sm:$0xff] }
 0x4c5   : > { %4583 = vrot.lane.b32.xlu0 %v3643_v62, %s13327_s13 }
 0x4c6   : > { %6580 = vst.msk [vmem:[#allocation3] sm:$0xff] %vm434_vm0, %v6530_v11  ;;  %v5076_v21 = vpop.permute.xlu1 %5075  ;;  %v6282_v11 = vld [vmem:[#allocation2 + $0x11] sm:$0xff] }
 0x4c7   : > { %v5559_v38 = vsel %vm2678_vm8, %v5509_v13, %v5076_v21  ;;  %v4923_v39 = vpop.permute.xlu0 %4922  ;;  %v5311_v21 = vsel %vm2423_vm3, %v5261_v26, %v11445_v51  ;;  %v6332_v36 = vmax.f32 %v6232_v20, %v6282_v11 }
 0x4c8   : > { %4185 = vrot.lane.b32.xlu1 %v3544_v41, %s13323_s22  ;;  %8333 = vmatprep.mubr.msk.f32.mxu1 %vm2748_vm9, %v5559_v38  ;;  %v5510_v17 = vsel %vm2627_vm7, %v5460_v8, %v4923_v39 }
 0x4c9   : > { %3987 = vrot.lane.b32.xlu0 %v3495_v59, %s13325_s16 }
 0x4ca   : > { %v11487_v46 = vpop.permute.xlu1 %4371 }
 0x4cb   : > { %v11491_v0 = vpop.permute.xlu0 %3773 }
 0x4cc   : > { %4936 = vrot.lane.b32.xlu1 %v3447_v3, %s13625_s12 }
 0x4cd   : > { %4783 = vrot.lane.b32.xlu0 %v3398_v48, %s13635_s29 }
 0x4ce   : > { %v5078_v60 = vpop.permute.xlu1 %5077 }
 0x4cf   : > { %v5560_v22 = vsel %vm2678_vm8, %v5510_v17, %v5078_v60  ;;  %v4570_v35 = vpop.permute.xlu0 %4569  ;;  %v3546_v60 = vld [vmem:[#allocation3 + $0xf4] sm:$0xff] }
 0x4d0   : > { %4385 = vrot.lane.b32.xlu1 %v3594_v33, %s13329_s24  ;;  %v8317_v23 = vpop.f32.mrf.mxu1  ;;  %8334 = vmatmul.mubr.msk.f32.gmra.mxu1 %vm2748_vm9, %v5560_v22  ;;  %v5212_v22 = vsel %vm434_vm0, %v11092_v18, %v11432_v52  ;;  %v3449_v18 = vld [vmem:[#allocation3 + $0xf9] sm:$0xff] }
 0x4d1   : > { %4187 = vrot.lane.b32.xlu0 %v3545_v50, %s13323_s22  ;;  %v5857_v15 = vadd.f32 %v8317_v23, %v11352_v40 }
 0x4d2   : > { %v11503_v57 = vpop.permute.xlu1 %3973  ;;  %v5851_v59 = vpop.f32.mrf.mxu1 }
 0x4d3   : > { %v6085_v49 = vmax.f32 %v5857_v15, 0.0  ;;  %v11505_v1 = vpop.permute.xlu0 %3775  ;;  %v5852_v61 = vadd.f32 %v11352_v40, %v5851_v59  ;;  %v3400_v59 = vld [vmem:[#allocation3 + $0x100] sm:$0xff] }
 0x4d4   : > { %5091 = vrot.lane.b32.xlu1 %v3497_v27, %s13626_s30 }
 0x4d5   : > { %v6135_v31 = vmin.f32 %v6085_v49, 6.0  ;;  %v6084_v19 = vmax.f32 %v5852_v61, 0.0  ;;  %4938 = vrot.lane.b32.xlu0 %v11509_v29, %s13625_s12 }
 0x4d6   : > { %v4770_v9 = vpop.permute.xlu1 %4769 }
 0x4d7   : > { %6185 = vst.msk [vmem:[#allocation2 + $0x28] sm:$0xff] %vm434_vm0, %v6135_v31  ;;  %v6134_v54 = vmin.f32 %v6084_v19, 6.0  ;;  %v4572_v28 = vpop.permute.xlu0 %4571  ;;  %v3596_v31 = vld [vmem:[#allocation3 + $0xf5] sm:$0xff] }
 0x4d8   : > { %4387 = vrot.lane.b32.xlu1 %v3595_v25, %s13329_s24  ;;  %v3547_v19 = vld [vmem:[#allocation3 + $0xfc] sm:$0xff] }
 0x4d9   : > { %6184 = vst.msk [vmem:[#allocation2 + $0x20] sm:$0xff] %vm434_vm0, %v6134_v54  ;;  %3789 = vrot.lane.b32.xlu0 %v11436_v16, %s13331_s15  ;;  %v6231_v16 = vld [vmem:[#allocation2 + $0x8] sm:$0xff] }
 0x4da   : > { %v11518_v43 = vpop.permute.xlu1 %4173  ;;  %v6331_v6 = vmax.f32 %v6231_v16, %v6281_v32  ;;  %v3499_v32 = vld [vmem:[#allocation3 + $0xfa] sm:$0xff] }
 0x4db   : > { %v11520_v42 = vpop.permute.xlu0 %3975 }
 0x4dc   : > { %5093 = vrot.lane.b32.xlu1 %v11522_v53, %s13626_s30 }
 0x4dd   : > { %4585 = vrot.lane.b32.xlu0 %v3644_v10, %s13327_s13 }
 0x4de   : > { %v4925_v24 = vpop.permute.xlu1 %4924 }
 0x4df   : > { %v4772_v47 = vpop.permute.xlu0 %4771 }
 0x4e0   : > { %3989 = vrot.lane.b32.xlu1 %v11449_v4, %s13325_s16  ;;  %v6381_v62 = vld [vmem:[#allocation2 + $0x1c] sm:$0xff]  ;;  %v6382_v13 = vld [vmem:[#allocation2 + $0x24] sm:$0xff]  ;;  %v5361_v4 = vsel %vm2474_vm4, %v5311_v21, %v11464_v37 }
 0x4e1   : > { %3791 = vrot.lane.b32.xlu0 %v3447_v3, %s13331_s15  ;;  %v6431_v34 = vld [vmem:[#allocation2 + $0x1d] sm:$0xff]  ;;  %v6432_v39 = vld [vmem:[#allocation2 + $0x25] sm:$0xff]  ;;  %v5411_v55 = vsel %vm2525_vm5, %v5361_v4, %v4570_v35  ;;  %v5262_v35 = vsel %vm2372_vm2, %v5212_v22, %v11447_v58 }
 0x4e2   : > { %v11537_v38 = vpop.permute.xlu1 %4373  ;;  %v6481_v5 = vmax.f32 %v6381_v62, %v6431_v34  ;;  %v6482_v63 = vmax.f32 %v6382_v13, %v6432_v39  ;;  %v5461_v51 = vsel %vm2576_vm6, %v5411_v55, %v4770_v9  ;;  %v5312_v33 = vsel %vm2423_vm3, %v5262_v35, %v11468_v30  ;;  %v3597_v34 = vld [vmem:[#allocation3 + $0xfd] sm:$0xff] }
 0x4e3   : > { %v11541_v41 = vpop.permute.xlu0 %4175  ;;  %v5511_v48 = vsel %vm2627_vm7, %v5461_v51, %v4925_v24  ;;  %v5362_v23 = vsel %vm2474_vm4, %v5312_v33, %v11487_v46  ;;  %v6233_v55 = vld [vmem:[#allocation2 + $0x18] sm:$0xff] }
 0x4e4   : > { %4785 = vrot.lane.b32.xlu1 %v3399_v14, %s13635_s29  ;;  %v6531_v3 = vmax.f32 %v6331_v6, %v6481_v5  ;;  %v6532_v44 = vmax.f32 %v6332_v36, %v6482_v63  ;;  %v5412_v52 = vsel %vm2525_vm5, %v5362_v23, %v4572_v28  ;;  %v11597_v6 = vld [vmem:[#allocation3 + $0x102] sm:$0xff]  ;;  %v3646_v5 = vld [vmem:[#allocation3 + $0xf6] sm:$0xff]  ;;  %v5213_v36 = vsel %vm434_vm0, %v11121_v12, %v11491_v0 }
 0x4e5   : > { %4587 = vrot.lane.b32.xlu0 %v3645_v2, %s13327_s13  ;;  %v5462_v58 = vsel %vm2576_vm6, %v5412_v52, %v4772_v47  ;;  %v6283_v14 = vld [vmem:[#allocation2 + $0x19] sm:$0xff]  ;;  %v6284_v63 = vld [vmem:[#allocation2 + $0x21] sm:$0xff]  ;;  %v5263_v2 = vsel %vm2372_vm2, %v5213_v36, %v11503_v57 }
 0x4e6   : > { %v5080_v8 = vpop.permute.xlu1 %5079  ;;  %6581 = vst.msk [vmem:[#allocation3 + $0x8] sm:$0xff] %vm434_vm0, %v6531_v3  ;;  %6582 = vst.msk [vmem:[#allocation3 + $0x10] sm:$0xff] %vm434_vm0, %v6532_v44  ;;  %v6333_v12 = vmax.f32 %v6233_v55, %v6283_v14  ;;  %v3401_v57 = vld [vmem:[#allocation3 + $0x108] sm:$0xff]  ;;  %v3647_v33 = vld [vmem:[#allocation3 + $0xfe] sm:$0xff] }
 0x4e7   : > { %v5561_v37 = vsel %vm2678_vm8, %v5511_v48, %v5080_v8  ;;  %v4927_v17 = vpop.permute.xlu0 %4926  ;;  %v5313_v48 = vsel %vm2423_vm3, %v5263_v2, %v11518_v43  ;;  %v3599_v55 = vld [vmem:[#allocation3 + $0x10d] sm:$0xff] }
 0x4e8   : > { %4189 = vrot.lane.b32.xlu1 %v3546_v60, %s13323_s22  ;;  %8336 = vmatprep.mubr.msk.f32.mxu1 %vm2748_vm9, %v5561_v37  ;;  %v5512_v30 = vsel %vm2627_vm7, %v5462_v58, %v4927_v17 }
 0x4e9   : > { %3991 = vrot.lane.b32.xlu0 %v3497_v27, %s13325_s16 }
 0x4ea   : > { %v11561_v50 = vpop.permute.xlu1 %4375 }
 0x4eb   : > { %v11565_v15 = vpop.permute.xlu0 %3777 }
 0x4ec   : > { %4940 = vrot.lane.b32.xlu1 %v3449_v18, %s13625_s12 }
 0x4ed   : > { %4787 = vrot.lane.b32.xlu0 %v3400_v59, %s13635_s29  ;;  %v6630_v49 = vld [vmem:[#allocation3] ss:$2 sm:$0xff] }
 0x4ee   : > { %v5082_v61 = vpop.permute.xlu1 %5081  ;;  %6631 = vst.msk [vmem:[#allocation2] sm:$0xff] %vm434_vm0, %v6630_v49  ;;  %v3548_v49 = vld [vmem:[#allocation3 + $0x104] sm:$0xff] }
 0x4ef   : > { %v5562_v46 = vsel %vm2678_vm8, %v5512_v30, %v5082_v61  ;;  %v4574_v27 = vpop.permute.xlu0 %4573  ;;  %v5214_v30 = vsel %vm434_vm0, %v11172_v45, %v11505_v1  ;;  %v3451_v45 = vld [vmem:[#allocation3 + $0x109] sm:$0xff] }
 0x4f0   : > { %4389 = vrot.lane.b32.xlu1 %v3596_v31, %s13329_s24  ;;  %v8320_v9 = vpop.f32.mrf.mxu1  ;;  %8337 = vmatmul.mubr.msk.f32.gmra.mxu1 %vm2748_vm9, %v5562_v46  ;;  %v5264_v61 = vsel %vm2372_vm2, %v5214_v30, %v11520_v42 }
 0x4f1   : > { %4191 = vrot.lane.b32.xlu0 %v3547_v19, %s13323_s22  ;;  %v5867_v54 = vadd.f32 %v8320_v9, %v11352_v40  ;;  %v5314_v46 = vsel %vm2423_vm3, %v5264_v61, %v11541_v41  ;;  %v3402_v9 = vld [vmem:[#allocation3 + $0x110] sm:$0xff] }
 0x4f2   : > { %v11578_v28 = vpop.permute.xlu1 %3977  ;;  %v5861_v25 = vpop.f32.mrf.mxu1  ;;  %v5364_v31 = vsel %vm2474_vm4, %v5314_v46, %v11561_v50  ;;  %v3549_v50 = vld [vmem:[#allocation3 + $0x10c] sm:$0xff] }
 0x4f3   : > { %v6087_v10 = vmax.f32 %v5867_v54, 0.0  ;;  %v11580_v24 = vpop.permute.xlu0 %3779  ;;  %v5862_v47 = vadd.f32 %v11352_v40, %v5861_v25  ;;  %v3649_v46 = vld [vmem:[#allocation3 + $0x10e] sm:$0xff] }
 0x4f4   : > { %5095 = vrot.lane.b32.xlu1 %v3499_v32, %s13626_s30 }
 0x4f5   : > { %v6137_v16 = vmin.f32 %v6087_v10, 6.0  ;;  %v6086_v20 = vmax.f32 %v5862_v47, 0.0  ;;  %4942 = vrot.lane.b32.xlu0 %v11584_v56, %s13625_s12  ;;  %v3598_v47 = vld [vmem:[#allocation3 + $0x105] sm:$0xff] }
 0x4f6   : > { %v4774_v11 = vpop.permute.xlu1 %4773 }
 0x4f7   : > { %6187 = vst.msk [vmem:[#allocation2 + $0x38] sm:$0xff] %vm434_vm0, %v6137_v16  ;;  %v6136_v26 = vmin.f32 %v6086_v20, 6.0  ;;  %v4576_v62 = vpop.permute.xlu0 %4575 }
 0x4f8   : > { %4391 = vrot.lane.b32.xlu1 %v3597_v34, %s13329_s24  ;;  %v5414_v1 = vsel %vm2525_vm5, %v5364_v31, %v4576_v62 }
 0x4f9   : > { %6186 = vst.msk [vmem:[#allocation2 + $0x30] sm:$0xff] %vm434_vm0, %v6136_v26  ;;  %3793 = vrot.lane.b32.xlu0 %v11509_v29, %s13331_s15  ;;  %v6234_v29 = vld [vmem:[#allocation2 + $0x20] sm:$0xff] }
 0x4fa   : > { %v11593_v13 = vpop.permute.xlu1 %4177  ;;  %v6334_v17 = vmax.f32 %v6234_v29, %v6284_v63 }
 0x4fb   : > { %v11595_v21 = vpop.permute.xlu0 %3979 }
 0x4fc   : > { %5097 = vrot.lane.b32.xlu1 %v11597_v6, %s13626_s30 }
 0x4fd   : > { %4589 = vrot.lane.b32.xlu0 %v3646_v5, %s13327_s13  ;;  %v11657_v5 = vld [vmem:[#allocation3 + $0x10a] sm:$0xff] }
 0x4fe   : > { %v4929_v39 = vpop.permute.xlu1 %4928 }
 0x4ff   : > { %v4776_v4 = vpop.permute.xlu0 %4775 }
 0x500   : > { %3993 = vrot.lane.b32.xlu1 %v11522_v53, %s13325_s16  ;;  %v6383_v3 = vld [vmem:[#allocation2 + $0x2c] sm:$0xff]  ;;  %v6384_v51 = vld [vmem:[#allocation2 + $0x34] sm:$0xff]  ;;  %v5363_v53 = vsel %vm2474_vm4, %v5313_v48, %v11537_v38  ;;  %v5464_v42 = vsel %vm2576_vm6, %v5414_v1, %v4776_v4 }
 0x501   : > { %v6433_v44 = vld [vmem:[#allocation2 + $0x2d] sm:$0xff]  ;;  %3795 = vrot.lane.b32.xlu0 %v3449_v18, %s13331_s15  ;;  %v6434_v8 = vld [vmem:[#allocation2 + $0x35] sm:$0xff]  ;;  %v5413_v35 = vsel %vm2525_vm5, %v5363_v53, %v4574_v27 }
 0x502   : > { %v11612_v37 = vpop.permute.xlu1 %4377  ;;  %v6483_v0 = vmax.f32 %v6383_v3, %v6433_v44  ;;  %v6484_v60 = vmax.f32 %v6384_v51, %v6434_v8  ;;  %v5463_v18 = vsel %vm2576_vm6, %v5413_v35, %v4774_v11  ;;  %v11674_v51 = vld [vmem:[#allocation3 + $0x112] sm:$0xff]  ;;  %v3648_v44 = vld [vmem:[#allocation3 + $0x106] sm:$0xff] }
 0x503   : > { %v11616_v22 = vpop.permute.xlu0 %4179  ;;  %v5513_v52 = vsel %vm2627_vm7, %v5463_v18, %v4929_v39  ;;  %v11661_v39 = vld [vmem:[#allocation3 + $0x111] sm:$0xff]  ;;  %v6285_v8 = vld [vmem:[#allocation2 + $0x29] sm:$0xff] }
 0x504   : > { %4789 = vrot.lane.b32.xlu1 %v3401_v57, %s13635_s29  ;;  %v6533_v23 = vmax.f32 %v6333_v12, %v6483_v0  ;;  %v6534_v43 = vmax.f32 %v6334_v17, %v6484_v60  ;;  %v6235_v0 = vld [vmem:[#allocation2 + $0x28] sm:$0xff]  ;;  %v8632_v17 = vld [vmem:[#allocation3 + $0xb0] sm:$0xff] }
 0x505   : > { %4591 = vrot.lane.b32.xlu0 %v3647_v33, %s13327_s13  ;;  %v6236_v53 = vld [vmem:[#allocation2 + $0x30] sm:$0xff]  ;;  %v6335_v18 = vmax.f32 %v6235_v0, %v6285_v8  ;;  %v11739_v8 = vld [vmem:[#allocation3 + $0x121] sm:$0xff] }
 0x506   : > { %v5084_v59 = vpop.permute.xlu1 %5083  ;;  %6583 = vst.msk [vmem:[#allocation3 + $0x18] sm:$0xff] %vm434_vm0, %v6533_v23  ;;  %6584 = vst.msk [vmem:[#allocation3 + $0x20] sm:$0xff] %vm434_vm0, %v6534_v43  ;;  %v6286_v60 = vld [vmem:[#allocation2 + $0x31] sm:$0xff] }
 0x507   : > { %v5563_v38 = vsel %vm2678_vm8, %v5513_v52, %v5084_v59  ;;  %v4931_v58 = vpop.permute.xlu0 %4930 }
 0x508   : > { %4193 = vrot.lane.b32.xlu1 %v3548_v49, %s13323_s22  ;;  %8339 = vmatprep.mubr.msk.f32.mxu1 %vm2748_vm9, %v5563_v38  ;;  %v5514_v54 = vsel %vm2627_vm7, %v5464_v42, %v4931_v58  ;;  %v6336_v38 = vmax.f32 %v6236_v53, %v6286_v60  ;;  %v3550_v42 = vld [vmem:[#allocation3 + $0x114] sm:$0xff]  ;;  %v3601_v60 = vld [vmem:[#allocation3 + $0x11d] sm:$0xff] }
 0x509   : > { %3995 = vrot.lane.b32.xlu0 %v3499_v32, %s13325_s16 }
 0x50a   : > { %v11636_v27 = vpop.permute.xlu1 %4379 }
 0x50b   : > { %v11640_v19 = vpop.permute.xlu0 %3781 }
 0x50c   : > { %4944 = vrot.lane.b32.xlu1 %v3451_v45, %s13625_s12 }
 0x50d   : > { %4791 = vrot.lane.b32.xlu0 %v3402_v9, %s13635_s29 }
 0x50e   : > { %v5086_v41 = vpop.permute.xlu1 %5085 }
 0x50f   : > { %v5564_v25 = vsel %vm2678_vm8, %v5514_v54, %v5086_v41  ;;  %v4578_v10 = vpop.permute.xlu0 %4577  ;;  %v5216_v54 = vsel %vm434_vm0, %v11250_v7, %v11580_v24  ;;  %v3453_v7 = vld [vmem:[#allocation3 + $0x119] sm:$0xff] }
 0x510   : > { %4393 = vrot.lane.b32.xlu1 %v3598_v47, %s13329_s24  ;;  %v8323_v32 = vpop.f32.mrf.mxu1  ;;  %8340 = vmatmul.mubr.msk.f32.gmra.mxu1 %vm2748_vm9, %v5564_v25  ;;  %v5266_v41 = vsel %vm2372_vm2, %v5216_v54, %v11595_v21 }
 0x511   : > { %4195 = vrot.lane.b32.xlu0 %v3549_v50, %s13323_s22  ;;  %v5877_v16 = vadd.f32 %v8323_v32, %v11352_v40  ;;  %v5316_v25 = vsel %vm2423_vm3, %v5266_v41, %v11616_v22  ;;  %v3404_v32 = vld [vmem:[#allocation3 + $0x120] sm:$0xff] }
 0x512   : > { %v11652_v20 = vpop.permute.xlu1 %3981  ;;  %v5871_v11 = vpop.f32.mrf.mxu1  ;;  %v5366_v47 = vsel %vm2474_vm4, %v5316_v25, %v11636_v27  ;;  %v3600_v27 = vld [vmem:[#allocation3 + $0x115] sm:$0xff]  ;;  %v3651_v41 = vld [vmem:[#allocation3 + $0x11e] sm:$0xff] }
 0x513   : > { %v6089_v26 = vmax.f32 %v5877_v16, 0.0  ;;  %v11654_v62 = vpop.permute.xlu0 %3783  ;;  %v5872_v34 = vadd.f32 %v11352_v40, %v5871_v11 }
 0x514   : > { %5099 = vrot.lane.b32.xlu1 %v11657_v5, %s13626_s30 }
 0x515   : > { %v6139_v4 = vmin.f32 %v6089_v26, 6.0  ;;  %v6088_v14 = vmax.f32 %v5872_v34, 0.0  ;;  %4946 = vrot.lane.b32.xlu0 %v11661_v39, %s13625_s12 }
 0x516   : > { %v4778_v36 = vpop.permute.xlu1 %4777 }
 0x517   : > { %6189 = vst.msk [vmem:[#allocation2 + $0x48] sm:$0xff] %vm434_vm0, %v6139_v4  ;;  %v6138_v29 = vmin.f32 %v6088_v14, 6.0  ;;  %v4580_v63 = vpop.permute.xlu0 %4579 }
 0x518   : > { %4395 = vrot.lane.b32.xlu1 %v3599_v55, %s13329_s24  ;;  %v5416_v24 = vsel %vm2525_vm5, %v5366_v47, %v4580_v63 }
 0x519   : > { %6188 = vst.msk [vmem:[#allocation2 + $0x40] sm:$0xff] %vm434_vm0, %v6138_v29  ;;  %3797 = vrot.lane.b32.xlu0 %v11584_v56, %s13331_s15  ;;  %v5215_v56 = vsel %vm434_vm0, %v8632_v17, %v11565_v15 }
 0x51a   : > { %v11670_v2 = vpop.permute.xlu1 %4181  ;;  %v5265_v57 = vsel %vm2372_vm2, %v5215_v56, %v11578_v28  ;;  %v3403_v28 = vld [vmem:[#allocation3 + $0x118] sm:$0xff] }
 0x51b   : > { %v11672_v3 = vpop.permute.xlu0 %3983  ;;  %v5315_v43 = vsel %vm2423_vm3, %v5265_v57, %v11593_v13 }
 0x51c   : > { %5101 = vrot.lane.b32.xlu1 %v11674_v51, %s13626_s30 }
 0x51d   : > { %4593 = vrot.lane.b32.xlu0 %v3648_v44, %s13327_s13 }
 0x51e   : > { %v4933_v48 = vpop.permute.xlu1 %4932 }
 0x51f   : > { %v4780_v12 = vpop.permute.xlu0 %4779 }
 0x520   : > { %3997 = vrot.lane.b32.xlu1 %v11597_v6, %s13325_s16  ;;  %v6385_v35 = vld [vmem:[#allocation2 + $0x3c] sm:$0xff]  ;;  %v6386_v33 = vld [vmem:[#allocation2 + $0x44] sm:$0xff]  ;;  %v5365_v6 = vsel %vm2474_vm4, %v5315_v43, %v11612_v37  ;;  %v5466_v21 = vsel %vm2576_vm6, %v5416_v24, %v4780_v12 }
 0x521   : > { %v6435_v23 = vld [vmem:[#allocation2 + $0x3d] sm:$0xff]  ;;  %3799 = vrot.lane.b32.xlu0 %v3451_v45, %s13331_s15  ;;  %v6436_v52 = vld [vmem:[#allocation2 + $0x45] sm:$0xff]  ;;  %v5415_v30 = vsel %vm2525_vm5, %v5365_v6, %v4578_v10 }
 0x522   : > { %v6485_v59 = vmax.f32 %v6385_v35, %v6435_v23  ;;  %v11688_v15 = vpop.permute.xlu1 %4381  ;;  %v6486_v58 = vmax.f32 %v6386_v33, %v6436_v52  ;;  %v5465_v31 = vsel %vm2576_vm6, %v5415_v30, %v4778_v36  ;;  %v11752_v35 = vld [vmem:[#allocation3 + $0x122] sm:$0xff]  ;;  %v3650_v33 = vld [vmem:[#allocation3 + $0x116] sm:$0xff] }
 0x523   : > { %v11692_v49 = vpop.permute.xlu0 %4183  ;;  %v5515_v45 = vsel %vm2627_vm7, %v5465_v31, %v4933_v48  ;;  %v11735_v48 = vld [vmem:[#allocation3 + $0x11a] sm:$0xff] }
 0x524   : > { %v6535_v61 = vmax.f32 %v6335_v18, %v6485_v59  ;;  %4793 = vrot.lane.b32.xlu1 %v3403_v28, %s13635_s29  ;;  %v6536_v13 = vmax.f32 %v6336_v38, %v6486_v58  ;;  %v6287_v43 = vld [vmem:[#allocation2 + $0x39] sm:$0xff]  ;;  %v6288_v6 = vld [vmem:[#allocation2 + $0x41] sm:$0xff] }
 0x525   : > { %4595 = vrot.lane.b32.xlu0 %v3649_v46, %s13327_s13  ;;  %v6237_v52 = vld [vmem:[#allocation2 + $0x38] sm:$0xff]  ;;  %v8633_v59 = vld [vmem:[#allocation3 + $0xc0] sm:$0xff] }
 0x526   : > { %6585 = vst.msk [vmem:[#allocation3 + $0x28] sm:$0xff] %vm434_vm0, %v6535_v61  ;;  %v5088_v37 = vpop.permute.xlu1 %5087  ;;  %6586 = vst.msk [vmem:[#allocation3 + $0x30] sm:$0xff] %vm434_vm0, %v6536_v13  ;;  %v6238_v38 = vld [vmem:[#allocation2 + $0x40] sm:$0xff]  ;;  %v6337_v46 = vmax.f32 %v6237_v52, %v6287_v43  ;;  %v11820_v43 = vld [vmem:[#allocation3 + $0x131] sm:$0xff] }
 0x527   : > { %v5565_v1 = vsel %vm2678_vm8, %v5515_v45, %v5088_v37  ;;  %v4935_v9 = vpop.permute.xlu0 %4934  ;;  %v6338_v37 = vmax.f32 %v6238_v38, %v6288_v6  ;;  %v3603_v6 = vld [vmem:[#allocation3 + $0x12d] sm:$0xff] }
 0x528   : > { %4197 = vrot.lane.b32.xlu1 %v3550_v42, %s13323_s22  ;;  %8342 = vmatprep.mubr.msk.f32.mxu1 %vm2748_vm9, %v5565_v1  ;;  %v5516_v16 = vsel %vm2627_vm7, %v5466_v21, %v4935_v9  ;;  %v8634_v21 = vld [vmem:[#allocation3 + $0xc8] sm:$0xff] }
 0x529   : > { %3999 = vrot.lane.b32.xlu0 %v11657_v5, %s13325_s16  ;;  %v3551_v5 = vld [vmem:[#allocation3 + $0x11c] sm:$0xff] }
 0x52a   : > { %v11713_v10 = vpop.permute.xlu1 %4383 }
 0x52b   : > { %v11717_v50 = vpop.permute.xlu0 %3785 }
 0x52c   : > { %4948 = vrot.lane.b32.xlu1 %v3453_v7, %s13625_s12 }
 0x52d   : > { %4795 = vrot.lane.b32.xlu0 %v3404_v32, %s13635_s29  ;;  %v6633_v11 = vld [vmem:[#allocation3 + $0x28] ss:$2 sm:$0xff] }
 0x52e   : > { %v5090_v22 = vpop.permute.xlu1 %5089  ;;  %6634 = vst.msk [vmem:[#allocation2 + $0x8] sm:$0xff] %vm434_vm0, %v6633_v11  ;;  %v3552_v32 = vld [vmem:[#allocation3 + $0x124] sm:$0xff] }
 0x52f   : > { %v5566_v26 = vsel %vm2678_vm8, %v5516_v16, %v5090_v22  ;;  %v4582_v34 = vpop.permute.xlu0 %4581  ;;  %v5218_v16 = vsel %vm434_vm0, %v8634_v21, %v11654_v62  ;;  %v3455_v62 = vld [vmem:[#allocation3 + $0x129] sm:$0xff] }
 0x530   : > { %4397 = vrot.lane.b32.xlu1 %v3600_v27, %s13329_s24  ;;  %v8326_v4 = vpop.f32.mrf.mxu1  ;;  %8343 = vmatmul.mubr.msk.f32.gmra.mxu1 %vm2748_vm9, %v5566_v26  ;;  %v5268_v22 = vsel %vm2372_vm2, %v5218_v16, %v11672_v3  ;;  %v3653_v16 = vld [vmem:[#allocation3 + $0x12e] sm:$0xff] }
 0x531   : > { %4199 = vrot.lane.b32.xlu0 %v3551_v5, %s13323_s22  ;;  %v5887_v14 = vadd.f32 %v8326_v4, %v11352_v40  ;;  %v5318_v11 = vsel %vm2423_vm3, %v5268_v22, %v11692_v49  ;;  %v3406_v4 = vld [vmem:[#allocation3 + $0x130] sm:$0xff] }
 0x532   : > { %v11730_v36 = vpop.permute.xlu1 %3985  ;;  %v5881_v29 = vpop.f32.mrf.mxu1 }
 0x533   : > { %v6091_v63 = vmax.f32 %v5887_v14, 0.0  ;;  %v11732_v55 = vpop.permute.xlu0 %3787  ;;  %v5882_v44 = vadd.f32 %v11352_v40, %v5881_v29 }
 0x534   : > { %5103 = vrot.lane.b32.xlu1 %v11735_v48, %s13626_s30 }
 0x535   : > { %v6141_v12 = vmin.f32 %v6091_v63, 6.0  ;;  %v6090_v0 = vmax.f32 %v5882_v44, 0.0  ;;  %4950 = vrot.lane.b32.xlu0 %v11739_v8, %s13625_s12  ;;  %v3602_v44 = vld [vmem:[#allocation3 + $0x125] sm:$0xff] }
 0x536   : > { %v4782_v17 = vpop.permute.xlu1 %4781 }
 0x537   : > { %6191 = vst.msk [vmem:[#allocation2 + $0x58] sm:$0xff] %vm434_vm0, %v6141_v12  ;;  %v6140_v56 = vmin.f32 %v6090_v0, 6.0  ;;  %v4584_v53 = vpop.permute.xlu0 %4583  ;;  %v11808_v12 = vld [vmem:[%s13297_s4] ss:$0 sm:$0xff] }
 0x538   : > { %4399 = vrot.lane.b32.xlu1 %v3601_v60, %s13329_s24 }
 0x539   : > { %6190 = vst.msk [vmem:[#allocation2 + $0x50] sm:$0xff] %vm434_vm0, %v6140_v56  ;;  %3801 = vrot.lane.b32.xlu0 %v11661_v39, %s13331_s15  ;;  %v5217_v39 = vsel %vm434_vm0, %v8633_v59, %v11640_v19 }
 0x53a   : > { %v11748_v40 = vpop.permute.xlu1 %4185  ;;  %v5267_v58 = vsel %vm2372_vm2, %v5217_v39, %v11652_v20  ;;  %v3405_v20 = vld [vmem:[#allocation3 + $0x128] sm:$0xff] }
 0x53b   : > { %v11750_v57 = vpop.permute.xlu0 %3987  ;;  %v5317_v13 = vsel %vm2423_vm3, %v5267_v58, %v11670_v2 }
 0x53c   : > { %5105 = vrot.lane.b32.xlu1 %v11752_v35, %s13626_s30 }
 0x53d   : > { %4597 = vrot.lane.b32.xlu0 %v3650_v33, %s13327_s13 }
 0x53e   : > { %v4937_v23 = vpop.permute.xlu1 %4936 }
 0x53f   : > { %v4784_v18 = vpop.permute.xlu0 %4783 }
 0x540   : > { %4001 = vrot.lane.b32.xlu1 %v11674_v51, %s13325_s16  ;;  %v6387_v28 = vld [vmem:[#allocation2 + $0x4c] sm:$0xff]  ;;  %v6388_v30 = vld [vmem:[#allocation2 + $0x54] sm:$0xff]  ;;  %v5367_v51 = vsel %vm2474_vm4, %v5317_v13, %v11688_v15 }
 0x541   : > { %v6437_v61 = vld [vmem:[#allocation2 + $0x4d] sm:$0xff]  ;;  %3803 = vrot.lane.b32.xlu0 %v3453_v7, %s13331_s15  ;;  %v6438_v31 = vld [vmem:[#allocation2 + $0x55] sm:$0xff]  ;;  %v5417_v42 = vsel %vm2525_vm5, %v5367_v51, %v4582_v34  ;;  %v5368_v34 = vsel %vm2474_vm4, %v5318_v11, %v11713_v10 }
 0x542   : > { %v6487_v45 = vmax.f32 %v6387_v28, %v6437_v61  ;;  %v11766_v19 = vpop.permute.xlu1 %4385  ;;  %v6488_v1 = vmax.f32 %v6388_v30, %v6438_v31  ;;  %v5467_v2 = vsel %vm2576_vm6, %v5417_v42, %v4782_v17  ;;  %v5418_v5 = vsel %vm2525_vm5, %v5368_v34, %v4584_v53  ;;  %v3553_v10 = vld [vmem:[#allocation3 + $0x12c] sm:$0xff] }
 0x543   : > { %v11770_v9 = vpop.permute.xlu0 %4187  ;;  %v5517_v47 = vsel %vm2627_vm7, %v5467_v2, %v4937_v23  ;;  %v5468_v3 = vsel %vm2576_vm6, %v5418_v5, %v4784_v18  ;;  %v11816_v23 = vld [vmem:[#allocation3 + $0x12a] sm:$0xff]  ;;  %v11833_v30 = vld [vmem:[#allocation3 + $0x132] sm:$0xff] }
 0x544   : > { %v6537_v54 = vmax.f32 %v6337_v46, %v6487_v45  ;;  %4797 = vrot.lane.b32.xlu1 %v3405_v20, %s13635_s29  ;;  %v6538_v25 = vmax.f32 %v6338_v37, %v6488_v1  ;;  %v3652_v61 = vld [vmem:[#allocation3 + $0x126] sm:$0xff]  ;;  %v8636_v37 = vld [vmem:[#allocation3 + $0xd0] sm:$0xff] }
 0x545   : > { %4599 = vrot.lane.b32.xlu0 %v3651_v41, %s13327_s13  ;;  %v6289_v13 = vld [vmem:[#allocation2 + $0x49] sm:$0xff]  ;;  %v6290_v1 = vld [vmem:[#allocation2 + $0x51] sm:$0xff] }
 0x546   : > { %6587 = vst.msk [vmem:[#allocation3 + $0x38] sm:$0xff] %vm434_vm0, %v6537_v54  ;;  %v5092_v15 = vpop.permute.xlu1 %5091  ;;  %6588 = vst.msk [vmem:[#allocation3 + $0x40] sm:$0xff] %vm434_vm0, %v6538_v25  ;;  %v6239_v45 = vld [vmem:[#allocation2 + $0x48] sm:$0xff]  ;;  %v6240_v51 = vld [vmem:[#allocation2 + $0x50] sm:$0xff] }
 0x547   : > { %v5567_v7 = vsel %vm2678_vm8, %v5517_v47, %v5092_v15  ;;  %v4939_v24 = vpop.permute.xlu0 %4938  ;;  %v6339_v2 = vmax.f32 %v6239_v45, %v6289_v13  ;;  %v3458_v13 = vld [vmem:[#allocation3 + $0x141] sm:$0xff] }
 0x548   : > { %4201 = vrot.lane.b32.xlu1 %v3552_v32, %s13323_s22  ;;  %8345 = vmatprep.mubr.msk.f32.mxu1 %vm2748_vm9, %v5567_v7  ;;  %v5518_v14 = vsel %vm2627_vm7, %v5468_v3, %v4939_v24  ;;  %v6340_v7 = vmax.f32 %v6240_v51, %v6290_v1  ;;  %v8637_v3 = vld [vmem:[#allocation3 + $0xd8] sm:$0xff] }
 0x549   : > { %4003 = vrot.lane.b32.xlu0 %v11735_v48, %s13325_s16  ;;  %v3605_v1 = vld [vmem:[#allocation3 + $0x13d] sm:$0xff] }
 0x54a   : > { %v11790_v26 = vpop.permute.xlu1 %4387 }
 0x54b   : > { %v11794_v27 = vpop.permute.xlu0 %3789 }
 0x54c   : > { %4952 = vrot.lane.b32.xlu1 %v3455_v62, %s13625_s12 }
 0x54d   : > { %4799 = vrot.lane.b32.xlu0 %v3406_v4, %s13635_s29  ;;  %v3554_v4 = vld [vmem:[#allocation3 + $0x134] sm:$0xff] }
 0x54e   : > { %v5094_v49 = vpop.permute.xlu1 %5093 }
 0x54f   : > { %v5568_v29 = vsel %vm2678_vm8, %v5518_v14, %v5094_v49  ;;  %v4586_v63 = vpop.permute.xlu0 %4585  ;;  %v5220_v14 = vsel %vm434_vm0, %v8637_v3, %v11732_v55  ;;  %v3457_v55 = vld [vmem:[#allocation3 + $0x139] sm:$0xff] }
 0x550   : > { %4401 = vrot.lane.b32.xlu1 %v3602_v44, %s13329_s24  ;;  %v8329_v48 = vpop.f32.mrf.mxu1  ;;  %8346 = vmatmul.mubr.msk.f32.gmra.mxu1 %vm2748_vm9, %v5568_v29  ;;  %v5270_v49 = vsel %vm2372_vm2, %v5220_v14, %v11750_v57 }
 0x551   : > { %4203 = vrot.lane.b32.xlu0 %v3553_v10, %s13323_s22  ;;  %v5897_v0 = vadd.f32 %v11808_v12, %v8329_v48  ;;  %v5320_v29 = vsel %vm2423_vm3, %v5270_v49, %v11770_v9 }
 0x552   : > { %v11811_v17 = vpop.permute.xlu1 %3989  ;;  %v5891_v56 = vpop.f32.mrf.mxu1  ;;  %v5370_v44 = vsel %vm2474_vm4, %v5320_v29, %v11790_v26  ;;  %v3555_v26 = vld [vmem:[#allocation3 + $0x13c] sm:$0xff] }
 0x553   : > { %v6093_v53 = vmax.f32 %v5897_v0, 0.0  ;;  %v11813_v60 = vpop.permute.xlu0 %3791  ;;  %v5892_v33 = vadd.f32 %v11808_v12, %v5891_v56  ;;  %v3408_v0 = vld [vmem:[#allocation3 + $0x140] sm:$0xff] }
 0x554   : > { %5107 = vrot.lane.b32.xlu1 %v11816_v23, %s13626_s30  ;;  %v3655_v29 = vld [vmem:[#allocation3 + $0x13e] sm:$0xff] }
 0x555   : > { %v6143_v18 = vmin.f32 %v6093_v53, 6.0  ;;  %v6092_v52 = vmax.f32 %v5892_v33, 0.0  ;;  %4954 = vrot.lane.b32.xlu0 %v11820_v43, %s13625_s12 }
 0x556   : > { %v4786_v59 = vpop.permute.xlu1 %4785 }
 0x557   : > { %6193 = vst.msk [vmem:[#allocation2 + $0x68] sm:$0xff] %vm434_vm0, %v6143_v18  ;;  %v6142_v39 = vmin.f32 %v6092_v52, 6.0  ;;  %v4588_v38 = vpop.permute.xlu0 %4587 }
 0x558   : > { %4403 = vrot.lane.b32.xlu1 %v3603_v6, %s13329_s24  ;;  %v5420_v48 = vsel %vm2525_vm5, %v5370_v44, %v4588_v38 }
 0x559   : > { %6192 = vst.msk [vmem:[#allocation2 + $0x60] sm:$0xff] %vm434_vm0, %v6142_v39  ;;  %3805 = vrot.lane.b32.xlu0 %v11739_v8, %s13331_s15  ;;  %v5219_v8 = vsel %vm434_vm0, %v8636_v37, %v11717_v50 }
 0x55a   : > { %v11829_v58 = vpop.permute.xlu1 %4189  ;;  %v5269_v20 = vsel %vm2372_vm2, %v5219_v8, %v11730_v36  ;;  %v11853_v36 = vld [vmem:[#allocation3 + $0x138] sm:$0xff] }
 0x55b   : > { %v11831_v28 = vpop.permute.xlu0 %3991  ;;  %v5319_v25 = vsel %vm2423_vm3, %v5269_v20, %v11748_v40 }
 0x55c   : > { %5109 = vrot.lane.b32.xlu1 %v11833_v30, %s13626_s30 }
 0x55d   : > { %4601 = vrot.lane.b32.xlu0 %v3652_v61, %s13327_s13 }
 0x55e   : > { %v4941_v46 = vpop.permute.xlu1 %4940 }
 0x55f   : > { %v4788_v31 = vpop.permute.xlu0 %4787 }
 0x560   : > { %4005 = vrot.lane.b32.xlu1 %v11752_v35, %s13325_s16  ;;  %v6389_v42 = vld [vmem:[#allocation2 + $0x5c] sm:$0xff]  ;;  %v6390_v54 = vld [vmem:[#allocation2 + $0x64] sm:$0xff]  ;;  %v5369_v35 = vsel %vm2474_vm4, %v5319_v25, %v11766_v19  ;;  %v5470_v57 = vsel %vm2576_vm6, %v5420_v48, %v4788_v31 }
 0x561   : > { %v6439_v41 = vld [vmem:[#allocation2 + $0x5d] sm:$0xff]  ;;  %3807 = vrot.lane.b32.xlu0 %v3455_v62, %s13331_s15  ;;  %v6440_v47 = vld [vmem:[#allocation2 + $0x65] sm:$0xff]  ;;  %v5419_v21 = vsel %vm2525_vm5, %v5369_v35, %v4586_v63 }
 0x562   : > { %v6489_v15 = vmax.f32 %v6389_v42, %v6439_v41  ;;  %v11847_v50 = vpop.permute.xlu1 %4389  ;;  %v6490_v24 = vmax.f32 %v6390_v54, %v6440_v47  ;;  %v5469_v11 = vsel %vm2576_vm6, %v5419_v21, %v4786_v59  ;;  %v3508_v54 = vld [vmem:[#allocation3 + $0x142] sm:$0xff]  ;;  %v3654_v41 = vld [vmem:[#allocation3 + $0x136] sm:$0xff] }
 0x563   : > { %v11851_v32 = vpop.permute.xlu0 %4191  ;;  %v5519_v34 = vsel %vm2627_vm7, %v5469_v11, %v4941_v46  ;;  %v11895_v46 = vld [vmem:[#allocation3 + $0x13a] sm:$0xff] }
 0x564   : > { %4801 = vrot.lane.b32.xlu1 %v11853_v36, %s13635_s29  ;;  %v6539_v40 = vmax.f32 %v6339_v2, %v6489_v15  ;;  %v6540_v22 = vmax.f32 %v6340_v7, %v6490_v24  ;;  %v6291_v25 = vld [vmem:[#allocation2 + $0x59] sm:$0xff] }
 0x565   : > { %4603 = vrot.lane.b32.xlu0 %v3653_v16, %s13327_s13  ;;  %v6241_v15 = vld [vmem:[#allocation2 + $0x58] sm:$0xff]  ;;  %v8638_v7 = vld [vmem:[#allocation3 + $0xe0] sm:$0xff] }
 0x566   : > { %v5096_v19 = vpop.permute.xlu1 %5095  ;;  %6589 = vst.msk [vmem:[#allocation3 + $0x48] sm:$0xff] %vm434_vm0, %v6539_v40  ;;  %6590 = vst.msk [vmem:[#allocation3 + $0x50] sm:$0xff] %vm434_vm0, %v6540_v22  ;;  %v5221_v35 = vsel %vm434_vm0, %v8638_v7, %v11794_v27  ;;  %v6242_v24 = vld [vmem:[#allocation2 + $0x60] sm:$0xff]  ;;  %v6341_v11 = vmax.f32 %v6241_v15, %v6291_v25  ;;  %v3460_v25 = vld [vmem:[#allocation3 + $0x151] sm:$0xff] }
 0x567   : > { %v5569_v62 = vsel %vm2678_vm8, %v5519_v34, %v5096_v19  ;;  %v4943_v5 = vpop.permute.xlu0 %4942  ;;  %v5271_v21 = vsel %vm2372_vm2, %v5221_v35, %v11811_v17  ;;  %v3409_v17 = vld [vmem:[#allocation3 + $0x148] sm:$0xff] }
 0x568   : > { %4205 = vrot.lane.b32.xlu1 %v3554_v4, %s13323_s22  ;;  %8348 = vmatprep.mubr.msk.f32.mxu1 %vm2748_vm9, %v5569_v62  ;;  %v5520_v56 = vsel %vm2627_vm7, %v5470_v57, %v4943_v5  ;;  %v5321_v34 = vsel %vm2423_vm3, %v5271_v21, %v11829_v58  ;;  %v3556_v57 = vld [vmem:[#allocation3 + $0x144] sm:$0xff]  ;;  %v3607_v21 = vld [vmem:[#allocation3 + $0x14d] sm:$0xff] }
 0x569   : > { %4007 = vrot.lane.b32.xlu0 %v11816_v23, %s13325_s16  ;;  %v3604_v23 = vld [vmem:[#allocation3 + $0x135] sm:$0xff] }
 0x56a   : > { %v11874_v63 = vpop.permute.xlu1 %4391 }
 0x56b   : > { %v11878_v10 = vpop.permute.xlu0 %3793 }
 0x56c   : > { %4956 = vrot.lane.b32.xlu1 %v3457_v55, %s13625_s12 }
 0x56d   : > { %4803 = vrot.lane.b32.xlu0 %v3408_v0, %s13635_s29 }
 0x56e   : > { %v5098_v9 = vpop.permute.xlu1 %5097 }
 0x56f   : > { %v5570_v53 = vsel %vm2678_vm8, %v5520_v56, %v5098_v9  ;;  %v4590_v33 = vpop.permute.xlu0 %4589  ;;  %v8639_v56 = vld [vmem:[#allocation3 + $0xe8] sm:$0xff] }
 0x570   : > { %4405 = vrot.lane.b32.xlu1 %v3604_v23, %s13329_s24  ;;  %v8332_v18 = vpop.f32.mrf.mxu1  ;;  %8349 = vmatmul.mubr.msk.f32.gmra.mxu1 %vm2748_vm9, %v5570_v53  ;;  %v5222_v9 = vsel %vm434_vm0, %v8639_v56, %v11813_v60  ;;  %v3459_v60 = vld [vmem:[#allocation3 + $0x149] sm:$0xff] }
 0x571   : > { %4207 = vrot.lane.b32.xlu0 %v3555_v26, %s13323_s22  ;;  %v5907_v52 = vadd.f32 %v11808_v12, %v8332_v18  ;;  %v5272_v53 = vsel %vm2372_vm2, %v5222_v9, %v11831_v28 }
 0x572   : > { %v11890_v59 = vpop.permute.xlu1 %3993  ;;  %v5901_v39 = vpop.f32.mrf.mxu1 }
 0x573   : > { %v6095_v38 = vmax.f32 %v5907_v52, 0.0  ;;  %v11892_v6 = vpop.permute.xlu0 %3795  ;;  %v5902_v61 = vadd.f32 %v11808_v12, %v5901_v39  ;;  %v3410_v39 = vld [vmem:[#allocation3 + $0x150] sm:$0xff] }
 0x574   : > { %5111 = vrot.lane.b32.xlu1 %v11895_v46, %s13626_s30 }
 0x575   : > { %v6145_v31 = vmin.f32 %v6095_v38, 6.0  ;;  %v6094_v45 = vmax.f32 %v5902_v61, 0.0  ;;  %4958 = vrot.lane.b32.xlu0 %v3458_v13, %s13625_s12  ;;  %v3606_v13 = vld [vmem:[#allocation3 + $0x145] sm:$0xff] }
 0x576   : > { %v4790_v37 = vpop.permute.xlu1 %4789 }
 0x577   : > { %6195 = vst.msk [vmem:[#allocation2 + $0x78] sm:$0xff] %vm434_vm0, %v6145_v31  ;;  %v6144_v8 = vmin.f32 %v6094_v45, 6.0  ;;  %v4592_v51 = vpop.permute.xlu0 %4591  ;;  %v3557_v31 = vld [vmem:[#allocation3 + $0x14c] sm:$0xff] }
 0x578   : > { %4407 = vrot.lane.b32.xlu1 %v3605_v1, %s13329_s24 }
 0x579   : > { %6194 = vst.msk [vmem:[#allocation2 + $0x70] sm:$0xff] %vm434_vm0, %v6144_v8  ;;  %3809 = vrot.lane.b32.xlu0 %v11820_v43, %s13331_s15  ;;  %v6292_v43 = vld [vmem:[#allocation2 + $0x61] sm:$0xff] }
 0x57a   : > { %v11905_v20 = vpop.permute.xlu1 %4193  ;;  %v6342_v5 = vmax.f32 %v6242_v24, %v6292_v43  ;;  %v3656_v43 = vld [vmem:[#allocation3 + $0x146] sm:$0xff] }
 0x57b   : > { %v11907_v42 = vpop.permute.xlu0 %3995 }
 0x57c   : > { %5113 = vrot.lane.b32.xlu1 %v3508_v54, %s13626_s30 }
 0x57d   : > { %4605 = vrot.lane.b32.xlu0 %v3654_v41, %s13327_s13 }
 0x57e   : > { %v4945_v2 = vpop.permute.xlu1 %4944 }
 0x57f   : > { %v4792_v47 = vpop.permute.xlu0 %4791 }
 0x580   : > { %4009 = vrot.lane.b32.xlu1 %v11833_v30, %s13325_s16  ;;  %v6391_v16 = vld [vmem:[#allocation2 + $0x6c] sm:$0xff]  ;;  %v6392_v40 = vld [vmem:[#allocation2 + $0x74] sm:$0xff]  ;;  %v5371_v30 = vsel %vm2474_vm4, %v5321_v34, %v11847_v50 }
 0x581   : > { %v6441_v22 = vld [vmem:[#allocation2 + $0x6d] sm:$0xff]  ;;  %3811 = vrot.lane.b32.xlu0 %v3457_v55, %s13331_s15  ;;  %v6442_v19 = vld [vmem:[#allocation2 + $0x75] sm:$0xff]  ;;  %v5421_v14 = vsel %vm2525_vm5, %v5371_v30, %v4590_v33  ;;  %v5322_v33 = vsel %vm2423_vm3, %v5272_v53, %v11851_v32 }
 0x582   : > { %v6491_v62 = vmax.f32 %v6391_v16, %v6441_v22  ;;  %v11920_v27 = vpop.permute.xlu1 %4393  ;;  %v6492_v4 = vmax.f32 %v6392_v40, %v6442_v19  ;;  %v5471_v58 = vsel %vm2576_vm6, %v5421_v14, %v4790_v37  ;;  %v5372_v26 = vsel %vm2474_vm4, %v5322_v33, %v11874_v63  ;;  %v3657_v22 = vld [vmem:[#allocation3 + $0x14e] sm:$0xff]  ;;  %v3411_v30 = vld [vmem:[#allocation3 + $0x158] sm:$0xff] }
 0x583   : > { %v11924_v3 = vpop.permute.xlu0 %4195  ;;  %v5521_v55 = vsel %vm2627_vm7, %v5471_v58, %v4945_v2  ;;  %v5422_v52 = vsel %vm2525_vm5, %v5372_v26, %v4592_v51  ;;  %v3509_v2 = vld [vmem:[#allocation3 + $0x14a] sm:$0xff] }
 0x584   : > { %v6541_v49 = vmax.f32 %v6341_v11, %v6491_v62  ;;  %4805 = vrot.lane.b32.xlu1 %v3409_v17, %s13635_s29  ;;  %v6542_v44 = vmax.f32 %v6342_v5, %v6492_v4  ;;  %v5472_v28 = vsel %vm2576_vm6, %v5422_v52, %v4792_v47  ;;  %v3510_v11 = vld [vmem:[#allocation3 + $0x152] sm:$0xff]  ;;  %v6293_v19 = vld [vmem:[#allocation2 + $0x69] sm:$0xff]  ;;  %v3412_v5 = vld [vmem:[#allocation3 + $0x160] sm:$0xff] }
 0x585   : > { %4607 = vrot.lane.b32.xlu0 %v3655_v29, %s13327_s13  ;;  %v6243_v4 = vld [vmem:[#allocation2 + $0x68] sm:$0xff]  ;;  %v8640_v17 = vld [vmem:[#allocation3 + $0xf0] sm:$0xff] }
 0x586   : > { %6591 = vst.msk [vmem:[#allocation3 + $0x58] sm:$0xff] %vm434_vm0, %v6541_v49  ;;  %v5100_v50 = vpop.permute.xlu1 %5099  ;;  %6592 = vst.msk [vmem:[#allocation3 + $0x60] sm:$0xff] %vm434_vm0, %v6542_v44  ;;  %v5223_v14 = vsel %vm434_vm0, %v8640_v17, %v11878_v10  ;;  %v6244_v49 = vld [vmem:[#allocation2 + $0x70] sm:$0xff] }
 0x587   : > { %v5571_v48 = vsel %vm2678_vm8, %v5521_v55, %v5100_v50  ;;  %v4947_v0 = vpop.permute.xlu0 %4946  ;;  %v6294_v29 = vld [vmem:[#allocation2 + $0x71] sm:$0xff]  ;;  %v5273_v44 = vsel %vm2372_vm2, %v5223_v14, %v11890_v59  ;;  %v3462_v59 = vld [vmem:[#allocation3 + $0x161] sm:$0xff] }
 0x588   : > { %4209 = vrot.lane.b32.xlu1 %v3556_v57, %s13323_s22  ;;  %8351 = vmatprep.mubr.msk.f32.mxu1 %vm2748_vm9, %v5571_v48  ;;  %v5522_v32 = vsel %vm2627_vm7, %v5472_v28, %v4947_v0  ;;  %v6343_v48 = vmax.f32 %v6243_v4, %v6293_v19  ;;  %v5323_v0 = vsel %vm2423_vm3, %v5273_v44, %v11905_v20  ;;  %v795_v17 = vld [vmem:[#allocation2 + $0x196] sm:$0xff] }
 0x589   : > { %4011 = vrot.lane.b32.xlu0 %v11895_v46, %s13325_s16  ;;  %v6344_v10 = vmax.f32 %v6244_v49, %v6294_v29  ;;  %v5373_v53 = vsel %vm2474_vm4, %v5323_v0, %v11920_v27  ;;  %v808_v49 = vld [vmem:[#allocation2 + $0x19a] sm:$0xff]  ;;  %v801_v0 = vld [vmem:[#allocation2 + $0x1b0] sm:$0xff] }
 0x58a   : > { %v11944_v23 = vpop.permute.xlu1 %4395 }
 0x58b   : > { %v11948_v18 = vpop.permute.xlu0 %3797 }
 0x58c   : > { %4960 = vrot.lane.b32.xlu1 %v3459_v60, %s13625_s12 }
 0x58d   : > { %4807 = vrot.lane.b32.xlu0 %v3410_v39, %s13635_s29  ;;  %v6636_v38 = vld [vmem:[#allocation3 + $0x50] ss:$2 sm:$0xff] }
 0x58e   : > { %v5102_v61 = vpop.permute.xlu1 %5101  ;;  %6637 = vst.msk [vmem:[#allocation2 + $0x10] sm:$0xff] %vm434_vm0, %v6636_v38  ;;  %v3461_v39 = vld [vmem:[#allocation3 + $0x159] sm:$0xff] }
 0x58f   : > { %v5572_v63 = vsel %vm2678_vm8, %v5522_v32, %v5102_v61  ;;  %v4594_v46 = vpop.permute.xlu0 %4593 }
 0x590   : > { %4409 = vrot.lane.b32.xlu1 %v3606_v13, %s13329_s24  ;;  %v8335_v45 = vpop.f32.mrf.mxu1  ;;  %8352 = vmatmul.mubr.msk.f32.gmra.mxu1 %vm2748_vm9, %v5572_v63  ;;  %v5423_v60 = vsel %vm2525_vm5, %v5373_v53, %v4594_v46  ;;  %v3512_v63 = vld [vmem:[#allocation3 + $0x162] sm:$0xff]  ;;  %v8641_v46 = vld [vmem:[#allocation3 + $0xf8] sm:$0xff] }
 0x591   : > { %4211 = vrot.lane.b32.xlu0 %v3557_v31, %s13323_s22  ;;  %v5917_v37 = vadd.f32 %v11808_v12, %v8335_v45  ;;  %v5224_v13 = vsel %vm434_vm0, %v8641_v46, %v11892_v6  ;;  %v3511_v31 = vld [vmem:[#allocation3 + $0x15a] sm:$0xff] }
 0x592   : > { %v11961_v8 = vpop.permute.xlu1 %3997  ;;  %v5911_v51 = vpop.f32.mrf.mxu1  ;;  %v5274_v45 = vsel %vm2372_vm2, %v5224_v13, %v11907_v42 }
 0x593   : > { %v6097_v1 = vmax.f32 %v5917_v37, 0.0  ;;  %v11963_v54 = vpop.permute.xlu0 %3799  ;;  %v5912_v41 = vadd.f32 %v11808_v12, %v5911_v51  ;;  %v794_v37 = vld [vmem:[#allocation2 + $0x18e] sm:$0xff]  ;;  %v5324_v51 = vsel %vm2423_vm3, %v5274_v45, %v11924_v3 }
 0x594   : > { %5115 = vrot.lane.b32.xlu1 %v3509_v2, %s13626_s30  ;;  %v5374_v6 = vsel %vm2474_vm4, %v5324_v51, %v11944_v23 }
 0x595   : > { %v6147_v47 = vmin.f32 %v6097_v1, 6.0  ;;  %v6096_v15 = vmax.f32 %v5912_v41, 0.0  ;;  %4962 = vrot.lane.b32.xlu0 %v3460_v25, %s13625_s12  ;;  %v793_v41 = vld [vmem:[#allocation2 + $0x186] sm:$0xff] }
 0x596   : > { %v4794_v7 = vpop.permute.xlu1 %4793 }
 0x597   : > { %6197 = vst.msk [vmem:[#allocation2 + $0x88] sm:$0xff] %vm434_vm0, %v6147_v47  ;;  %v6146_v35 = vmin.f32 %v6096_v15, 6.0  ;;  %v11969_v24 = vpop.permute.xlu0 %4595  ;;  %v5473_v20 = vsel %vm2576_vm6, %v5423_v60, %v4794_v7  ;;  %v799_v47 = vld [vmem:[#allocation2 + $0x1a0] sm:$0xff]  ;;  %v798_v7 = vld [vmem:[#allocation2 + $0x198] sm:$0xff] }
 0x598   : > { %4609 = vrot.lane.b32.xlu1 %v3656_v43, %s13327_s13  ;;  %v5424_v25 = vsel %vm2525_vm5, %v5374_v6, %v11969_v24  ;;  %v8642_v60 = vld [vmem:[#allocation3 + $0x100] sm:$0xff] }
 0x599   : > { %6196 = vst.msk [vmem:[#allocation2 + $0x80] sm:$0xff] %vm434_vm0, %v6146_v35  ;;  %4411 = vrot.lane.b32.xlu0 %v3607_v21, %s13329_s24  ;;  %v804_v21 = vld [vmem:[#allocation2 + $0x1a1] sm:$0xff] }
 0x59a   : > { %v11974_v16 = vpop.permute.xlu1 %4197 }
 0x59b   : > { %v11976_v40 = vpop.permute.xlu0 %3999 }
 0x59c   : > { %4611 = vrot.lane.b32.xlu1 %v3657_v22, %s13327_s13 }
 0x59d   : > { %5117 = vrot.lane.b32.xlu0 %v3510_v11, %s13626_s30 }
 0x59e   : > { %v4949_v34 = vpop.permute.xlu1 %4948 }
 0x59f   : > { %v4796_v62 = vpop.permute.xlu0 %4795  ;;  %v5523_v38 = vsel %vm2627_vm7, %v5473_v20, %v4949_v34  ;;  %v803_v34 = vld [vmem:[#allocation2 + $0x199] sm:$0xff] }
 0x5a0   : > { %4811 = vrot.lane.b32.xlu1 %v3412_v5, %s13635_s29  ;;  %v6393_v58 = vld [vmem:[#allocation2 + $0x7c] sm:$0xff]  ;;  %v6394_v55 = vld [vmem:[#allocation2 + $0x84] sm:$0xff]  ;;  %v5474_v42 = vsel %vm2576_vm6, %v5424_v25, %v4796_v62 }
 0x5a1   : > { %v6443_v50 = vld [vmem:[#allocation2 + $0x7d] sm:$0xff]  ;;  %4809 = vrot.lane.b32.xlu0 %v3411_v30, %s13635_s29  ;;  %v6444_v57 = vld [vmem:[#allocation2 + $0x85] sm:$0xff] }
 0x5a2   : > { %v6493_v56 = vmax.f32 %v6393_v58, %v6443_v50  ;;  %v11988_v9 = vpop.permute.xlu1 %4397  ;;  %v6494_v33 = vmax.f32 %v6394_v55, %v6444_v57  ;;  %v796_v58 = vld [vmem:[#allocation2 + $0x19e] sm:$0xff] }
 0x5a3   : > { %v11992_v26 = vpop.permute.xlu0 %4199  ;;  %v809_v50 = vld [vmem:[#allocation2 + $0x1a2] sm:$0xff] }
 0x5a4   : > { %v6543_v52 = vmax.f32 %v6343_v48, %v6493_v56  ;;  %4966 = vrot.lane.b32.xlu1 %v3462_v59, %s13625_s12  ;;  %v6544_v28 = vmax.f32 %v6344_v10, %v6494_v33  ;;  %v800_v56 = vld [vmem:[#allocation2 + $0x1a8] sm:$0xff]  ;;  %v6295_v10 = vld [vmem:[#allocation2 + $0x79] sm:$0xff]  ;;  %v806_v33 = vld [vmem:[#allocation2 + $0x1b1] sm:$0xff] }
 0x5a5   : > { %4964 = vrot.lane.b32.xlu0 %v3461_v39, %s13625_s12  ;;  %v6245_v59 = vld [vmem:[#allocation2 + $0x78] sm:$0xff]  ;;  %v6246_v39 = vld [vmem:[#allocation2 + $0x80] sm:$0xff] }
 0x5a6   : > { %6593 = vst.msk [vmem:[#allocation3 + $0x68] sm:$0xff] %vm434_vm0, %v6543_v52  ;;  %v5104_v27 = vpop.permute.xlu1 %5103  ;;  %6594 = vst.msk [vmem:[#allocation3 + $0x70] sm:$0xff] %vm434_vm0, %v6544_v28  ;;  %v5225_v52 = vsel %vm434_vm0, %v8642_v60, %v11948_v18  ;;  %v6296_v28 = vld [vmem:[#allocation2 + $0x81] sm:$0xff]  ;;  %v805_v18 = vld [vmem:[#allocation2 + $0x1a9] sm:$0xff] }
 0x5a7   : > { %v5573_v32 = vsel %vm2678_vm8, %v5523_v38, %v5104_v27  ;;  %v4951_v61 = vpop.permute.xlu0 %4950  ;;  %v5275_v20 = vsel %vm2372_vm2, %v5225_v52, %v11961_v8  ;;  %v6346_v45 = vmax.f32 %v6246_v39, %v6296_v28 }
 0x5a8   : > { %5121 = vrot.lane.b32.xlu1 %v3512_v63, %s13626_s30  ;;  %8354 = vmatprep.mubr.msk.f32.mxu1 %vm2748_vm9, %v5573_v32  ;;  %v5524_v3 = vsel %vm2627_vm7, %v5474_v42, %v4951_v61  ;;  %v6345_v61 = vmax.f32 %v6245_v59, %v6295_v10  ;;  %v5325_v63 = vsel %vm2423_vm3, %v5275_v20, %v11974_v16  ;;  %v6655_v10 = vld [vmem:[#allocation2 + $0x10] sm:$0xff] }
 0x5a9   : > { %5119 = vrot.lane.b32.xlu0 %v3511_v31, %s13626_s30 }
 0x5aa   : > { %v12011_v1 = vpop.permute.xlu1 %4399 }
 0x5ab   : > { %v12015_v2 = vpop.permute.xlu0 %3801 }
 0x5ac   : > { %1756 = vrot.lane.b32.xlu1 %v794_v37, %s13327_s13  ;;  %v5375_v37 = vsel %vm2474_vm4, %v5325_v63, %v11988_v9 }
 0x5ad   : > { %1754 = vrot.lane.b32.xlu0 %v793_v41, %s13327_s13 }
 0x5ae   : > { %v5106_v15 = vpop.permute.xlu1 %5105 }
 0x5af   : > { %v5574_v35 = vsel %vm2678_vm8, %v5524_v3, %v5106_v15  ;;  %v4598_v43 = vpop.permute.xlu0 %4597  ;;  %v810_v3 = vld [vmem:[#allocation2 + $0x1aa] sm:$0xff] }
 0x5b0   : > { %1956 = vrot.lane.b32.xlu1 %v799_v47, %s13635_s29  ;;  %v8338_v23 = vpop.f32.mrf.mxu1  ;;  %8355 = vmatmul.mubr.msk.f32.gmra.mxu1 %vm2748_vm9, %v5574_v35  ;;  %v5425_v41 = vsel %vm2525_vm5, %v5375_v37, %v4598_v43  ;;  %v8643_v35 = vld [vmem:[#allocation3 + $0x108] sm:$0xff] }
 0x5b1   : > { %1954 = vrot.lane.b32.xlu0 %v798_v7, %s13635_s29  ;;  %v5927_v24 = vadd.f32 %v11808_v12, %v8338_v23  ;;  %v6661_v7 = vld [vmem:[#allocation2 + $0x1] sm:$0xff]  ;;  %v5226_v43 = vsel %vm434_vm0, %v8643_v35, %v11963_v54  ;;  %v6662_v54 = vld [vmem:[#allocation2 + $0x9] sm:$0xff] }
 0x5b2   : > { %v12028_v22 = vpop.permute.xlu1 %4001  ;;  %v5921_v11 = vpop.f32.mrf.mxu1  ;;  %v5276_v23 = vsel %vm2372_vm2, %v5226_v43, %v11976_v40 }
 0x5b3   : > { %v6099_v19 = vmax.f32 %v5927_v24, 0.0  ;;  %v12030_v62 = vpop.permute.xlu0 %3803  ;;  %v5922_v5 = vadd.f32 %v11808_v12, %v5921_v11  ;;  %v5326_v24 = vsel %vm2423_vm3, %v5276_v23, %v11992_v26  ;;  %v811_v11 = vld [vmem:[#allocation2 + $0x1b2] sm:$0xff] }
 0x5b4   : > { %2111 = vrot.lane.b32.xlu1 %v804_v21, %s13625_s12 }
 0x5b5   : > { %v6149_v30 = vmin.f32 %v6099_v19, 6.0  ;;  %v6098_v4 = vmax.f32 %v5922_v5, 0.0  ;;  %2109 = vrot.lane.b32.xlu0 %v803_v34, %s13625_s12  ;;  %v5376_v34 = vsel %vm2474_vm4, %v5326_v24, %v12011_v1  ;;  %v6670_v1 = vld [vmem:[#allocation2 + $0xa] sm:$0xff] }
 0x5b6   : > { %v4798_v14 = vpop.permute.xlu1 %4797 }
 0x5b7   : > { %6199 = vst.msk [vmem:[#allocation2 + $0x98] sm:$0xff] %vm434_vm0, %v6149_v30  ;;  %v6148_v29 = vmin.f32 %v6098_v4, 6.0  ;;  %v12036_v44 = vpop.permute.xlu0 %4599  ;;  %v5475_v16 = vsel %vm2576_vm6, %v5425_v41, %v4798_v14 }
 0x5b8   : > { %1758 = vrot.lane.b32.xlu1 %v795_v17, %s13327_s13  ;;  %v5426_v5 = vsel %vm2525_vm5, %v5376_v34, %v12036_v44 }
 0x5b9   : > { %6198 = vst.msk [vmem:[#allocation2 + $0x90] sm:$0xff] %vm434_vm0, %v6148_v29  ;;  %2264 = vrot.lane.b32.xlu0 %v808_v49, %s13626_s30  ;;  %v6669_v29 = vld [vmem:[#allocation2 + $0x2] sm:$0xff] }
 0x5ba   : > { %v12041_v55 = vpop.permute.xlu1 %4201 }
 0x5bb   : > { %v12043_v48 = vpop.permute.xlu0 %4003 }
 0x5bc   : > { %1760 = vrot.lane.b32.xlu1 %v796_v58, %s13327_s13 }
 0x5bd   : > { %2266 = vrot.lane.b32.xlu0 %v809_v50, %s13626_s30 }
 0x5be   : > { %v4953_v57 = vpop.permute.xlu1 %4952 }
 0x5bf   : > { %v4800_v53 = vpop.permute.xlu0 %4799  ;;  %v5525_v42 = vsel %vm2627_vm7, %v5475_v16, %v4953_v57 }
 0x5c0   : > { %1960 = vrot.lane.b32.xlu1 %v801_v0, %s13635_s29  ;;  %v6395_v38 = vld [vmem:[#allocation2 + $0x8c] sm:$0xff]  ;;  %v6396_v27 = vld [vmem:[#allocation2 + $0x94] sm:$0xff]  ;;  %v5476_v40 = vsel %vm2576_vm6, %v5426_v5, %v4800_v53 }
 0x5c1   : > { %v6445_v32 = vld [vmem:[#allocation2 + $0x8d] sm:$0xff]  ;;  %1958 = vrot.lane.b32.xlu0 %v800_v56, %s13635_s29  ;;  %v6446_v46 = vld [vmem:[#allocation2 + $0x95] sm:$0xff] }
 0x5c2   : > { %v6495_v13 = vmax.f32 %v6395_v38, %v6445_v32  ;;  %v12055_v31 = vpop.permute.xlu1 %4401  ;;  %v6496_v51 = vmax.f32 %v6396_v27, %v6446_v46  ;;  %v12101_v53 = vld [vmem:[#allocation2 + $0x8] sm:$0xff]  ;;  %v6298_v37 = vld [vmem:[#allocation2 + $0x91] sm:$0xff] }
 0x5c3   : > { %v12059_v8 = vpop.permute.xlu0 %4203  ;;  %v6297_v32 = vld [vmem:[#allocation2 + $0x89] sm:$0xff]  ;;  %v8645_v5 = vld [vmem:[#allocation3 + $0x118] sm:$0xff] }
 0x5c4   : > { %v6545_v6 = vmax.f32 %v6345_v61, %v6495_v13  ;;  %2115 = vrot.lane.b32.xlu1 %v806_v33, %s13625_s12  ;;  %v6546_v25 = vmax.f32 %v6346_v45, %v6496_v51  ;;  %v6247_v46 = vld [vmem:[#allocation2 + $0x88] sm:$0xff]  ;;  %v8644_v13 = vld [vmem:[#allocation3 + $0x110] sm:$0xff] }
 0x5c5   : > { %2113 = vrot.lane.b32.xlu0 %v805_v18, %s13625_s12  ;;  %v5227_v18 = vsel %vm434_vm0, %v8644_v13, %v12015_v2  ;;  %v6248_v45 = vld [vmem:[#allocation2 + $0x90] sm:$0xff]  ;;  %v6347_v16 = vmax.f32 %v6247_v46, %v6297_v32 }
 0x5c6   : > { %6595 = vst.msk [vmem:[#allocation3 + $0x78] sm:$0xff] %vm434_vm0, %v6545_v6  ;;  %v5108_v47 = vpop.permute.xlu1 %5107  ;;  %6596 = vst.msk [vmem:[#allocation3 + $0x80] sm:$0xff] %vm434_vm0, %v6546_v25  ;;  %v5277_v51 = vsel %vm2372_vm2, %v5227_v18, %v12028_v22  ;;  %v6348_v2 = vmax.f32 %v6248_v45, %v6298_v37  ;;  %v6249_v18 = vld [vmem:[#allocation2 + $0x98] sm:$0xff]  ;;  %v8646_v45 = vld [vmem:[#allocation3 + $0x120] sm:$0xff] }
 0x5c7   : > { %v5575_v9 = vsel %vm2678_vm8, %v5525_v42, %v5108_v47  ;;  %v4955_v15 = vpop.permute.xlu0 %4954  ;;  %v5327_v42 = vsel %vm2423_vm3, %v5277_v51, %v12041_v55 }
 0x5c8   : > { %8357 = vmatprep.mubr.msk.f32.mxu1 %vm2748_vm9, %v5575_v9  ;;  %6691 = vrot.lane.b32.xlu1 %v6661_v7, %s13331_s15  ;;  %v5526_v26 = vsel %vm2627_vm7, %v5476_v40, %v4955_v15  ;;  %v5377_v15 = vsel %vm2474_vm4, %v5327_v42, %v12055_v31  ;;  %v5228_v40 = vsel %vm434_vm0, %v8645_v5, %v12030_v62 }
 0x5c9   : > { %2268 = vrot.lane.b32.xlu0 %v810_v3, %s13626_s30 }
 0x5ca   : > { %v12078_v21 = vpop.permute.xlu1 %4403 }
 0x5cb   : > { %v12082_v19 = vpop.permute.xlu0 %3805 }
 0x5cc   : > { %6693 = vrot.lane.b32.xlu1 %v6662_v54, %s13331_s15  ;;  %v5229_v37 = vsel %vm434_vm0, %v8646_v45, %v12082_v19 }
 0x5cd   : > { %2270 = vrot.lane.b32.xlu0 %v811_v11, %s13626_s30  ;;  %v6639_v4 = vld [vmem:[#allocation3 + $0x78] ss:$2 sm:$0xff] }
 0x5ce   : > { %v5110_v30 = vpop.permute.xlu1 %5109  ;;  %6640 = vst.msk [vmem:[#allocation2 + $0x18] sm:$0xff] %vm434_vm0, %v6639_v4 }
 0x5cf   : > { %v5576_v17 = vsel %vm2678_vm8, %v5526_v26, %v5110_v30  ;;  %v4602_v14 = vpop.permute.xlu0 %4601  ;;  %v5278_v26 = vsel %vm2372_vm2, %v5228_v40, %v12043_v48 }
 0x5d0   : > { %v8341_v49 = vpop.f32.mrf.mxu1  ;;  %8358 = vmatmul.mubr.msk.f32.gmra.mxu1 %vm2748_vm9, %v5576_v17  ;;  %6725 = vrot.lane.b32.xlu1 %v6670_v1, %s13325_s16  ;;  %v5427_v22 = vsel %vm2525_vm5, %v5377_v15, %v4602_v14  ;;  %v5328_v30 = vsel %vm2423_vm3, %v5278_v26, %v12059_v8 }
 0x5d1   : > { %v5937_v44 = vadd.f32 %v11808_v12, %v8341_v49  ;;  %6723 = vrot.lane.b32.xlu0 %v6669_v29, %s13325_s16  ;;  %v5378_v17 = vsel %vm2474_vm4, %v5328_v30, %v12078_v21 }
 0x5d2   : > { %v12096_v58 = vpop.permute.xlu1 %4005  ;;  %v5931_v50 = vpop.f32.mrf.mxu1 }
 0x5d3   : > { %v6101_v0 = vmax.f32 %v5937_v44, 0.0  ;;  %v12098_v57 = vpop.permute.xlu0 %3807  ;;  %v5932_v56 = vadd.f32 %v11808_v12, %v5931_v50 }
 0x5d4   : > { %6757 = vrot.lane.b32.xlu1 %v6655_v10, %s13323_s22 }
 0x5d5   : > { %v6151_v33 = vmin.f32 %v6101_v0, 6.0  ;;  %v6100_v59 = vmax.f32 %v5932_v56, 0.0  ;;  %6755 = vrot.lane.b32.xlu0 %v12101_v53, %s13323_s22  ;;  %v6663_v28 = vld [vmem:[#allocation2 + $0x11] sm:$0xff] }
 0x5d6   : > { %v4802_v60 = vpop.permute.xlu1 %4801  ;;  %v12116_v63 = vld [vmem:[#allocation2 + $0x12] sm:$0xff] }
 0x5d7   : > { %6201 = vst.msk [vmem:[#allocation2 + $0xa8] sm:$0xff] %vm434_vm0, %v6151_v33  ;;  %v6150_v52 = vmin.f32 %v6100_v59, 6.0  ;;  %v4604_v39 = vpop.permute.xlu0 %4603  ;;  %v5477_v24 = vsel %vm2576_vm6, %v5427_v22, %v4802_v60 }
 0x5d8   : > { %6695 = vrot.lane.b32.xlu1 %v6663_v28, %s13331_s15  ;;  %v5428_v62 = vsel %vm2525_vm5, %v5378_v17, %v4604_v39 }
 0x5d9   : > { %6200 = vst.msk [vmem:[#allocation2 + $0xa0] sm:$0xff] %vm434_vm0, %v6150_v52  ;;  %6780 = vrot.lane.b32.xlu0 %v6662_v54, %s13329_s24  ;;  %v12139_v54 = vld [vmem:[#allocation2 + $0x18] sm:$0xff] }
 0x5da   : > { %v12110_v20 = vpop.permute.xlu1 %4205 }
 0x5db   : > { %v12112_v38 = vpop.permute.xlu0 %4007 }
 0x5dc   : > { %6805 = vrot.lane.b32.xlu1 %v6670_v1, %s13327_s13 }
 0x5dd   : > { %6782 = vrot.lane.b32.xlu0 %v6663_v28, %s13329_s24 }
 0x5de   : > { %v4957_v27 = vpop.permute.xlu1 %4956 }
 0x5df   : > { %v4804_v61 = vpop.permute.xlu0 %4803  ;;  %v5527_v55 = vsel %vm2627_vm7, %v5477_v24, %v4957_v27 }
 0x5e0   : > { %6727 = vrot.lane.b32.xlu1 %v12116_v63, %s13325_s16  ;;  %v6397_v41 = vld [vmem:[#allocation2 + $0x9c] sm:$0xff]  ;;  %v6398_v6 = vld [vmem:[#allocation2 + $0xa4] sm:$0xff]  ;;  %v5478_v1 = vsel %vm2576_vm6, %v5428_v62, %v4804_v61 }
 0x5e1   : > { %v6447_v25 = vld [vmem:[#allocation2 + $0x9d] sm:$0xff]  ;;  %v6448_v47 = vld [vmem:[#allocation2 + $0xa5] sm:$0xff] }
 0x5e2   : > { %v6497_v3 = vmax.f32 %v6397_v41, %v6447_v25  ;;  %v12126_v9 = vpop.permute.xlu1 %4405  ;;  %v6498_v7 = vmax.f32 %v6398_v6, %v6448_v47  ;;  %v6299_v46 = vld [vmem:[#allocation2 + $0x99] sm:$0xff]  ;;  %v6300_v41 = vld [vmem:[#allocation2 + $0xa1] sm:$0xff]  ;;  %v5279_v6 = vsel %vm2372_vm2, %v5229_v37, %v12096_v58 }
 0x5e3   : > { %v12130_v35 = vpop.permute.xlu0 %4207  ;;  %v6250_v51 = vld [vmem:[#allocation2 + $0xa0] sm:$0xff]  ;;  %v6349_v47 = vmax.f32 %v6249_v18, %v6299_v46 }
 0x5e4   : > { %v6547_v43 = vmax.f32 %v6347_v16, %v6497_v3  ;;  %6830 = vrot.lane.b32.xlu1 %v6655_v10, %s13635_s29  ;;  %v6548_v23 = vmax.f32 %v6348_v2, %v6498_v7  ;;  %v5329_v3 = vsel %vm2423_vm3, %v5279_v6, %v12110_v20  ;;  %v6350_v22 = vmax.f32 %v6250_v51, %v6300_v41 }
 0x5e6   : > { %6597 = vst.msk [vmem:[#allocation3 + $0x88] sm:$0xff] %vm434_vm0, %v6547_v43  ;;  %v5112_v11 = vpop.permute.xlu1 %5111  ;;  %6598 = vst.msk [vmem:[#allocation3 + $0x90] sm:$0xff] %vm434_vm0, %v6548_v23  ;;  %v5379_v43 = vsel %vm2474_vm4, %v5329_v3, %v12126_v9  ;;  %v8647_v9 = vld [vmem:[#allocation3 + $0x128] sm:$0xff] }
 0x5e7   : > { %v5577_v31 = vsel %vm2678_vm8, %v5527_v55, %v5112_v11  ;;  %v4959_v34 = vpop.permute.xlu0 %4958  ;;  %v5230_v40 = vsel %vm434_vm0, %v8647_v9, %v12098_v57  ;;  %v8649_v9 = vld [vmem:[#allocation2 + $0x170] sm:$0xff] }
 0x5e8   : > { %8360 = vmatprep.mubr.msk.f32.mxu1 %vm2748_vm9, %v5577_v31  ;;  %6759 = vrot.lane.b32.xlu1 %v12139_v54, %s13323_s22  ;;  %v5528_v49 = vsel %vm2627_vm7, %v5478_v1, %v4959_v34  ;;  %v5280_v26 = vsel %vm2372_vm2, %v5230_v40, %v12112_v38  ;;  %v13668_v40 = vld [vmem:[#allocation43_spill] sm:$0xff] }
 0x5e9   : > { %v5330_v17 = vsel %vm2423_vm3, %v5280_v26, %v12130_v35  ;;  %v2368_v26 = vsel %vm434_vm0, %v8649_v9, %v13668_v40 }
 0x5ea   : > { %v12150_v4 = vpop.permute.xlu1 %4407 }
 0x5eb   : > { %v12154_v14 = vpop.permute.xlu0 %3809  ;;  %v5380_v1 = vsel %vm2474_vm4, %v5330_v17, %v12150_v4  ;;  %v13669_v17 = vld [vmem:[#allocation83_spill] sm:$0xff] }
 0x5ec   : > { %6855 = vrot.lane.b32.xlu1 %v6663_v28, %s13625_s12 }
 0x5ee   : > { %v5114_v29 = vpop.permute.xlu1 %5113 }
 0x5ef   : > { %v5578_v48 = vsel %vm2678_vm8, %v5528_v49, %v5114_v29  ;;  %v4606_v44 = vpop.permute.xlu0 %4605 }
 0x5f0   : > { %v8344_v8 = vpop.f32.mrf.mxu1  ;;  %8361 = vmatmul.mubr.msk.f32.gmra.mxu1 %vm2748_vm9, %v5578_v48  ;;  %v5429_v24 = vsel %vm2525_vm5, %v5379_v43, %v4606_v44 }
 0x5f1   : > { %v5947_v50 = vadd.f32 %v11808_v12, %v8344_v8 }
 0x5f2   : > { %v12163_v21 = vpop.permute.xlu1 %4009  ;;  %v5941_v0 = vpop.f32.mrf.mxu1 }
 0x5f3   : > { %v6103_v56 = vmax.f32 %v5947_v50, 0.0  ;;  %v12165_v10 = vpop.permute.xlu0 %3811  ;;  %v5942_v33 = vadd.f32 %v11808_v12, %v5941_v0 }
 0x5f5   : > { %v6153_v59 = vmin.f32 %v6103_v56, 6.0  ;;  %v6102_v60 = vmax.f32 %v5942_v33, 0.0 }
 0x5f6   : > { %v4806_v52 = vpop.permute.xlu1 %4805 }
 0x5f7   : > { %6203 = vst.msk [vmem:[#allocation2 + $0xb8] sm:$0xff] %vm434_vm0, %v6153_v59  ;;  %v6152_v39 = vmin.f32 %v6102_v60, 6.0  ;;  %v4608_v28 = vpop.permute.xlu0 %4607  ;;  %v5479_v11 = vsel %vm2576_vm6, %v5429_v24, %v4806_v52  ;;  %v5232_v59 = vsel %vm434_vm0, %v11853_v36, %v12165_v10  ;;  %v8648_v60 = vld [vmem:[#allocation3 + $0x130] sm:$0xff] }
 0x5f8   : > { %v5430_v49 = vsel %vm2525_vm5, %v5380_v1, %v4608_v28  ;;  %v5231_v52 = vsel %vm434_vm0, %v8648_v60, %v12154_v14 }
 0x5f9   : > { %6202 = vst.msk [vmem:[#allocation2 + $0xb0] sm:$0xff] %vm434_vm0, %v6152_v39  ;;  %v5281_v46 = vsel %vm2372_vm2, %v5231_v52, %v12163_v21 }
 0x5fa   : > { %v12170_v27 = vpop.permute.xlu1 %4209 }
 0x5fb   : > { %v4012_v32 = vpop.permute.xlu0 %4011 }
 0x5fc   : > { %v5282_v39 = vsel %vm2372_vm2, %v5232_v59, %v4012_v32  ;;  %v13674_v59 = vld [vmem:[#allocation122_spill] sm:$0xff] }
 0x5fe   : > { %v4961_v61 = vpop.permute.xlu1 %4960 }
 0x5ff   : > { %v4808_v13 = vpop.permute.xlu0 %4807  ;;  %v5529_v31 = vsel %vm2627_vm7, %v5479_v11, %v4961_v61 }
 0x600   : > { %v6399_v25 = vld [vmem:[#allocation2 + $0xac] sm:$0xff]  ;;  %v6400_v16 = vld [vmem:[#allocation2 + $0xb4] sm:$0xff]  ;;  %v5480_v29 = vsel %vm2576_vm6, %v5430_v49, %v4808_v13  ;;  %v13670_v49 = vld [vmem:[#allocation123_spill] sm:$0xff] }
 0x601   : > { %v6449_v42 = vld [vmem:[#allocation2 + $0xad] sm:$0xff]  ;;  %v6450_v2 = vld [vmem:[#allocation2 + $0xb5] sm:$0xff] }
 0x602   : > { %v6499_v15 = vmax.f32 %v6399_v25, %v6449_v42  ;;  %v4410_v7 = vpop.permute.xlu1 %4409  ;;  %v6500_v19 = vmax.f32 %v6400_v16, %v6450_v2  ;;  %v6301_v3 = vld [vmem:[#allocation2 + $0xa9] sm:$0xff] }
 0x603   : > { %v4212_v23 = vpop.permute.xlu0 %4211 }
 0x604   : > { %v6549_v55 = vmax.f32 %v6349_v47, %v6499_v15  ;;  %v6550_v58 = vmax.f32 %v6350_v22, %v6500_v19  ;;  %v5332_v13 = vsel %vm2423_vm3, %v5282_v39, %v4212_v23  ;;  %v6251_v15 = vld [vmem:[#allocation2 + $0xa8] sm:$0xff]  ;;  %v6302_v22 = vld [vmem:[#allocation2 + $0xb1] sm:$0xff] }
 0x605   : > { %v6351_v24 = vmax.f32 %v6251_v15, %v6301_v3  ;;  %v13677_v15 = vld [vmem:[#allocation85_spill] sm:$0xff] }
 0x606   : > { %6599 = vst.msk [vmem:[#allocation3 + $0x98] sm:$0xff] %vm434_vm0, %v6549_v55  ;;  %v5116_v20 = vpop.permute.xlu1 %5115  ;;  %6600 = vst.msk [vmem:[#allocation3 + $0xa0] sm:$0xff] %vm434_vm0, %v6550_v58 }
 0x607   : > { %v5579_v34 = vsel %vm2678_vm8, %v5529_v31, %v5116_v20  ;;  %v4963_v5 = vpop.permute.xlu0 %4962 }
 0x608   : > { %8363 = vmatprep.mubr.msk.f32.mxu1 %vm2748_vm9, %v5579_v34  ;;  %v5530_v44 = vsel %vm2627_vm7, %v5480_v29, %v4963_v5 }
 0x60a   : > { %v4610_v30 = vpop.permute.xlu1 %4609 }
 0x60b   : > { %v4412_v62 = vpop.permute.xlu0 %4411 }
 0x60c   : > { %v5382_v45 = vsel %vm2474_vm4, %v5332_v13, %v4412_v62  ;;  %v2419_v62 = vsel %vm2372_vm2, %v2368_v26, %v13669_v17  ;;  %v13682_v26 = vld [vmem:[#allocation124_spill] sm:$0xff] }
 0x60d   : > { %v2470_v29 = vsel %vm2423_vm3, %v2419_v62, %v13670_v49 }
 0x60e   : > { %v4612_v48 = vpop.permute.xlu1 %4611 }
 0x60f   : > { %v5118_v8 = vpop.permute.xlu0 %5117  ;;  %v5432_v32 = vsel %vm2525_vm5, %v5382_v45, %v4612_v48 }
 0x610   : > { %v5580_v57 = vsel %vm2678_vm8, %v5530_v44, %v5118_v8  ;;  %v8347_v50 = vpop.f32.mrf.mxu1  ;;  %v13671_v44 = vld [vmem:[#allocation171_spill] sm:$0xff] }
 0x611   : > { %v5957_v38 = vadd.f32 %v11808_v12, %v8347_v50  ;;  %8364 = vmatmul.mubr.msk.f32.gmra.mxu1 %vm2748_vm9, %v5580_v57  ;;  %v2521_v8 = vsel %vm2474_vm4, %v2470_v29, %v13671_v44  ;;  %v8650_v57 = vld [vmem:[#allocation2 + $0x178] sm:$0xff] }
 0x612   : > { %v4812_v35 = vpop.permute.xlu1 %4811  ;;  %v5951_v0 = vpop.f32.mrf.mxu1  ;;  %v13672_v50 = vld [vmem:[#allocation42_spill] sm:$0xff] }
 0x613   : > { %v6105_v56 = vmax.f32 %v5957_v38, 0.0  ;;  %v4810_v33 = vpop.permute.xlu0 %4809  ;;  %v5952_v4 = vadd.f32 %v11808_v12, %v5951_v0  ;;  %v5331_v12 = vsel %vm2423_vm3, %v5281_v46, %v12170_v27  ;;  %v5482_v21 = vsel %vm2576_vm6, %v5432_v32, %v4812_v35  ;;  %v13673_v0 = vld [vmem:[#allocation82_spill] sm:$0xff] }
 0x614   : > { %v5381_v14 = vsel %vm2474_vm4, %v5331_v12, %v4410_v7  ;;  %v6252_v7 = vld [vmem:[#allocation2 + $0xb0] sm:$0xff]  ;;  %v2369_v38 = vsel %vm434_vm0, %v8650_v57, %v13672_v50 }
 0x615   : > { %v6155_v28 = vmin.f32 %v6105_v56, 6.0  ;;  %v6104_v61 = vmax.f32 %v5952_v4, 0.0  ;;  %v5431_v37 = vsel %vm2525_vm5, %v5381_v14, %v4610_v30  ;;  %v6352_v31 = vmax.f32 %v6252_v7, %v6302_v22 }
 0x616   : > { %v4967_v18 = vpop.permute.xlu1 %4966  ;;  %v5481_v51 = vsel %vm2576_vm6, %v5431_v37, %v4810_v33  ;;  %v2420_v56 = vsel %vm2372_vm2, %v2369_v38, %v13673_v0  ;;  %v12259_v37 = vld [vmem:[%s13297_s4] ss:$0 sm:$0xff] }
 0x617   : > { %6205 = vst.msk [vmem:[#allocation2 + $0xc8] sm:$0xff] %vm434_vm0, %v6155_v28  ;;  %v6154_v36 = vmin.f32 %v6104_v61, 6.0  ;;  %v4965_v10 = vpop.permute.xlu0 %4964  ;;  %v5532_v27 = vsel %vm2627_vm7, %v5482_v21, %v4967_v18  ;;  %v2471_v60 = vsel %vm2423_vm3, %v2420_v56, %v13674_v59  ;;  %v13675_v28 = vld [vmem:[#allocation170_spill] sm:$0xff] }
 0x618   : > { %v5531_v6 = vsel %vm2627_vm7, %v5481_v51, %v4965_v10  ;;  %v2522_v61 = vsel %vm2474_vm4, %v2471_v60, %v13675_v28 }
 0x619   : > { %6204 = vst.msk [vmem:[#allocation2 + $0xc0] sm:$0xff] %vm434_vm0, %v6154_v36 }
 0x61a   : > { %v5122_v41 = vpop.permute.xlu1 %5121 }
 0x61b   : > { %v5582_v25 = vsel %vm2678_vm8, %v5532_v27, %v5122_v41  ;;  %v5120_v16 = vpop.permute.xlu0 %5119 }
 0x61c   : > { %v5581_v42 = vsel %vm2678_vm8, %v5531_v6, %v5120_v16  ;;  %v13676_v16 = vld [vmem:[#allocation45_spill] sm:$0xff] }
 0x61d   : > { %8366 = vmatprep.mubr.msk.f32.mxu1 %vm2748_vm9, %v5581_v42 }
 0x61e   : > { %8367 = vmatmul.mubr.msk.f32.gmra.mxu1 %vm2748_vm9, %v5582_v25  ;;  %v1757_v47 = vpop.permute.xlu1 %1756  ;;  %v8652_v25 = vld [vmem:[#allocation2 + $0x180] sm:$0xff] }
 0x61f   : > { %v1755_v2 = vpop.permute.xlu0 %1754  ;;  %v2573_v13 = vsel %vm2525_vm5, %v2522_v61, %v1757_v47  ;;  %v2370_v42 = vsel %vm434_vm0, %v8652_v25, %v13676_v16  ;;  %v6976_v25 = vld [vmem:[%s13298_s5 + $0x40] sm:$0xff] }
 0x620   : > { %v6401_v43 = vld [vmem:[#allocation2 + $0xbc] sm:$0xff]  ;;  %v6402_v19 = vld [vmem:[#allocation2 + $0xc4] sm:$0xff]  ;;  %v2572_v35 = vsel %vm2525_vm5, %v2521_v8, %v1755_v2  ;;  %v2421_v7 = vsel %vm2372_vm2, %v2370_v42, %v13677_v15 }
 0x621   : > { %v6451_v23 = vld [vmem:[#allocation2 + $0xbd] sm:$0xff]  ;;  %v6452_v55 = vld [vmem:[#allocation2 + $0xc5] sm:$0xff] }
 0x622   : > { %v6501_v58 = vmax.f32 %v6401_v43, %v6451_v23  ;;  %v1957_v11 = vpop.permute.xlu1 %1956  ;;  %v6502_v20 = vmax.f32 %v6402_v19, %v6452_v55  ;;  %v13678_v43 = vld [vmem:[#allocation125_spill] sm:$0xff]  ;;  %v6254_v0 = vld [vmem:[#allocation2 + $0xc0] sm:$0xff]  ;;  %v6255_v42 = vld [vmem:[#allocation2 + $0xc8] sm:$0xff] }
 0x623   : > { %v1955_v34 = vpop.permute.xlu0 %1954  ;;  %v2624_v12 = vsel %vm2576_vm6, %v2573_v13, %v1957_v11  ;;  %v2472_v19 = vsel %vm2423_vm3, %v2421_v7, %v13678_v43  ;;  %v13679_v55 = vld [vmem:[#allocation173_spill] sm:$0xff]  ;;  %v8653_v11 = vld [vmem:[#allocation2 + $0x188] sm:$0xff] }
 0x624   : > { %v6551_v5 = vmax.f32 %v6351_v24, %v6501_v58  ;;  %v6552_v30 = vmax.f32 %v6352_v31, %v6502_v20  ;;  %v2623_v33 = vsel %vm2576_vm6, %v2572_v35, %v1955_v34  ;;  %v2523_v58 = vsel %vm2474_vm4, %v2472_v19, %v13679_v55  ;;  %v13680_v31 = vld [vmem:[#allocation44_spill] sm:$0xff]  ;;  %v6303_v57 = vld [vmem:[#allocation2 + $0xb9] sm:$0xff]  ;;  %v6304_v56 = vld [vmem:[#allocation2 + $0xc1] sm:$0xff] }
 0x625   : > { %v2371_v20 = vsel %vm434_vm0, %v8653_v11, %v13680_v31  ;;  %v6253_v35 = vld [vmem:[#allocation2 + $0xb8] sm:$0xff]  ;;  %v6354_v61 = vmax.f32 %v6254_v0, %v6304_v56  ;;  %v6973_v31 = vld [vmem:[%s13298_s5 + $0x28] sm:$0xff] }
 0x626   : > { %6601 = vst.msk [vmem:[#allocation3 + $0xa8] sm:$0xff] %vm434_vm0, %v6551_v5  ;;  %v2112_v1 = vpop.permute.xlu1 %2111  ;;  %6602 = vst.msk [vmem:[#allocation3 + $0xb0] sm:$0xff] %vm434_vm0, %v6552_v30  ;;  %v13681_v5 = vld [vmem:[#allocation84_spill] sm:$0xff] }
 0x627   : > { %v2110_v48 = vpop.permute.xlu0 %2109  ;;  %v2675_v45 = vsel %vm2627_vm7, %v2624_v12, %v2112_v1  ;;  %v2422_v9 = vsel %vm2372_vm2, %v2371_v20, %v13681_v5  ;;  %v13683_v1 = vld [vmem:[#allocation172_spill] sm:$0xff]  ;;  %v6971_v5 = vld [vmem:[%s13298_s5 + $0x18] sm:$0xff] }
 0x628   : > { %v2674_v52 = vsel %vm2627_vm7, %v2623_v33, %v2110_v48  ;;  %v2473_v30 = vsel %vm2423_vm3, %v2422_v9, %v13682_v26  ;;  %v6970_v9 = vld [vmem:[%s13298_s5 + $0x10] sm:$0xff] }
 0x629   : > { %v2524_v49 = vsel %vm2474_vm4, %v2473_v30, %v13683_v1 }
 0x62a   : > { %v1759_v4 = vpop.permute.xlu1 %1758 }
 0x62b   : > { %v2265_v39 = vpop.permute.xlu0 %2264  ;;  %v2574_v34 = vsel %vm2525_vm5, %v2523_v58, %v1759_v4 }
 0x62c   : > { %v2725_v46 = vsel %vm2678_vm8, %v2674_v52, %v2265_v39  ;;  %v6353_v52 = vmax.f32 %v6253_v35, %v6303_v57 }
 0x62d   : > { %8279 = vmatprep.mubr.msk.f32.mxu0 %vm2748_vm9, %v2725_v46  ;;  %v6642_v18 = vld [vmem:[#allocation3 + $0xa0] ss:$2 sm:$0xff] }
 0x62e   : > { %6643 = vst.msk [vmem:[#allocation2 + $0x20] sm:$0xff] %vm434_vm0, %v6642_v18  ;;  %v1761_v10 = vpop.permute.xlu1 %1760 }
 0x62f   : > { %v2267_v36 = vpop.permute.xlu0 %2266  ;;  %v2575_v44 = vsel %vm2525_vm5, %v2524_v49, %v1761_v10 }
 0x630   : > { %v2726_v14 = vsel %vm2678_vm8, %v2675_v45, %v2267_v36  ;;  %v8350_v32 = vpop.f32.mrf.mxu1 }
 0x631   : > { %8280 = vmatmul.mubr.msk.f32.gmra.mxu0 %vm2748_vm9, %v2726_v14  ;;  %v5967_v21 = vadd.f32 %v12259_v37, %v8350_v32 }
 0x632   : > { %v5961_v51 = vpop.f32.mrf.mxu1  ;;  %v1961_v22 = vpop.permute.xlu1 %1960 }
 0x633   : > { %v6107_v27 = vmax.f32 %v5967_v21, 0.0  ;;  %v1959_v41 = vpop.permute.xlu0 %1958  ;;  %v5962_v6 = vadd.f32 %v12259_v37, %v5961_v51 }
 0x634   : > { %v2625_v40 = vsel %vm2576_vm6, %v2574_v34, %v1959_v41  ;;  %v6978_v41 = vld [vmem:[%s13298_s5 + $0x50] sm:$0xff]  ;;  %v6972_v34 = vld [vmem:[%s13298_s5 + $0x20] sm:$0xff] }
 0x635   : > { %v6157_v47 = vmin.f32 %v6107_v27, 6.0  ;;  %v6106_v3 = vmax.f32 %v5962_v6, 0.0  ;;  %v6664_v2 = vld [vmem:[#allocation2 + $0x19] sm:$0xff]  ;;  %v6977_v6 = vld [vmem:[%s13298_s5 + $0x48] sm:$0xff] }
 0x636   : > { %6697 = vrot.lane.b32.xlu0 %v6664_v2, %s13331_s15  ;;  %6784 = vrot.lane.b32.xlu1 %v6664_v2, %s13329_s24  ;;  %v2116_v29 = vpop.permute.xlu1 %2115  ;;  %v12293_v8 = vld [vmem:[#allocation2 + $0x1a] sm:$0xff]  ;;  %v6979_v27 = vld [vmem:[%s13298_s5 + $0x58] sm:$0x3]  ;;  %s13686_s15 = smov 40   ;;  %s13687_s24 = smov 50  }
 0x637   : > { %6207 = vst.msk [vmem:[#allocation2 + $0xd8] sm:$0xff] %vm434_vm0, %v6157_v47  ;;  %v6156_v23 = vmin.f32 %v6106_v3, 6.0  ;;  %v2114_v24 = vpop.permute.xlu0 %2113  ;;  %v12303_v12 = vld [vmem:[#allocation2 + $0x20] sm:$0xff]  ;;  %8384 = vmatprep.subr.msk.mxu0 %vm2899_vm1, %v6979_v27 }
 0x638   : > { %v2676_v17 = vsel %vm2627_vm7, %v2625_v40, %v2114_v24  ;;  %8385 = vmatpush3.msk.msra.mxu0 %vm2899_vm1, %v6979_v27  ;;  %v6974_v24 = vld [vmem:[%s13298_s5 + $0x30] sm:$0xff]  ;;  %v6969_v40 = vld [vmem:[%s13298_s5 + $0x8] sm:$0xff] }
 0x639   : > { %6206 = vst.msk [vmem:[#allocation2 + $0xd0] sm:$0xff] %vm434_vm0, %v6156_v23  ;;  %8386 = vmatprep.subr.mxu0 %v6978_v41  ;;  %v6975_v23 = vld [vmem:[%s13298_s5 + $0x38] sm:$0xff] }
 0x63a   : > { %6807 = vrot.lane.b32.xlu0 %v12116_v63, %s13327_s13  ;;  %6880 = vrot.lane.b32.xlu1 %v12116_v63, %s13626_s30  ;;  %v2626_v63 = vsel %vm2576_vm6, %v2575_v44, %v1961_v22  ;;  %v12351_v26 = vpop.permute.xlu1 %6691  ;;  %v13684_v44 = vmov 0.0   ;;  %s13688_s13 = smov 20  }
 0x63b   : > { %v2269_v62 = vpop.permute.xlu0 %2268  ;;  %v2677_v50 = vsel %vm2627_vm7, %v2626_v63, %v2116_v29  ;;  %8387 = vmatpush3.msra.mxu0 %v6978_v41 }
 0x63c   : > { %v2727_v48 = vsel %vm2678_vm8, %v2676_v17, %v2269_v62  ;;  %8388 = vmatprep.subr.mxu0 %v6977_v6  ;;  %v6968_v17 = vld [vmem:[%s13298_s5] sm:$0xff] }
 0x63d   : > { %8282 = vmatprep.mubr.msk.f32.mxu0 %vm2748_vm9, %v2727_v48  ;;  %8389 = vmatpush3.msra.mxu0 %v6977_v6 }
 0x63e   : > { %6729 = vrot.lane.b32.xlu0 %v12293_v8, %s13325_s16  ;;  %8390 = vmatprep.subr.mxu0 %v6976_v25  ;;  %v12360_v63 = vpop.permute.xlu1 %6693 }
 0x63f   : > { %v2271_v38 = vpop.permute.xlu0 %2270  ;;  %8391 = vmatpush3.msra.mxu0 %v6976_v25 }
 0x640   : > { %v2728_v33 = vsel %vm2678_vm8, %v2677_v50, %v2271_v38  ;;  %v6403_v4 = vld [vmem:[#allocation2 + $0xcc] sm:$0xff]  ;;  %v6404_v59 = vld [vmem:[#allocation2 + $0xd4] sm:$0xff]  ;;  %8392 = vmatprep.subr.mxu0 %v6975_v23 }
 0x641   : > { %v6453_v60 = vld [vmem:[#allocation2 + $0xcd] sm:$0xff]  ;;  %8283 = vmatmul.mubr.msk.f32.gmra.mxu0 %vm2748_vm9, %v2728_v33  ;;  %v6454_v39 = vld [vmem:[#allocation2 + $0xd5] sm:$0xff] }
 0x642   : > { %v6503_v28 = vmax.f32 %v6403_v4, %v6453_v60  ;;  %6832 = vrot.lane.b32.xlu0 %v12139_v54, %s13635_s29  ;;  %v6504_v46 = vmax.f32 %v6404_v59, %v6454_v39  ;;  %v6305_v16 = vld [vmem:[#allocation2 + $0xc9] sm:$0xff]  ;;  %v6306_v3 = vld [vmem:[#allocation2 + $0xd1] sm:$0xff]  ;;  %8393 = vmatpush3.msra.mxu0 %v6975_v23  ;;  %v12366_v0 = vpop.permute.xlu1 %6725 }
 0x643   : > { %v6256_v47 = vld [vmem:[#allocation2 + $0xd0] sm:$0xff]  ;;  %v6355_v22 = vmax.f32 %v6255_v42, %v6305_v16  ;;  %8394 = vmatprep.subr.mxu0 %v6974_v24  ;;  %v6257_v4 = vld [vmem:[#allocation2 + $0xd8] sm:$0xff] }
 0x644   : > { %v6553_v13 = vmax.f32 %v6353_v52, %v6503_v28  ;;  %v6554_v18 = vmax.f32 %v6354_v61, %v6504_v46  ;;  %v6356_v55 = vmax.f32 %v6256_v47, %v6306_v3  ;;  %8395 = vmatpush3.msra.mxu0 %v6974_v24 }
 0x645   : > { %8396 = vmatprep.subr.mxu0 %v6973_v31 }
 0x646   : > { %6603 = vst.msk [vmem:[#allocation3 + $0xb8] sm:$0xff] %vm434_vm0, %v6553_v13  ;;  %6761 = vrot.lane.b32.xlu0 %v12303_v12, %s13323_s22  ;;  %6604 = vst.msk [vmem:[#allocation3 + $0xc0] sm:$0xff] %vm434_vm0, %v6554_v18  ;;  %8397 = vmatpush3.msra.mxu0 %v6973_v31  ;;  %v12376_v59 = vpop.permute.xlu1 %6757 }
 0x647   : > { %8398 = vmatprep.subr.mxu0 %v6972_v34 }
 0x648   : > { %8399 = vmatpush3.msra.mxu0 %v6972_v34 }
 0x649   : > { %8400 = vmatprep.subr.mxu0 %v6971_v5 }
 0x64a   : > { %6857 = vrot.lane.b32.xlu0 %v6664_v2, %s13625_s12  ;;  %8401 = vmatpush3.msra.mxu0 %v6971_v5 }
 0x64b   : > { %8402 = vmatprep.subr.mxu0 %v6970_v9 }
 0x64c   : > { %8403 = vmatpush3.msra.mxu0 %v6970_v9 }
 0x64d   : > { %8404 = vmatprep.subr.mxu0 %v6969_v40 }
 0x64e   : > { %8405 = vmatpush3.msra.mxu0 %v6969_v40 }
 0x64f   : > { %8406 = vmatprep.subr.mxu0 %v6968_v17 }
 0x650   : > { %v8353_v45 = vpop.f32.mrf.mxu1  ;;  %8407 = vmatpush3.msra.mxu0 %v6968_v17 }
 0x651   : > { %v5977_v36 = vadd.f32 %v12259_v37, %v8353_v45  ;;  %8456 = vmatprep.subr.mxu0 %v13684_v44 }
 0x652   : > { %v5971_v10 = vpop.f32.mrf.mxu1 }
 0x653   : > { %v6109_v54 = vmax.f32 %v5977_v36, 0.0  ;;  %v5972_v14 = vadd.f32 %v12259_v37, %v5971_v10 }
 0x655   : > { %v6159_v32 = vmin.f32 %v6109_v54, 6.0  ;;  %v6108_v21 = vmax.f32 %v5972_v14, 0.0  ;;  %v12380_v54 = vpop.permute.xlu1 %6695 }
 0x657   : > { %6209 = vst.msk [vmem:[#allocation2 + $0xe8] sm:$0xff] %vm434_vm0, %v6159_v32  ;;  %v6158_v51 = vmin.f32 %v6108_v21, 6.0 }
 0x659   : > { %6208 = vst.msk [vmem:[#allocation2 + $0xe0] sm:$0xff] %vm434_vm0, %v6158_v51  ;;  %v6806_v32 = vpop.permute.xlu1 %6805 }
 0x65d   : > { %v12390_v27 = vpop.permute.xlu1 %6727 }
 0x660   : > { %v6405_v2 = vld [vmem:[#allocation2 + $0xdc] sm:$0xff]  ;;  %v6406_v15 = vld [vmem:[#allocation2 + $0xe4] sm:$0xff] }
 0x661   : > { %v6455_v7 = vld [vmem:[#allocation2 + $0xdd] sm:$0xff]  ;;  %v6456_v43 = vld [vmem:[#allocation2 + $0xe5] sm:$0xff]  ;;  %v6831_v3 = vpop.permute.xlu1 %6830 }
 0x662   : > { %v6505_v19 = vmax.f32 %v6405_v2, %v6455_v7  ;;  %v6506_v58 = vmax.f32 %v6406_v15, %v6456_v43  ;;  %v6307_v33 = vld [vmem:[#allocation2 + $0xd9] sm:$0xff]  ;;  %v6308_v52 = vld [vmem:[#allocation2 + $0xe1] sm:$0xff]  ;;  %v6724_v2 = vpop.permute.xlu0 %6723 }
 0x663   : > { %v6258_v60 = vld [vmem:[#allocation2 + $0xe0] sm:$0xff]  ;;  %v6357_v46 = vmax.f32 %v6257_v4, %v6307_v33  ;;  %v6259_v43 = vld [vmem:[#allocation2 + $0xe8] sm:$0xff] }
 0x664   : > { %v6555_v11 = vmax.f32 %v6355_v22, %v6505_v19  ;;  %v6556_v20 = vmax.f32 %v6356_v55, %v6506_v58  ;;  %v6358_v45 = vmax.f32 %v6258_v60, %v6308_v52 }
 0x665   : > { %v12395_v15 = vpop.permute.xlu1 %6759 }
 0x666   : > { %6605 = vst.msk [vmem:[#allocation3 + $0xc8] sm:$0xff] %vm434_vm0, %v6555_v11  ;;  %6606 = vst.msk [vmem:[#allocation3 + $0xd0] sm:$0xff] %vm434_vm0, %v6556_v20  ;;  %v6756_v22 = vpop.permute.xlu0 %6755 }
 0x669   : > { %v6856_v9 = vpop.permute.xlu1 %6855 }
 0x66d   : > { %v6645_v30 = vld [vmem:[#allocation3 + $0xc8] ss:$2 sm:$0xff] }
 0x66e   : > { %6646 = vst.msk [vmem:[#allocation2 + $0x28] sm:$0xff] %vm434_vm0, %v6645_v30  ;;  %v6653_v30 = vld [vmem:[#allocation2] sm:$0xff] }
 0x670   : > { %v8356_v62 = vpop.f32.mrf.mxu1 }
 0x671   : > { %v5987_v1 = vadd.f32 %v12259_v37, %v8356_v62  ;;  %v6904_v62 = vsel %vm434_vm0, %v6653_v30, %v12351_v26 }
 0x672   : > { %v5981_v49 = vpop.f32.mrf.mxu1 }
 0x673   : > { %v6111_v29 = vmax.f32 %v5987_v1, 0.0  ;;  %v5982_v48 = vadd.f32 %v12259_v37, %v5981_v49  ;;  %v6781_v1 = vpop.permute.xlu0 %6780  ;;  %v6912_v49 = vsel %vm2372_vm2, %v6904_v62, %v6724_v2 }
 0x675   : > { %v6161_v57 = vmin.f32 %v6111_v29, 6.0  ;;  %v6110_v50 = vmax.f32 %v5982_v48, 0.0  ;;  %v6665_v38 = vld [vmem:[#allocation2 + $0x21] sm:$0xff]  ;;  %v6920_v29 = vsel %vm2423_vm3, %v6912_v49, %v6756_v22 }
 0x676   : > { %6699 = vrot.lane.b32.xlu0 %v6665_v38, %s13685_s0  ;;  %6786 = vrot.lane.b32.xlu1 %v6665_v38, %s13686_s15  ;;  %v12372_v56 = vld [vmem:[#allocation2 + $0x22] sm:$0xff] }
 0x677   : > { %6211 = vst.msk [vmem:[#allocation2 + $0xf8] sm:$0xff] %vm434_vm0, %v6161_v57  ;;  %v6160_v35 = vmin.f32 %v6110_v50, 6.0  ;;  %v12383_v14 = vld [vmem:[#allocation2 + $0x28] sm:$0xff]  ;;  %v6928_v57 = vsel %vm2474_vm4, %v6920_v29, %v6781_v1 }
 0x678   : > { %v6936_v50 = vsel %vm2525_vm5, %v6928_v57, %v6806_v32 }
 0x679   : > { %6210 = vst.msk [vmem:[#allocation2 + $0xf0] sm:$0xff] %vm434_vm0, %v6160_v35 }
 0x67a   : > { %6809 = vrot.lane.b32.xlu0 %v12293_v8, %s13687_s24  ;;  %6882 = vrot.lane.b32.xlu1 %v12293_v8, %s13626_s30 }
 0x67e   : > { %6731 = vrot.lane.b32.xlu1 %v12372_v56, %s13688_s13 }
 0x680   : > { %v6407_v39 = vld [vmem:[#allocation2 + $0xec] sm:$0xff]  ;;  %v6408_v28 = vld [vmem:[#allocation2 + $0xf4] sm:$0xff] }
 0x681   : > { %v6457_v61 = vld [vmem:[#allocation2 + $0xed] sm:$0xff]  ;;  %v6458_v13 = vld [vmem:[#allocation2 + $0xf5] sm:$0xff] }
 0x682   : > { %v6507_v18 = vmax.f32 %v6407_v39, %v6457_v61  ;;  %v6508_v36 = vmax.f32 %v6408_v28, %v6458_v13  ;;  %6834 = vrot.lane.b32.xlu1 %v12303_v12, %s13635_s29  ;;  %v6309_v7 = vld [vmem:[#allocation2 + $0xe9] sm:$0xff]  ;;  %v6310_v23 = vld [vmem:[#allocation2 + $0xf1] sm:$0xff] }
 0x683   : > { %v6260_v19 = vld [vmem:[#allocation2 + $0xf0] sm:$0xff]  ;;  %v6359_v11 = vmax.f32 %v6259_v43, %v6309_v7 }
 0x684   : > { %v6557_v8 = vmax.f32 %v6357_v46, %v6507_v18  ;;  %v6558_v10 = vmax.f32 %v6358_v45, %v6508_v36  ;;  %v6360_v34 = vmax.f32 %v6260_v19, %v6310_v23  ;;  %v6261_v45 = vld [vmem:[#allocation2 + $0xf8] sm:$0xff] }
 0x686   : > { %6607 = vst.msk [vmem:[#allocation3 + $0xd8] sm:$0xff] %vm434_vm0, %v6557_v8  ;;  %6608 = vst.msk [vmem:[#allocation3 + $0xe0] sm:$0xff] %vm434_vm0, %v6558_v10  ;;  %6763 = vrot.lane.b32.xlu1 %v12383_v14, %s13689_s14 }
 0x68a   : > { %6859 = vrot.lane.b32.xlu1 %v6665_v38, %s13625_s12  ;;  %v6944_v38 = vsel %vm2576_vm6, %v6936_v50, %v6831_v3  ;;  %v6783_v3 = vpop.permute.xlu0 %6782 }
 0x68b   : > { %v6952_v35 = vsel %vm2627_vm7, %v6944_v38, %v6856_v9 }
 0x690   : > { %v8359_v21 = vpop.f32.mrf.mxu1 }
 0x691   : > { %v5997_v51 = vadd.f32 %v12259_v37, %v8359_v21 }
 0x692   : > { %v5991_v41 = vpop.f32.mrf.mxu1 }
 0x693   : > { %v6113_v6 = vmax.f32 %v5997_v51, 0.0  ;;  %v5992_v25 = vadd.f32 %v12259_v37, %v5991_v41 }
 0x695   : > { %v6163_v16 = vmin.f32 %v6113_v6, 6.0  ;;  %v6112_v42 = vmax.f32 %v5992_v25, 0.0 }
 0x697   : > { %6213 = vst.msk [vmem:[#allocation2 + $0x108] sm:$0xff] %vm434_vm0, %v6163_v16  ;;  %v6162_v47 = vmin.f32 %v6112_v42, 6.0 }
 0x699   : > { %6212 = vst.msk [vmem:[#allocation2 + $0x100] sm:$0xff] %vm434_vm0, %v6162_v47 }
 0x69e   : > { %v6263_v1 = vld [vmem:[#allocation2 + $0x108] sm:$0xff] }
 0x6a0   : > { %v6409_v24 = vld [vmem:[#allocation2 + $0xfc] sm:$0xff]  ;;  %v6410_v55 = vld [vmem:[#allocation2 + $0x104] sm:$0xff] }
 0x6a1   : > { %v6459_v58 = vld [vmem:[#allocation2 + $0xfd] sm:$0xff]  ;;  %v6460_v31 = vld [vmem:[#allocation2 + $0x105] sm:$0xff] }
 0x6a2   : > { %v6509_v20 = vmax.f32 %v6409_v24, %v6459_v58  ;;  %v6510_v5 = vmax.f32 %v6410_v55, %v6460_v31  ;;  %v6311_v18 = vld [vmem:[#allocation2 + $0xf9] sm:$0xff]  ;;  %v6312_v8 = vld [vmem:[#allocation2 + $0x101] sm:$0xff] }
 0x6a3   : > { %v6262_v36 = vld [vmem:[#allocation2 + $0x100] sm:$0xff]  ;;  %v6361_v51 = vmax.f32 %v6261_v45, %v6311_v18  ;;  %v6905_v45 = vsel %vm434_vm0, %v12101_v53, %v12360_v63 }
 0x6a4   : > { %v6559_v40 = vmax.f32 %v6359_v11, %v6509_v20  ;;  %v6560_v17 = vmax.f32 %v6360_v34, %v6510_v5  ;;  %v6362_v25 = vmax.f32 %v6262_v36, %v6312_v8  ;;  %v6913_v36 = vsel %vm2372_vm2, %v6905_v45, %v12366_v0  ;;  %v6682_v45 = vld [vmem:[#allocation2 + $0x4a] sm:$0xff] }
 0x6a5   : > { %v6921_v8 = vsel %vm2423_vm3, %v6913_v36, %v12376_v59 }
 0x6a6   : > { %6609 = vst.msk [vmem:[#allocation3 + $0xe8] sm:$0xff] %vm434_vm0, %v6559_v40  ;;  %6610 = vst.msk [vmem:[#allocation3 + $0xf0] sm:$0xff] %vm434_vm0, %v6560_v17 }
 0x6a8   : > { %v12403_v48 = vpop.permute.xlu1 %6784  ;;  %v12417_v2 = vpop.permute.xlu0 %6697 }
 0x6ac   : > { %v6881_v26 = vpop.permute.xlu1 %6880  ;;  %v6808_v43 = vpop.permute.xlu0 %6807 }
 0x6ad   : > { %v6960_v33 = vsel %vm2678_vm8, %v6952_v35, %v6881_v26 }
 0x6ae   : > { %8408 = vmatprep.mubr.msk.f32.mxu0 %vm2748_vm9, %v6960_v33 }
 0x6b0   : > { %v8362_v4 = vpop.f32.mrf.mxu1  ;;  %v12424_v20 = vpop.permute.xlu0 %6729 }
 0x6b1   : > { %v6007_v60 = vadd.f32 %v12259_v37, %v8362_v4 }
 0x6b2   : > { %v6001_v52 = vpop.f32.mrf.mxu1 }
 0x6b3   : > { %v6115_v39 = vmax.f32 %v6007_v60, 0.0  ;;  %v6002_v28 = vadd.f32 %v12259_v37, %v6001_v52 }
 0x6b4   : > { %v6833_v9 = vpop.permute.xlu0 %6832 }
 0x6b5   : > { %v6165_v61 = vmin.f32 %v6115_v39, 6.0  ;;  %v6114_v46 = vmax.f32 %v6002_v28, 0.0 }
 0x6b7   : > { %6215 = vst.msk [vmem:[#allocation2 + $0x118] sm:$0xff] %vm434_vm0, %v6165_v61  ;;  %v6164_v13 = vmin.f32 %v6114_v46, 6.0 }
 0x6b8   : > { %v12442_v28 = vpop.permute.xlu0 %6761 }
 0x6b9   : > { %6214 = vst.msk [vmem:[#allocation2 + $0x110] sm:$0xff] %vm434_vm0, %v6164_v13 }
 0x6c0   : > { %v6411_v10 = vld [vmem:[#allocation2 + $0x10c] sm:$0xff]  ;;  %v6412_v32 = vld [vmem:[#allocation2 + $0x114] sm:$0xff] }
 0x6c1   : > { %v6461_v21 = vld [vmem:[#allocation2 + $0x10d] sm:$0xff]  ;;  %v6462_v41 = vld [vmem:[#allocation2 + $0x115] sm:$0xff] }
 0x6c2   : > { %v6511_v6 = vmax.f32 %v6411_v10, %v6461_v21  ;;  %v6512_v16 = vmax.f32 %v6412_v32, %v6462_v41  ;;  %v6313_v17 = vld [vmem:[#allocation2 + $0x109] sm:$0xff]  ;;  %v6314_v29 = vld [vmem:[#allocation2 + $0x111] sm:$0xff]  ;;  %v6929_v32 = vsel %vm2474_vm4, %v6921_v8, %v6783_v3  ;;  %v6858_v21 = vpop.permute.xlu0 %6857 }
 0x6c3   : > { %v6264_v49 = vld [vmem:[#allocation2 + $0x110] sm:$0xff]  ;;  %v6363_v26 = vmax.f32 %v6263_v1, %v6313_v17  ;;  %v6937_v53 = vsel %vm2525_vm5, %v6929_v32, %v6808_v43 }
 0x6c4   : > { %v6561_v42 = vmax.f32 %v6361_v51, %v6511_v6  ;;  %v6562_v47 = vmax.f32 %v6362_v25, %v6512_v16  ;;  %v6364_v39 = vmax.f32 %v6264_v49, %v6314_v29  ;;  %v6945_v63 = vsel %vm2576_vm6, %v6937_v53, %v6833_v9  ;;  %v6265_v6 = vld [vmem:[#allocation2 + $0x118] sm:$0xff]  ;;  %v8655_v8 = vld [vmem:[#allocation3 + $0x149] sm:$0xff] }
 0x6c5   : > { %v6953_v51 = vsel %vm2627_vm7, %v6945_v63, %v6858_v21  ;;  %v8656_v21 = vld [vmem:[#allocation3 + $0x141] sm:$0xff]  ;;  %v8657_v53 = vld [vmem:[#allocation3 + $0x14a] sm:$0xff] }
 0x6c6   : > { %6611 = vst.msk [vmem:[#allocation3 + $0xf8] sm:$0xff] %vm434_vm0, %v6561_v42  ;;  %6612 = vst.msk [vmem:[#allocation3 + $0x100] sm:$0xff] %vm434_vm0, %v6562_v47  ;;  %v3559_v63 = vld [vmem:[#allocation3 + $0x15c] sm:$0xff] }
 0x6cd   : > { %v6648_v7 = vld [vmem:[#allocation3 + $0xf0] ss:$2 sm:$0xff] }
 0x6ce   : > { %6649 = vst.msk [vmem:[#allocation2 + $0x30] sm:$0xff] %vm434_vm0, %v6648_v7 }
 0x6d1   : > { %v8365_v22 = vpop.f32.mrf.mxu1 }
 0x6d2   : > { %v6017_v19 = vadd.f32 %v12259_v37, %v8365_v22 }
 0x6d3   : > { %v6011_v23 = vpop.f32.mrf.mxu1 }
 0x6d4   : > { %v6117_v24 = vmax.f32 %v6017_v19, 0.0  ;;  %v6012_v55 = vadd.f32 %v12259_v37, %v6011_v23 }
 0x6d5   : > { %v6666_v58 = vld [vmem:[#allocation2 + $0x29] sm:$0xff] }
 0x6d6   : > { %v6167_v11 = vmin.f32 %v6117_v24, 6.0  ;;  %v6116_v31 = vmax.f32 %v6012_v55, 0.0  ;;  %6701 = vrot.lane.b32.xlu0 %v6666_v58, %s13685_s0  ;;  %6788 = vrot.lane.b32.xlu1 %v6666_v58, %s13686_s15  ;;  %v12432_v5 = vld [vmem:[#allocation2 + $0x2a] sm:$0xff] }
 0x6d8   : > { %6217 = vst.msk [vmem:[#allocation2 + $0x128] sm:$0xff] %vm434_vm0, %v6167_v11  ;;  %v6166_v34 = vmin.f32 %v6116_v31, 6.0 }
 0x6da   : > { %6216 = vst.msk [vmem:[#allocation2 + $0x120] sm:$0xff] %vm434_vm0, %v6166_v34  ;;  %6811 = vrot.lane.b32.xlu0 %v12372_v56, %s13687_s24  ;;  %6884 = vrot.lane.b32.xlu1 %v12372_v56, %s13626_s30 }
 0x6de   : > { %v8368_v40 = vpop.f32.mrf.mxu1  ;;  %6733 = vrot.lane.b32.xlu0 %v12432_v5, %s13688_s13  ;;  %6813 = vrot.lane.b32.xlu1 %v12432_v5, %s13687_s24 }
 0x6df   : > { %v6027_v30 = vadd.f32 %v12259_v37, %v8368_v40 }
 0x6e0   : > { %v6021_v62 = vpop.f32.mrf.mxu1 }
 0x6e1   : > { %v6119_v57 = vmax.f32 %v6027_v30, 0.0  ;;  %v6022_v56 = vadd.f32 %v12259_v37, %v6021_v62  ;;  %v6413_v50 = vld [vmem:[#allocation2 + $0x11c] sm:$0xff]  ;;  %v6414_v38 = vld [vmem:[#allocation2 + $0x124] sm:$0xff]  ;;  %v12445_v37 = vld [vmem:[#allocation2 + $0x30] sm:$0xff] }
 0x6e2   : > { %v6463_v35 = vld [vmem:[#allocation2 + $0x11d] sm:$0xff]  ;;  %6836 = vrot.lane.b32.xlu0 %v12383_v14, %s13635_s29  ;;  %v6464_v33 = vld [vmem:[#allocation2 + $0x125] sm:$0xff] }
 0x6e3   : > { %v6513_v4 = vmax.f32 %v6413_v50, %v6463_v35  ;;  %v6169_v60 = vmin.f32 %v6119_v57, 6.0  ;;  %v6118_v52 = vmax.f32 %v6022_v56, 0.0  ;;  %v6514_v61 = vmax.f32 %v6414_v38, %v6464_v33  ;;  %v6315_v41 = vld [vmem:[#allocation2 + $0x119] sm:$0xff]  ;;  %v6316_v16 = vld [vmem:[#allocation2 + $0x121] sm:$0xff] }
 0x6e4   : > { %v6266_v25 = vld [vmem:[#allocation2 + $0x120] sm:$0xff]  ;;  %v6365_v3 = vmax.f32 %v6265_v6, %v6315_v41 }
 0x6e5   : > { %v6563_v46 = vmax.f32 %v6363_v26, %v6513_v4  ;;  %6219 = vst.msk [vmem:[#allocation2 + $0x138] sm:$0xff] %vm434_vm0, %v6169_v60  ;;  %v6168_v13 = vmin.f32 %v6118_v52, 6.0  ;;  %v6564_v18 = vmax.f32 %v6364_v39, %v6514_v61  ;;  %v6366_v43 = vmax.f32 %v6266_v25, %v6316_v16  ;;  %v6677_v39 = vld [vmem:[#allocation2 + $0x40] sm:$0xff]  ;;  %v8659_v25 = vld [vmem:[#allocation3 + $0x151] sm:$0xff] }
 0x6e6   : > { %6765 = vrot.lane.b32.xlu0 %v12445_v37, %s13689_s14  ;;  %v6678_v61 = vld [vmem:[#allocation2 + $0x41] sm:$0xff] }
 0x6e7   : > { %6613 = vst.msk [vmem:[#allocation3 + $0x108] sm:$0xff] %vm434_vm0, %v6563_v46  ;;  %6218 = vst.msk [vmem:[#allocation2 + $0x130] sm:$0xff] %vm434_vm0, %v6168_v13  ;;  %v6679_v46 = vld [vmem:[#allocation2 + $0x42] sm:$0xff] }
 0x6e8   : > { %6614 = vst.msk [vmem:[#allocation3 + $0x110] sm:$0xff] %vm434_vm0, %v6564_v18  ;;  %v12459_v10 = vpop.permute.xlu1 %6786  ;;  %v6680_v13 = vld [vmem:[#allocation2 + $0x48] sm:$0xff]  ;;  %v12518_v6 = vpop.permute.xlu0 %6699 }
 0x6e9   : > { %v6681_v18 = vld [vmem:[#allocation2 + $0x49] sm:$0xff] }
 0x6ea   : > { %6861 = vrot.lane.b32.xlu0 %v6666_v58, %s13625_s12  ;;  %v8654_v58 = vld [vmem:[%s13583_s2] ss:$0 sm:$0xff] }
 0x6ec   : > { %v6883_v0 = vpop.permute.xlu1 %6882 }
 0x6ed   : > { %v6961_v59 = vsel %vm2678_vm8, %v6953_v51, %v6883_v0  ;;  %v8658_v51 = vld [vmem:[#allocation3 + $0x142] sm:$0xff]  ;;  %v3558_v0 = vld [vmem:[#allocation3 + $0x154] sm:$0xff] }
 0x6ee   : > { %v6415_v42 = vld [vmem:[#allocation2 + $0x12c] sm:$0xff]  ;;  %v6416_v47 = vld [vmem:[#allocation2 + $0x134] sm:$0xff]  ;;  %8409 = vmatmul.mubr.msk.f32.vlgmr.msra.gmra.mxu0 %vm2748_vm9, %v6961_v59 }
 0x6ef   : > { %v6465_v7 = vld [vmem:[#allocation2 + $0x12d] sm:$0xff]  ;;  %v6466_v22 = vld [vmem:[#allocation2 + $0x135] sm:$0xff] }
 0x6f0   : > { %v6515_v19 = vmax.f32 %v6415_v42, %v6465_v7  ;;  %v6516_v23 = vmax.f32 %v6416_v47, %v6466_v22  ;;  %v12508_v36 = vpop.permute.xlu1 %6731  ;;  %v3608_v59 = vld [vmem:[#allocation3 + $0x155] sm:$0xff]  ;;  %v6810_v22 = vpop.permute.xlu0 %6809 }
 0x6f1   : > { %v8281_v24 = vpop.f32.mrf.mxu0  ;;  %v3658_v42 = vld [vmem:[#allocation3 + $0x156] sm:$0xff] }
 0x6f2   : > { %v6565_v55 = vmax.f32 %v6365_v3, %v6515_v19  ;;  %v3205_v11 = vadd.f32 %v8654_v58, %v8281_v24  ;;  %v6566_v31 = vmax.f32 %v6366_v43, %v6516_v23  ;;  %v8660_v47 = vld [vmem:[#allocation2 + $0x10] sm:$0xff]  ;;  %v3609_v43 = vld [vmem:[#allocation3 + $0x15d] sm:$0xff] }
 0x6f3   : > { %v3199_v34 = vpop.f32.mrf.mxu0  ;;  %v6906_v7 = vsel %vm434_vm0, %v8660_v47, %v12380_v54 }
 0x6f4   : > { %6615 = vst.msk [vmem:[#allocation3 + $0x118] sm:$0xff] %vm434_vm0, %v6565_v55  ;;  %v3265_v9 = vmax.f32 %v3205_v11, 0.0  ;;  %v3200_v40 = vadd.f32 %v8654_v58, %v3199_v34  ;;  %6616 = vst.msk [vmem:[#allocation3 + $0x120] sm:$0xff] %vm434_vm0, %v6566_v31  ;;  %v6835_v32 = vpop.permute.xlu1 %6834  ;;  %v6914_v3 = vsel %vm2372_vm2, %v6906_v7, %v12390_v27  ;;  %v8661_v55 = vld [vmem:[#allocation3 + $0x152] sm:$0xff]  ;;  %v12539_v11 = vld [vmem:[#allocation3 + $0x168] sm:$0xff] }
 0x6f5   : > { %v6922_v19 = vsel %vm2423_vm3, %v6914_v3, %v12395_v15  ;;  %v8662_v31 = vld [vmem:[#allocation3 + $0x159] sm:$0xff]  ;;  %v6908_v3 = vsel %vm434_vm0, %v12303_v12, %v12518_v6 }
 0x6f6   : > { %v3315_v30 = vmin.f32 %v3265_v9, 6.0  ;;  %v3264_v17 = vmax.f32 %v3200_v40, 0.0  ;;  %v6930_v24 = vsel %vm2474_vm4, %v6922_v19, %v12403_v48  ;;  %v3659_v34 = vld [vmem:[#allocation3 + $0x15e] sm:$0xff] }
 0x6f7   : > { %v6938_v54 = vsel %vm2525_vm5, %v6930_v24, %v6810_v22  ;;  %v3560_v9 = vld [vmem:[#allocation3 + $0x164] sm:$0xff] }
 0x6f8   : > { %3365 = vst.msk [vmem:[#allocation3 + $0x178] sm:$0xff] %vm434_vm0, %v3315_v30  ;;  %v3314_v62 = vmin.f32 %v3264_v17, 6.0  ;;  %v12516_v41 = vpop.permute.xlu1 %6763  ;;  %v8663_v17 = vld [vmem:[#allocation3 + $0x15a] sm:$0xff] }
 0x6fa   : > { %3364 = vst.msk [vmem:[#allocation3 + $0x170] sm:$0xff] %vm434_vm0, %v3314_v62 }
 0x6fb   : > { %v6651_v1 = vld [vmem:[#allocation3 + $0x118] ss:$2 sm:$0xff] }
 0x6fc   : > { %6652 = vst.msk [vmem:[#allocation2 + $0x38] sm:$0xff] %vm434_vm0, %v6651_v1  ;;  %v6860_v16 = vpop.permute.xlu1 %6859  ;;  %v3610_v1 = vld [vmem:[#allocation3 + $0x165] sm:$0xff] }
 0x701   : > { %v8284_v49 = vpop.f32.mrf.mxu0  ;;  %v3463_v40 = vld [vmem:[#allocation3 + $0x169] sm:$0xff] }
 0x702   : > { %v3215_v29 = vadd.f32 %v8654_v58, %v8284_v49  ;;  %v12552_v62 = vld [vmem:[#allocation3 + $0x170] sm:$0xff] }
 0x703   : > { %v3209_v57 = vpop.f32.mrf.mxu0  ;;  %v6667_v38 = vld [vmem:[#allocation2 + $0x31] sm:$0xff]  ;;  %v6668_v52 = vld [vmem:[#allocation2 + $0x39] sm:$0xff] }
 0x704   : > { %v3267_v56 = vmax.f32 %v3215_v29, 0.0  ;;  %v3210_v50 = vadd.f32 %v8654_v58, %v3209_v57  ;;  %v6675_v35 = vld [vmem:[#allocation2 + $0x32] sm:$0xff]  ;;  %6790 = vrot.lane.b32.xlu0 %v6667_v38, %s13686_s15  ;;  %v6946_v58 = vsel %vm2576_vm6, %v6938_v54, %v6835_v32  ;;  %v3513_v57 = vld [vmem:[#allocation3 + $0x16a] sm:$0xff] }
 0x705   : > { %6815 = vrot.lane.b32.xlu1 %v6675_v35, %s13687_s24  ;;  %v12486_v60 = vld [vmem:[#allocation2 + $0x38] sm:$0xff]  ;;  %v6954_v27 = vsel %vm2627_vm7, %v6946_v58, %v6860_v16  ;;  %v3561_v29 = vld [vmem:[#allocation3 + $0x16c] sm:$0xff] }
 0x706   : > { %v3317_v26 = vmin.f32 %v3267_v56, 6.0  ;;  %v3266_v33 = vmax.f32 %v3210_v50, 0.0  ;;  %v12559_v56 = vld [vmem:[#allocation3 + $0x171] sm:$0xff] }
 0x707   : > { %v3611_v50 = vld [vmem:[#allocation3 + $0x16d] sm:$0xff]  ;;  %v3612_v16 = vld [vmem:[#allocation3 + $0x175] sm:$0xff] }
 0x708   : > { %3367 = vst.msk [vmem:[#allocation3 + $0x188] sm:$0xff] %vm434_vm0, %v3317_v26  ;;  %v3316_v4 = vmin.f32 %v3266_v33, 6.0  ;;  %6886 = vrot.lane.b32.xlu0 %v12432_v5, %s13626_s30  ;;  %v6676_v5 = vld [vmem:[#allocation2 + $0x3a] sm:$0xff] }
 0x709   : > { %6703 = vrot.lane.b32.xlu1 %v6667_v38, %s13685_s0  ;;  %v8664_v26 = vld [vmem:[#allocation3 + $0x161] sm:$0xff] }
 0x70a   : > { %3366 = vst.msk [vmem:[#allocation3 + $0x180] sm:$0xff] %vm434_vm0, %v3316_v4  ;;  %v3660_v4 = vld [vmem:[#allocation3 + $0x166] sm:$0xff] }
 0x70c   : > { %6838 = vrot.lane.b32.xlu0 %v12445_v37, %s13635_s29 }
 0x70d   : > { %6863 = vrot.lane.b32.xlu1 %v6667_v38, %s13625_s12 }
 0x710   : > { %6840 = vrot.lane.b32.xlu0 %v12486_v60, %s13635_s29 }
 0x711   : > { %6735 = vrot.lane.b32.xlu1 %v6675_v35, %s13688_s13  ;;  %v3515_v7 = vld [vmem:[#allocation3 + $0x17a] sm:$0xff] }
 0x712   : > { %v12611_v24 = vld [vmem:[#allocation3 + $0x181] sm:$0xff] }
 0x714   : > { %6705 = vrot.lane.b32.xlu0 %v6668_v52, %s13685_s0 }
 0x715   : > { %6888 = vrot.lane.b32.xlu1 %v6675_v35, %s13626_s30  ;;  %v12566_v35 = vld [vmem:[#allocation3 + $0x172] sm:$0xff] }
 0x718   : > { %6865 = vrot.lane.b32.xlu0 %v6668_v52, %s13625_s12 }
 0x719   : > { %6767 = vrot.lane.b32.xlu1 %v12486_v60, %s13689_s14 }
 0x71c   : > { %6737 = vrot.lane.b32.xlu0 %v6676_v5, %s13688_s13 }
 0x71d   : > { %6769 = vrot.lane.b32.xlu1 %v6677_v39, %s13689_s14 }
 0x720   : > { %6890 = vrot.lane.b32.xlu0 %v6676_v5, %s13626_s30 }
 0x721   : > { %6794 = vrot.lane.b32.xlu1 %v6678_v61, %s13686_s15 }
 0x724   : > { %6792 = vrot.lane.b32.xlu0 %v6668_v52, %s13686_s15  ;;  %v8665_v52 = vld [vmem:[#allocation3 + $0x162] sm:$0xff] }
 0x725   : > { %6819 = vrot.lane.b32.xlu1 %v6679_v46, %s13687_s24 }
 0x728   : > { %6817 = vrot.lane.b32.xlu0 %v6676_v5, %s13687_s24  ;;  %v12573_v5 = vld [vmem:[#allocation3 + $0x178] sm:$0xff] }
 0x729   : > { %6844 = vrot.lane.b32.xlu1 %v6680_v13, %s13635_s29 }
 0x72c   : > { %6842 = vrot.lane.b32.xlu0 %v6677_v39, %s13635_s29 }
 0x72d   : > { %6869 = vrot.lane.b32.xlu1 %v6681_v18, %s13625_s12 }
 0x730   : > { %6867 = vrot.lane.b32.xlu0 %v6678_v61, %s13625_s12  ;;  %v3661_v61 = vld [vmem:[#allocation3 + $0x16e] sm:$0xff] }
 0x731   : > { %6894 = vrot.lane.b32.xlu1 %v6682_v45, %s13626_s30  ;;  %v3465_v45 = vld [vmem:[#allocation3 + $0x179] sm:$0xff] }
 0x734   : > { %6892 = vrot.lane.b32.xlu0 %v6679_v46, %s13626_s30  ;;  %v3562_v46 = vld [vmem:[#allocation3 + $0x174] sm:$0xff] }
 0x735   : > { %3815 = vrot.lane.b32.xlu1 %v8655_v8, %s13685_s0  ;;  %v8666_v8 = vld [vmem:[#allocation2 + $0x18] sm:$0xff] }
 0x736   : > { %v6907_v32 = vsel %vm434_vm0, %v8666_v8, %v12417_v2 }
 0x738   : > { %3813 = vrot.lane.b32.xlu0 %v8656_v21, %s13685_s0  ;;  %v6915_v21 = vsel %vm2372_vm2, %v6907_v32, %v12424_v20  ;;  %v3565_v32 = vld [vmem:[#allocation3 + $0x18c] sm:$0xff] }
 0x739   : > { %4015 = vrot.lane.b32.xlu1 %v8657_v53, %s13688_s13  ;;  %v6923_v53 = vsel %vm2423_vm3, %v6915_v21, %v12442_v28  ;;  %v3517_v21 = vld [vmem:[#allocation3 + $0x18a] sm:$0xff] }
 0x73c   : > { %4013 = vrot.lane.b32.xlu0 %v8658_v51, %s13688_s13 }
 0x73d   : > { %4215 = vrot.lane.b32.xlu1 %v3559_v63, %s13689_s14 }
 0x740   : > { %4213 = vrot.lane.b32.xlu0 %v3558_v0, %s13689_s14  ;;  %v6931_v0 = vsel %vm2474_vm4, %v6923_v53, %v12459_v10  ;;  %v3563_v10 = vld [vmem:[#allocation3 + $0x17c] sm:$0xff]  ;;  %v3673_v53 = vld [vmem:[#allocation3 + $0x191] sm:$0xff] }
 0x741   : > { %3817 = vrot.lane.b32.xlu1 %v8659_v25, %s13685_s0  ;;  %v12592_v25 = vld [vmem:[#allocation3 + $0x180] sm:$0xff] }
 0x744   : > { %4413 = vrot.lane.b32.xlu0 %v3608_v59, %s13686_s15 }
 0x745   : > { %4613 = vrot.lane.b32.xlu1 %v3658_v42, %s13687_s24 }
 0x748   : > { %v12530_v23 = vpop.permute.xlu1 %6788  ;;  %4415 = vrot.lane.b32.xlu0 %v3609_v43, %s13686_s15  ;;  %v12548_v30 = vpop.permute.xlu0 %6701  ;;  %v6916_v43 = vsel %vm2372_vm2, %v6908_v3, %v12508_v36 }
 0x749   : > { %4017 = vrot.lane.b32.xlu1 %v8661_v55, %s13688_s13  ;;  %v3613_v55 = vld [vmem:[#allocation3 + $0x17d] sm:$0xff]  ;;  %v6924_v54 = vsel %vm2423_vm3, %v6916_v43, %v12516_v41 }
 0x74a   : > { %v6932_v58 = vsel %vm2474_vm4, %v6924_v54, %v12530_v23 }
 0x74c   : > { %v6885_v15 = vpop.permute.xlu1 %6884  ;;  %3819 = vrot.lane.b32.xlu0 %v8662_v31, %s13685_s0  ;;  %v6812_v49 = vpop.permute.xlu0 %6811 }
 0x74d   : > { %4813 = vrot.lane.b32.xlu1 %v12539_v11, %s13635_s29  ;;  %v6962_v48 = vsel %vm2678_vm8, %v6954_v27, %v6885_v15  ;;  %v6939_v2 = vsel %vm2525_vm5, %v6931_v0, %v6812_v49  ;;  %v12622_v15 = vld [vmem:[#allocation3 + $0x182] sm:$0xff]  ;;  %v3615_v0 = vld [vmem:[#allocation3 + $0x18d] sm:$0xff] }
 0x74e   : > { %8411 = vmatprep.mubr.msk.f32.mxu0 %vm2748_vm9, %v6962_v48  ;;  %v12639_v49 = vld [vmem:[#allocation3 + $0x188] sm:$0xff] }
 0x750   : > { %4615 = vrot.lane.b32.xlu0 %v3659_v34, %s13687_s24  ;;  %v12561_v38 = vpop.permute.xlu0 %6733  ;;  %v6814_v13 = vpop.permute.xlu1 %6813  ;;  %v3662_v34 = vld [vmem:[#allocation3 + $0x176] sm:$0xff] }
 0x751   : > { %4217 = vrot.lane.b32.xlu1 %v3560_v9, %s13689_s14  ;;  %v6940_v12 = vsel %vm2525_vm5, %v6932_v58, %v6814_v13  ;;  %v6909_v9 = vsel %vm434_vm0, %v12383_v14, %v12548_v30  ;;  %v3663_v14 = vld [vmem:[#allocation3 + $0x17e] sm:$0xff] }
 0x752   : > { %v3564_v30 = vld [vmem:[#allocation3 + $0x184] sm:$0xff] }
 0x754   : > { %4019 = vrot.lane.b32.xlu0 %v8663_v17, %s13688_s13  ;;  %v6837_v33 = vpop.permute.xlu0 %6836 }
 0x755   : > { %4968 = vrot.lane.b32.xlu1 %v3463_v40, %s13625_s12  ;;  %v6947_v20 = vsel %vm2576_vm6, %v6939_v2, %v6837_v33 }
 0x758   : > { %4815 = vrot.lane.b32.xlu0 %v12552_v62, %s13635_s29  ;;  %v12575_v39 = vpop.permute.xlu0 %6765 }
 0x759   : > { %4417 = vrot.lane.b32.xlu1 %v3610_v1, %s13686_s15  ;;  %v6917_v1 = vsel %vm2372_vm2, %v6909_v9, %v12561_v38 }
 0x75c   : > { %4219 = vrot.lane.b32.xlu0 %v3561_v29, %s13689_s14  ;;  %v6862_v18 = vpop.permute.xlu0 %6861  ;;  %v6925_v29 = vsel %vm2423_vm3, %v6917_v1, %v12575_v39  ;;  %v3467_v39 = vld [vmem:[#allocation3 + $0x189] sm:$0xff] }
 0x75d   : > { %5123 = vrot.lane.b32.xlu1 %v3513_v57, %s13626_s30  ;;  %v6955_v59 = vsel %vm2627_vm7, %v6947_v20, %v6862_v18  ;;  %v3614_v18 = vld [vmem:[#allocation3 + $0x185] sm:$0xff] }
 0x760   : > { %4970 = vrot.lane.b32.xlu0 %v12559_v56, %s13625_s12 }
 0x761   : > { %4419 = vrot.lane.b32.xlu1 %v3611_v50, %s13686_s15 }
 0x764   : > { %3821 = vrot.lane.b32.xlu0 %v8664_v26, %s13685_s0 }
 0x765   : > { %5125 = vrot.lane.b32.xlu1 %v12566_v35, %s13626_s30 }
 0x768   : > { %4617 = vrot.lane.b32.xlu0 %v3660_v4, %s13687_s24 }
 0x769   : > { %4021 = vrot.lane.b32.xlu1 %v8665_v52, %s13688_s13 }
 0x76c   : > { %3823 = vrot.lane.b32.xlu0 %v3463_v40, %s13685_s0 }
 0x76d   : > { %4817 = vrot.lane.b32.xlu1 %v12573_v5, %s13635_s29 }
 0x770   : > { %4619 = vrot.lane.b32.xlu0 %v3661_v61, %s13687_s24  ;;  %v3668_v61 = vld [vmem:[#allocation3 + $0x190] sm:$0xff] }
 0x771   : > { %4221 = vrot.lane.b32.xlu1 %v3562_v46, %s13689_s14 }
 0x774   : > { %4023 = vrot.lane.b32.xlu0 %v3513_v57, %s13688_s13 }
 0x775   : > { %4972 = vrot.lane.b32.xlu1 %v3465_v45, %s13625_s12 }
 0x776   : > { %v6791_v63 = vpop.permute.xlu0 %6790 }
 0x777   : > { %v6816_v51 = vpop.permute.xlu1 %6815  ;;  %v6933_v57 = vsel %vm2474_vm4, %v6925_v29, %v6791_v63  ;;  %v3674_v29 = vld [vmem:[#allocation3 + $0x199] sm:$0xff] }
 0x778   : > { %4819 = vrot.lane.b32.xlu0 %v12592_v25, %s13635_s29 }
 0x779   : > { %4421 = vrot.lane.b32.xlu1 %v3612_v16, %s13686_s15 }
 0x77a   : > { %v6887_v28 = vpop.permute.xlu0 %6886 }
 0x77b   : > { %v12600_v42 = vpop.permute.xlu1 %6703  ;;  %v6963_v47 = vsel %vm2678_vm8, %v6955_v59, %v6887_v28  ;;  %v3678_v28 = vld [vmem:[#allocation3 + $0x192] sm:$0xff] }
 0x77c   : > { %4223 = vrot.lane.b32.xlu0 %v3563_v10, %s13689_s14  ;;  %8412 = vmatmul.mubr.msk.f32.gmra.mxu0 %vm2748_vm9, %v6963_v47  ;;  %v6910_v16 = vsel %vm434_vm0, %v12445_v37, %v12600_v42 }
 0x77d   : > { %5127 = vrot.lane.b32.xlu1 %v3515_v7, %s13626_s30 }
 0x77e   : > { %v6839_v22 = vpop.permute.xlu0 %6838 }
 0x77f   : > { %v6864_v19 = vpop.permute.xlu1 %6863  ;;  %v6948_v36 = vsel %vm2576_vm6, %v6940_v12, %v6839_v22 }
 0x780   : > { %4974 = vrot.lane.b32.xlu0 %v12611_v24, %s13625_s12  ;;  %v6956_v41 = vsel %vm2627_vm7, %v6948_v36, %v6864_v19  ;;  %v3669_v36 = vld [vmem:[#allocation3 + $0x198] sm:$0xff] }
 0x781   : > { %4423 = vrot.lane.b32.xlu1 %v3613_v55, %s13686_s15 }
 0x782   : > { %v6841_v6 = vpop.permute.xlu0 %6840 }
 0x783   : > { %v6736_v27 = vpop.permute.xlu1 %6735 }
 0x784   : > { %3825 = vrot.lane.b32.xlu0 %v12559_v56, %s13685_s0  ;;  %v6918_v20 = vsel %vm2372_vm2, %v6910_v16, %v6736_v27  ;;  %v3671_v16 = vld [vmem:[#allocation3 + $0x1a8] sm:$0xff] }
 0x785   : > { %5129 = vrot.lane.b32.xlu1 %v12622_v15, %s13626_s30 }
 0x786   : > { %v6706_v31 = vpop.permute.xlu0 %6705 }
 0x787   : > { %v6889_v48 = vpop.permute.xlu1 %6888  ;;  %v6911_v2 = vsel %vm434_vm0, %v12486_v60, %v6706_v31 }
 0x788   : > { %v6964_v23 = vsel %vm2678_vm8, %v6956_v41, %v6889_v48  ;;  %4621 = vrot.lane.b32.xlu0 %v3662_v34, %s13687_s24  ;;  %v12698_v48 = vld [vmem:[%s13299_s6] ss:$0 sm:$0xff] }
 0x789   : > { %4025 = vrot.lane.b32.xlu1 %v12566_v35, %s13688_s13  ;;  %8414 = vmatprep.mubr.msk.f32.mxu0 %vm2748_vm9, %v6964_v23  ;;  %v6941_v35 = vsel %vm2525_vm5, %v6933_v57, %v6816_v51 }
 0x78a   : > { %v6866_v40 = vpop.permute.xlu0 %6865  ;;  %v6949_v38 = vsel %vm2576_vm6, %v6941_v35, %v6841_v6  ;;  %v3664_v6 = vld [vmem:[#allocation3 + $0x186] sm:$0xff] }
 0x78b   : > { %v6768_v17 = vpop.permute.xlu1 %6767  ;;  %v6957_v26 = vsel %vm2627_vm7, %v6949_v38, %v6866_v40  ;;  %v3665_v40 = vld [vmem:[#allocation3 + $0x18e] sm:$0xff]  ;;  %v3670_v38 = vld [vmem:[#allocation3 + $0x1a0] sm:$0xff] }
 0x78c   : > { %3827 = vrot.lane.b32.xlu0 %v3465_v45, %s13685_s0  ;;  %v6926_v47 = vsel %vm2423_vm3, %v6918_v20, %v6768_v17 }
 0x78d   : > { %4821 = vrot.lane.b32.xlu1 %v12639_v49, %s13635_s29 }
 0x78e   : > { %v6738_v56 = vpop.permute.xlu0 %6737 }
 0x78f   : > { %v6770_v50 = vpop.permute.xlu1 %6769  ;;  %v6919_v59 = vsel %vm2372_vm2, %v6911_v2, %v6738_v56  ;;  %v8667_v2 = vld [vmem:[#allocation3 + $0x140] sm:$0xff] }
 0x790   : > { %4623 = vrot.lane.b32.xlu0 %v3663_v14, %s13687_s24  ;;  %v6927_v37 = vsel %vm2423_vm3, %v6919_v59, %v6770_v50 }
 0x791   : > { %4225 = vrot.lane.b32.xlu1 %v3564_v30, %s13689_s14 }
 0x792   : > { %v6891_v33 = vpop.permute.xlu0 %6890 }
 0x793   : > { %v6795_v4 = vpop.permute.xlu1 %6794  ;;  %v6965_v52 = vsel %vm2678_vm8, %v6957_v26, %v6891_v33  ;;  %v3616_v26 = vld [vmem:[#allocation3 + $0x195] sm:$0xff] }
 0x794   : > { %4027 = vrot.lane.b32.xlu0 %v3515_v7, %s13688_s13  ;;  %8415 = vmatmul.mubr.msk.f32.gmra.mxu0 %vm2748_vm9, %v6965_v52  ;;  %v6935_v60 = vsel %vm2474_vm4, %v6927_v37, %v6795_v4 }
 0x795   : > { %4976 = vrot.lane.b32.xlu1 %v3467_v39, %s13625_s12 }
 0x796   : > { %v6793_v46 = vpop.permute.xlu0 %6792 }
 0x797   : > { %v6820_v13 = vpop.permute.xlu1 %6819  ;;  %v6934_v3 = vsel %vm2474_vm4, %v6926_v47, %v6793_v46 }
 0x798   : > { %4823 = vrot.lane.b32.xlu0 %v3668_v61, %s13635_s29  ;;  %v6943_v19 = vsel %vm2525_vm5, %v6935_v60, %v6820_v13  ;;  %v3679_v61 = vld [vmem:[#allocation3 + $0x19a] sm:$0xff] }
 0x799   : > { %4425 = vrot.lane.b32.xlu1 %v3614_v18, %s13686_s15  ;;  %v3675_v18 = vld [vmem:[#allocation3 + $0x1a1] sm:$0xff] }
 0x79a   : > { %v6818_v45 = vpop.permute.xlu0 %6817 }
 0x79b   : > { %v6845_v8 = vpop.permute.xlu1 %6844  ;;  %v6942_v42 = vsel %vm2525_vm5, %v6934_v3, %v6818_v45  ;;  %v3666_v45 = vld [vmem:[#allocation3 + $0x196] sm:$0xff]  ;;  %v3667_v3 = vld [vmem:[#allocation3 + $0x19e] sm:$0xff] }
 0x79c   : > { %4227 = vrot.lane.b32.xlu0 %v3565_v32, %s13689_s14  ;;  %v6951_v58 = vsel %vm2576_vm6, %v6943_v19, %v6845_v8 }
 0x79d   : > { %5131 = vrot.lane.b32.xlu1 %v3517_v21, %s13626_s30 }
 0x79e   : > { %v6843_v63 = vpop.permute.xlu0 %6842 }
 0x79f   : > { %v6870_v51 = vpop.permute.xlu1 %6869  ;;  %v6950_v22 = vsel %vm2576_vm6, %v6942_v42, %v6843_v63 }
 0x7a0   : > { %4978 = vrot.lane.b32.xlu0 %v3673_v53, %s13625_s12 }
 0x7a1   : > { %4427 = vrot.lane.b32.xlu1 %v3615_v0, %s13686_s15  ;;  %v3680_v0 = vld [vmem:[#allocation3 + $0x1a2] sm:$0xff] }
 0x7a2   : > { %v6868_v10 = vpop.permute.xlu0 %6867 }
 0x7a3   : > { %v6895_v7 = vpop.permute.xlu1 %6894  ;;  %v6958_v43 = vsel %vm2627_vm7, %v6950_v22, %v6868_v10 }
 0x7a4   : > { %3829 = vrot.lane.b32.xlu0 %v12611_v24, %s13685_s0  ;;  %v6959_v24 = vsel %vm2627_vm7, %v6951_v58, %v6870_v51 }
 0x7a5   : > { %5133 = vrot.lane.b32.xlu1 %v3678_v28, %s13626_s30  ;;  %v6967_v27 = vsel %vm2678_vm8, %v6959_v24, %v6895_v7  ;;  %v8668_v24 = vld [vmem:[#allocation3 + $0x148] sm:$0xff] }
 0x7a6   : > { %v6893_v55 = vpop.permute.xlu0 %6892 }
 0x7a7   : > { %v12680_v54 = vpop.permute.xlu1 %3815  ;;  %v6966_v12 = vsel %vm2678_vm8, %v6958_v43, %v6893_v55  ;;  %v3676_v43 = vld [vmem:[#allocation3 + $0x1a9] sm:$0xff] }
 0x7a8   : > { %4625 = vrot.lane.b32.xlu0 %v3664_v6, %s13687_s24  ;;  %8417 = vmatprep.mubr.msk.f32.mxu0 %vm2748_vm9, %v6966_v12 }
 0x7a9   : > { %4029 = vrot.lane.b32.xlu1 %v12622_v15, %s13688_s13  ;;  %8418 = vmatmul.mubr.msk.f32.gmra.mxu0 %vm2748_vm9, %v6967_v27  ;;  %v3566_v15 = vld [vmem:[#allocation3 + $0x194] sm:$0xff]  ;;  %v5234_v27 = vsel %vm434_vm0, %v8668_v24, %v12680_v54  ;;  %v8671_v24 = vld [vmem:[#allocation3 + $0x160] sm:$0xff] }
 0x7aa   : > { %v3814_v41 = vpop.permute.xlu0 %3813  ;;  %8480 = vmatprep.mubr.msk.f32.mxu0 %vm8748_vm10, %v13684_v44 }
 0x7ab   : > { %v12691_v31 = vpop.permute.xlu1 %4015  ;;  %v5233_v20 = vsel %vm434_vm0, %v8667_v2, %v3814_v41 }
 0x7ac   : > { %3831 = vrot.lane.b32.xlu0 %v3467_v39, %s13685_s0  ;;  %v3567_v39 = vld [vmem:[#allocation3 + $0x19c] sm:$0xff] }
 0x7ad   : > { %4825 = vrot.lane.b32.xlu1 %v3669_v36, %s13635_s29  ;;  %v5284_v36 = vsel %vm2372_vm2, %v5234_v27, %v12691_v31 }
 0x7ae   : > { %v4014_v23 = vpop.permute.xlu0 %4013  ;;  %v8410_v9 = vpop.f32.mrf.mxu0 }
 0x7af   : > { %v12700_v34 = vpop.permute.xlu1 %4215  ;;  %v7086_v17 = vadd.f32 %v8410_v9, %v12698_v48  ;;  %v5283_v47 = vsel %vm2372_vm2, %v5233_v20, %v4014_v23 }
 0x7b0   : > { %4627 = vrot.lane.b32.xlu0 %v3665_v40, %s13687_s24  ;;  %v7080_v1 = vpop.f32.mrf.mxu0  ;;  %v5334_v41 = vsel %vm2423_vm3, %v5284_v36, %v12700_v34 }
 0x7b1   : > { %4229 = vrot.lane.b32.xlu1 %v3566_v15, %s13689_s14  ;;  %v7120_v57 = vmax.f32 %v7086_v17, 0.0  ;;  %v7081_v56 = vadd.f32 %v12698_v48, %v7080_v1  ;;  %v3681_v1 = vld [vmem:[#allocation3 + $0x1aa] sm:$0xff] }
 0x7b2   : > { %v4214_v50 = vpop.permute.xlu0 %4213 }
 0x7b3   : > { %v12706_v14 = vpop.permute.xlu1 %3817  ;;  %v7128_v30 = vmin.f32 %v7120_v57, 6.0  ;;  %v7119_v35 = vmax.f32 %v7081_v56, 0.0  ;;  %v5333_v10 = vsel %vm2423_vm3, %v5283_v47, %v4214_v50 }
 0x7b4   : > { %4031 = vrot.lane.b32.xlu0 %v3517_v21, %s13688_s13  ;;  %v3617_v21 = vld [vmem:[#allocation3 + $0x19d] sm:$0xff] }
 0x7b5   : > { %4980 = vrot.lane.b32.xlu1 %v3674_v29, %s13625_s12  ;;  %7136 = vst.msk [vmem:[#allocation3 + $0x8] sm:$0xff] %vm434_vm0, %v7128_v30  ;;  %v7127_v33 = vmin.f32 %v7119_v35, 6.0 }
 0x7b6   : > { %v4414_v4 = vpop.permute.xlu0 %4413 }
 0x7b7   : > { %v4614_v52 = vpop.permute.xlu1 %4613  ;;  %7135 = vst.msk [vmem:[#allocation3] sm:$0xff] %vm434_vm0, %v7127_v33  ;;  %v5383_v7 = vsel %vm2474_vm4, %v5333_v10, %v4414_v4 }
 0x7b8   : > { %4827 = vrot.lane.b32.xlu0 %v3670_v38, %s13635_s29  ;;  %v5433_v22 = vsel %vm2525_vm5, %v5383_v7, %v4614_v52  ;;  %v8669_v52 = vld [vmem:[#allocation3 + $0x150] sm:$0xff] }
 0x7b9   : > { %4429 = vrot.lane.b32.xlu1 %v3616_v26, %s13686_s15 }
 0x7ba   : > { %v4416_v46 = vpop.permute.xlu0 %4415 }
 0x7bb   : > { %v12714_v13 = vpop.permute.xlu1 %4017  ;;  %v5384_v9 = vsel %vm2474_vm4, %v5334_v41, %v4416_v46 }
 0x7bc   : > { %4231 = vrot.lane.b32.xlu0 %v3567_v39, %s13689_s14  ;;  %v12747_v40 = vld [vmem:[#allocation3 + $0x8] sm:$0xff]  ;;  %v5235_v39 = vsel %vm434_vm0, %v8669_v52, %v12706_v14  ;;  %v8670_v14 = vld [vmem:[#allocation3 + $0x158] sm:$0xff] }
 0x7bd   : > { %5135 = vrot.lane.b32.xlu1 %v3679_v61, %s13626_s30  ;;  %v5285_v61 = vsel %vm2372_vm2, %v5235_v39, %v12714_v13 }
 0x7be   : > { %v12718_v8 = vpop.permute.xlu0 %3819  ;;  %v7151_v51 = vld [vmem:[#allocation3 + $0x1] sm:$0xff] }
 0x7bf   : > { %v4814_v32 = vpop.permute.xlu1 %4813  ;;  %v7159_v60 = vld [vmem:[#allocation3 + $0x2] sm:$0xff]  ;;  %v5236_v13 = vsel %vm434_vm0, %v8670_v14, %v12718_v8 }
 0x7c0   : > { %4982 = vrot.lane.b32.xlu0 %v3675_v18, %s13625_s12  ;;  %v5483_v19 = vsel %vm2576_vm6, %v5433_v22, %v4814_v32 }
 0x7c1   : > { %4629 = vrot.lane.b32.xlu1 %v3666_v45, %s13687_s24 }
 0x7c2   : > { %v4616_v53 = vpop.permute.xlu0 %4615 }
 0x7c3   : > { %v4218_v63 = vpop.permute.xlu1 %4217  ;;  %v5434_v17 = vsel %vm2525_vm5, %v5384_v9, %v4616_v53 }
 0x7c4   : > { %4431 = vrot.lane.b32.xlu0 %v3617_v21, %s13686_s15  ;;  %v5335_v46 = vsel %vm2423_vm3, %v5285_v61, %v4218_v63 }
 0x7c5   : > { %7181 = vrot.lane.b32.xlu1 %v7151_v51, %s13685_s0 }
 0x7c6   : > { %v12725_v59 = vpop.permute.xlu0 %4019 }
 0x7c7   : > { %v4969_v28 = vpop.permute.xlu1 %4968  ;;  %v5286_v63 = vsel %vm2372_vm2, %v5236_v13, %v12725_v59 }
 0x7c8   : > { %5137 = vrot.lane.b32.xlu0 %v3680_v0, %s13626_s30  ;;  %v5533_v55 = vsel %vm2627_vm7, %v5483_v19, %v4969_v28 }
 0x7c9   : > { %4829 = vrot.lane.b32.xlu1 %v3671_v16, %s13635_s29 }
 0x7ca   : > { %v4816_v37 = vpop.permute.xlu0 %4815 }
 0x7cb   : > { %v4418_v42 = vpop.permute.xlu1 %4417  ;;  %v5484_v54 = vsel %vm2576_vm6, %v5434_v17, %v4816_v37 }
 0x7cc   : > { %4631 = vrot.lane.b32.xlu0 %v3667_v3, %s13687_s24  ;;  %v5385_v32 = vsel %vm2474_vm4, %v5335_v46, %v4418_v42 }
 0x7cd   : > { %7213 = vrot.lane.b32.xlu1 %v7159_v60, %s13688_s13 }
 0x7ce   : > { %v4220_v58 = vpop.permute.xlu0 %4219 }
 0x7cf   : > { %v5124_v12 = vpop.permute.xlu1 %5123  ;;  %v5336_v20 = vsel %vm2423_vm3, %v5286_v63, %v4220_v58 }
 0x7d0   : > { %v5583_v6 = vsel %vm2678_vm8, %v5533_v55, %v5124_v12 }
 0x7d1   : > { %8369 = vmatprep.mubr.msk.f32.mxu1 %vm2748_vm9, %v5583_v6  ;;  %4984 = vrot.lane.b32.xlu1 %v3676_v43, %s13625_s12 }
 0x7d2   : > { %v4971_v15 = vpop.permute.xlu0 %4970 }
 0x7d3   : > { %v4420_v23 = vpop.permute.xlu1 %4419  ;;  %v5534_v29 = vsel %vm2627_vm7, %v5484_v54, %v4971_v15 }
 0x7d4   : > { %v5386_v10 = vsel %vm2474_vm4, %v5336_v20, %v4420_v23 }
 0x7d5   : > { %7245 = vrot.lane.b32.xlu1 %v12747_v40, %s13689_s14 }
 0x7d6   : > { %v3822_v31 = vpop.permute.xlu0 %3821 }
 0x7d7   : > { %v5126_v57 = vpop.permute.xlu1 %5125  ;;  %v5237_v27 = vsel %vm434_vm0, %v8671_v24, %v3822_v31 }
 0x7d8   : > { %v5584_v34 = vsel %vm2678_vm8, %v5534_v29, %v5126_v57 }
 0x7d9   : > { %8370 = vmatmul.mubr.msk.f32.gmra.mxu1 %vm2748_vm9, %v5584_v34  ;;  %5139 = vrot.lane.b32.xlu1 %v3681_v1, %s13626_s30 }
 0x7da   : > { %v4618_v56 = vpop.permute.xlu0 %4617 }
 0x7db   : > { %v4022_v50 = vpop.permute.xlu1 %4021  ;;  %v5435_v21 = vsel %vm2525_vm5, %v5385_v32, %v4618_v56 }
 0x7dc   : > { %v5287_v36 = vsel %vm2372_vm2, %v5237_v27, %v4022_v50 }
 0x7de   : > { %v3824_v30 = vpop.permute.xlu0 %3823 }
 0x7df   : > { %v4818_v35 = vpop.permute.xlu1 %4817  ;;  %v5238_v31 = vsel %vm434_vm0, %v12539_v11, %v3824_v30 }
 0x7e0   : > { %v5485_v53 = vsel %vm2576_vm6, %v5435_v21, %v4818_v35 }
 0x7e2   : > { %v4620_v38 = vpop.permute.xlu0 %4619 }
 0x7e3   : > { %v4222_v26 = vpop.permute.xlu1 %4221  ;;  %v5436_v7 = vsel %vm2525_vm5, %v5386_v10, %v4620_v38 }
 0x7e4   : > { %v5337_v41 = vsel %vm2423_vm3, %v5287_v36, %v4222_v26  ;;  %v7469_v26 = vld [vmem:[%s13300_s7 + $0x58] sm:$0x3] }
 0x7e5   : > { %8420 = vmatprep.subr.msk.mxu1 %vm2899_vm1, %v7469_v26  ;;  %v7465_v36 = vld [vmem:[%s13300_s7 + $0x38] sm:$0xff] }
 0x7e6   : > { %v4024_v33 = vpop.permute.xlu0 %4023  ;;  %8421 = vmatpush3.msk.msra.mxu1 %vm2899_vm1, %v7469_v26 }
 0x7e7   : > { %v4973_v4 = vpop.permute.xlu1 %4972  ;;  %v5288_v56 = vsel %vm2372_vm2, %v5238_v31, %v4024_v33 }
 0x7e8   : > { %v5535_v51 = vsel %vm2627_vm7, %v5485_v53, %v4973_v4 }
 0x7ea   : > { %v4820_v18 = vpop.permute.xlu0 %4819 }
 0x7eb   : > { %v4422_v45 = vpop.permute.xlu1 %4421  ;;  %v5486_v3 = vsel %vm2576_vm6, %v5436_v7, %v4820_v18 }
 0x7ec   : > { %v5387_v9 = vsel %vm2474_vm4, %v5337_v41, %v4422_v45 }
 0x7ee   : > { %v4224_v0 = vpop.permute.xlu0 %4223 }
 0x7ef   : > { %v5128_v16 = vpop.permute.xlu1 %5127  ;;  %v5338_v50 = vsel %vm2423_vm3, %v5288_v56, %v4224_v0 }
 0x7f0   : > { %v5585_v2 = vsel %vm2678_vm8, %v5535_v51, %v5128_v16 }
 0x7f1   : > { %8372 = vmatprep.mubr.msk.f32.mxu1 %vm2748_vm9, %v5585_v2 }
 0x7f2   : > { %v4975_v28 = vpop.permute.xlu0 %4974 }
 0x7f3   : > { %v4424_v47 = vpop.permute.xlu1 %4423  ;;  %v5536_v37 = vsel %vm2627_vm7, %v5486_v3, %v4975_v28 }
 0x7f4   : > { %v5388_v4 = vsel %vm2474_vm4, %v5338_v50, %v4424_v47 }
 0x7f6   : > { %v3826_v42 = vpop.permute.xlu0 %3825 }
 0x7f7   : > { %v5130_v60 = vpop.permute.xlu1 %5129  ;;  %v5239_v14 = vsel %vm434_vm0, %v12552_v62, %v3826_v42  ;;  %v7468_v42 = vld [vmem:[%s13300_s7 + $0x50] sm:$0xff] }
 0x7f8   : > { %v5586_v8 = vsel %vm2678_vm8, %v5536_v37, %v5130_v60  ;;  %8422 = vmatprep.subr.mxu1 %v7468_v42 }
 0x7f9   : > { %8373 = vmatmul.mubr.msk.f32.gmra.mxu1 %vm2748_vm9, %v5586_v8  ;;  %v7467_v8 = vld [vmem:[%s13300_s7 + $0x48] sm:$0xff] }
 0x7fa   : > { %v4622_v22 = vpop.permute.xlu0 %4621  ;;  %8423 = vmatpush3.msra.mxu1 %v7468_v42 }
 0x7fb   : > { %v4026_v59 = vpop.permute.xlu1 %4025  ;;  %v5437_v17 = vsel %vm2525_vm5, %v5387_v9, %v4622_v22  ;;  %v7466_v22 = vld [vmem:[%s13300_s7 + $0x40] sm:$0xff]  ;;  %8424 = vmatprep.subr.mxu1 %v7467_v8 }
 0x7fc   : > { %v5289_v13 = vsel %vm2372_vm2, %v5239_v14, %v4026_v59  ;;  %8425 = vmatpush3.msra.mxu1 %v7467_v8  ;;  %v7462_v14 = vld [vmem:[%s13300_s7 + $0x20] sm:$0xff]  ;;  %v3682_v8 = vld [vmem:[#allocation3 + $0x1b2] sm:$0xff] }
 0x7fd   : > { %8426 = vmatprep.subr.mxu1 %v7466_v22 }
 0x7fe   : > { %v12779_v19 = vpop.permute.xlu0 %3827  ;;  %8427 = vmatpush3.msra.mxu1 %v7466_v22 }
 0x7ff   : > { %v4822_v43 = vpop.permute.xlu1 %4821  ;;  %8428 = vmatprep.subr.mxu1 %v7465_v36 }
 0x800   : > { %v5487_v54 = vsel %vm2576_vm6, %v5437_v17, %v4822_v43  ;;  %8429 = vmatpush3.msra.mxu1 %v7465_v36 }
 0x802   : > { %v4624_v55 = vpop.permute.xlu0 %4623 }
 0x803   : > { %v4226_v58 = vpop.permute.xlu1 %4225  ;;  %v5438_v52 = vsel %vm2525_vm5, %v5388_v4, %v4624_v55  ;;  %v5240_v55 = vsel %vm434_vm0, %v12573_v5, %v12779_v19 }
 0x804   : > { %v5339_v63 = vsel %vm2423_vm3, %v5289_v13, %v4226_v58 }
 0x806   : > { %v12781_v12 = vpop.permute.xlu0 %4027 }
 0x807   : > { %v4977_v6 = vpop.permute.xlu1 %4976  ;;  %v5290_v58 = vsel %vm2372_vm2, %v5240_v55, %v12781_v12 }
 0x808   : > { %v5537_v1 = vsel %vm2627_vm7, %v5487_v54, %v4977_v6  ;;  %v7143_v54 = vld [vmem:[#allocation3] sm:$0xff] }
 0x80a   : > { %v4824_v15 = vpop.permute.xlu0 %4823 }
 0x80b   : > { %v4426_v23 = vpop.permute.xlu1 %4425  ;;  %v5488_v11 = vsel %vm2576_vm6, %v5438_v52, %v4824_v15 }
 0x80c   : > { %v5389_v47 = vsel %vm2474_vm4, %v5339_v63, %v4426_v23 }
 0x80e   : > { %v4228_v29 = vpop.permute.xlu0 %4227 }
 0x80f   : > { %v5132_v57 = vpop.permute.xlu1 %5131  ;;  %v5340_v6 = vsel %vm2423_vm3, %v5290_v58, %v4228_v29 }
 0x810   : > { %v5587_v34 = vsel %vm2678_vm8, %v5537_v1, %v5132_v57 }
 0x811   : > { %8375 = vmatprep.mubr.msk.f32.mxu1 %vm2748_vm9, %v5587_v34 }
 0x812   : > { %v4979_v35 = vpop.permute.xlu0 %4978 }
 0x813   : > { %v4428_v38 = vpop.permute.xlu1 %4427  ;;  %v5538_v30 = vsel %vm2627_vm7, %v5488_v11, %v4979_v35 }
 0x814   : > { %v5390_v41 = vsel %vm2474_vm4, %v5340_v6, %v4428_v38 }
 0x816   : > { %v12805_v33 = vpop.permute.xlu0 %3829 }
 0x817   : > { %v5134_v39 = vpop.permute.xlu1 %5133  ;;  %v5241_v52 = vsel %vm434_vm0, %v12592_v25, %v12805_v33 }
 0x818   : > { %v5588_v61 = vsel %vm2678_vm8, %v5538_v30, %v5134_v39 }
 0x819   : > { %8376 = vmatmul.mubr.msk.f32.gmra.mxu1 %vm2748_vm9, %v5588_v61 }
 0x81a   : > { %v4626_v46 = vpop.permute.xlu0 %4625 }
 0x81b   : > { %v12809_v18 = vpop.permute.xlu1 %4029  ;;  %v5439_v10 = vsel %vm2525_vm5, %v5389_v47, %v4626_v46 }
 0x81c   : > { %v5291_v30 = vsel %vm2372_vm2, %v5241_v52, %v12809_v18 }
 0x81e   : > { %v3832_v45 = vpop.permute.xlu0 %3831 }
 0x81f   : > { %v4826_v32 = vpop.permute.xlu1 %4825  ;;  %v5242_v51 = vsel %vm434_vm0, %v12639_v49, %v3832_v45 }
 0x820   : > { %v5489_v7 = vsel %vm2576_vm6, %v5439_v10, %v4826_v32  ;;  %v3677_v10 = vld [vmem:[#allocation3 + $0x1b1] sm:$0xff] }
 0x822   : > { %v4628_v21 = vpop.permute.xlu0 %4627 }
 0x823   : > { %v12811_v53 = vpop.permute.xlu1 %4229  ;;  %v5440_v5 = vsel %vm2525_vm5, %v5390_v41, %v4628_v21  ;;  %v7460_v41 = vld [vmem:[%s13300_s7 + $0x10] sm:$0xff] }
 0x824   : > { %v5341_v39 = vsel %vm2423_vm3, %v5291_v30, %v12811_v53 }
 0x826   : > { %v4032_v0 = vpop.permute.xlu0 %4031 }
 0x827   : > { %v4981_v16 = vpop.permute.xlu1 %4980  ;;  %v5292_v2 = vsel %vm2372_vm2, %v5242_v51, %v4032_v0  ;;  %v3672_v51 = vld [vmem:[#allocation3 + $0x1b0] sm:$0xff] }
 0x828   : > { %v5539_v49 = vsel %vm2627_vm7, %v5489_v7, %v4981_v16  ;;  %v7464_v0 = vld [vmem:[%s13300_s7 + $0x30] sm:$0xff]  ;;  %v7463_v16 = vld [vmem:[%s13300_s7 + $0x28] sm:$0xff] }
 0x829   : > { %8430 = vmatprep.subr.mxu1 %v7464_v0 }
 0x82a   : > { %v4828_v20 = vpop.permute.xlu0 %4827  ;;  %8431 = vmatpush3.msra.mxu1 %v7464_v0 }
 0x82b   : > { %v4430_v28 = vpop.permute.xlu1 %4429  ;;  %v5490_v19 = vsel %vm2576_vm6, %v5440_v5, %v4828_v20  ;;  %8432 = vmatprep.subr.mxu1 %v7463_v16 }
 0x82c   : > { %v5391_v46 = vsel %vm2474_vm4, %v5341_v39, %v4430_v28  ;;  %8433 = vmatpush3.msra.mxu1 %v7463_v16  ;;  %v7461_v28 = vld [vmem:[%s13300_s7 + $0x18] sm:$0xff] }
 0x82d   : > { %8434 = vmatprep.subr.mxu1 %v7462_v14 }
 0x82e   : > { %v4232_v3 = vpop.permute.xlu0 %4231  ;;  %8435 = vmatpush3.msra.mxu1 %v7462_v14 }
 0x82f   : > { %v5136_v37 = vpop.permute.xlu1 %5135  ;;  %v5342_v60 = vsel %vm2423_vm3, %v5292_v2, %v4232_v3  ;;  %8436 = vmatprep.subr.mxu1 %v7461_v28 }
 0x830   : > { %v5589_v62 = vsel %vm2678_vm8, %v5539_v49, %v5136_v37  ;;  %8437 = vmatpush3.msra.mxu1 %v7461_v28  ;;  %v12991_v28 = vld [vmem:[#allocation3 + $0x42] sm:$0xff] }
 0x831   : > { %8378 = vmatprep.mubr.msk.f32.mxu1 %vm2748_vm9, %v5589_v62  ;;  %8438 = vmatprep.subr.mxu1 %v7460_v41 }
 0x832   : > { %v4983_v59 = vpop.permute.xlu0 %4982  ;;  %8439 = vmatpush3.msra.mxu1 %v7460_v41  ;;  %v6269_v41 = vld [vmem:[#allocation2 + $0x138] sm:$0xff] }
 0x833   : > { %v4630_v43 = vpop.permute.xlu1 %4629  ;;  %v5540_v12 = vsel %vm2627_vm7, %v5490_v19, %v4983_v59 }
 0x834   : > { %v5441_v32 = vsel %vm2525_vm5, %v5391_v46, %v4630_v43  ;;  %v6317_v46 = vld [vmem:[#allocation2 + $0x129] sm:$0xff] }
 0x836   : > { %v4432_v24 = vpop.permute.xlu0 %4431 }
 0x837   : > { %v7182_v27 = vpop.permute.xlu1 %7181  ;;  %v12847_v15 = vsel %vm2474_vm4, %v5342_v60, %v4432_v24 }
 0x838   : > { %v7394_v29 = vsel %vm434_vm0, %v7143_v54, %v7182_v27 }
 0x83a   : > { %v5138_v23 = vpop.permute.xlu0 %5137 }
 0x83b   : > { %v4830_v9 = vpop.permute.xlu1 %4829  ;;  %v5590_v17 = vsel %vm2678_vm8, %v5540_v12, %v5138_v23  ;;  %v7459_v12 = vld [vmem:[%s13300_s7 + $0x8] sm:$0xff] }
 0x83c   : > { %8379 = vmatmul.mubr.msk.f32.gmra.mxu1 %vm2748_vm9, %v5590_v17  ;;  %v8413_v1 = vpop.f32.mrf.mxu0  ;;  %v5491_v25 = vsel %vm2576_vm6, %v5441_v32, %v4830_v9  ;;  %8440 = vmatprep.subr.mxu1 %v7459_v12  ;;  %v6268_v32 = vld [vmem:[#allocation2 + $0x130] sm:$0xff] }
 0x83d   : > { %v7096_v57 = vadd.f32 %v8413_v1, %v12698_v48  ;;  %8441 = vmatpush3.msra.mxu1 %v7459_v12 }
 0x83e   : > { %v7090_v31 = vpop.f32.mrf.mxu0 }
 0x83f   : > { %v7214_v34 = vpop.permute.xlu1 %7213  ;;  %v7122_v50 = vmax.f32 %v7096_v57, 0.0  ;;  %v7091_v35 = vadd.f32 %v12698_v48, %v7090_v31 }
 0x840   : > { %v7402_v56 = vsel %vm2372_vm2, %v7394_v29, %v7214_v34 }
 0x841   : > { %v7130_v38 = vmin.f32 %v7122_v50, 6.0  ;;  %v7121_v26 = vmax.f32 %v7091_v35, 0.0 }
 0x843   : > { %v4985_v4 = vpop.permute.xlu1 %4984  ;;  %7138 = vst.msk [vmem:[#allocation3 + $0x18] sm:$0xff] %vm434_vm0, %v7130_v38  ;;  %v7129_v11 = vmin.f32 %v7121_v26, 6.0 }
 0x844   : > { %v5541_v33 = vsel %vm2627_vm7, %v5491_v25, %v4985_v4  ;;  %v6318_v25 = vld [vmem:[#allocation2 + $0x131] sm:$0xff] }
 0x845   : > { %7137 = vst.msk [vmem:[#allocation3 + $0x10] sm:$0xff] %vm434_vm0, %v7129_v11 }
 0x847   : > { %v7246_v61 = vpop.permute.xlu1 %7245 }
 0x848   : > { %v12869_v45 = vsel %vm2423_vm3, %v7402_v56, %v7246_v61  ;;  %v12964_v56 = vld [vmem:[%s13297_s4] ss:$0 sm:$0xff]  ;;  %v6267_v61 = vld [vmem:[#allocation2 + $0x128] sm:$0xff] }
 0x84a   : > { %v12906_v22 = vld [vmem:[#allocation3 + $0x18] sm:$0xff] }
 0x84b   : > { %v5140_v21 = vpop.permute.xlu1 %5139 }
 0x84c   : > { %v5591_v18 = vsel %vm2678_vm8, %v5541_v33, %v5140_v21  ;;  %v7152_v53 = vld [vmem:[#allocation3 + $0x9] sm:$0xff]  ;;  %v7153_v2 = vld [vmem:[#allocation3 + $0x11] sm:$0xff] }
 0x84d   : > { %8381 = vmatprep.mubr.msk.f32.mxu1 %vm2748_vm9, %v5591_v18  ;;  %7183 = vrot.lane.b32.xlu0 %v7152_v53, %s13685_s0  ;;  %v7160_v63 = vld [vmem:[#allocation3 + $0xa] sm:$0xff]  ;;  %v7161_v3 = vld [vmem:[#allocation3 + $0x12] sm:$0xff] }
 0x84e   : > { %7270 = vrot.lane.b32.xlu1 %v7152_v53, %s13686_s15  ;;  %v12899_v42 = vld [vmem:[#allocation3 + $0x10] sm:$0xff] }
 0x851   : > { %4831 = vrot.lane.b32.xlu0 %v3672_v51, %s13635_s29  ;;  %v6367_v51 = vmax.f32 %v6267_v61, %v6317_v46  ;;  %v7171_v61 = vld [vmem:[#allocation3 + $0x49] sm:$0xff] }
 0x852   : > { %7185 = vrot.lane.b32.xlu1 %v7153_v2, %s13685_s0 }
 0x854   : > { %v8416_v13 = vpop.f32.mrf.mxu0 }
 0x855   : > { %v7106_v20 = vadd.f32 %v8416_v13, %v12698_v48  ;;  %7215 = vrot.lane.b32.xlu0 %v7160_v63, %s13688_s13 }
 0x856   : > { %7295 = vrot.lane.b32.xlu1 %v7160_v63, %s13687_s24  ;;  %v7100_v47 = vpop.f32.mrf.mxu0 }
 0x857   : > { %v7124_v7 = vmax.f32 %v7106_v20, 0.0  ;;  %v7101_v49 = vadd.f32 %v12698_v48, %v7100_v47 }
 0x859   : > { %v7132_v37 = vmin.f32 %v7124_v7, 6.0  ;;  %v7123_v60 = vmax.f32 %v7101_v49, 0.0  ;;  %4986 = vrot.lane.b32.xlu0 %v3677_v10, %s13625_s12  ;;  %v7167_v7 = vld [vmem:[#allocation3 + $0x40] sm:$0xff]  ;;  %v7170_v49 = vld [vmem:[#allocation3 + $0x48] sm:$0xff] }
 0x85a   : > { %7217 = vrot.lane.b32.xlu1 %v7161_v3, %s13688_s13 }
 0x85b   : > { %7140 = vst.msk [vmem:[#allocation3 + $0x28] sm:$0xff] %vm434_vm0, %v7132_v37  ;;  %v7131_v62 = vmin.f32 %v7123_v60, 6.0 }
 0x85d   : > { %7139 = vst.msk [vmem:[#allocation3 + $0x20] sm:$0xff] %vm434_vm0, %v7131_v62  ;;  %7247 = vrot.lane.b32.xlu0 %v12899_v42, %s13689_s14  ;;  %v4632_v62 = vpop.permute.xlu0 %4631 }
 0x85e   : > { %7320 = vrot.lane.b32.xlu1 %v12899_v42, %s13635_s29  ;;  %v5442_v46 = vsel %vm2525_vm5, %v12847_v15, %v4632_v62 }
 0x861   : > { %5141 = vrot.lane.b32.xlu0 %v3682_v8, %s13626_s30 }
 0x862   : > { %7249 = vrot.lane.b32.xlu1 %v12906_v22, %s13689_s14  ;;  %v12937_v17 = vld [vmem:[#allocation3 + $0x28] sm:$0xff] }
 0x864   : > { %v7154_v59 = vld [vmem:[#allocation3 + $0x19] sm:$0xff]  ;;  %v7163_v23 = vld [vmem:[#allocation3 + $0x22] sm:$0xff] }
 0x865   : > { %7272 = vrot.lane.b32.xlu0 %v7153_v2, %s13686_s15  ;;  %v7162_v19 = vld [vmem:[#allocation3 + $0x1a] sm:$0xff] }
 0x866   : > { %7345 = vrot.lane.b32.xlu1 %v7153_v2, %s13625_s12  ;;  %v12935_v9 = vld [vmem:[#allocation3 + $0x20] sm:$0xff]  ;;  %v6368_v2 = vmax.f32 %v6268_v32, %v6318_v25 }
 0x867   : > { %v7155_v1 = vld [vmem:[#allocation3 + $0x21] sm:$0xff] }
 0x869   : > { %v8419_v43 = vpop.f32.mrf.mxu0  ;;  %7187 = vrot.lane.b32.xlu0 %v7154_v59, %s13685_s0 }
 0x86a   : > { %7274 = vrot.lane.b32.xlu1 %v7154_v59, %s13686_s15  ;;  %v7116_v55 = vadd.f32 %v8419_v43, %v12698_v48 }
 0x86b   : > { %v7110_v58 = vpop.f32.mrf.mxu0 }
 0x86c   : > { %v7126_v6 = vmax.f32 %v7116_v55, 0.0  ;;  %v7111_v24 = vadd.f32 %v12698_v48, %v7110_v58  ;;  %v7458_v48 = vld [vmem:[%s13300_s7] sm:$0xff] }
 0x86d   : > { %7297 = vrot.lane.b32.xlu0 %v7161_v3, %s13687_s24  ;;  %8442 = vmatprep.subr.mxu1 %v7458_v48 }
 0x86e   : > { %7370 = vrot.lane.b32.xlu1 %v7161_v3, %s13626_s30  ;;  %v7134_v27 = vmin.f32 %v7126_v6, 6.0  ;;  %v7125_v36 = vmax.f32 %v7111_v24, 0.0  ;;  %8443 = vmatpush3.msra.mxu1 %v7458_v48  ;;  %v7168_v6 = vld [vmem:[#allocation3 + $0x41] sm:$0xff] }
 0x870   : > { %7142 = vst.msk [vmem:[#allocation3 + $0x38] sm:$0xff] %vm434_vm0, %v7134_v27  ;;  %v7133_v5 = vmin.f32 %v7125_v36, 6.0 }
 0x871   : > { %7219 = vrot.lane.b32.xlu0 %v7162_v19, %s13688_s13 }
 0x872   : > { %7299 = vrot.lane.b32.xlu1 %v7162_v19, %s13687_s24  ;;  %7141 = vst.msk [vmem:[#allocation3 + $0x30] sm:$0xff] %vm434_vm0, %v7133_v5 }
 0x875   : > { %7322 = vrot.lane.b32.xlu0 %v12906_v22, %s13635_s29 }
 0x876   : > { %7301 = vrot.lane.b32.xlu1 %v7163_v23, %s13687_s24 }
 0x877   : > { %v12976_v39 = vld [vmem:[#allocation3 + $0x38] sm:$0xff] }
 0x878   : > { %v7158_v33 = vld [vmem:[#allocation3 + $0x39] sm:$0xff] }
 0x879   : > { %7251 = vrot.lane.b32.xlu0 %v12935_v9, %s13689_s14  ;;  %v7156_v54 = vld [vmem:[#allocation3 + $0x29] sm:$0xff]  ;;  %v7157_v34 = vld [vmem:[#allocation3 + $0x31] sm:$0xff]  ;;  %v7166_v20 = vld [vmem:[#allocation3 + $0x3a] sm:$0xff] }
 0x87a   : > { %7326 = vrot.lane.b32.xlu1 %v12937_v17, %s13635_s29  ;;  %v7164_v29 = vld [vmem:[#allocation3 + $0x2a] sm:$0xff]  ;;  %v7165_v35 = vld [vmem:[#allocation3 + $0x32] sm:$0xff] }
 0x87b   : > { %v12952_v57 = vld [vmem:[#allocation3 + $0x30] sm:$0xff] }
 0x87d   : > { %7347 = vrot.lane.b32.xlu0 %v7154_v59, %s13625_s12 }
 0x87e   : > { %7351 = vrot.lane.b32.xlu1 %v7156_v54, %s13625_s12 }
 0x881   : > { %7276 = vrot.lane.b32.xlu0 %v7155_v1, %s13686_s15 }
 0x882   : > { %7376 = vrot.lane.b32.xlu1 %v7164_v29, %s13626_s30 }
 0x885   : > { %7372 = vrot.lane.b32.xlu0 %v7162_v19, %s13626_s30 }
 0x886   : > { %7191 = vrot.lane.b32.xlu1 %v7156_v54, %s13685_s0 }
 0x889   : > { %7324 = vrot.lane.b32.xlu0 %v12935_v9, %s13635_s29 }
 0x88a   : > { %7223 = vrot.lane.b32.xlu1 %v7164_v29, %s13688_s13 }
 0x88d   : > { %7349 = vrot.lane.b32.xlu0 %v7155_v1, %s13625_s12 }
 0x88e   : > { %7255 = vrot.lane.b32.xlu1 %v12952_v57, %s13689_s14 }
 0x891   : > { %7374 = vrot.lane.b32.xlu0 %v7163_v23, %s13626_s30 }
 0x892   : > { %7193 = vrot.lane.b32.xlu1 %v7157_v34, %s13685_s0 }
 0x895   : > { %7189 = vrot.lane.b32.xlu0 %v7155_v1, %s13685_s0 }
 0x896   : > { %7303 = vrot.lane.b32.xlu1 %v7164_v29, %s13687_s24 }
 0x899   : > { %v8371_v31 = vpop.f32.mrf.mxu1  ;;  %7221 = vrot.lane.b32.xlu0 %v7163_v23, %s13688_s13 }
 0x89a   : > { %v6037_v50 = vadd.f32 %v12964_v56, %v8371_v31  ;;  %7225 = vrot.lane.b32.xlu1 %v7165_v35, %s13688_s13 }
 0x89b   : > { %v6031_v38 = vpop.f32.mrf.mxu1 }
 0x89c   : > { %v6121_v26 = vmax.f32 %v6037_v50, 0.0  ;;  %v6032_v4 = vadd.f32 %v12964_v56, %v6031_v38 }
 0x89d   : > { %7253 = vrot.lane.b32.xlu0 %v12937_v17, %s13689_s14 }
 0x89e   : > { %v6171_v52 = vmin.f32 %v6121_v26, 6.0  ;;  %v6120_v11 = vmax.f32 %v6032_v4, 0.0  ;;  %7328 = vrot.lane.b32.xlu1 %v12952_v57, %s13635_s29 }
 0x8a0   : > { %6221 = vst.msk [vmem:[#allocation2 + $0x148] sm:$0xff] %vm434_vm0, %v6171_v52  ;;  %v6170_v30 = vmin.f32 %v6120_v11, 6.0 }
 0x8a1   : > { %7278 = vrot.lane.b32.xlu0 %v7156_v54, %s13686_s15 }
 0x8a2   : > { %6220 = vst.msk [vmem:[#allocation2 + $0x140] sm:$0xff] %vm434_vm0, %v6170_v30  ;;  %7257 = vrot.lane.b32.xlu1 %v12976_v39, %s13689_s14 }
 0x8a5   : > { %7280 = vrot.lane.b32.xlu0 %v7157_v34, %s13686_s15 }
 0x8a6   : > { %7353 = vrot.lane.b32.xlu1 %v7157_v34, %s13625_s12 }
 0x8a9   : > { %v6417_v21 = vld [vmem:[#allocation2 + $0x13c] sm:$0xff]  ;;  %v6418_v18 = vld [vmem:[#allocation2 + $0x144] sm:$0xff]  ;;  %7195 = vrot.lane.b32.xlu0 %v7158_v33, %s13685_s0 }
 0x8aa   : > { %v6467_v53 = vld [vmem:[#allocation2 + $0x13d] sm:$0xff]  ;;  %v6468_v0 = vld [vmem:[#allocation2 + $0x145] sm:$0xff]  ;;  %7282 = vrot.lane.b32.xlu1 %v7158_v33, %s13686_s15 }
 0x8ab   : > { %v6517_v16 = vmax.f32 %v6417_v21, %v6467_v53  ;;  %v6518_v14 = vmax.f32 %v6418_v18, %v6468_v0  ;;  %v6319_v36 = vld [vmem:[#allocation2 + $0x139] sm:$0xff]  ;;  %v6320_v19 = vld [vmem:[#allocation2 + $0x141] sm:$0xff] }
 0x8ac   : > { %v6270_v5 = vld [vmem:[#allocation2 + $0x140] sm:$0xff]  ;;  %v6369_v29 = vmax.f32 %v6269_v41, %v6319_v36 }
 0x8ad   : > { %v6567_v13 = vmax.f32 %v6367_v51, %v6517_v16  ;;  %v6568_v63 = vmax.f32 %v6368_v2, %v6518_v14  ;;  %7305 = vrot.lane.b32.xlu0 %v7165_v35, %s13687_s24  ;;  %v6370_v50 = vmax.f32 %v6270_v5, %v6320_v19 }
 0x8ae   : > { %7378 = vrot.lane.b32.xlu1 %v7165_v35, %s13626_s30 }
 0x8af   : > { %6617 = vst.msk [vmem:[#allocation3 + $0x128] sm:$0xff] %vm434_vm0, %v6567_v13  ;;  %6618 = vst.msk [vmem:[#allocation3 + $0x130] sm:$0xff] %vm434_vm0, %v6568_v63 }
 0x8b1   : > { %7227 = vrot.lane.b32.xlu0 %v7166_v20, %s13688_s13 }
 0x8b2   : > { %7307 = vrot.lane.b32.xlu1 %v7166_v20, %s13687_s24 }
 0x8b5   : > { %7330 = vrot.lane.b32.xlu0 %v12976_v39, %s13635_s29 }
 0x8b6   : > { %7309 = vrot.lane.b32.xlu1 %v12991_v28, %s13687_s24 }
 0x8b9   : > { %v8374_v47 = vpop.f32.mrf.mxu1  ;;  %7259 = vrot.lane.b32.xlu0 %v7167_v7, %s13689_s14 }
 0x8ba   : > { %v6047_v10 = vadd.f32 %v12964_v56, %v8374_v47  ;;  %7334 = vrot.lane.b32.xlu1 %v7170_v49, %s13635_s29 }
 0x8bb   : > { %v6041_v3 = vpop.f32.mrf.mxu1 }
 0x8bc   : > { %v6123_v37 = vmax.f32 %v6047_v10, 0.0  ;;  %v6042_v60 = vadd.f32 %v12964_v56, %v6041_v3 }
 0x8bd   : > { %7355 = vrot.lane.b32.xlu0 %v7158_v33, %s13625_s12 }
 0x8be   : > { %v6173_v8 = vmin.f32 %v6123_v37, 6.0  ;;  %v6122_v59 = vmax.f32 %v6042_v60, 0.0 }
 0x8bf   : > { %v13003_v55 = vpop.permute.xlu0 %7183 }
 0x8c0   : > { %6223 = vst.msk [vmem:[#allocation2 + $0x158] sm:$0xff] %vm434_vm0, %v6173_v8  ;;  %v6172_v43 = vmin.f32 %v6122_v59, 6.0  ;;  %v7271_v58 = vpop.permute.xlu1 %7270 }
 0x8c1   : > { %7284 = vrot.lane.b32.xlu0 %v7168_v6, %s13686_s15 }
 0x8c2   : > { %6222 = vst.msk [vmem:[#allocation2 + $0x150] sm:$0xff] %vm434_vm0, %v6172_v43 }
 0x8c3   : > { %v4832_v24 = vpop.permute.xlu0 %4831 }
 0x8c4   : > { %v13007_v27 = vpop.permute.xlu1 %7185  ;;  %v5492_v32 = vsel %vm2576_vm6, %v5442_v46, %v4832_v24  ;;  %v6271_v24 = vld [vmem:[#allocation2 + $0x148] sm:$0xff] }
 0x8c5   : > { %7380 = vrot.lane.b32.xlu0 %v7166_v20, %s13626_s30  ;;  %v7418_v20 = vsel %vm2474_vm4, %v12869_v45, %v7271_v58 }
 0x8c7   : > { %v13010_v12 = vpop.permute.xlu0 %7215 }
 0x8c8   : > { %v7296_v48 = vpop.permute.xlu1 %7295 }
 0x8c9   : > { %v6419_v23 = vld [vmem:[#allocation2 + $0x14c] sm:$0xff]  ;;  %v6420_v54 = vld [vmem:[#allocation2 + $0x154] sm:$0xff]  ;;  %7332 = vrot.lane.b32.xlu0 %v7167_v7, %s13635_s29  ;;  %v7426_v47 = vsel %vm2525_vm5, %v7418_v20, %v7296_v48  ;;  %v7396_v20 = vsel %vm434_vm0, %v12899_v42, %v13007_v27 }
 0x8ca   : > { %v6469_v1 = vld [vmem:[#allocation2 + $0x14d] sm:$0xff]  ;;  %v6470_v34 = vld [vmem:[#allocation2 + $0x155] sm:$0xff] }
 0x8cb   : > { %v6519_v31 = vmax.f32 %v6419_v23, %v6469_v1  ;;  %v6520_v35 = vmax.f32 %v6420_v54, %v6470_v34  ;;  %v4987_v26 = vpop.permute.xlu0 %4986  ;;  %v6321_v43 = vld [vmem:[#allocation2 + $0x149] sm:$0xff]  ;;  %v6322_v41 = vld [vmem:[#allocation2 + $0x151] sm:$0xff] }
 0x8cc   : > { %v13013_v4 = vpop.permute.xlu1 %7217  ;;  %v5542_v25 = vsel %vm2627_vm7, %v5492_v32, %v4987_v26  ;;  %v6272_v36 = vld [vmem:[#allocation2 + $0x150] sm:$0xff]  ;;  %v6371_v23 = vmax.f32 %v6271_v24, %v6321_v43 }
 0x8cd   : > { %v6569_v38 = vmax.f32 %v6369_v29, %v6519_v31  ;;  %v6570_v52 = vmax.f32 %v6370_v50, %v6520_v35  ;;  %7357 = vrot.lane.b32.xlu0 %v7168_v6, %s13625_s12  ;;  %v6372_v29 = vmax.f32 %v6272_v36, %v6322_v41 }
 0x8cf   : > { %6619 = vst.msk [vmem:[#allocation3 + $0x138] sm:$0xff] %vm434_vm0, %v6569_v38  ;;  %6620 = vst.msk [vmem:[#allocation3 + $0x140] sm:$0xff] %vm434_vm0, %v6570_v52  ;;  %v7248_v11 = vpop.permute.xlu0 %7247 }
 0x8d0   : > { %v7321_v30 = vpop.permute.xlu1 %7320 }
 0x8d1   : > { %7359 = vrot.lane.b32.xlu0 %v7171_v61, %s13625_s12  ;;  %v7434_v49 = vsel %vm2576_vm6, %v7426_v47, %v7321_v30  ;;  %v7395_v30 = vsel %vm434_vm0, %v12747_v40, %v13003_v55 }
 0x8d2   : > { %v7403_v61 = vsel %vm2372_vm2, %v7395_v30, %v13010_v12 }
 0x8d3   : > { %v5142_v33 = vpop.permute.xlu0 %5141  ;;  %v7411_v46 = vsel %vm2423_vm3, %v7403_v61, %v7248_v11 }
 0x8d4   : > { %v13023_v21 = vpop.permute.xlu1 %7249  ;;  %v5592_v18 = vsel %vm2678_vm8, %v5542_v25, %v5142_v33 }
 0x8d5   : > { %8382 = vmatmul.mubr.msk.f32.gmra.mxu1 %vm2748_vm9, %v5592_v18 }
 0x8d7   : > { %v7273_v53 = vpop.permute.xlu0 %7272 }
 0x8d8   : > { %v7346_v51 = vpop.permute.xlu1 %7345  ;;  %v7419_v33 = vsel %vm2474_vm4, %v7411_v46, %v7273_v53 }
 0x8d9   : > { %v8377_v0 = vpop.f32.mrf.mxu1  ;;  %v7442_v3 = vsel %vm2627_vm7, %v7434_v49, %v7346_v51 }
 0x8da   : > { %v6057_v16 = vadd.f32 %v12964_v56, %v8377_v0 }
 0x8db   : > { %v6051_v2 = vpop.f32.mrf.mxu1  ;;  %v7188_v13 = vpop.permute.xlu0 %7187 }
 0x8dc   : > { %v6125_v15 = vmax.f32 %v6057_v16, 0.0  ;;  %v6052_v14 = vadd.f32 %v12964_v56, %v6051_v2  ;;  %v13029_v63 = vpop.permute.xlu1 %7274  ;;  %v7397_v51 = vsel %vm434_vm0, %v12906_v22, %v7188_v13 }
 0x8de   : > { %v6175_v10 = vmin.f32 %v6125_v15, 6.0  ;;  %v6124_v7 = vmax.f32 %v6052_v14, 0.0 }
 0x8df   : > { %v7298_v60 = vpop.permute.xlu0 %7297 }
 0x8e0   : > { %6225 = vst.msk [vmem:[#allocation2 + $0x168] sm:$0xff] %vm434_vm0, %v6175_v10  ;;  %v6174_v37 = vmin.f32 %v6124_v7, 6.0  ;;  %v7371_v62 = vpop.permute.xlu1 %7370  ;;  %v7427_v18 = vsel %vm2525_vm5, %v7419_v33, %v7298_v60  ;;  %v7404_v10 = vsel %vm2372_vm2, %v7396_v20, %v13013_v4 }
 0x8e1   : > { %v7450_v8 = vsel %vm2678_vm8, %v7442_v3, %v7371_v62  ;;  %v7412_v49 = vsel %vm2423_vm3, %v7404_v10, %v13023_v21 }
 0x8e2   : > { %6224 = vst.msk [vmem:[#allocation2 + $0x160] sm:$0xff] %vm434_vm0, %v6174_v37  ;;  %8444 = vmatprep.mubr.msk.f32.mxu1 %vm2748_vm9, %v7450_v8  ;;  %v7420_v42 = vsel %vm2474_vm4, %v7412_v49, %v13029_v63 }
 0x8e3   : > { %v7220_v45 = vpop.permute.xlu0 %7219 }
 0x8e4   : > { %v7300_v59 = vpop.permute.xlu1 %7299  ;;  %v7405_v16 = vsel %vm2372_vm2, %v7397_v51, %v7220_v45 }
 0x8e5   : > { %v7428_v27 = vsel %vm2525_vm5, %v7420_v42, %v7300_v59 }
 0x8e7   : > { %v7323_v58 = vpop.permute.xlu0 %7322 }
 0x8e8   : > { %v7302_v6 = vpop.permute.xlu1 %7301  ;;  %v7435_v0 = vsel %vm2576_vm6, %v7427_v18, %v7323_v58 }
 0x8e9   : > { %v6421_v5 = vld [vmem:[#allocation2 + $0x15c] sm:$0xff]  ;;  %v6422_v19 = vld [vmem:[#allocation2 + $0x164] sm:$0xff] }
 0x8ea   : > { %v6471_v48 = vld [vmem:[#allocation2 + $0x15d] sm:$0xff]  ;;  %v6472_v54 = vld [vmem:[#allocation2 + $0x165] sm:$0xff] }
 0x8eb   : > { %v6521_v1 = vmax.f32 %v6421_v5, %v6471_v48  ;;  %v6522_v34 = vmax.f32 %v6422_v19, %v6472_v54  ;;  %v7252_v31 = vpop.permute.xlu0 %7251  ;;  %v6323_v19 = vld [vmem:[#allocation2 + $0x159] sm:$0xff] }
 0x8ec   : > { %v7327_v50 = vpop.permute.xlu1 %7326  ;;  %v7413_v12 = vsel %vm2423_vm3, %v7405_v16, %v7252_v31 }
 0x8ed   : > { %v6571_v35 = vmax.f32 %v6371_v23, %v6521_v1  ;;  %v6572_v38 = vmax.f32 %v6372_v29, %v6522_v34  ;;  %v6273_v1 = vld [vmem:[#allocation2 + $0x158] sm:$0xff]  ;;  %v6274_v29 = vld [vmem:[#allocation2 + $0x160] sm:$0xff] }
 0x8ee   : > { %v6324_v34 = vld [vmem:[#allocation2 + $0x161] sm:$0xff] }
 0x8ef   : > { %6621 = vst.msk [vmem:[#allocation3 + $0x148] sm:$0xff] %vm434_vm0, %v6571_v35  ;;  %6622 = vst.msk [vmem:[#allocation3 + $0x150] sm:$0xff] %vm434_vm0, %v6572_v38  ;;  %v7348_v26 = vpop.permute.xlu0 %7347  ;;  %v6374_v61 = vmax.f32 %v6274_v29, %v6324_v34  ;;  %v8674_v29 = vld [vmem:[#allocation2 + $0x19d] sm:$0xff] }
 0x8f0   : > { %v7352_v52 = vpop.permute.xlu1 %7351  ;;  %v7443_v40 = vsel %vm2627_vm7, %v7435_v0, %v7348_v26  ;;  %v6373_v26 = vmax.f32 %v6273_v1, %v6323_v19  ;;  %v8673_v1 = vld [vmem:[#allocation2 + $0x19c] sm:$0xff] }
 0x8f1   : > { %v6529_v34 = vmax.f32 %v8673_v1, %v8674_v29 }
 0x8f3   : > { %v7277_v32 = vpop.permute.xlu0 %7276 }
 0x8f4   : > { %v7377_v25 = vpop.permute.xlu1 %7376  ;;  %v7421_v53 = vsel %vm2474_vm4, %v7413_v12, %v7277_v32 }
 0x8f5   : > { %v7429_v22 = vsel %vm2525_vm5, %v7421_v53, %v7302_v6 }
 0x8f6   : > { %v7437_v3 = vsel %vm2576_vm6, %v7429_v22, %v7327_v50 }
 0x8f7   : > { %v7373_v55 = vpop.permute.xlu0 %7372  ;;  %v7445_v4 = vsel %vm2627_vm7, %v7437_v3, %v7352_v52 }
 0x8f8   : > { %v13055_v2 = vpop.permute.xlu1 %7191  ;;  %v7451_v11 = vsel %vm2678_vm8, %v7443_v40, %v7373_v55  ;;  %v7453_v5 = vsel %vm2678_vm8, %v7445_v4, %v7377_v25 }
 0x8f9   : > { %8445 = vmatmul.mubr.msk.f32.vlgmr.msra.gmra.mxu1 %vm2748_vm9, %v7451_v11 }
 0x8fb   : > { %v7325_v15 = vpop.permute.xlu0 %7324 }
 0x8fc   : > { %v13061_v14 = vpop.permute.xlu1 %7223  ;;  %v8380_v13 = vpop.f32.mrf.mxu1  ;;  %v7436_v58 = vsel %vm2576_vm6, %v7428_v27, %v7325_v15 }
 0x8fd   : > { %v6067_v47 = vadd.f32 %v12964_v56, %v8380_v13 }
 0x8fe   : > { %v6061_v7 = vpop.f32.mrf.mxu1 }
 0x8ff   : > { %v6127_v37 = vmax.f32 %v6067_v47, 0.0  ;;  %v6062_v60 = vadd.f32 %v12964_v56, %v6061_v7  ;;  %v7350_v62 = vpop.permute.xlu0 %7349 }
 0x900   : > { %v13074_v8 = vpop.permute.xlu1 %7255  ;;  %v7444_v6 = vsel %vm2627_vm7, %v7436_v58, %v7350_v62 }
 0x901   : > { %v6177_v45 = vmin.f32 %v6127_v37, 6.0  ;;  %v6126_v43 = vmax.f32 %v6062_v60, 0.0 }
 0x903   : > { %6227 = vst.msk [vmem:[#allocation2 + $0x178] sm:$0xff] %vm434_vm0, %v6177_v45  ;;  %v6176_v21 = vmin.f32 %v6126_v43, 6.0  ;;  %v7375_v24 = vpop.permute.xlu0 %7374  ;;  %v7399_v43 = vsel %vm434_vm0, %v12937_v17, %v13055_v2  ;;  %v7727_v2 = vld [vmem:[%s13302_s9 + $0x58] sm:$0x3] }
 0x904   : > { %v7194_v36 = vpop.permute.xlu1 %7193  ;;  %v7452_v41 = vsel %vm2678_vm8, %v7444_v6, %v7375_v24  ;;  %v7407_v4 = vsel %vm2372_vm2, %v7399_v43, %v13061_v14  ;;  %8457 = vmatpush3.msk.msra.mxu0 %vm2899_vm1, %v7727_v2 }
 0x905   : > { %6226 = vst.msk [vmem:[#allocation2 + $0x170] sm:$0xff] %vm434_vm0, %v6176_v21  ;;  %8447 = vmatprep.mubr.msk.f32.mxu1 %vm2748_vm9, %v7452_v41  ;;  %v7400_v48 = vsel %vm434_vm0, %v12952_v57, %v7194_v36  ;;  %v7415_v58 = vsel %vm2423_vm3, %v7407_v4, %v13074_v8  ;;  %8458 = vmatprep.subr.mxu0 %v13684_v44 }
 0x906   : > { %8448 = vmatmul.mubr.msk.f32.gmra.mxu1 %vm2748_vm9, %v7453_v5 }
 0x907   : > { %v7190_v63 = vpop.permute.xlu0 %7189 }
 0x908   : > { %v7304_v59 = vpop.permute.xlu1 %7303  ;;  %v7398_v57 = vsel %vm434_vm0, %v12935_v9, %v7190_v63 }
 0x90b   : > { %v7222_v23 = vpop.permute.xlu0 %7221 }
 0x90c   : > { %v7226_v54 = vpop.permute.xlu1 %7225  ;;  %v6423_v50 = vld [vmem:[#allocation2 + $0x16c] sm:$0xff]  ;;  %v6424_v35 = vld [vmem:[#allocation2 + $0x174] sm:$0xff]  ;;  %v7406_v16 = vsel %vm2372_vm2, %v7398_v57, %v7222_v23 }
 0x90d   : > { %v7408_v31 = vsel %vm2372_vm2, %v7400_v48, %v7226_v54  ;;  %v6473_v38 = vld [vmem:[#allocation2 + $0x16d] sm:$0xff]  ;;  %v6474_v52 = vld [vmem:[#allocation2 + $0x175] sm:$0xff] }
 0x90e   : > { %v6523_v30 = vmax.f32 %v6423_v50, %v6473_v38  ;;  %v6524_v46 = vmax.f32 %v6424_v35, %v6474_v52  ;;  %v6276_v50 = vld [vmem:[#allocation2 + $0x170] sm:$0xff] }
 0x90f   : > { %v7254_v32 = vpop.permute.xlu0 %7253  ;;  %v8675_v52 = vld [vmem:[#allocation2 + $0x194] sm:$0xff] }
 0x910   : > { %v7329_v25 = vpop.permute.xlu1 %7328  ;;  %v6573_v33 = vmax.f32 %v6373_v26, %v6523_v30  ;;  %v6574_v18 = vmax.f32 %v6374_v61, %v6524_v46  ;;  %v7414_v55 = vsel %vm2423_vm3, %v7406_v16, %v7254_v32  ;;  %v8676_v30 = vld [vmem:[#allocation2 + $0x195] sm:$0xff]  ;;  %v6275_v46 = vld [vmem:[#allocation2 + $0x168] sm:$0xff] }
 0x911   : > { %v6528_v61 = vmax.f32 %v8675_v52, %v8676_v30  ;;  %v6326_v32 = vld [vmem:[#allocation2 + $0x171] sm:$0xff] }
 0x912   : > { %6623 = vst.msk [vmem:[#allocation3 + $0x158] sm:$0xff] %vm434_vm0, %v6573_v33  ;;  %6624 = vst.msk [vmem:[#allocation3 + $0x160] sm:$0xff] %vm434_vm0, %v6574_v18 }
 0x913   : > { %v7279_v51 = vpop.permute.xlu0 %7278 }
 0x914   : > { %v7258_v0 = vpop.permute.xlu1 %7257  ;;  %v7422_v12 = vsel %vm2474_vm4, %v7414_v55, %v7279_v51 }
 0x915   : > { %v7416_v40 = vsel %vm2423_vm3, %v7408_v31, %v7258_v0  ;;  %v7430_v15 = vsel %vm2525_vm5, %v7422_v12, %v7304_v59  ;;  %v6277_v31 = vld [vmem:[#allocation2 + $0x178] sm:$0xff] }
 0x916   : > { %v7438_v20 = vsel %vm2576_vm6, %v7430_v15, %v7329_v25 }
 0x917   : > { %v7281_v11 = vpop.permute.xlu0 %7280 }
 0x918   : > { %v7354_v53 = vpop.permute.xlu1 %7353 }
 0x919   : > { %v7446_v47 = vsel %vm2627_vm7, %v7438_v20, %v7354_v53  ;;  %v6376_v20 = vmax.f32 %v6276_v50, %v6326_v32 }
 0x91b   : > { %v7196_v22 = vpop.permute.xlu0 %7195 }
 0x91c   : > { %v7283_v13 = vpop.permute.xlu1 %7282  ;;  %v7401_v3 = vsel %vm434_vm0, %v12976_v39, %v7196_v22  ;;  %v7423_v39 = vsel %vm2474_vm4, %v7415_v58, %v7281_v11 }
 0x91d   : > { %v13102_v9 = vsel %vm2474_vm4, %v7416_v40, %v7283_v13 }
 0x91f   : > { %v7306_v10 = vpop.permute.xlu0 %7305 }
 0x920   : > { %v7379_v7 = vpop.permute.xlu1 %7378  ;;  %v7431_v24 = vsel %vm2525_vm5, %v7423_v39, %v7306_v10  ;;  %v7725_v39 = vld [vmem:[%s13302_s9 + $0x48] sm:$0xff] }
 0x921   : > { %v7454_v49 = vsel %vm2678_vm8, %v7446_v47, %v7379_v7 }
 0x922   : > { %8450 = vmatprep.mubr.msk.f32.mxu1 %vm2748_vm9, %v7454_v49 }
 0x923   : > { %v7228_v37 = vpop.permute.xlu0 %7227 }
 0x924   : > { %v7409_v60 = vsel %vm2372_vm2, %v7401_v3, %v7228_v37  ;;  %v13144_v37 = vld [vmem:[%s13301_s8] ss:$0 sm:$0xff] }
 0x927   : > { %v7331_v62 = vpop.permute.xlu0 %7330 }
 0x928   : > { %v7439_v36 = vsel %vm2576_vm6, %v7431_v24, %v7331_v62 }
 0x92b   : > { %v7260_v42 = vpop.permute.xlu0 %7259 }
 0x92c   : > { %v7417_v27 = vsel %vm2423_vm3, %v7409_v60, %v7260_v42 }
 0x92f   : > { %v7356_v45 = vpop.permute.xlu0 %7355 }
 0x930   : > { %v7447_v41 = vsel %vm2627_vm7, %v7439_v36, %v7356_v45 }
 0x933   : > { %v7285_v21 = vpop.permute.xlu0 %7284 }
 0x934   : > { %v13120_v6 = vsel %vm2474_vm4, %v7417_v27, %v7285_v21  ;;  %v7726_v21 = vld [vmem:[%s13302_s9 + $0x50] sm:$0xff] }
 0x935   : > { %8459 = vmatpush3.msra.mxu0 %v7726_v21 }
 0x936   : > { %8460 = vmatprep.subr.mxu0 %v13684_v44 }
 0x937   : > { %v7381_v5 = vpop.permute.xlu0 %7380  ;;  %8461 = vmatpush3.msra.mxu0 %v7725_v39 }
 0x938   : > { %v7455_v17 = vsel %vm2678_vm8, %v7447_v41, %v7381_v5  ;;  %8462 = vmatprep.subr.mxu0 %v13684_v44  ;;  %v7724_v5 = vld [vmem:[%s13302_s9 + $0x40] sm:$0xff] }
 0x939   : > { %8451 = vmatmul.mubr.msk.f32.gmra.mxu1 %vm2748_vm9, %v7455_v17  ;;  %8463 = vmatpush3.msra.mxu0 %v7724_v5 }
 0x93a   : > { %8464 = vmatprep.subr.mxu0 %v13684_v44 }
 0x995   : > { %v8383_v14 = vpop.f32.mrf.mxu1 }
 0x996   : > { %v6077_v8 = vadd.f32 %v12964_v56, %v8383_v14 }
 0x997   : > { %v6071_v63 = vpop.f32.mrf.mxu1 }
 0x998   : > { %v6129_v59 = vmax.f32 %v6077_v8, 0.0  ;;  %v6072_v19 = vadd.f32 %v12964_v56, %v6071_v63  ;;  %v6325_v56 = vld [vmem:[#allocation2 + $0x169] sm:$0xff]  ;;  %v7723_v63 = vld [vmem:[%s13302_s9 + $0x38] sm:$0xff] }
 0x999   : > { %v6375_v15 = vmax.f32 %v6275_v46, %v6325_v56  ;;  %8465 = vmatpush3.msra.mxu0 %v7723_v63  ;;  %v7721_v46 = vld [vmem:[%s13302_s9 + $0x28] sm:$0xff]  ;;  %v7308_v63 = vpop.permute.xlu1 %7307 }
 0x99a   : > { %v6179_v48 = vmin.f32 %v6129_v59, 6.0  ;;  %v6128_v23 = vmax.f32 %v6072_v19, 0.0  ;;  %8466 = vmatprep.subr.mxu0 %v13684_v44 }
 0x99c   : > { %6229 = vst.msk [vmem:[#allocation2 + $0x188] sm:$0xff] %vm434_vm0, %v6179_v48  ;;  %v6178_v54 = vmin.f32 %v6128_v23, 6.0 }
 0x99e   : > { %6228 = vst.msk [vmem:[#allocation2 + $0x180] sm:$0xff] %vm434_vm0, %v6178_v54 }
 0x9a3   : > { %v6279_v35 = vld [vmem:[#allocation2 + $0x188] sm:$0xff] }
 0x9a4   : > { %v6329_v38 = vld [vmem:[#allocation2 + $0x189] sm:$0xff] }
 0x9a5   : > { %v6427_v26 = vld [vmem:[#allocation2 + $0x18c] sm:$0xff]  ;;  %v6379_v25 = vmax.f32 %v6279_v35, %v6329_v38  ;;  %v6278_v18 = vld [vmem:[#allocation2 + $0x180] sm:$0xff] }
 0x9a6   : > { %v6477_v33 = vld [vmem:[#allocation2 + $0x18d] sm:$0xff]  ;;  %v6327_v57 = vld [vmem:[#allocation2 + $0x179] sm:$0xff]  ;;  %v6328_v51 = vld [vmem:[#allocation2 + $0x181] sm:$0xff] }
 0x9a7   : > { %v6527_v0 = vmax.f32 %v6427_v26, %v6477_v33  ;;  %v6579_v16 = vmax.f32 %v6379_v25, %v6529_v34  ;;  %v6377_v40 = vmax.f32 %v6277_v31, %v6327_v57  ;;  %v6378_v55 = vmax.f32 %v6278_v18, %v6328_v51  ;;  %v6425_v12 = vld [vmem:[#allocation2 + $0x17c] sm:$0xff]  ;;  %v6426_v11 = vld [vmem:[#allocation2 + $0x184] sm:$0xff]  ;;  %v7722_v38 = vld [vmem:[%s13302_s9 + $0x30] sm:$0xff] }
 0x9a8   : > { %v6475_v53 = vld [vmem:[#allocation2 + $0x17d] sm:$0xff]  ;;  %v6476_v22 = vld [vmem:[#allocation2 + $0x185] sm:$0xff]  ;;  %8467 = vmatpush3.msra.mxu0 %v7722_v38 }
 0x9a9   : > { %v6525_v13 = vmax.f32 %v6425_v12, %v6475_v53  ;;  %6629 = vst.msk [vmem:[#allocation3 + $0x188] sm:$0xff] %vm434_vm0, %v6579_v16  ;;  %v6526_v47 = vmax.f32 %v6426_v11, %v6476_v22  ;;  %v6577_v10 = vmax.f32 %v6377_v40, %v6527_v0  ;;  %v6578_v7 = vmax.f32 %v6378_v55, %v6528_v61  ;;  %v7720_v33 = vld [vmem:[%s13302_s9 + $0x20] sm:$0xff]  ;;  %v7719_v18 = vld [vmem:[%s13302_s9 + $0x18] sm:$0xff]  ;;  %v7718_v0 = vld [vmem:[%s13302_s9 + $0x10] sm:$0xff] }
 0x9aa   : > { %8468 = vmatprep.subr.mxu0 %v13684_v44  ;;  %v7717_v16 = vld [vmem:[%s13302_s9 + $0x8] sm:$0xff] }
 0x9ab   : > { %v6575_v49 = vmax.f32 %v6375_v15, %v6525_v13  ;;  %v6576_v3 = vmax.f32 %v6376_v20, %v6526_v47  ;;  %6627 = vst.msk [vmem:[#allocation3 + $0x178] sm:$0xff] %vm434_vm0, %v6577_v10  ;;  %6628 = vst.msk [vmem:[#allocation3 + $0x180] sm:$0xff] %vm434_vm0, %v6578_v7  ;;  %8469 = vmatpush3.msra.mxu0 %v7721_v46  ;;  %v7172_v22 = vld [vmem:[#allocation3 + $0x4a] sm:$0xff]  ;;  %v7716_v20 = vld [vmem:[%s13302_s9] sm:$0xff] }
 0x9ac   : > { %8470 = vmatprep.subr.mxu0 %v13684_v44 }
 0x9ad   : > { %6625 = vst.msk [vmem:[#allocation3 + $0x168] sm:$0xff] %vm434_vm0, %v6575_v49  ;;  %6626 = vst.msk [vmem:[#allocation3 + $0x170] sm:$0xff] %vm434_vm0, %v6576_v3  ;;  %8471 = vmatpush3.msra.mxu0 %v7720_v33 }
 0x9ae   : > { %8472 = vmatprep.subr.mxu0 %v13684_v44 }
 0x9af   : > { %8473 = vmatpush3.msra.mxu0 %v7719_v18 }
 0x9b0   : > { %8474 = vmatprep.subr.mxu0 %v13684_v44 }
 0x9b1   : > { %8475 = vmatpush3.msra.mxu0 %v7718_v0 }
 0x9b2   : > { %8476 = vmatprep.subr.mxu0 %v13684_v44 }
 0x9b3   : > { %8477 = vmatpush3.msra.mxu0 %v7717_v16 }
 0x9b4   : > { %8478 = vmatprep.subr.mxu0 %v13684_v44 }
 0x9b5   : > { %8479 = vmatpush3.msra.mxu0 %v7716_v20 }
 0x9b9   : > { %v8446_v60 = vpop.f32.mrf.mxu1 }
 0x9ba   : > { %v7576_v62 = vadd.f32 %v8446_v60, %v13144_v37 }
 0x9bb   : > { %v7570_v42 = vpop.f32.mrf.mxu1 }
 0x9bc   : > { %v7610_v27 = vmax.f32 %v7576_v62, 0.0  ;;  %v7571_v45 = vadd.f32 %v13144_v37, %v7570_v42 }
 0x9be   : > { %v7618_v43 = vmin.f32 %v7610_v27, 6.0  ;;  %v7609_v4 = vmax.f32 %v7571_v45, 0.0 }
 0x9c0   : > { %7626 = vst.msk [vmem:[#allocation2 + $0x8] sm:$0xff] %vm434_vm0, %v7618_v43  ;;  %v7617_v58 = vmin.f32 %v7609_v4, 6.0 }
 0x9c2   : > { %7625 = vst.msk [vmem:[#allocation2] sm:$0xff] %vm434_vm0, %v7617_v58 }
 0x9c6   : > { %v8449_v24 = vpop.f32.mrf.mxu1 }
 0x9c7   : > { %v7586_v36 = vadd.f32 %v8449_v24, %v13144_v37  ;;  %v7643_v1 = vld [vmem:[#allocation2 + $0xa] sm:$0x1]  ;;  %v13167_v50 = vld [vmem:[#allocation2 + $0x9] sm:$0x1]  ;;  %v7636_v35 = vld [vmem:[#allocation2 + $0x8] sm:$0x1] }
 0x9c8   : > { %v7580_v41 = vpop.f32.mrf.mxu1  ;;  %v7648_v52 = vld [vmem:[#allocation2 + $0xb] sm:$0x1]  ;;  %v7650_v57 = vmax.f32 %v7636_v35, %v13167_v50  ;;  %v7655_v51 = vmax.f32 %v13167_v50, %v7643_v1 }
 0x9c9   : > { %v7612_v17 = vmax.f32 %v7586_v36, 0.0  ;;  %v7581_v2 = vadd.f32 %v13144_v37, %v7580_v41  ;;  %v7640_v14 = vld [vmem:[#allocation2 + $0x2] sm:$0x1]  ;;  %v7645_v8 = vld [vmem:[#allocation2 + $0x3] sm:$0x1]  ;;  %v7659_v11 = vmax.f32 %v7643_v1, %v7648_v52 }
 0x9ca   : > { %v7646_v59 = vmax.f32 %v7640_v14, %v7645_v8  ;;  %v7634_v19 = vld [vmem:[#allocation2 + $0x1] sm:$0x1]  ;;  %v7633_v48 = vld [vmem:[#allocation2] sm:$0x1] }
 0x9cb   : > { %v7620_v23 = vmin.f32 %v7612_v17, 6.0  ;;  %v7611_v54 = vmax.f32 %v7581_v2, 0.0  ;;  %v7641_v29 = vmax.f32 %v7634_v19, %v7640_v14  ;;  %v7635_v34 = vmax.f32 %v7633_v48, %v7634_v19  ;;  %v7333_v19 = vpop.permute.xlu0 %7332 }
 0x9cc   : > { %v7647_v31 = vmax.f32 %v7646_v59, %v7643_v1  ;;  %v7310_v59 = vpop.permute.xlu1 %7309 }
 0x9cd   : > { %7628 = vst.msk [vmem:[#allocation2 + $0x18] sm:$0xff] %vm434_vm0, %v7620_v23  ;;  %v7619_v26 = vmin.f32 %v7611_v54, 6.0  ;;  %v7642_v30 = vmax.f32 %v7641_v29, %v13167_v50  ;;  %v13175_v61 = vmax.f32 %v7635_v34, %v7636_v35 }
 0x9ce   : > { %v7649_v56 = vmax.f32 %v7647_v31, %v7648_v52  ;;  %v7433_v31 = vsel %vm2525_vm5, %v13120_v6, %v7310_v59 }
 0x9cf   : > { %7627 = vst.msk [vmem:[#allocation2 + $0x10] sm:$0xff] %vm434_vm0, %v7619_v26  ;;  %v7644_v32 = vmax.f32 %v7642_v30, %v7643_v1  ;;  %v7639_v25 = vmax.f32 %v13175_v61, %v13167_v50  ;;  %v7358_v23 = vpop.permute.xlu0 %7357  ;;  %v7432_v1 = vsel %vm2525_vm5, %v13102_v9, %v7308_v63 }
 0x9d0   : > { %7681 = vrot.lane.b32.xlu0 %v7649_v56, %s13688_s13  ;;  %v7335_v48 = vpop.permute.xlu1 %7334  ;;  %v7440_v34 = vsel %vm2576_vm6, %v7432_v1, %v7333_v19 }
 0x9d1   : > { %7677 = vrot.lane.b32.xlu1 %v7644_v32, %s13685_s0  ;;  %v7448_v35 = vsel %vm2627_vm7, %v7440_v34, %v7358_v23  ;;  %v7441_v30 = vsel %vm2576_vm6, %v7433_v31, %v7335_v48 }
 0x9d3   : > { %v7360_v29 = vpop.permute.xlu0 %7359 }
 0x9d4   : > { %v7664_v3 = vld [vmem:[#allocation2 + $0x18] sm:$0x1]  ;;  %v7666_v42 = vld [vmem:[#allocation2 + $0x19] sm:$0x1]  ;;  %v7670_v43 = vld [vmem:[#allocation2 + $0x1a] sm:$0x1]  ;;  %v7449_v46 = vsel %vm2627_vm7, %v7441_v30, %v7360_v29 }
 0x9d5   : > { %7382 = vrot.lane.b32.xlu1 %v12991_v28, %s13626_s30  ;;  %v7674_v39 = vld [vmem:[#allocation2 + $0x1b] sm:$0x1] }
 0x9d6   : > { %v7651_v40 = vld [vmem:[#allocation2 + $0x10] sm:$0x1]  ;;  %v7653_v55 = vld [vmem:[#allocation2 + $0x11] sm:$0x1]  ;;  %v7657_v12 = vld [vmem:[#allocation2 + $0x12] sm:$0x1] }
 0x9d7   : > { %v7652_v53 = vmax.f32 %v7650_v57, %v7651_v40  ;;  %v7656_v15 = vmax.f32 %v7655_v51, %v7653_v55  ;;  %v7663_v28 = vmax.f32 %v7651_v40, %v7653_v55  ;;  %v7661_v13 = vld [vmem:[#allocation2 + $0x13] sm:$0x1]  ;;  %v7660_v7 = vmax.f32 %v7659_v11, %v7657_v12 }
 0x9d8   : > { %v7668_v49 = vmax.f32 %v7653_v55, %v7657_v12  ;;  %v7672_v60 = vmax.f32 %v7657_v12, %v7661_v13 }
 0x9d9   : > { %7384 = vrot.lane.b32.xlu1 %v7172_v22, %s13626_s30  ;;  %v7654_v47 = vmax.f32 %v7652_v53, %v7653_v55  ;;  %v7658_v10 = vmax.f32 %v7656_v15, %v7657_v12  ;;  %v7665_v62 = vmax.f32 %v7663_v28, %v7664_v3  ;;  %v7662_v27 = vmax.f32 %v7660_v7, %v7661_v13 }
 0x9da   : > { %v7669_v45 = vmax.f32 %v7668_v49, %v7666_v42  ;;  %v7673_v58 = vmax.f32 %v7672_v60, %v7670_v43 }
 0x9db   : > { %7685 = vrot.lane.b32.xlu0 %v7654_v47, %s13689_s14  ;;  %v7667_v4 = vmax.f32 %v7665_v62, %v7666_v42 }
 0x9dc   : > { %v7671_v21 = vmax.f32 %v7669_v45, %v7670_v43  ;;  %v7675_v44 = vmax.f32 %v7673_v58, %v7674_v39 }
 0x9dd   : > { %7689 = vrot.lane.b32.xlu1 %v7658_v10, %s13686_s15  ;;  %v7728_v10 = vld [vmem:[%s13303_s10] sm:$0x1]  ;;  %s8006_s15 = sshll.u32 %s8831_s21, 4  ;;  %s8749_s21 = smov [#allocation4]  }
 0x9de   : > { %s13258_s13 = scalar_lea.hbm %s13304_s11, %s8006_s15  ;;  %s8681_s16 = sshll.u32 %s8749_s21, 4  ;;  %s8682_s16 = int_to_ptr.vmem [resolvable:$false] %s8681_s16 }
 0x9df   : > { %7693 = vrot.lane.b32.xlu0 %v7662_v27, %s13687_s24  ;;  %s8683_s0 = scalar_lea.vmem %s8682_s16, 32 }
 0x9e1   : > { %7697 = vrot.lane.b32.xlu1 %v7667_v4, %s13635_s29 }
 0x9e3   : > { %7701 = vrot.lane.b32.xlu0 %v7671_v21, %s13625_s12  ;;  %s377_s12 = sand.u32 1, %s8729_s18  }
 0x9e4   : > { %s378_s24 = scalar_lea.vmem [#allocation4], %s377_s12  ;;  %s7808_s3 = scalar_lea.sflag [#allocation5], %s377_s12 }
 0x9e5   : > { %7705 = vrot.lane.b32.xlu1 %v7675_v44, %s13626_s30  ;;  %s7820_s14 = sshll.u32 %s378_s24, 4  ;;  %s7821_s14 = int_to_ptr.vmem [resolvable:$true] %s7820_s14 }
 0x9e6   : > { %s8677_s25 = scalar_lea.vmem %s7821_s14, 16  ;;  %p8684_p0 = scmp.lt.s32.totalorder %s7821_s14, %s8682_s16 }
 0x9e7   : > { %p8678_p11 = scmp.ne.s32.totalorder %s7821_s14, %s8677_s25  ;;  %p8685_p1 = scmp.lt.s32.totalorder %s8683_s0, %s8677_s25 }
 0x9e9   : > { %p8679_p12 = pnand %p8678_p11, %p8848_p5  ;;  %p8686_p2 = por %p8685_p1, %p8684_p0 }
 0x9eb   : > { %p8680_p13 = pneg %p8679_p12 }
 0x9ed   : > { %p8687_p3 = pnand %p8686_p2, %p8680_p13 }
 0x9f9   : > { %v8452_v24 = vpop.f32.mrf.mxu1 }
 0x9fa   : > { %v7596_v36 = vadd.f32 %v8452_v24, %v13144_v37 }
 0x9fb   : > { %v7590_v41 = vpop.f32.mrf.mxu1 }
 0x9fc   : > { %v7614_v5 = vmax.f32 %v7596_v36, 0.0  ;;  %v7591_v17 = vadd.f32 %v13144_v37, %v7590_v41 }
 0x9fe   : > { %v7622_v2 = vmin.f32 %v7614_v5, 6.0  ;;  %v7613_v14 = vmax.f32 %v7591_v17, 0.0 }
 0xa00   : > { %7630 = vst.msk [vmem:[#allocation2 + $0x28] sm:$0xff] %vm434_vm0, %v7622_v2  ;;  %v7621_v8 = vmin.f32 %v7613_v14, 6.0 }
 0xa02   : > { %7629 = vst.msk [vmem:[#allocation2 + $0x20] sm:$0xff] %vm434_vm0, %v7621_v8 }
 0xa42   : > { %v7682_v52 = vpop.permute.xlu0 %7681 }
 0xa43   : > { %v7678_v54 = vpop.permute.xlu1 %7677 }
 0xa44   : > { %v7708_v9 = vsel %vm434_vm0, %v7639_v25, %v7678_v54 }
 0xa45   : > { %v7709_v33 = vsel %vm2372_vm2, %v7708_v9, %v7682_v52 }
 0xa47   : > { %v7383_v38 = vpop.permute.xlu1 %7382 }
 0xa48   : > { %v7456_v26 = vsel %vm2678_vm8, %v7448_v35, %v7383_v38 }
 0xa49   : > { %8453 = vmatprep.mubr.msk.f32.mxu1 %vm2748_vm9, %v7456_v26 }
 0xa4b   : > { %v7385_v56 = vpop.permute.xlu1 %7384 }
 0xa4c   : > { %v7457_v6 = vsel %vm2678_vm8, %v7449_v46, %v7385_v56 }
 0xa4d   : > { %8454 = vmatmul.mubr.msk.f32.gmra.mxu1 %vm2748_vm9, %v7457_v6  ;;  %v7686_v32 = vpop.permute.xlu0 %7685 }
 0xa4e   : > { %v7710_v18 = vsel %vm2423_vm3, %v7709_v33, %v7686_v32 }
 0xa4f   : > { %v7690_v57 = vpop.permute.xlu1 %7689 }
 0xa50   : > { %v7711_v51 = vsel %vm2474_vm4, %v7710_v18, %v7690_v57 }
 0xa51   : > { %v7694_v0 = vpop.permute.xlu0 %7693 }
 0xa52   : > { %v7712_v50 = vsel %vm2525_vm5, %v7711_v51, %v7694_v0 }
 0xa53   : > { %v7698_v61 = vpop.permute.xlu1 %7697 }
 0xa54   : > { %v7713_v25 = vsel %vm2576_vm6, %v7712_v50, %v7698_v61 }
 0xa55   : > { %v7702_v16 = vpop.permute.xlu0 %7701 }
 0xa56   : > { %v7714_v40 = vsel %vm2627_vm7, %v7713_v25, %v7702_v16 }
 0xa57   : > { %v7706_v55 = vpop.permute.xlu1 %7705 }
 0xa58   : > { %v7715_v12 = vsel %vm2678_vm8, %v7714_v40, %v7706_v55 }
 0xa59   : > { %8481 = vmatmul.mubr.msk.f32.vlgmr.msra.gmra.mxu0 %vm2748_vm9, %v7715_v12 }
 0xb0d   : > { %v8455_v11 = vpop.f32.mrf.mxu1 }
 0xb0e   : > { %v7606_v53 = vadd.f32 %v8455_v11, %v13144_v37 }
 0xb0f   : > { %v7600_v15 = vpop.f32.mrf.mxu1 }
 0xb10   : > { %v7616_v28 = vmax.f32 %v7606_v53, 0.0  ;;  %v7601_v22 = vadd.f32 %v13144_v37, %v7600_v15 }
 0xb12   : > { %v7624_v13 = vmin.f32 %v7616_v28, 6.0  ;;  %v7615_v20 = vmax.f32 %v7601_v22, 0.0 }
 0xb14   : > { %7632 = vst.msk [vmem:[#allocation2 + $0x38] sm:$0xff] %vm434_vm0, %v7624_v13  ;;  %v7623_v47 = vmin.f32 %v7615_v20, 6.0 }
 0xb16   : > { %7631 = vst.msk [vmem:[#allocation2 + $0x30] sm:$0xff] %vm434_vm0, %v7623_v47 }
 0xb19   : > { %v7801_v7 = vpop.f32.mrf.mxu0 }
 0xb1a   : > { %v7802_v49 = vadd.f32 %v7801_v7, %v7728_v10 }
 0xb1b   : > { %v8482_v37 = vpop.f32.mrf.mxu0 }
 0xb1c   : > { %7806 = vst.msk [vmem:[%s378_s24] sm:$0x1] %vm7805_vm11, %v7802_v49 }
 0xb1d   : > { %8690 = shalt.err (!%p8687_p3)
}
 0xb1e   : > { %s8691_s22 = scalar_lea.hbm %s13258_s13, 16  ;;  %s8695_s29 = scalar_lea.hbm %s13304_s11, 32 }
 0xb1f   : > { %p8692_p4 = scmp.ne.s32.totalorder %s13258_s13, %s8691_s22  ;;  %p8696_p9 = scmp.lt.s32.totalorder %s13258_s13, %s13304_s11 }
 0xb20   : > { %p8697_p10 = scmp.lt.s32.totalorder %s8695_s29, %s8691_s22 }
 0xb21   : > { %p8693_p7 = pnand %p8692_p4, %p8848_p5 }
 0xb22   : > { %p8698_p11 = por %p8697_p10, %p8696_p9 }
 0xb23   : > { %p8694_p8 = pneg %p8693_p7 }
 0xb25   : > { %p8699_p12 = pnand %p8698_p11, %p8694_p8 }
 0xb27   : > { %8702 = shalt.err (!%p8699_p12)
}
 0xb28   : > { %8484 = dma.vmem_to_hbm [thread:$0]  (%p8848_p5), %s7821_s14, 16, %s13258_s13, %s7808_s3  }
 0xb29 PF: > { %p8490_p13 = scmp.ge.s32.totalorder %s8737_s20, 2  ;;  %s7832_s1 = sand.u32 1, %s8725_s17  }
 0xb2a   : > { %s7833_s2 = scalar_lea.sflag [#allocation5], %s7832_s1 }
 0xb2b   : > { %p8487_p0 = pnand %p8490_p13, %p8852_p6 }
 0xb2d   : > { %p8488_p1 = pneg %p8487_p0 }
 0xb2f   : > { %8720 = dma.done.wait (%p8488_p1), %s7833_s2, 16  }
 0xb30   : > { %8722 = vsyncadd (%p8488_p1), %s7833_s2, 4294967280  ;;  %p21_p2 = scmp.ge.s32.totalorder %s8835_s23, 4   ;;  %s13690_s17 = smov %s8729_s18 }
 0xb31   : > { %s13691_s18 = smov %s8733_s19  ;;  %s13692_s19 = smov %s8846_s26 }
 0xb32   : > { %s13693_s20 = smov %s8835_s23  ;;  %23 = sbr.rel (!%p21_p2) target bundleno = 8 (0x8), region = 106 }
 0xb37   :  { %7837 = vsyncpa [#allocation5], 1 }
 0xb38   :  { %7839 = vsyncpa [#allocation5 + $0x1], 1 }

</bundles_post_ra>
